<compile_context>
chip_gen: v7x
topology: tpu7x:2x2x1
jax: 0.10.0
libtpu: 0.0.40
codegen_flags: <defaults>
</compile_context>

<pallas_src>
import functools

import jax
import jax.numpy as jnp
from jax.experimental import pallas as pl
from jax.experimental.pallas import tpu as pltpu

# model config (args: factor=4, channels=3, resolution=16, z_channels=32,
# codebook_dim=32, codebook_size=64, quantizer_name='vanilla_quantizer')
CHANNELS = 3
RES = 16
CH = 64
Z_CH = 32
CB_DIM = 32
CB_SIZE = 64
BETA = 0.25
LANES = 128          # every channel axis is zero-padded to 128 lanes

_VMEM = pl.BlockSpec(memory_space=pltpu.MemorySpace.VMEM)


# ----------------------------------------------------------------------------
# Pallas kernels
# ----------------------------------------------------------------------------

def _conv3x3_kernel(x_ref, w_ref, b_ref, *rest, H, W, act, with_err):
    """3x3 / stride-1 conv for one image: 9 shifted-tap matmuls accumulated in
    f32, optional swish, optional fused squared-error against a target."""
    if with_err:
        tgt_ref, o_ref, err_ref = rest
    else:
        (o_ref,) = rest
    x = x_ref[...]                                   # (1, H+2, W+2, C) bf16
    C = x.shape[-1]
    Cout = w_ref.shape[-1]
    M = H * W
    acc = jnp.zeros((M, Cout), jnp.float32)
    for di in range(3):
        for dj in range(3):
            patch = x[:, di:di + H, dj:dj + W, :].reshape(M, C)
            acc = acc + jnp.dot(patch, w_ref[di * 3 + dj],
                                preferred_element_type=jnp.float32)
    acc = acc + b_ref[...]
    if act == "swish":
        acc = acc * jax.nn.sigmoid(acc)
    o_ref[...] = acc.astype(o_ref.dtype)
    if with_err:
        dif = acc - tgt_ref[...]
        col = jnp.sum(dif * dif, axis=0, keepdims=True)      # (1, 128)
        err_ref[...] = jnp.broadcast_to(col, (8, LANES))


def _tapconv_kernel(s_ref, w_ref, b_ref, o_ref, *, act):
    """Generic tap-stacked conv: sum_t  s[t] @ w[t]  (+ bias, optional swish)."""
    T = s_ref.shape[0]
    M = s_ref.shape[1]
    Cout = w_ref.shape[-1]
    acc = jnp.zeros((M, Cout), jnp.float32)
    for t in range(T):
        acc = acc + jnp.dot(s_ref[t], w_ref[t],
                            preferred_element_type=jnp.float32)
    acc = acc + b_ref[...]
    if act == "swish":
        acc = acc * jax.nn.sigmoid(acc)
    o_ref[...] = acc.astype(o_ref.dtype)


def _upconv_kernel(s_ref, w_ref, b_ref, o_ref, *, act):
    """Fused nearest-2x-upsample + 3x3 conv: 4 output phases, each a 2x2
    effective-weight conv over the low-res padded input (taps pre-stacked)."""
    M = s_ref.shape[1]
    Cout = w_ref.shape[-1]
    for p in range(4):
        pi, pj = divmod(p, 2)
        acc = jnp.zeros((M, Cout), jnp.float32)
        for t in range(4):
            ri, rj = divmod(t, 2)
            s_idx = (pi + ri) * 3 + (pj + rj)
            acc = acc + jnp.dot(s_ref[s_idx], w_ref[p, t],
                                preferred_element_type=jnp.float32)
        acc = acc + b_ref[...]
        if act == "swish":
            acc = acc * jax.nn.sigmoid(acc)
        o_ref[p] = acc.astype(o_ref.dtype)


def _vq_fused_kernel(z_ref, pre_w_ref, pre_b_ref, cb_ref, cbt_ref, cb_sq_ref,
                     post_w_ref, post_b_ref, zq_ref, cnt_ref, err_ref, *,
                     k_true):
    """pre_quant_proj -> nearest-neighbour VQ -> post_quant_proj, fused."""
    z = z_ref[...]                                              # (N, 128) bf16
    z_pre = jnp.dot(z, pre_w_ref[...],
                    preferred_element_type=jnp.float32) + pre_b_ref[...]
    z2 = jnp.sum(z_pre * z_pre, axis=1, keepdims=True)          # (N, 1)
    d = z2 + cb_sq_ref[...] - 2.0 * jnp.dot(
        z_pre, cbt_ref[...], preferred_element_type=jnp.float32)  # (N, K=128)
    K = d.shape[1]
    lane = jax.lax.broadcasted_iota(jnp.int32, d.shape, 1)
    d = jnp.where(lane < k_true, d, jnp.inf)                    # mask pad rows
    dmin = jnp.min(d, axis=1, keepdims=True)
    idx = jnp.min(jnp.where(d <= dmin, lane, K), axis=1, keepdims=True)
    onehot = (lane == idx).astype(jnp.float32)                  # (N, K)
    z_q = jnp.dot(onehot, cb_ref[...], preferred_element_type=jnp.float32)
    cnt_ref[...] = jnp.sum(onehot, axis=0, keepdims=True)       # (1, K)
    dif = z_q - z_pre
    err_ref[...] = jnp.reshape(jnp.sum(dif * dif), (1, 1))
    zq_post = jnp.dot(z_q.astype(jnp.bfloat16), post_w_ref[...],
                      preferred_element_type=jnp.float32) + post_b_ref[...]
    zq_ref[...] = zq_post.astype(zq_ref.dtype)


# ----------------------------------------------------------------------------
# Wrappers (plain-JAX glue is only padding / phase splits / reshapes)
# ----------------------------------------------------------------------------

def conv3x3(x_nhwc, w_taps, b, *, act="none", target=None,
            out_dtype=jnp.bfloat16):
    """3x3 stride-1 conv via the in-kernel tap-accumulation kernel.
    Grid over batch ('parallel') so v7x can shard across both TensorCores."""
    B, H, W, C = x_nhwc.shape
    Cout = w_taps.shape[-1]
    xp = jnp.pad(x_nhwc.astype(jnp.bfloat16), ((0, 0), (1, 1), (1, 1), (0, 0)))
    M = B * H * W
    with_err = target is not None

    kernel = functools.partial(_conv3x3_kernel, H=H, W=W, act=act,
                               with_err=with_err)
    in_specs = [
        pl.BlockSpec((1, H + 2, W + 2, C), lambda i: (i, 0, 0, 0)),
        pl.BlockSpec((9, C, Cout), lambda i: (0, 0, 0)),
        pl.BlockSpec((1, Cout), lambda i: (0, 0)),
    ]
    inputs = [xp, w_taps, b]
    out_shapes = [jax.ShapeDtypeStruct((M, Cout), out_dtype)]
    out_specs = [pl.BlockSpec((H * W, Cout), lambda i: (i, 0))]
    if with_err:
        in_specs.append(pl.BlockSpec((H * W, Cout), lambda i: (i, 0)))
        inputs.append(target.astype(jnp.float32))
        out_shapes.append(jax.ShapeDtypeStruct((B * 8, LANES), jnp.float32))
        out_specs.append(pl.BlockSpec((8, LANES), lambda i: (i, 0)))

    outs = pl.pallas_call(
        kernel,
        grid=(B,),
        in_specs=in_specs,
        out_specs=tuple(out_specs) if with_err else out_specs[0],
        out_shape=tuple(out_shapes) if with_err else out_shapes[0],
        compiler_params=pltpu.CompilerParams(
            dimension_semantics=("parallel",)),
    )(*inputs)

    if with_err:
        y, err_blk = outs
        err_sum = jnp.sum(err_blk) / 8.0      # 8 identical rows per batch
        return y.reshape(B, H, W, Cout), err_sum
    return outs.reshape(B, H, W, Cout)


def _tapconv(taps, w_taps, b, *, act, out_dtype=jnp.bfloat16):
    T, M, C = taps.shape
    Cout = w_taps.shape[-1]
    return pl.pallas_call(
        functools.partial(_tapconv_kernel, act=act),
        out_shape=jax.ShapeDtypeStruct((M, Cout), out_dtype),
        in_specs=[_VMEM, _VMEM, _VMEM],
        out_specs=_VMEM,
    )(taps, w_taps, b)


def downsample_conv(x_nhwc, w_taps, b, *, act="swish"):
    """2x2 / stride-2 conv: the 4 taps are exactly the 4 input phases."""
    B, H, W, C = x_nhwc.shape
    Hq, Wq = H // 2, W // 2
    Cout = w_taps.shape[-1]
    xb = x_nhwc.astype(jnp.bfloat16)
    ph = xb.reshape(B, Hq, 2, Wq, 2, C).transpose(2, 4, 0, 1, 3, 5)
    taps = ph.reshape(4, B * Hq * Wq, C)
    y = _tapconv(taps, w_taps, b, act=act)
    return y.reshape(B, Hq, Wq, Cout)


def conv3x3_small(x_nhwc, w_taps, b, *, act="none"):
    """3x3 conv for tiny (4x4) spatial maps: taps stacked in the wrapper."""
    B, H, W, C = x_nhwc.shape
    Cout = w_taps.shape[-1]
    xp = jnp.pad(x_nhwc.astype(jnp.bfloat16), ((0, 0), (1, 1), (1, 1), (0, 0)))
    M = B * H * W
    taps = jnp.stack([xp[:, u:u + H, v:v + W, :].reshape(M, C)
                      for u in range(3) for v in range(3)])
    y = _tapconv(taps, w_taps, b, act=act)
    return y.reshape(B, H, W, Cout)


def upsample_conv(x_nhwc, w_eff, b, *, act="swish"):
    """Nearest-2x upsample fused with a 3x3 conv (per-phase 2x2 eff weights)."""
    B, Hl, Wl, C = x_nhwc.shape
    Cout = w_eff.shape[-1]
    xp = jnp.pad(x_nhwc.astype(jnp.bfloat16), ((0, 0), (1, 1), (1, 1), (0, 0)))
    M = B * Hl * Wl
    taps = jnp.stack([xp[:, u:u + Hl, v:v + Wl, :].reshape(M, C)
                      for u in range(3) for v in range(3)])       # (9, M, C)
    out = pl.pallas_call(
        functools.partial(_upconv_kernel, act=act),
        out_shape=jax.ShapeDtypeStruct((4, M, Cout), jnp.bfloat16),
        in_specs=[_VMEM, _VMEM, _VMEM],
        out_specs=_VMEM,
    )(taps, w_eff, b)
    out = out.reshape(2, 2, B, Hl, Wl, Cout).transpose(2, 3, 0, 4, 1, 5)
    return out.reshape(B, 2 * Hl, 2 * Wl, Cout)


def vq_fused(z_flat, pre_w, pre_b, codebook_p, post_w, post_b):
    N, C = z_flat.shape
    cbt = codebook_p.T                                         # (D, K) f32
    cb_sq = jnp.sum(codebook_p * codebook_p, axis=1)[None, :]  # (1, K) f32
    zq_post, counts, err = pl.pallas_call(
        functools.partial(_vq_fused_kernel, k_true=CB_SIZE),
        out_shape=(
            jax.ShapeDtypeStruct((N, C), jnp.bfloat16),
            jax.ShapeDtypeStruct((1, C), jnp.float32),
            jax.ShapeDtypeStruct((1, 1), jnp.float32),
        ),
        in_specs=[_VMEM] * 8,
        out_specs=(_VMEM, _VMEM, _VMEM),
    )(z_flat, pre_w, pre_b, codebook_p, cbt, cb_sq, post_w, post_b)
    return zq_post, counts, err


# ----------------------------------------------------------------------------
# Parameter construction (PyTorch-default-like uniform init, lane-padded)
# ----------------------------------------------------------------------------

def _conv3_weights(key, cin, cout):
    kw_, kb_ = jax.random.split(key)
    bound = 1.0 / (9 * cin) ** 0.5
    w = jax.random.uniform(kw_, (3, 3, cin, cout), jnp.float32, -bound, bound)
    b = jax.random.uniform(kb_, (cout,), jnp.float32, -bound, bound)
    wp = jnp.pad(w, ((0, 0), (0, 0), (0, LANES - cin), (0, LANES - cout)))
    bp = jnp.pad(b, (0, LANES - cout)).reshape(1, LANES)
    return wp, bp


def _tap_layout(wp):                         # (3,3,128,128) -> (9,128,128) bf16
    return wp.reshape(9, LANES, LANES).astype(jnp.bfloat16)


def _upconv_layout(wp):
    """Effective weights for nearest-2x-upsample + 3x3 conv (4 phases x 4 taps)."""
    R = jnp.array([[[1., 0., 0.], [0., 1., 1.]],
                   [[1., 1., 0.], [0., 0., 1.]]], jnp.float32)   # [phase, tap, di]
    w_eff = jnp.einsum('prd,qse,decf->pqrscf', R, R, wp)
    return w_eff.reshape(4, 4, LANES, LANES).astype(jnp.bfloat16)


def _conv2_weights(key, cin, cout):          # 2x2 stride-2 downsample conv
    kw_, kb_ = jax.random.split(key)
    bound = 1.0 / (4 * cin) ** 0.5
    w = jax.random.uniform(kw_, (2, 2, cin, cout), jnp.float32, -bound, bound)
    b = jax.random.uniform(kb_, (cout,), jnp.float32, -bound, bound)
    wp = jnp.pad(w, ((0, 0), (0, 0), (0, LANES - cin), (0, LANES - cout)))
    bp = jnp.pad(b, (0, LANES - cout)).reshape(1, LANES)
    return wp.reshape(4, LANES, LANES).astype(jnp.bfloat16), bp


def _dense_weights(key, cin, cout):          # 1x1 conv -> dense
    kw_, kb_ = jax.random.split(key)
    bound = 1.0 / cin ** 0.5
    w = jax.random.uniform(kw_, (cin, cout), jnp.float32, -bound, bound)
    b = jax.random.uniform(kb_, (cout,), jnp.float32, -bound, bound)
    wp = jnp.pad(w, ((0, LANES - cin), (0, LANES - cout))).astype(jnp.bfloat16)
    bp = jnp.pad(b, (0, LANES - cout)).reshape(1, LANES)
    return wp, bp


def init_params(key):
    ks = jax.random.split(key, 12)
    p = {}
    w, b = _conv3_weights(ks[0], CHANNELS, CH)
    p["enc_in_w"], p["enc_in_b"] = _tap_layout(w), b
    p["enc_d1_w"], p["enc_d1_b"] = _conv2_weights(ks[1], CH, CH)
    p["enc_d2_w"], p["enc_d2_b"] = _conv2_weights(ks[2], CH, 2 * CH)
    w, b = _conv3_weights(ks[3], 2 * CH, Z_CH)
    p["enc_out_w"], p["enc_out_b"] = _tap_layout(w), b
    p["pre_w"], p["pre_b"] = _dense_weights(ks[4], Z_CH, CB_DIM)
    p["post_w"], p["post_b"] = _dense_weights(ks[5], CB_DIM, Z_CH)
    cb = jax.random.uniform(ks[6], (CB_SIZE, CB_DIM), jnp.float32,
                            -1.0 / CB_SIZE, 1.0 / CB_SIZE)
    p["codebook"] = jnp.pad(cb, ((0, LANES - CB_SIZE), (0, LANES - CB_DIM)))
    w, b = _conv3_weights(ks[7], Z_CH, 2 * CH)
    p["dec_in_w"], p["dec_in_b"] = _tap_layout(w), b
    w, b = _conv3_weights(ks[8], 2 * CH, CH)
    p["dec_u1_w"], p["dec_u1_b"] = _upconv_layout(w), b
    w, b = _conv3_weights(ks[9], CH, CH)
    p["dec_u2_w"], p["dec_u2_b"] = _upconv_layout(w), b
    w, b = _conv3_weights(ks[10], CH, CHANNELS)
    p["dec_out_w"], p["dec_out_b"] = _tap_layout(w), b
    return p


# ----------------------------------------------------------------------------
# VQVAE forward
# ----------------------------------------------------------------------------

def vqvae_forward(x_nchw, params, beta=BETA):
    p = params
    B, C_true, H, W = x_nchw.shape
    x = jnp.transpose(x_nchw, (0, 2, 3, 1)).astype(jnp.float32)     # NCHW->NHWC
    x_p = jnp.pad(x, ((0, 0), (0, 0), (0, 0), (0, LANES - C_true)))  # 128 lanes

    # ---- encoder ----
    h = conv3x3(x_p, p["enc_in_w"], p["enc_in_b"], act="swish")      # (B,16,16,128)
    h = downsample_conv(h, p["enc_d1_w"], p["enc_d1_b"], act="swish")  # (B,8,8,128)
    h = downsample_conv(h, p["enc_d2_w"], p["enc_d2_b"], act="swish")  # (B,4,4,128)
    z = conv3x3_small(h, p["enc_out_w"], p["enc_out_b"], act="none")   # (B,4,4,128)

    # ---- pre_quant_proj -> vanilla quantizer -> post_quant_proj (fused) ----
    Hl, Wl = z.shape[1], z.shape[2]
    N = B * Hl * Wl
    z_flat = z.reshape(N, LANES)
    zq_post, counts, sq_err = vq_fused(z_flat, p["pre_w"], p["pre_b"],
                                       p["codebook"], p["post_w"], p["post_b"])
    quant_error = sq_err[0, 0] / (N * CB_DIM)          # F.mse_loss(z_q, z)
    vq_loss = (1.0 + beta) * quant_error               # codebook + commitment (fwd value)
    counts_true = counts[0, :CB_SIZE]
    avg_probs = counts_true / N
    codebook_perplexity = jnp.exp(-jnp.sum(avg_probs * jnp.log(avg_probs + 1e-10)))
    codebook_utilization = jnp.sum((counts_true > 0).astype(jnp.float32)) / CB_SIZE

    # ---- decoder ----
    zq = zq_post.reshape(B, Hl, Wl, LANES)
    h = conv3x3_small(zq, p["dec_in_w"], p["dec_in_b"], act="swish")   # (B,4,4,128)
    h = upsample_conv(h, p["dec_u1_w"], p["dec_u1_b"], act="swish")    # (B,8,8,128)
    h = upsample_conv(h, p["dec_u2_w"], p["dec_u2_b"], act="swish")    # (B,16,16,128)

    # final conv with fused reconstruction squared-error against x
    tgt = x_p.reshape(B * H * W, LANES)
    _x_rec, rec_sum = conv3x3(h, p["dec_out_w"], p["dec_out_b"], act="none",
                              target=tgt)
    rec_loss = rec_sum / (B * C_true * H * W)

    loss = rec_loss + vq_loss
    loss_pack = dict(loss=loss, vq_loss=vq_loss, rec_loss=rec_loss,
                     quant_error=quant_error,
                     codebook_utilization=codebook_utilization,
                     codebook_perplexity=codebook_perplexity)
    return loss, loss_pack


# ----------------------------------------------------------------------------

if __name__ == "__main__":
    key = jax.random.PRNGKey(0)
    k_x, k_p = jax.random.split(key)
    x = jax.random.normal(k_x, (2, CHANNELS, RES, RES), dtype=jnp.float32)
    params = init_params(k_p)

    fwd = jax.jit(vqvae_forward)
    loss, pack = fwd(x, params)
    jax.block_until_ready((loss, pack))
    print("KERNEL_OK")
</pallas_src>

<mosaic_0001>
module attributes {stable_mosaic.version = 11 : i64} {
  func.func @_conv3x3_kernel(%arg0: i32, %arg1: memref<1x18x18x128xbf16, #tpu.memory_space<vmem>>, %arg2: memref<9x128x128xbf16, #tpu.memory_space<vmem>>, %arg3: memref<1x128xf32, #tpu.memory_space<vmem>>, %arg4: memref<256x128xbf16, #tpu.memory_space<vmem>>) attributes {dimension_semantics = [#tpu.dimension_semantics<parallel>], iteration_bounds = array<i64: 2>, scalar_prefetch = 0 : i64, scratch_operands = 0 : i64, tpu.core_type = #tpu.core_type<tc>, window_params = [{transform_indices = @transform_0, window_bounds = array<i64: 1, 18, 18, 128>}, {pipeline_mode = #tpu.pipeline_mode<synchronous>, transform_indices = @transform_1, window_bounds = array<i64: 9, 128, 128>}, {pipeline_mode = #tpu.pipeline_mode<synchronous>, transform_indices = @transform_2, window_bounds = array<i64: 1, 128>}, {transform_indices = @transform_3, window_bounds = array<i64: 256, 128>}]} {
    %c0 = arith.constant 0 : index
    %c0_0 = arith.constant 0 : index
    %c0_1 = arith.constant 0 : index
    %c0_2 = arith.constant 0 : index
    %0 = vector.load %arg1[%c0, %c0_0, %c0_1, %c0_2] : memref<1x18x18x128xbf16, #tpu.memory_space<vmem>>, vector<1x18x18x128xbf16>
    %cst = arith.constant 0.000000e+00 : f32
    %1 = vector.broadcast %cst : f32 to vector<256x128xf32>
    %2 = vector.extract_strided_slice %0 {offsets = [0, 0, 0, 0], sizes = [1, 16, 16, 128], strides = [1, 1, 1, 1]} : vector<1x18x18x128xbf16> to vector<1x16x16x128xbf16>
    %3 = vector.shape_cast %2 : vector<1x16x16x128xbf16> to vector<256x128xbf16>
    %c0_3 = arith.constant 0 : index
    %c0_4 = arith.constant 0 : index
    %c0_5 = arith.constant 0 : index
    %4 = vector.load %arg2[%c0_3, %c0_4, %c0_5] : memref<9x128x128xbf16, #tpu.memory_space<vmem>>, vector<1x128x128xbf16>
    %5 = vector.shape_cast %4 : vector<1x128x128xbf16> to vector<128x128xbf16>
    %cst_6 = arith.constant dense<0.000000e+00> : vector<256x128xf32>
    %6 = tpu.matmul %3, %5, %cst_6 {dimension_numbers = #tpu.dot_dimension_numbers<[1], [0], [0], [1], [0, 0, 1, 1], [], []>} : vector<256x128xbf16>, vector<128x128xbf16>, vector<256x128xf32> -> vector<256x128xf32>
    %7 = arith.addf %1, %6 : vector<256x128xf32>
    %8 = vector.extract_strided_slice %0 {offsets = [0, 0, 1, 0], sizes = [1, 16, 16, 128], strides = [1, 1, 1, 1]} : vector<1x18x18x128xbf16> to vector<1x16x16x128xbf16>
    %9 = vector.shape_cast %8 : vector<1x16x16x128xbf16> to vector<256x128xbf16>
    %c1 = arith.constant 1 : index
    %c0_7 = arith.constant 0 : index
    %c0_8 = arith.constant 0 : index
    %10 = vector.load %arg2[%c1, %c0_7, %c0_8] : memref<9x128x128xbf16, #tpu.memory_space<vmem>>, vector<1x128x128xbf16>
    %11 = vector.shape_cast %10 : vector<1x128x128xbf16> to vector<128x128xbf16>
    %cst_9 = arith.constant dense<0.000000e+00> : vector<256x128xf32>
    %12 = tpu.matmul %9, %11, %cst_9 {dimension_numbers = #tpu.dot_dimension_numbers<[1], [0], [0], [1], [0, 0, 1, 1], [], []>} : vector<256x128xbf16>, vector<128x128xbf16>, vector<256x128xf32> -> vector<256x128xf32>
    %13 = arith.addf %7, %12 : vector<256x128xf32>
    %14 = vector.extract_strided_slice %0 {offsets = [0, 0, 2, 0], sizes = [1, 16, 16, 128], strides = [1, 1, 1, 1]} : vector<1x18x18x128xbf16> to vector<1x16x16x128xbf16>
    %15 = vector.shape_cast %14 : vector<1x16x16x128xbf16> to vector<256x128xbf16>
    %c2 = arith.constant 2 : index
    %c0_10 = arith.constant 0 : index
    %c0_11 = arith.constant 0 : index
    %16 = vector.load %arg2[%c2, %c0_10, %c0_11] : memref<9x128x128xbf16, #tpu.memory_space<vmem>>, vector<1x128x128xbf16>
    %17 = vector.shape_cast %16 : vector<1x128x128xbf16> to vector<128x128xbf16>
    %cst_12 = arith.constant dense<0.000000e+00> : vector<256x128xf32>
    %18 = tpu.matmul %15, %17, %cst_12 {dimension_numbers = #tpu.dot_dimension_numbers<[1], [0], [0], [1], [0, 0, 1, 1], [], []>} : vector<256x128xbf16>, vector<128x128xbf16>, vector<256x128xf32> -> vector<256x128xf32>
    %19 = arith.addf %13, %18 : vector<256x128xf32>
    %20 = vector.extract_strided_slice %0 {offsets = [0, 1, 0, 0], sizes = [1, 16, 16, 128], strides = [1, 1, 1, 1]} : vector<1x18x18x128xbf16> to vector<1x16x16x128xbf16>
    %21 = vector.shape_cast %20 : vector<1x16x16x128xbf16> to vector<256x128xbf16>
    %c3 = arith.constant 3 : index
    %c0_13 = arith.constant 0 : index
    %c0_14 = arith.constant 0 : index
    %22 = vector.load %arg2[%c3, %c0_13, %c0_14] : memref<9x128x128xbf16, #tpu.memory_space<vmem>>, vector<1x128x128xbf16>
    %23 = vector.shape_cast %22 : vector<1x128x128xbf16> to vector<128x128xbf16>
    %cst_15 = arith.constant dense<0.000000e+00> : vector<256x128xf32>
    %24 = tpu.matmul %21, %23, %cst_15 {dimension_numbers = #tpu.dot_dimension_numbers<[1], [0], [0], [1], [0, 0, 1, 1], [], []>} : vector<256x128xbf16>, vector<128x128xbf16>, vector<256x128xf32> -> vector<256x128xf32>
    %25 = arith.addf %19, %24 : vector<256x128xf32>
    %26 = vector.extract_strided_slice %0 {offsets = [0, 1, 1, 0], sizes = [1, 16, 16, 128], strides = [1, 1, 1, 1]} : vector<1x18x18x128xbf16> to vector<1x16x16x128xbf16>
    %27 = vector.shape_cast %26 : vector<1x16x16x128xbf16> to vector<256x128xbf16>
    %c4 = arith.constant 4 : index
    %c0_16 = arith.constant 0 : index
    %c0_17 = arith.constant 0 : index
    %28 = vector.load %arg2[%c4, %c0_16, %c0_17] : memref<9x128x128xbf16, #tpu.memory_space<vmem>>, vector<1x128x128xbf16>
    %29 = vector.shape_cast %28 : vector<1x128x128xbf16> to vector<128x128xbf16>
    %cst_18 = arith.constant dense<0.000000e+00> : vector<256x128xf32>
    %30 = tpu.matmul %27, %29, %cst_18 {dimension_numbers = #tpu.dot_dimension_numbers<[1], [0], [0], [1], [0, 0, 1, 1], [], []>} : vector<256x128xbf16>, vector<128x128xbf16>, vector<256x128xf32> -> vector<256x128xf32>
    %31 = arith.addf %25, %30 : vector<256x128xf32>
    %32 = vector.extract_strided_slice %0 {offsets = [0, 1, 2, 0], sizes = [1, 16, 16, 128], strides = [1, 1, 1, 1]} : vector<1x18x18x128xbf16> to vector<1x16x16x128xbf16>
    %33 = vector.shape_cast %32 : vector<1x16x16x128xbf16> to vector<256x128xbf16>
    %c5 = arith.constant 5 : index
    %c0_19 = arith.constant 0 : index
    %c0_20 = arith.constant 0 : index
    %34 = vector.load %arg2[%c5, %c0_19, %c0_20] : memref<9x128x128xbf16, #tpu.memory_space<vmem>>, vector<1x128x128xbf16>
    %35 = vector.shape_cast %34 : vector<1x128x128xbf16> to vector<128x128xbf16>
    %cst_21 = arith.constant dense<0.000000e+00> : vector<256x128xf32>
    %36 = tpu.matmul %33, %35, %cst_21 {dimension_numbers = #tpu.dot_dimension_numbers<[1], [0], [0], [1], [0, 0, 1, 1], [], []>} : vector<256x128xbf16>, vector<128x128xbf16>, vector<256x128xf32> -> vector<256x128xf32>
    %37 = arith.addf %31, %36 : vector<256x128xf32>
    %38 = vector.extract_strided_slice %0 {offsets = [0, 2, 0, 0], sizes = [1, 16, 16, 128], strides = [1, 1, 1, 1]} : vector<1x18x18x128xbf16> to vector<1x16x16x128xbf16>
    %39 = vector.shape_cast %38 : vector<1x16x16x128xbf16> to vector<256x128xbf16>
    %c6 = arith.constant 6 : index
    %c0_22 = arith.constant 0 : index
    %c0_23 = arith.constant 0 : index
    %40 = vector.load %arg2[%c6, %c0_22, %c0_23] : memref<9x128x128xbf16, #tpu.memory_space<vmem>>, vector<1x128x128xbf16>
    %41 = vector.shape_cast %40 : vector<1x128x128xbf16> to vector<128x128xbf16>
    %cst_24 = arith.constant dense<0.000000e+00> : vector<256x128xf32>
    %42 = tpu.matmul %39, %41, %cst_24 {dimension_numbers = #tpu.dot_dimension_numbers<[1], [0], [0], [1], [0, 0, 1, 1], [], []>} : vector<256x128xbf16>, vector<128x128xbf16>, vector<256x128xf32> -> vector<256x128xf32>
    %43 = arith.addf %37, %42 : vector<256x128xf32>
    %44 = vector.extract_strided_slice %0 {offsets = [0, 2, 1, 0], sizes = [1, 16, 16, 128], strides = [1, 1, 1, 1]} : vector<1x18x18x128xbf16> to vector<1x16x16x128xbf16>
    %45 = vector.shape_cast %44 : vector<1x16x16x128xbf16> to vector<256x128xbf16>
    %c7 = arith.constant 7 : index
    %c0_25 = arith.constant 0 : index
    %c0_26 = arith.constant 0 : index
    %46 = vector.load %arg2[%c7, %c0_25, %c0_26] : memref<9x128x128xbf16, #tpu.memory_space<vmem>>, vector<1x128x128xbf16>
    %47 = vector.shape_cast %46 : vector<1x128x128xbf16> to vector<128x128xbf16>
    %cst_27 = arith.constant dense<0.000000e+00> : vector<256x128xf32>
    %48 = tpu.matmul %45, %47, %cst_27 {dimension_numbers = #tpu.dot_dimension_numbers<[1], [0], [0], [1], [0, 0, 1, 1], [], []>} : vector<256x128xbf16>, vector<128x128xbf16>, vector<256x128xf32> -> vector<256x128xf32>
    %49 = arith.addf %43, %48 : vector<256x128xf32>
    %50 = vector.extract_strided_slice %0 {offsets = [0, 2, 2, 0], sizes = [1, 16, 16, 128], strides = [1, 1, 1, 1]} : vector<1x18x18x128xbf16> to vector<1x16x16x128xbf16>
    %51 = vector.shape_cast %50 : vector<1x16x16x128xbf16> to vector<256x128xbf16>
    %c8 = arith.constant 8 : index
    %c0_28 = arith.constant 0 : index
    %c0_29 = arith.constant 0 : index
    %52 = vector.load %arg2[%c8, %c0_28, %c0_29] : memref<9x128x128xbf16, #tpu.memory_space<vmem>>, vector<1x128x128xbf16>
    %53 = vector.shape_cast %52 : vector<1x128x128xbf16> to vector<128x128xbf16>
    %cst_30 = arith.constant dense<0.000000e+00> : vector<256x128xf32>
    %54 = tpu.matmul %51, %53, %cst_30 {dimension_numbers = #tpu.dot_dimension_numbers<[1], [0], [0], [1], [0, 0, 1, 1], [], []>} : vector<256x128xbf16>, vector<128x128xbf16>, vector<256x128xf32> -> vector<256x128xf32>
    %55 = arith.addf %49, %54 : vector<256x128xf32>
    %c0_31 = arith.constant 0 : index
    %c0_32 = arith.constant 0 : index
    %56 = vector.load %arg3[%c0_31, %c0_32] : memref<1x128xf32, #tpu.memory_space<vmem>>, vector<1x128xf32>
    %57 = vector.broadcast %56 : vector<1x128xf32> to vector<256x128xf32>
    %58 = arith.addf %55, %57 : vector<256x128xf32>
    %59 = arith.negf %58 : vector<256x128xf32>
    %60 = math.exp %59 : vector<256x128xf32>
    %cst_33 = arith.constant 1.000000e+00 : f32
    %61 = vector.broadcast %cst_33 : f32 to vector<256x128xf32>
    %62 = arith.addf %61, %60 : vector<256x128xf32>
    %63 = arith.divf %61, %62 : vector<256x128xf32>
    %64 = arith.mulf %58, %63 : vector<256x128xf32>
    %65 = arith.truncf %64 : vector<256x128xf32> to vector<256x128xbf16>
    %c0_34 = arith.constant 0 : index
    %c0_35 = arith.constant 0 : index
    %66 = vector.load %arg4[%c0_34, %c0_35] : memref<256x128xbf16, #tpu.memory_space<vmem>>, vector<256x128xbf16>
    tpu.vector_store %arg4[%c0_34, %c0_35], %65 {strides = array<i32>} : memref<256x128xbf16, #tpu.memory_space<vmem>>, vector<256x128xbf16>,
    return
  }
  func.func @transform_0(%arg0: i32) -> (i32, i32, i32, i32) {
    %c0_i32 = arith.constant 0 : i32
    %c0_i32_0 = arith.constant 0 : i32
    %c0_i32_1 = arith.constant 0 : i32
    %c0_i32_2 = arith.constant 0 : i32
    return %arg0, %c0_i32, %c0_i32_0, %c0_i32_1 : i32, i32, i32, i32
  }
  func.func @transform_1(%arg0: i32) -> (i32, i32, i32) {
    %c0_i32 = arith.constant 0 : i32
    %c0_i32_0 = arith.constant 0 : i32
    %c0_i32_1 = arith.constant 0 : i32
    %c0_i32_2 = arith.constant 0 : i32
    return %c0_i32, %c0_i32_0, %c0_i32_1 : i32, i32, i32
  }
  func.func @transform_2(%arg0: i32) -> (i32, i32) {
    %c0_i32 = arith.constant 0 : i32
    %c0_i32_0 = arith.constant 0 : i32
    %c0_i32_1 = arith.constant 0 : i32
    return %c0_i32, %c0_i32_0 : i32, i32
  }
  func.func @transform_3(%arg0: i32) -> (i32, i32) {
    %c0_i32 = arith.constant 0 : i32
    %c0_i32_0 = arith.constant 0 : i32
    return %arg0, %c0_i32 : i32, i32
  }
}

module attributes {stable_mosaic.version = 11 : i64} {
  func.func @_tapconv_kernel(%arg0: memref<4x128x128xbf16, #tpu.memory_space<vmem>>, %arg1: memref<4x128x128xbf16, #tpu.memory_space<vmem>>, %arg2: memref<1x128xf32, #tpu.memory_space<vmem>>, %arg3: memref<128x128xbf16, #tpu.memory_space<vmem>>) attributes {dimension_semantics = [], scalar_prefetch = 0 : i64, scratch_operands = 0 : i64, tpu.core_type = #tpu.core_type<tc>} {
    %cst = arith.constant 0.000000e+00 : f32
    %0 = vector.broadcast %cst : f32 to vector<128x128xf32>
    %c0 = arith.constant 0 : index
    %c0_0 = arith.constant 0 : index
    %c0_1 = arith.constant 0 : index
    %1 = vector.load %arg0[%c0, %c0_0, %c0_1] : memref<4x128x128xbf16, #tpu.memory_space<vmem>>, vector<1x128x128xbf16>
    %2 = vector.shape_cast %1 : vector<1x128x128xbf16> to vector<128x128xbf16>
    %c0_2 = arith.constant 0 : index
    %c0_3 = arith.constant 0 : index
    %c0_4 = arith.constant 0 : index
    %3 = vector.load %arg1[%c0_2, %c0_3, %c0_4] : memref<4x128x128xbf16, #tpu.memory_space<vmem>>, vector<1x128x128xbf16>
    %4 = vector.shape_cast %3 : vector<1x128x128xbf16> to vector<128x128xbf16>
    %cst_5 = arith.constant dense<0.000000e+00> : vector<128x128xf32>
    %5 = tpu.matmul %2, %4, %cst_5 {dimension_numbers = #tpu.dot_dimension_numbers<[1], [0], [0], [1], [0, 0, 1, 1], [], []>} : vector<128x128xbf16>, vector<128x128xbf16>, vector<128x128xf32> -> vector<128x128xf32>
    %6 = arith.addf %0, %5 : vector<128x128xf32>
    %c1 = arith.constant 1 : index
    %c0_6 = arith.constant 0 : index
    %c0_7 = arith.constant 0 : index
    %7 = vector.load %arg0[%c1, %c0_6, %c0_7] : memref<4x128x128xbf16, #tpu.memory_space<vmem>>, vector<1x128x128xbf16>
    %8 = vector.shape_cast %7 : vector<1x128x128xbf16> to vector<128x128xbf16>
    %c1_8 = arith.constant 1 : index
    %c0_9 = arith.constant 0 : index
    %c0_10 = arith.constant 0 : index
    %9 = vector.load %arg1[%c1_8, %c0_9, %c0_10] : memref<4x128x128xbf16, #tpu.memory_space<vmem>>, vector<1x128x128xbf16>
    %10 = vector.shape_cast %9 : vector<1x128x128xbf16> to vector<128x128xbf16>
    %cst_11 = arith.constant dense<0.000000e+00> : vector<128x128xf32>
    %11 = tpu.matmul %8, %10, %cst_11 {dimension_numbers = #tpu.dot_dimension_numbers<[1], [0], [0], [1], [0, 0, 1, 1], [], []>} : vector<128x128xbf16>, vector<128x128xbf16>, vector<128x128xf32> -> vector<128x128xf32>
    %12 = arith.addf %6, %11 : vector<128x128xf32>
    %c2 = arith.constant 2 : index
    %c0_12 = arith.constant 0 : index
    %c0_13 = arith.constant 0 : index
    %13 = vector.load %arg0[%c2, %c0_12, %c0_13] : memref<4x128x128xbf16, #tpu.memory_space<vmem>>, vector<1x128x128xbf16>
    %14 = vector.shape_cast %13 : vector<1x128x128xbf16> to vector<128x128xbf16>
    %c2_14 = arith.constant 2 : index
    %c0_15 = arith.constant 0 : index
    %c0_16 = arith.constant 0 : index
    %15 = vector.load %arg1[%c2_14, %c0_15, %c0_16] : memref<4x128x128xbf16, #tpu.memory_space<vmem>>, vector<1x128x128xbf16>
    %16 = vector.shape_cast %15 : vector<1x128x128xbf16> to vector<128x128xbf16>
    %cst_17 = arith.constant dense<0.000000e+00> : vector<128x128xf32>
    %17 = tpu.matmul %14, %16, %cst_17 {dimension_numbers = #tpu.dot_dimension_numbers<[1], [0], [0], [1], [0, 0, 1, 1], [], []>} : vector<128x128xbf16>, vector<128x128xbf16>, vector<128x128xf32> -> vector<128x128xf32>
    %18 = arith.addf %12, %17 : vector<128x128xf32>
    %c3 = arith.constant 3 : index
    %c0_18 = arith.constant 0 : index
    %c0_19 = arith.constant 0 : index
    %19 = vector.load %arg0[%c3, %c0_18, %c0_19] : memref<4x128x128xbf16, #tpu.memory_space<vmem>>, vector<1x128x128xbf16>
    %20 = vector.shape_cast %19 : vector<1x128x128xbf16> to vector<128x128xbf16>
    %c3_20 = arith.constant 3 : index
    %c0_21 = arith.constant 0 : index
    %c0_22 = arith.constant 0 : index
    %21 = vector.load %arg1[%c3_20, %c0_21, %c0_22] : memref<4x128x128xbf16, #tpu.memory_space<vmem>>, vector<1x128x128xbf16>
    %22 = vector.shape_cast %21 : vector<1x128x128xbf16> to vector<128x128xbf16>
    %cst_23 = arith.constant dense<0.000000e+00> : vector<128x128xf32>
    %23 = tpu.matmul %20, %22, %cst_23 {dimension_numbers = #tpu.dot_dimension_numbers<[1], [0], [0], [1], [0, 0, 1, 1], [], []>} : vector<128x128xbf16>, vector<128x128xbf16>, vector<128x128xf32> -> vector<128x128xf32>
    %24 = arith.addf %18, %23 : vector<128x128xf32>
    %c0_24 = arith.constant 0 : index
    %c0_25 = arith.constant 0 : index
    %25 = vector.load %arg2[%c0_24, %c0_25] : memref<1x128xf32, #tpu.memory_space<vmem>>, vector<1x128xf32>
    %26 = vector.broadcast %25 : vector<1x128xf32> to vector<128x128xf32>
    %27 = arith.addf %24, %26 : vector<128x128xf32>
    %28 = arith.negf %27 : vector<128x128xf32>
    %29 = math.exp %28 : vector<128x128xf32>
    %cst_26 = arith.constant 1.000000e+00 : f32
    %30 = vector.broadcast %cst_26 : f32 to vector<128x128xf32>
    %31 = arith.addf %30, %29 : vector<128x128xf32>
    %32 = arith.divf %30, %31 : vector<128x128xf32>
    %33 = arith.mulf %27, %32 : vector<128x128xf32>
    %34 = arith.truncf %33 : vector<128x128xf32> to vector<128x128xbf16>
    %c0_27 = arith.constant 0 : index
    %c0_28 = arith.constant 0 : index
    %35 = vector.load %arg3[%c0_27, %c0_28] : memref<128x128xbf16, #tpu.memory_space<vmem>>, vector<128x128xbf16>
    tpu.vector_store %arg3[%c0_27, %c0_28], %34 {strides = array<i32>} : memref<128x128xbf16, #tpu.memory_space<vmem>>, vector<128x128xbf16>,
    return
  }
}

module attributes {stable_mosaic.version = 11 : i64} {
  func.func @_tapconv_kernel(%arg0: memref<4x32x128xbf16, #tpu.memory_space<vmem>>, %arg1: memref<4x128x128xbf16, #tpu.memory_space<vmem>>, %arg2: memref<1x128xf32, #tpu.memory_space<vmem>>, %arg3: memref<32x128xbf16, #tpu.memory_space<vmem>>) attributes {dimension_semantics = [], scalar_prefetch = 0 : i64, scratch_operands = 0 : i64, tpu.core_type = #tpu.core_type<tc>} {
    %cst = arith.constant 0.000000e+00 : f32
    %0 = vector.broadcast %cst : f32 to vector<32x128xf32>
    %c0 = arith.constant 0 : index
    %c0_0 = arith.constant 0 : index
    %c0_1 = arith.constant 0 : index
    %1 = vector.load %arg0[%c0, %c0_0, %c0_1] : memref<4x32x128xbf16, #tpu.memory_space<vmem>>, vector<1x32x128xbf16>
    %2 = vector.shape_cast %1 : vector<1x32x128xbf16> to vector<32x128xbf16>
    %c0_2 = arith.constant 0 : index
    %c0_3 = arith.constant 0 : index
    %c0_4 = arith.constant 0 : index
    %3 = vector.load %arg1[%c0_2, %c0_3, %c0_4] : memref<4x128x128xbf16, #tpu.memory_space<vmem>>, vector<1x128x128xbf16>
    %4 = vector.shape_cast %3 : vector<1x128x128xbf16> to vector<128x128xbf16>
    %cst_5 = arith.constant dense<0.000000e+00> : vector<32x128xf32>
    %5 = tpu.matmul %2, %4, %cst_5 {dimension_numbers = #tpu.dot_dimension_numbers<[1], [0], [0], [1], [0, 0, 1, 1], [], []>} : vector<32x128xbf16>, vector<128x128xbf16>, vector<32x128xf32> -> vector<32x128xf32>
    %6 = arith.addf %0, %5 : vector<32x128xf32>
    %c1 = arith.constant 1 : index
    %c0_6 = arith.constant 0 : index
    %c0_7 = arith.constant 0 : index
    %7 = vector.load %arg0[%c1, %c0_6, %c0_7] : memref<4x32x128xbf16, #tpu.memory_space<vmem>>, vector<1x32x128xbf16>
    %8 = vector.shape_cast %7 : vector<1x32x128xbf16> to vector<32x128xbf16>
    %c1_8 = arith.constant 1 : index
    %c0_9 = arith.constant 0 : index
    %c0_10 = arith.constant 0 : index
    %9 = vector.load %arg1[%c1_8, %c0_9, %c0_10] : memref<4x128x128xbf16, #tpu.memory_space<vmem>>, vector<1x128x128xbf16>
    %10 = vector.shape_cast %9 : vector<1x128x128xbf16> to vector<128x128xbf16>
    %cst_11 = arith.constant dense<0.000000e+00> : vector<32x128xf32>
    %11 = tpu.matmul %8, %10, %cst_11 {dimension_numbers = #tpu.dot_dimension_numbers<[1], [0], [0], [1], [0, 0, 1, 1], [], []>} : vector<32x128xbf16>, vector<128x128xbf16>, vector<32x128xf32> -> vector<32x128xf32>
    %12 = arith.addf %6, %11 : vector<32x128xf32>
    %c2 = arith.constant 2 : index
    %c0_12 = arith.constant 0 : index
    %c0_13 = arith.constant 0 : index
    %13 = vector.load %arg0[%c2, %c0_12, %c0_13] : memref<4x32x128xbf16, #tpu.memory_space<vmem>>, vector<1x32x128xbf16>
    %14 = vector.shape_cast %13 : vector<1x32x128xbf16> to vector<32x128xbf16>
    %c2_14 = arith.constant 2 : index
    %c0_15 = arith.constant 0 : index
    %c0_16 = arith.constant 0 : index
    %15 = vector.load %arg1[%c2_14, %c0_15, %c0_16] : memref<4x128x128xbf16, #tpu.memory_space<vmem>>, vector<1x128x128xbf16>
    %16 = vector.shape_cast %15 : vector<1x128x128xbf16> to vector<128x128xbf16>
    %cst_17 = arith.constant dense<0.000000e+00> : vector<32x128xf32>
    %17 = tpu.matmul %14, %16, %cst_17 {dimension_numbers = #tpu.dot_dimension_numbers<[1], [0], [0], [1], [0, 0, 1, 1], [], []>} : vector<32x128xbf16>, vector<128x128xbf16>, vector<32x128xf32> -> vector<32x128xf32>
    %18 = arith.addf %12, %17 : vector<32x128xf32>
    %c3 = arith.constant 3 : index
    %c0_18 = arith.constant 0 : index
    %c0_19 = arith.constant 0 : index
    %19 = vector.load %arg0[%c3, %c0_18, %c0_19] : memref<4x32x128xbf16, #tpu.memory_space<vmem>>, vector<1x32x128xbf16>
    %20 = vector.shape_cast %19 : vector<1x32x128xbf16> to vector<32x128xbf16>
    %c3_20 = arith.constant 3 : index
    %c0_21 = arith.constant 0 : index
    %c0_22 = arith.constant 0 : index
    %21 = vector.load %arg1[%c3_20, %c0_21, %c0_22] : memref<4x128x128xbf16, #tpu.memory_space<vmem>>, vector<1x128x128xbf16>
    %22 = vector.shape_cast %21 : vector<1x128x128xbf16> to vector<128x128xbf16>
    %cst_23 = arith.constant dense<0.000000e+00> : vector<32x128xf32>
    %23 = tpu.matmul %20, %22, %cst_23 {dimension_numbers = #tpu.dot_dimension_numbers<[1], [0], [0], [1], [0, 0, 1, 1], [], []>} : vector<32x128xbf16>, vector<128x128xbf16>, vector<32x128xf32> -> vector<32x128xf32>
    %24 = arith.addf %18, %23 : vector<32x128xf32>
    %c0_24 = arith.constant 0 : index
    %c0_25 = arith.constant 0 : index
    %25 = vector.load %arg2[%c0_24, %c0_25] : memref<1x128xf32, #tpu.memory_space<vmem>>, vector<1x128xf32>
    %26 = vector.broadcast %25 : vector<1x128xf32> to vector<32x128xf32>
    %27 = arith.addf %24, %26 : vector<32x128xf32>
    %28 = arith.negf %27 : vector<32x128xf32>
    %29 = math.exp %28 : vector<32x128xf32>
    %cst_26 = arith.constant 1.000000e+00 : f32
    %30 = vector.broadcast %cst_26 : f32 to vector<32x128xf32>
    %31 = arith.addf %30, %29 : vector<32x128xf32>
    %32 = arith.divf %30, %31 : vector<32x128xf32>
    %33 = arith.mulf %27, %32 : vector<32x128xf32>
    %34 = arith.truncf %33 : vector<32x128xf32> to vector<32x128xbf16>
    %c0_27 = arith.constant 0 : index
    %c0_28 = arith.constant 0 : index
    %35 = vector.load %arg3[%c0_27, %c0_28] : memref<32x128xbf16, #tpu.memory_space<vmem>>, vector<32x128xbf16>
    tpu.vector_store %arg3[%c0_27, %c0_28], %34 {strides = array<i32>} : memref<32x128xbf16, #tpu.memory_space<vmem>>, vector<32x128xbf16>,
    return
  }
}

module attributes {stable_mosaic.version = 11 : i64} {
  func.func @_tapconv_kernel(%arg0: memref<9x32x128xbf16, #tpu.memory_space<vmem>>, %arg1: memref<9x128x128xbf16, #tpu.memory_space<vmem>>, %arg2: memref<1x128xf32, #tpu.memory_space<vmem>>, %arg3: memref<32x128xbf16, #tpu.memory_space<vmem>>) attributes {dimension_semantics = [], scalar_prefetch = 0 : i64, scratch_operands = 0 : i64, tpu.core_type = #tpu.core_type<tc>} {
    %cst = arith.constant 0.000000e+00 : f32
    %0 = vector.broadcast %cst : f32 to vector<32x128xf32>
    %c0 = arith.constant 0 : index
    %c0_0 = arith.constant 0 : index
    %c0_1 = arith.constant 0 : index
    %1 = vector.load %arg0[%c0, %c0_0, %c0_1] : memref<9x32x128xbf16, #tpu.memory_space<vmem>>, vector<1x32x128xbf16>
    %2 = vector.shape_cast %1 : vector<1x32x128xbf16> to vector<32x128xbf16>
    %c0_2 = arith.constant 0 : index
    %c0_3 = arith.constant 0 : index
    %c0_4 = arith.constant 0 : index
    %3 = vector.load %arg1[%c0_2, %c0_3, %c0_4] : memref<9x128x128xbf16, #tpu.memory_space<vmem>>, vector<1x128x128xbf16>
    %4 = vector.shape_cast %3 : vector<1x128x128xbf16> to vector<128x128xbf16>
    %cst_5 = arith.constant dense<0.000000e+00> : vector<32x128xf32>
    %5 = tpu.matmul %2, %4, %cst_5 {dimension_numbers = #tpu.dot_dimension_numbers<[1], [0], [0], [1], [0, 0, 1, 1], [], []>} : vector<32x128xbf16>, vector<128x128xbf16>, vector<32x128xf32> -> vector<32x128xf32>
    %6 = arith.addf %0, %5 : vector<32x128xf32>
    %c1 = arith.constant 1 : index
    %c0_6 = arith.constant 0 : index
    %c0_7 = arith.constant 0 : index
    %7 = vector.load %arg0[%c1, %c0_6, %c0_7] : memref<9x32x128xbf16, #tpu.memory_space<vmem>>, vector<1x32x128xbf16>
    %8 = vector.shape_cast %7 : vector<1x32x128xbf16> to vector<32x128xbf16>
    %c1_8 = arith.constant 1 : index
    %c0_9 = arith.constant 0 : index
    %c0_10 = arith.constant 0 : index
    %9 = vector.load %arg1[%c1_8, %c0_9, %c0_10] : memref<9x128x128xbf16, #tpu.memory_space<vmem>>, vector<1x128x128xbf16>
    %10 = vector.shape_cast %9 : vector<1x128x128xbf16> to vector<128x128xbf16>
    %cst_11 = arith.constant dense<0.000000e+00> : vector<32x128xf32>
    %11 = tpu.matmul %8, %10, %cst_11 {dimension_numbers = #tpu.dot_dimension_numbers<[1], [0], [0], [1], [0, 0, 1, 1], [], []>} : vector<32x128xbf16>, vector<128x128xbf16>, vector<32x128xf32> -> vector<32x128xf32>
    %12 = arith.addf %6, %11 : vector<32x128xf32>
    %c2 = arith.constant 2 : index
    %c0_12 = arith.constant 0 : index
    %c0_13 = arith.constant 0 : index
    %13 = vector.load %arg0[%c2, %c0_12, %c0_13] : memref<9x32x128xbf16, #tpu.memory_space<vmem>>, vector<1x32x128xbf16>
    %14 = vector.shape_cast %13 : vector<1x32x128xbf16> to vector<32x128xbf16>
    %c2_14 = arith.constant 2 : index
    %c0_15 = arith.constant 0 : index
    %c0_16 = arith.constant 0 : index
    %15 = vector.load %arg1[%c2_14, %c0_15, %c0_16] : memref<9x128x128xbf16, #tpu.memory_space<vmem>>, vector<1x128x128xbf16>
    %16 = vector.shape_cast %15 : vector<1x128x128xbf16> to vector<128x128xbf16>
    %cst_17 = arith.constant dense<0.000000e+00> : vector<32x128xf32>
    %17 = tpu.matmul %14, %16, %cst_17 {dimension_numbers = #tpu.dot_dimension_numbers<[1], [0], [0], [1], [0, 0, 1, 1], [], []>} : vector<32x128xbf16>, vector<128x128xbf16>, vector<32x128xf32> -> vector<32x128xf32>
    %18 = arith.addf %12, %17 : vector<32x128xf32>
    %c3 = arith.constant 3 : index
    %c0_18 = arith.constant 0 : index
    %c0_19 = arith.constant 0 : index
    %19 = vector.load %arg0[%c3, %c0_18, %c0_19] : memref<9x32x128xbf16, #tpu.memory_space<vmem>>, vector<1x32x128xbf16>
    %20 = vector.shape_cast %19 : vector<1x32x128xbf16> to vector<32x128xbf16>
    %c3_20 = arith.constant 3 : index
    %c0_21 = arith.constant 0 : index
    %c0_22 = arith.constant 0 : index
    %21 = vector.load %arg1[%c3_20, %c0_21, %c0_22] : memref<9x128x128xbf16, #tpu.memory_space<vmem>>, vector<1x128x128xbf16>
    %22 = vector.shape_cast %21 : vector<1x128x128xbf16> to vector<128x128xbf16>
    %cst_23 = arith.constant dense<0.000000e+00> : vector<32x128xf32>
    %23 = tpu.matmul %20, %22, %cst_23 {dimension_numbers = #tpu.dot_dimension_numbers<[1], [0], [0], [1], [0, 0, 1, 1], [], []>} : vector<32x128xbf16>, vector<128x128xbf16>, vector<32x128xf32> -> vector<32x128xf32>
    %24 = arith.addf %18, %23 : vector<32x128xf32>
    %c4 = arith.constant 4 : index
    %c0_24 = arith.constant 0 : index
    %c0_25 = arith.constant 0 : index
    %25 = vector.load %arg0[%c4, %c0_24, %c0_25] : memref<9x32x128xbf16, #tpu.memory_space<vmem>>, vector<1x32x128xbf16>
    %26 = vector.shape_cast %25 : vector<1x32x128xbf16> to vector<32x128xbf16>
    %c4_26 = arith.constant 4 : index
    %c0_27 = arith.constant 0 : index
    %c0_28 = arith.constant 0 : index
    %27 = vector.load %arg1[%c4_26, %c0_27, %c0_28] : memref<9x128x128xbf16, #tpu.memory_space<vmem>>, vector<1x128x128xbf16>
    %28 = vector.shape_cast %27 : vector<1x128x128xbf16> to vector<128x128xbf16>
    %cst_29 = arith.constant dense<0.000000e+00> : vector<32x128xf32>
    %29 = tpu.matmul %26, %28, %cst_29 {dimension_numbers = #tpu.dot_dimension_numbers<[1], [0], [0], [1], [0, 0, 1, 1], [], []>} : vector<32x128xbf16>, vector<128x128xbf16>, vector<32x128xf32> -> vector<32x128xf32>
    %30 = arith.addf %24, %29 : vector<32x128xf32>
    %c5 = arith.constant 5 : index
    %c0_30 = arith.constant 0 : index
    %c0_31 = arith.constant 0 : index
    %31 = vector.load %arg0[%c5, %c0_30, %c0_31] : memref<9x32x128xbf16, #tpu.memory_space<vmem>>, vector<1x32x128xbf16>
    %32 = vector.shape_cast %31 : vector<1x32x128xbf16> to vector<32x128xbf16>
    %c5_32 = arith.constant 5 : index
    %c0_33 = arith.constant 0 : index
    %c0_34 = arith.constant 0 : index
    %33 = vector.load %arg1[%c5_32, %c0_33, %c0_34] : memref<9x128x128xbf16, #tpu.memory_space<vmem>>, vector<1x128x128xbf16>
    %34 = vector.shape_cast %33 : vector<1x128x128xbf16> to vector<128x128xbf16>
    %cst_35 = arith.constant dense<0.000000e+00> : vector<32x128xf32>
    %35 = tpu.matmul %32, %34, %cst_35 {dimension_numbers = #tpu.dot_dimension_numbers<[1], [0], [0], [1], [0, 0, 1, 1], [], []>} : vector<32x128xbf16>, vector<128x128xbf16>, vector<32x128xf32> -> vector<32x128xf32>
    %36 = arith.addf %30, %35 : vector<32x128xf32>
    %c6 = arith.constant 6 : index
    %c0_36 = arith.constant 0 : index
    %c0_37 = arith.constant 0 : index
    %37 = vector.load %arg0[%c6, %c0_36, %c0_37] : memref<9x32x128xbf16, #tpu.memory_space<vmem>>, vector<1x32x128xbf16>
    %38 = vector.shape_cast %37 : vector<1x32x128xbf16> to vector<32x128xbf16>
    %c6_38 = arith.constant 6 : index
    %c0_39 = arith.constant 0 : index
    %c0_40 = arith.constant 0 : index
    %39 = vector.load %arg1[%c6_38, %c0_39, %c0_40] : memref<9x128x128xbf16, #tpu.memory_space<vmem>>, vector<1x128x128xbf16>
    %40 = vector.shape_cast %39 : vector<1x128x128xbf16> to vector<128x128xbf16>
    %cst_41 = arith.constant dense<0.000000e+00> : vector<32x128xf32>
    %41 = tpu.matmul %38, %40, %cst_41 {dimension_numbers = #tpu.dot_dimension_numbers<[1], [0], [0], [1], [0, 0, 1, 1], [], []>} : vector<32x128xbf16>, vector<128x128xbf16>, vector<32x128xf32> -> vector<32x128xf32>
    %42 = arith.addf %36, %41 : vector<32x128xf32>
    %c7 = arith.constant 7 : index
    %c0_42 = arith.constant 0 : index
    %c0_43 = arith.constant 0 : index
    %43 = vector.load %arg0[%c7, %c0_42, %c0_43] : memref<9x32x128xbf16, #tpu.memory_space<vmem>>, vector<1x32x128xbf16>
    %44 = vector.shape_cast %43 : vector<1x32x128xbf16> to vector<32x128xbf16>
    %c7_44 = arith.constant 7 : index
    %c0_45 = arith.constant 0 : index
    %c0_46 = arith.constant 0 : index
    %45 = vector.load %arg1[%c7_44, %c0_45, %c0_46] : memref<9x128x128xbf16, #tpu.memory_space<vmem>>, vector<1x128x128xbf16>
    %46 = vector.shape_cast %45 : vector<1x128x128xbf16> to vector<128x128xbf16>
    %cst_47 = arith.constant dense<0.000000e+00> : vector<32x128xf32>
    %47 = tpu.matmul %44, %46, %cst_47 {dimension_numbers = #tpu.dot_dimension_numbers<[1], [0], [0], [1], [0, 0, 1, 1], [], []>} : vector<32x128xbf16>, vector<128x128xbf16>, vector<32x128xf32> -> vector<32x128xf32>
    %48 = arith.addf %42, %47 : vector<32x128xf32>
    %c8 = arith.constant 8 : index
    %c0_48 = arith.constant 0 : index
    %c0_49 = arith.constant 0 : index
    %49 = vector.load %arg0[%c8, %c0_48, %c0_49] : memref<9x32x128xbf16, #tpu.memory_space<vmem>>, vector<1x32x128xbf16>
    %50 = vector.shape_cast %49 : vector<1x32x128xbf16> to vector<32x128xbf16>
    %c8_50 = arith.constant 8 : index
    %c0_51 = arith.constant 0 : index
    %c0_52 = arith.constant 0 : index
    %51 = vector.load %arg1[%c8_50, %c0_51, %c0_52] : memref<9x128x128xbf16, #tpu.memory_space<vmem>>, vector<1x128x128xbf16>
    %52 = vector.shape_cast %51 : vector<1x128x128xbf16> to vector<128x128xbf16>
    %cst_53 = arith.constant dense<0.000000e+00> : vector<32x128xf32>
    %53 = tpu.matmul %50, %52, %cst_53 {dimension_numbers = #tpu.dot_dimension_numbers<[1], [0], [0], [1], [0, 0, 1, 1], [], []>} : vector<32x128xbf16>, vector<128x128xbf16>, vector<32x128xf32> -> vector<32x128xf32>
    %54 = arith.addf %48, %53 : vector<32x128xf32>
    %c0_54 = arith.constant 0 : index
    %c0_55 = arith.constant 0 : index
    %55 = vector.load %arg2[%c0_54, %c0_55] : memref<1x128xf32, #tpu.memory_space<vmem>>, vector<1x128xf32>
    %56 = vector.broadcast %55 : vector<1x128xf32> to vector<32x128xf32>
    %57 = arith.addf %54, %56 : vector<32x128xf32>
    %58 = arith.truncf %57 : vector<32x128xf32> to vector<32x128xbf16>
    %c0_56 = arith.constant 0 : index
    %c0_57 = arith.constant 0 : index
    %59 = vector.load %arg3[%c0_56, %c0_57] : memref<32x128xbf16, #tpu.memory_space<vmem>>, vector<32x128xbf16>
    tpu.vector_store %arg3[%c0_56, %c0_57], %58 {strides = array<i32>} : memref<32x128xbf16, #tpu.memory_space<vmem>>, vector<32x128xbf16>,
    return
  }
}

module attributes {stable_mosaic.version = 11 : i64} {
  func.func @_vq_fused_kernel(%arg0: memref<32x128xbf16, #tpu.memory_space<vmem>>, %arg1: memref<128x128xbf16, #tpu.memory_space<vmem>>, %arg2: memref<1x128xf32, #tpu.memory_space<vmem>>, %arg3: memref<128x128xf32, #tpu.memory_space<vmem>>, %arg4: memref<128x128xf32, #tpu.memory_space<vmem>>, %arg5: memref<1x128xf32, #tpu.memory_space<vmem>>, %arg6: memref<128x128xbf16, #tpu.memory_space<vmem>>, %arg7: memref<1x128xf32, #tpu.memory_space<vmem>>, %arg8: memref<32x128xbf16, #tpu.memory_space<vmem>>, %arg9: memref<1x128xf32, #tpu.memory_space<vmem>>, %arg10: memref<1x1xf32, #tpu.memory_space<vmem>>) attributes {dimension_semantics = [], scalar_prefetch = 0 : i64, scratch_operands = 0 : i64, tpu.core_type = #tpu.core_type<tc>} {
    %c0 = arith.constant 0 : index
    %c0_0 = arith.constant 0 : index
    %0 = vector.load %arg0[%c0, %c0_0] : memref<32x128xbf16, #tpu.memory_space<vmem>>, vector<32x128xbf16>
    %c0_1 = arith.constant 0 : index
    %c0_2 = arith.constant 0 : index
    %1 = vector.load %arg1[%c0_1, %c0_2] : memref<128x128xbf16, #tpu.memory_space<vmem>>, vector<128x128xbf16>
    %cst = arith.constant dense<0.000000e+00> : vector<32x128xf32>
    %2 = tpu.matmul %0, %1, %cst {dimension_numbers = #tpu.dot_dimension_numbers<[1], [0], [0], [1], [0, 0, 1, 1], [], []>} : vector<32x128xbf16>, vector<128x128xbf16>, vector<32x128xf32> -> vector<32x128xf32>
    %c0_3 = arith.constant 0 : index
    %c0_4 = arith.constant 0 : index
    %3 = vector.load %arg2[%c0_3, %c0_4] : memref<1x128xf32, #tpu.memory_space<vmem>>, vector<1x128xf32>
    %4 = vector.broadcast %3 : vector<1x128xf32> to vector<32x128xf32>
    %5 = arith.addf %2, %4 : vector<32x128xf32>
    %6 = arith.mulf %5, %5 : vector<32x128xf32>
    %cst_5 = arith.constant dense<0.000000e+00> : vector<32xf32>
    %7 = vector.multi_reduction <add>, %6, %cst_5 [1] : vector<32x128xf32> to vector<32xf32>
    %8 = vector.shape_cast %7 : vector<32xf32> to vector<32x1xf32>
    %c0_6 = arith.constant 0 : index
    %c0_7 = arith.constant 0 : index
    %9 = vector.load %arg5[%c0_6, %c0_7] : memref<1x128xf32, #tpu.memory_space<vmem>>, vector<1x128xf32>
    %10 = vector.broadcast %8 : vector<32x1xf32> to vector<32x128xf32>
    %11 = vector.broadcast %9 : vector<1x128xf32> to vector<32x128xf32>
    %12 = arith.addf %10, %11 : vector<32x128xf32>
    %c0_8 = arith.constant 0 : index
    %c0_9 = arith.constant 0 : index
    %13 = vector.load %arg4[%c0_8, %c0_9] : memref<128x128xf32, #tpu.memory_space<vmem>>, vector<128x128xf32>
    %cst_10 = arith.constant dense<0.000000e+00> : vector<32x128xf32>
    %14 = tpu.matmul %5, %13, %cst_10 {dimension_numbers = #tpu.dot_dimension_numbers<[1], [0], [0], [1], [0, 0, 1, 1], [], []>} : vector<32x128xf32>, vector<128x128xf32>, vector<32x128xf32> -> vector<32x128xf32>
    %cst_11 = arith.constant 2.000000e+00 : f32
    %15 = vector.broadcast %cst_11 : f32 to vector<32x128xf32>
    %16 = arith.mulf %15, %14 : vector<32x128xf32>
    %17 = arith.subf %12, %16 : vector<32x128xf32>
    %18 = tpu.iota {dimensions = array<i32: 1>} : vector<32x128xi32>
    %c64_i32 = arith.constant 64 : i32
    %19 = vector.broadcast %c64_i32 : i32 to vector<32x128xi32>
    %20 = arith.cmpi slt, %18, %19 : vector<32x128xi32>
    %cst_12 = arith.constant 0x7F800000 : f32
    %21 = vector.broadcast %cst_12 : f32 to vector<32x128xf32>
    %22 = arith.select %20, %17, %21 : vector<32x128xi1>, vector<32x128xf32>
    %cst_13 = arith.constant dense<0x7F800000> : vector<32xf32>
    %23 = vector.multi_reduction <minimumf>, %22, %cst_13 [1] : vector<32x128xf32> to vector<32xf32>
    %24 = vector.shape_cast %23 : vector<32xf32> to vector<32x1xf32>
    %25 = vector.broadcast %24 : vector<32x1xf32> to vector<32x128xf32>
    %26 = arith.cmpf ole, %22, %25 : vector<32x128xf32>
    %c128_i32 = arith.constant 128 : i32
    %27 = vector.broadcast %c128_i32 : i32 to vector<32x128xi32>
    %28 = arith.select %26, %18, %27 : vector<32x128xi1>, vector<32x128xi32>
    %cst_14 = arith.constant dense<2147483647> : vector<32xi32>
    %29 = vector.multi_reduction <minsi>, %28, %cst_14 [1] : vector<32x128xi32> to vector<32xi32>
    %30 = vector.shape_cast %29 : vector<32xi32> to vector<32x1xi32>
    %31 = vector.broadcast %30 : vector<32x1xi32> to vector<32x128xi32>
    %32 = arith.cmpi eq, %18, %31 : vector<32x128xi32>
    %33 = arith.extui %32 : vector<32x128xi1> to vector<32x128xi32>
    %34 = arith.sitofp %33 : vector<32x128xi32> to vector<32x128xf32>
    %c0_15 = arith.constant 0 : index
    %c0_16 = arith.constant 0 : index
    %35 = vector.load %arg3[%c0_15, %c0_16] : memref<128x128xf32, #tpu.memory_space<vmem>>, vector<128x128xf32>
    %cst_17 = arith.constant dense<0.000000e+00> : vector<32x128xf32>
    %36 = tpu.matmul %34, %35, %cst_17 {dimension_numbers = #tpu.dot_dimension_numbers<[1], [0], [0], [1], [0, 0, 1, 1], [], []>} : vector<32x128xf32>, vector<128x128xf32>, vector<32x128xf32> -> vector<32x128xf32>
    %cst_18 = arith.constant dense<0.000000e+00> : vector<128xf32>
    %37 = vector.multi_reduction <add>, %34, %cst_18 [0] : vector<32x128xf32> to vector<128xf32>
    %38 = vector.shape_cast %37 : vector<128xf32> to vector<1x128xf32>
    %c0_19 = arith.constant 0 : index
    %c0_20 = arith.constant 0 : index
    %39 = vector.load %arg9[%c0_19, %c0_20] : memref<1x128xf32, #tpu.memory_space<vmem>>, vector<1x128xf32>
    tpu.vector_store %arg9[%c0_19, %c0_20], %38 {strides = array<i32>} : memref<1x128xf32, #tpu.memory_space<vmem>>, vector<1x128xf32>,
    %40 = arith.subf %36, %5 : vector<32x128xf32>
    %41 = arith.mulf %40, %40 : vector<32x128xf32>
    %42 = vector.shape_cast %41 : vector<32x128xf32> to vector<1x32x128xf32>
    %cst_21 = arith.constant dense<0.000000e+00> : vector<1xf32>
    %43 = vector.multi_reduction <add>, %42, %cst_21 [1, 2] : vector<1x32x128xf32> to vector<1xf32>
    %44 = vector.shape_cast %43 : vector<1xf32> to vector<1x1x1xf32>
    %45 = vector.extract %44[0, 0, 0] : f32 from vector<1x1x1xf32>
    %46 = vector.broadcast %45 : f32 to vector<1x1xf32>
    %c0_22 = arith.constant 0 : index
    %c0_23 = arith.constant 0 : index
    %47 = vector.load %arg10[%c0_22, %c0_23] : memref<1x1xf32, #tpu.memory_space<vmem>>, vector<1x1xf32>
    tpu.vector_store %arg10[%c0_22, %c0_23], %46 {strides = array<i32>} : memref<1x1xf32, #tpu.memory_space<vmem>>, vector<1x1xf32>,
    %48 = arith.truncf %36 : vector<32x128xf32> to vector<32x128xbf16>
    %c0_24 = arith.constant 0 : index
    %c0_25 = arith.constant 0 : index
    %49 = vector.load %arg6[%c0_24, %c0_25] : memref<128x128xbf16, #tpu.memory_space<vmem>>, vector<128x128xbf16>
    %cst_26 = arith.constant dense<0.000000e+00> : vector<32x128xf32>
    %50 = tpu.matmul %48, %49, %cst_26 {dimension_numbers = #tpu.dot_dimension_numbers<[1], [0], [0], [1], [0, 0, 1, 1], [], []>} : vector<32x128xbf16>, vector<128x128xbf16>, vector<32x128xf32> -> vector<32x128xf32>
    %c0_27 = arith.constant 0 : index
    %c0_28 = arith.constant 0 : index
    %51 = vector.load %arg7[%c0_27, %c0_28] : memref<1x128xf32, #tpu.memory_space<vmem>>, vector<1x128xf32>
    %52 = vector.broadcast %51 : vector<1x128xf32> to vector<32x128xf32>
    %53 = arith.addf %50, %52 : vector<32x128xf32>
    %54 = arith.truncf %53 : vector<32x128xf32> to vector<32x128xbf16>
    %c0_29 = arith.constant 0 : index
    %c0_30 = arith.constant 0 : index
    %55 = vector.load %arg8[%c0_29, %c0_30] : memref<32x128xbf16, #tpu.memory_space<vmem>>, vector<32x128xbf16>
    tpu.vector_store %arg8[%c0_29, %c0_30], %54 {strides = array<i32>} : memref<32x128xbf16, #tpu.memory_space<vmem>>, vector<32x128xbf16>,
    return
  }
}

module attributes {stable_mosaic.version = 11 : i64} {
  func.func @_tapconv_kernel(%arg0: memref<9x32x128xbf16, #tpu.memory_space<vmem>>, %arg1: memref<9x128x128xbf16, #tpu.memory_space<vmem>>, %arg2: memref<1x128xf32, #tpu.memory_space<vmem>>, %arg3: memref<32x128xbf16, #tpu.memory_space<vmem>>) attributes {dimension_semantics = [], scalar_prefetch = 0 : i64, scratch_operands = 0 : i64, tpu.core_type = #tpu.core_type<tc>} {
    %cst = arith.constant 0.000000e+00 : f32
    %0 = vector.broadcast %cst : f32 to vector<32x128xf32>
    %c0 = arith.constant 0 : index
    %c0_0 = arith.constant 0 : index
    %c0_1 = arith.constant 0 : index
    %1 = vector.load %arg0[%c0, %c0_0, %c0_1] : memref<9x32x128xbf16, #tpu.memory_space<vmem>>, vector<1x32x128xbf16>
    %2 = vector.shape_cast %1 : vector<1x32x128xbf16> to vector<32x128xbf16>
    %c0_2 = arith.constant 0 : index
    %c0_3 = arith.constant 0 : index
    %c0_4 = arith.constant 0 : index
    %3 = vector.load %arg1[%c0_2, %c0_3, %c0_4] : memref<9x128x128xbf16, #tpu.memory_space<vmem>>, vector<1x128x128xbf16>
    %4 = vector.shape_cast %3 : vector<1x128x128xbf16> to vector<128x128xbf16>
    %cst_5 = arith.constant dense<0.000000e+00> : vector<32x128xf32>
    %5 = tpu.matmul %2, %4, %cst_5 {dimension_numbers = #tpu.dot_dimension_numbers<[1], [0], [0], [1], [0, 0, 1, 1], [], []>} : vector<32x128xbf16>, vector<128x128xbf16>, vector<32x128xf32> -> vector<32x128xf32>
    %6 = arith.addf %0, %5 : vector<32x128xf32>
    %c1 = arith.constant 1 : index
    %c0_6 = arith.constant 0 : index
    %c0_7 = arith.constant 0 : index
    %7 = vector.load %arg0[%c1, %c0_6, %c0_7] : memref<9x32x128xbf16, #tpu.memory_space<vmem>>, vector<1x32x128xbf16>
    %8 = vector.shape_cast %7 : vector<1x32x128xbf16> to vector<32x128xbf16>
    %c1_8 = arith.constant 1 : index
    %c0_9 = arith.constant 0 : index
    %c0_10 = arith.constant 0 : index
    %9 = vector.load %arg1[%c1_8, %c0_9, %c0_10] : memref<9x128x128xbf16, #tpu.memory_space<vmem>>, vector<1x128x128xbf16>
    %10 = vector.shape_cast %9 : vector<1x128x128xbf16> to vector<128x128xbf16>
    %cst_11 = arith.constant dense<0.000000e+00> : vector<32x128xf32>
    %11 = tpu.matmul %8, %10, %cst_11 {dimension_numbers = #tpu.dot_dimension_numbers<[1], [0], [0], [1], [0, 0, 1, 1], [], []>} : vector<32x128xbf16>, vector<128x128xbf16>, vector<32x128xf32> -> vector<32x128xf32>
    %12 = arith.addf %6, %11 : vector<32x128xf32>
    %c2 = arith.constant 2 : index
    %c0_12 = arith.constant 0 : index
    %c0_13 = arith.constant 0 : index
    %13 = vector.load %arg0[%c2, %c0_12, %c0_13] : memref<9x32x128xbf16, #tpu.memory_space<vmem>>, vector<1x32x128xbf16>
    %14 = vector.shape_cast %13 : vector<1x32x128xbf16> to vector<32x128xbf16>
    %c2_14 = arith.constant 2 : index
    %c0_15 = arith.constant 0 : index
    %c0_16 = arith.constant 0 : index
    %15 = vector.load %arg1[%c2_14, %c0_15, %c0_16] : memref<9x128x128xbf16, #tpu.memory_space<vmem>>, vector<1x128x128xbf16>
    %16 = vector.shape_cast %15 : vector<1x128x128xbf16> to vector<128x128xbf16>
    %cst_17 = arith.constant dense<0.000000e+00> : vector<32x128xf32>
    %17 = tpu.matmul %14, %16, %cst_17 {dimension_numbers = #tpu.dot_dimension_numbers<[1], [0], [0], [1], [0, 0, 1, 1], [], []>} : vector<32x128xbf16>, vector<128x128xbf16>, vector<32x128xf32> -> vector<32x128xf32>
    %18 = arith.addf %12, %17 : vector<32x128xf32>
    %c3 = arith.constant 3 : index
    %c0_18 = arith.constant 0 : index
    %c0_19 = arith.constant 0 : index
    %19 = vector.load %arg0[%c3, %c0_18, %c0_19] : memref<9x32x128xbf16, #tpu.memory_space<vmem>>, vector<1x32x128xbf16>
    %20 = vector.shape_cast %19 : vector<1x32x128xbf16> to vector<32x128xbf16>
    %c3_20 = arith.constant 3 : index
    %c0_21 = arith.constant 0 : index
    %c0_22 = arith.constant 0 : index
    %21 = vector.load %arg1[%c3_20, %c0_21, %c0_22] : memref<9x128x128xbf16, #tpu.memory_space<vmem>>, vector<1x128x128xbf16>
    %22 = vector.shape_cast %21 : vector<1x128x128xbf16> to vector<128x128xbf16>
    %cst_23 = arith.constant dense<0.000000e+00> : vector<32x128xf32>
    %23 = tpu.matmul %20, %22, %cst_23 {dimension_numbers = #tpu.dot_dimension_numbers<[1], [0], [0], [1], [0, 0, 1, 1], [], []>} : vector<32x128xbf16>, vector<128x128xbf16>, vector<32x128xf32> -> vector<32x128xf32>
    %24 = arith.addf %18, %23 : vector<32x128xf32>
    %c4 = arith.constant 4 : index
    %c0_24 = arith.constant 0 : index
    %c0_25 = arith.constant 0 : index
    %25 = vector.load %arg0[%c4, %c0_24, %c0_25] : memref<9x32x128xbf16, #tpu.memory_space<vmem>>, vector<1x32x128xbf16>
    %26 = vector.shape_cast %25 : vector<1x32x128xbf16> to vector<32x128xbf16>
    %c4_26 = arith.constant 4 : index
    %c0_27 = arith.constant 0 : index
    %c0_28 = arith.constant 0 : index
    %27 = vector.load %arg1[%c4_26, %c0_27, %c0_28] : memref<9x128x128xbf16, #tpu.memory_space<vmem>>, vector<1x128x128xbf16>
    %28 = vector.shape_cast %27 : vector<1x128x128xbf16> to vector<128x128xbf16>
    %cst_29 = arith.constant dense<0.000000e+00> : vector<32x128xf32>
    %29 = tpu.matmul %26, %28, %cst_29 {dimension_numbers = #tpu.dot_dimension_numbers<[1], [0], [0], [1], [0, 0, 1, 1], [], []>} : vector<32x128xbf16>, vector<128x128xbf16>, vector<32x128xf32> -> vector<32x128xf32>
    %30 = arith.addf %24, %29 : vector<32x128xf32>
    %c5 = arith.constant 5 : index
    %c0_30 = arith.constant 0 : index
    %c0_31 = arith.constant 0 : index
    %31 = vector.load %arg0[%c5, %c0_30, %c0_31] : memref<9x32x128xbf16, #tpu.memory_space<vmem>>, vector<1x32x128xbf16>
    %32 = vector.shape_cast %31 : vector<1x32x128xbf16> to vector<32x128xbf16>
    %c5_32 = arith.constant 5 : index
    %c0_33 = arith.constant 0 : index
    %c0_34 = arith.constant 0 : index
    %33 = vector.load %arg1[%c5_32, %c0_33, %c0_34] : memref<9x128x128xbf16, #tpu.memory_space<vmem>>, vector<1x128x128xbf16>
    %34 = vector.shape_cast %33 : vector<1x128x128xbf16> to vector<128x128xbf16>
    %cst_35 = arith.constant dense<0.000000e+00> : vector<32x128xf32>
    %35 = tpu.matmul %32, %34, %cst_35 {dimension_numbers = #tpu.dot_dimension_numbers<[1], [0], [0], [1], [0, 0, 1, 1], [], []>} : vector<32x128xbf16>, vector<128x128xbf16>, vector<32x128xf32> -> vector<32x128xf32>
    %36 = arith.addf %30, %35 : vector<32x128xf32>
    %c6 = arith.constant 6 : index
    %c0_36 = arith.constant 0 : index
    %c0_37 = arith.constant 0 : index
    %37 = vector.load %arg0[%c6, %c0_36, %c0_37] : memref<9x32x128xbf16, #tpu.memory_space<vmem>>, vector<1x32x128xbf16>
    %38 = vector.shape_cast %37 : vector<1x32x128xbf16> to vector<32x128xbf16>
    %c6_38 = arith.constant 6 : index
    %c0_39 = arith.constant 0 : index
    %c0_40 = arith.constant 0 : index
    %39 = vector.load %arg1[%c6_38, %c0_39, %c0_40] : memref<9x128x128xbf16, #tpu.memory_space<vmem>>, vector<1x128x128xbf16>
    %40 = vector.shape_cast %39 : vector<1x128x128xbf16> to vector<128x128xbf16>
    %cst_41 = arith.constant dense<0.000000e+00> : vector<32x128xf32>
    %41 = tpu.matmul %38, %40, %cst_41 {dimension_numbers = #tpu.dot_dimension_numbers<[1], [0], [0], [1], [0, 0, 1, 1], [], []>} : vector<32x128xbf16>, vector<128x128xbf16>, vector<32x128xf32> -> vector<32x128xf32>
    %42 = arith.addf %36, %41 : vector<32x128xf32>
    %c7 = arith.constant 7 : index
    %c0_42 = arith.constant 0 : index
    %c0_43 = arith.constant 0 : index
    %43 = vector.load %arg0[%c7, %c0_42, %c0_43] : memref<9x32x128xbf16, #tpu.memory_space<vmem>>, vector<1x32x128xbf16>
    %44 = vector.shape_cast %43 : vector<1x32x128xbf16> to vector<32x128xbf16>
    %c7_44 = arith.constant 7 : index
    %c0_45 = arith.constant 0 : index
    %c0_46 = arith.constant 0 : index
    %45 = vector.load %arg1[%c7_44, %c0_45, %c0_46] : memref<9x128x128xbf16, #tpu.memory_space<vmem>>, vector<1x128x128xbf16>
    %46 = vector.shape_cast %45 : vector<1x128x128xbf16> to vector<128x128xbf16>
    %cst_47 = arith.constant dense<0.000000e+00> : vector<32x128xf32>
    %47 = tpu.matmul %44, %46, %cst_47 {dimension_numbers = #tpu.dot_dimension_numbers<[1], [0], [0], [1], [0, 0, 1, 1], [], []>} : vector<32x128xbf16>, vector<128x128xbf16>, vector<32x128xf32> -> vector<32x128xf32>
    %48 = arith.addf %42, %47 : vector<32x128xf32>
    %c8 = arith.constant 8 : index
    %c0_48 = arith.constant 0 : index
    %c0_49 = arith.constant 0 : index
    %49 = vector.load %arg0[%c8, %c0_48, %c0_49] : memref<9x32x128xbf16, #tpu.memory_space<vmem>>, vector<1x32x128xbf16>
    %50 = vector.shape_cast %49 : vector<1x32x128xbf16> to vector<32x128xbf16>
    %c8_50 = arith.constant 8 : index
    %c0_51 = arith.constant 0 : index
    %c0_52 = arith.constant 0 : index
    %51 = vector.load %arg1[%c8_50, %c0_51, %c0_52] : memref<9x128x128xbf16, #tpu.memory_space<vmem>>, vector<1x128x128xbf16>
    %52 = vector.shape_cast %51 : vector<1x128x128xbf16> to vector<128x128xbf16>
    %cst_53 = arith.constant dense<0.000000e+00> : vector<32x128xf32>
    %53 = tpu.matmul %50, %52, %cst_53 {dimension_numbers = #tpu.dot_dimension_numbers<[1], [0], [0], [1], [0, 0, 1, 1], [], []>} : vector<32x128xbf16>, vector<128x128xbf16>, vector<32x128xf32> -> vector<32x128xf32>
    %54 = arith.addf %48, %53 : vector<32x128xf32>
    %c0_54 = arith.constant 0 : index
    %c0_55 = arith.constant 0 : index
    %55 = vector.load %arg2[%c0_54, %c0_55] : memref<1x128xf32, #tpu.memory_space<vmem>>, vector<1x128xf32>
    %56 = vector.broadcast %55 : vector<1x128xf32> to vector<32x128xf32>
    %57 = arith.addf %54, %56 : vector<32x128xf32>
    %58 = arith.negf %57 : vector<32x128xf32>
    %59 = math.exp %58 : vector<32x128xf32>
    %cst_56 = arith.constant 1.000000e+00 : f32
    %60 = vector.broadcast %cst_56 : f32 to vector<32x128xf32>
    %61 = arith.addf %60, %59 : vector<32x128xf32>
    %62 = arith.divf %60, %61 : vector<32x128xf32>
    %63 = arith.mulf %57, %62 : vector<32x128xf32>
    %64 = arith.truncf %63 : vector<32x128xf32> to vector<32x128xbf16>
    %c0_57 = arith.constant 0 : index
    %c0_58 = arith.constant 0 : index
    %65 = vector.load %arg3[%c0_57, %c0_58] : memref<32x128xbf16, #tpu.memory_space<vmem>>, vector<32x128xbf16>
    tpu.vector_store %arg3[%c0_57, %c0_58], %64 {strides = array<i32>} : memref<32x128xbf16, #tpu.memory_space<vmem>>, vector<32x128xbf16>,
    return
  }
}

module attributes {stable_mosaic.version = 11 : i64} {
  func.func @_upconv_kernel(%arg0: memref<9x32x128xbf16, #tpu.memory_space<vmem>>, %arg1: memref<4x4x128x128xbf16, #tpu.memory_space<vmem>>, %arg2: memref<1x128xf32, #tpu.memory_space<vmem>>, %arg3: memref<4x32x128xbf16, #tpu.memory_space<vmem>>) attributes {dimension_semantics = [], scalar_prefetch = 0 : i64, scratch_operands = 0 : i64, tpu.core_type = #tpu.core_type<tc>} {
    %cst = arith.constant 0.000000e+00 : f32
    %0 = vector.broadcast %cst : f32 to vector<32x128xf32>
    %c0 = arith.constant 0 : index
    %c0_0 = arith.constant 0 : index
    %c0_1 = arith.constant 0 : index
    %1 = vector.load %arg0[%c0, %c0_0, %c0_1] : memref<9x32x128xbf16, #tpu.memory_space<vmem>>, vector<1x32x128xbf16>
    %2 = vector.shape_cast %1 : vector<1x32x128xbf16> to vector<32x128xbf16>
    %c0_2 = arith.constant 0 : index
    %c0_3 = arith.constant 0 : index
    %c0_4 = arith.constant 0 : index
    %c0_5 = arith.constant 0 : index
    %3 = vector.load %arg1[%c0_2, %c0_3, %c0_4, %c0_5] : memref<4x4x128x128xbf16, #tpu.memory_space<vmem>>, vector<1x1x128x128xbf16>
    %4 = vector.shape_cast %3 : vector<1x1x128x128xbf16> to vector<128x128xbf16>
    %cst_6 = arith.constant dense<0.000000e+00> : vector<32x128xf32>
    %5 = tpu.matmul %2, %4, %cst_6 {dimension_numbers = #tpu.dot_dimension_numbers<[1], [0], [0], [1], [0, 0, 1, 1], [], []>} : vector<32x128xbf16>, vector<128x128xbf16>, vector<32x128xf32> -> vector<32x128xf32>
    %6 = arith.addf %0, %5 : vector<32x128xf32>
    %c1 = arith.constant 1 : index
    %c0_7 = arith.constant 0 : index
    %c0_8 = arith.constant 0 : index
    %7 = vector.load %arg0[%c1, %c0_7, %c0_8] : memref<9x32x128xbf16, #tpu.memory_space<vmem>>, vector<1x32x128xbf16>
    %8 = vector.shape_cast %7 : vector<1x32x128xbf16> to vector<32x128xbf16>
    %c0_9 = arith.constant 0 : index
    %c1_10 = arith.constant 1 : index
    %c0_11 = arith.constant 0 : index
    %c0_12 = arith.constant 0 : index
    %9 = vector.load %arg1[%c0_9, %c1_10, %c0_11, %c0_12] : memref<4x4x128x128xbf16, #tpu.memory_space<vmem>>, vector<1x1x128x128xbf16>
    %10 = vector.shape_cast %9 : vector<1x1x128x128xbf16> to vector<128x128xbf16>
    %cst_13 = arith.constant dense<0.000000e+00> : vector<32x128xf32>
    %11 = tpu.matmul %8, %10, %cst_13 {dimension_numbers = #tpu.dot_dimension_numbers<[1], [0], [0], [1], [0, 0, 1, 1], [], []>} : vector<32x128xbf16>, vector<128x128xbf16>, vector<32x128xf32> -> vector<32x128xf32>
    %12 = arith.addf %6, %11 : vector<32x128xf32>
    %c3 = arith.constant 3 : index
    %c0_14 = arith.constant 0 : index
    %c0_15 = arith.constant 0 : index
    %13 = vector.load %arg0[%c3, %c0_14, %c0_15] : memref<9x32x128xbf16, #tpu.memory_space<vmem>>, vector<1x32x128xbf16>
    %14 = vector.shape_cast %13 : vector<1x32x128xbf16> to vector<32x128xbf16>
    %c0_16 = arith.constant 0 : index
    %c2 = arith.constant 2 : index
    %c0_17 = arith.constant 0 : index
    %c0_18 = arith.constant 0 : index
    %15 = vector.load %arg1[%c0_16, %c2, %c0_17, %c0_18] : memref<4x4x128x128xbf16, #tpu.memory_space<vmem>>, vector<1x1x128x128xbf16>
    %16 = vector.shape_cast %15 : vector<1x1x128x128xbf16> to vector<128x128xbf16>
    %cst_19 = arith.constant dense<0.000000e+00> : vector<32x128xf32>
    %17 = tpu.matmul %14, %16, %cst_19 {dimension_numbers = #tpu.dot_dimension_numbers<[1], [0], [0], [1], [0, 0, 1, 1], [], []>} : vector<32x128xbf16>, vector<128x128xbf16>, vector<32x128xf32> -> vector<32x128xf32>
    %18 = arith.addf %12, %17 : vector<32x128xf32>
    %c4 = arith.constant 4 : index
    %c0_20 = arith.constant 0 : index
    %c0_21 = arith.constant 0 : index
    %19 = vector.load %arg0[%c4, %c0_20, %c0_21] : memref<9x32x128xbf16, #tpu.memory_space<vmem>>, vector<1x32x128xbf16>
    %20 = vector.shape_cast %19 : vector<1x32x128xbf16> to vector<32x128xbf16>
    %c0_22 = arith.constant 0 : index
    %c3_23 = arith.constant 3 : index
    %c0_24 = arith.constant 0 : index
    %c0_25 = arith.constant 0 : index
    %21 = vector.load %arg1[%c0_22, %c3_23, %c0_24, %c0_25] : memref<4x4x128x128xbf16, #tpu.memory_space<vmem>>, vector<1x1x128x128xbf16>
    %22 = vector.shape_cast %21 : vector<1x1x128x128xbf16> to vector<128x128xbf16>
    %cst_26 = arith.constant dense<0.000000e+00> : vector<32x128xf32>
    %23 = tpu.matmul %20, %22, %cst_26 {dimension_numbers = #tpu.dot_dimension_numbers<[1], [0], [0], [1], [0, 0, 1, 1], [], []>} : vector<32x128xbf16>, vector<128x128xbf16>, vector<32x128xf32> -> vector<32x128xf32>
    %24 = arith.addf %18, %23 : vector<32x128xf32>
    %c0_27 = arith.constant 0 : index
    %c0_28 = arith.constant 0 : index
    %25 = vector.load %arg2[%c0_27, %c0_28] : memref<1x128xf32, #tpu.memory_space<vmem>>, vector<1x128xf32>
    %26 = vector.broadcast %25 : vector<1x128xf32> to vector<32x128xf32>
    %27 = arith.addf %24, %26 : vector<32x128xf32>
    %28 = arith.negf %27 : vector<32x128xf32>
    %29 = math.exp %28 : vector<32x128xf32>
    %cst_29 = arith.constant 1.000000e+00 : f32
    %30 = vector.broadcast %cst_29 : f32 to vector<32x128xf32>
    %31 = arith.addf %30, %29 : vector<32x128xf32>
    %32 = arith.divf %30, %31 : vector<32x128xf32>
    %33 = arith.mulf %27, %32 : vector<32x128xf32>
    %34 = arith.truncf %33 : vector<32x128xf32> to vector<32x128xbf16>
    %c0_30 = arith.constant 0 : index
    %c0_31 = arith.constant 0 : index
    %c0_32 = arith.constant 0 : index
    %35 = vector.load %arg3[%c0_30, %c0_31, %c0_32] : memref<4x32x128xbf16, #tpu.memory_space<vmem>>, vector<1x32x128xbf16>
    %36 = vector.shape_cast %35 : vector<1x32x128xbf16> to vector<32x128xbf16>
    %37 = vector.shape_cast %34 : vector<32x128xbf16> to vector<1x32x128xbf16>
    tpu.vector_store %arg3[%c0_30, %c0_31, %c0_32], %37 {strides = array<i32>} : memref<4x32x128xbf16, #tpu.memory_space<vmem>>, vector<1x32x128xbf16>,
    %cst_33 = arith.constant 0.000000e+00 : f32
    %38 = vector.broadcast %cst_33 : f32 to vector<32x128xf32>
    %c1_34 = arith.constant 1 : index
    %c0_35 = arith.constant 0 : index
    %c0_36 = arith.constant 0 : index
    %39 = vector.load %arg0[%c1_34, %c0_35, %c0_36] : memref<9x32x128xbf16, #tpu.memory_space<vmem>>, vector<1x32x128xbf16>
    %40 = vector.shape_cast %39 : vector<1x32x128xbf16> to vector<32x128xbf16>
    %c1_37 = arith.constant 1 : index
    %c0_38 = arith.constant 0 : index
    %c0_39 = arith.constant 0 : index
    %c0_40 = arith.constant 0 : index
    %41 = vector.load %arg1[%c1_37, %c0_38, %c0_39, %c0_40] : memref<4x4x128x128xbf16, #tpu.memory_space<vmem>>, vector<1x1x128x128xbf16>
    %42 = vector.shape_cast %41 : vector<1x1x128x128xbf16> to vector<128x128xbf16>
    %cst_41 = arith.constant dense<0.000000e+00> : vector<32x128xf32>
    %43 = tpu.matmul %40, %42, %cst_41 {dimension_numbers = #tpu.dot_dimension_numbers<[1], [0], [0], [1], [0, 0, 1, 1], [], []>} : vector<32x128xbf16>, vector<128x128xbf16>, vector<32x128xf32> -> vector<32x128xf32>
    %44 = arith.addf %38, %43 : vector<32x128xf32>
    %c2_42 = arith.constant 2 : index
    %c0_43 = arith.constant 0 : index
    %c0_44 = arith.constant 0 : index
    %45 = vector.load %arg0[%c2_42, %c0_43, %c0_44] : memref<9x32x128xbf16, #tpu.memory_space<vmem>>, vector<1x32x128xbf16>
    %46 = vector.shape_cast %45 : vector<1x32x128xbf16> to vector<32x128xbf16>
    %c1_45 = arith.constant 1 : index
    %c1_46 = arith.constant 1 : index
    %c0_47 = arith.constant 0 : index
    %c0_48 = arith.constant 0 : index
    %47 = vector.load %arg1[%c1_45, %c1_46, %c0_47, %c0_48] : memref<4x4x128x128xbf16, #tpu.memory_space<vmem>>, vector<1x1x128x128xbf16>
    %48 = vector.shape_cast %47 : vector<1x1x128x128xbf16> to vector<128x128xbf16>
    %cst_49 = arith.constant dense<0.000000e+00> : vector<32x128xf32>
    %49 = tpu.matmul %46, %48, %cst_49 {dimension_numbers = #tpu.dot_dimension_numbers<[1], [0], [0], [1], [0, 0, 1, 1], [], []>} : vector<32x128xbf16>, vector<128x128xbf16>, vector<32x128xf32> -> vector<32x128xf32>
    %50 = arith.addf %44, %49 : vector<32x128xf32>
    %c4_50 = arith.constant 4 : index
    %c0_51 = arith.constant 0 : index
    %c0_52 = arith.constant 0 : index
    %51 = vector.load %arg0[%c4_50, %c0_51, %c0_52] : memref<9x32x128xbf16, #tpu.memory_space<vmem>>, vector<1x32x128xbf16>
    %52 = vector.shape_cast %51 : vector<1x32x128xbf16> to vector<32x128xbf16>
    %c1_53 = arith.constant 1 : index
    %c2_54 = arith.constant 2 : index
    %c0_55 = arith.constant 0 : index
    %c0_56 = arith.constant 0 : index
    %53 = vector.load %arg1[%c1_53, %c2_54, %c0_55, %c0_56] : memref<4x4x128x128xbf16, #tpu.memory_space<vmem>>, vector<1x1x128x128xbf16>
    %54 = vector.shape_cast %53 : vector<1x1x128x128xbf16> to vector<128x128xbf16>
    %cst_57 = arith.constant dense<0.000000e+00> : vector<32x128xf32>
    %55 = tpu.matmul %52, %54, %cst_57 {dimension_numbers = #tpu.dot_dimension_numbers<[1], [0], [0], [1], [0, 0, 1, 1], [], []>} : vector<32x128xbf16>, vector<128x128xbf16>, vector<32x128xf32> -> vector<32x128xf32>
    %56 = arith.addf %50, %55 : vector<32x128xf32>
    %c5 = arith.constant 5 : index
    %c0_58 = arith.constant 0 : index
    %c0_59 = arith.constant 0 : index
    %57 = vector.load %arg0[%c5, %c0_58, %c0_59] : memref<9x32x128xbf16, #tpu.memory_space<vmem>>, vector<1x32x128xbf16>
    %58 = vector.shape_cast %57 : vector<1x32x128xbf16> to vector<32x128xbf16>
    %c1_60 = arith.constant 1 : index
    %c3_61 = arith.constant 3 : index
    %c0_62 = arith.constant 0 : index
    %c0_63 = arith.constant 0 : index
    %59 = vector.load %arg1[%c1_60, %c3_61, %c0_62, %c0_63] : memref<4x4x128x128xbf16, #tpu.memory_space<vmem>>, vector<1x1x128x128xbf16>
    %60 = vector.shape_cast %59 : vector<1x1x128x128xbf16> to vector<128x128xbf16>
    %cst_64 = arith.constant dense<0.000000e+00> : vector<32x128xf32>
    %61 = tpu.matmul %58, %60, %cst_64 {dimension_numbers = #tpu.dot_dimension_numbers<[1], [0], [0], [1], [0, 0, 1, 1], [], []>} : vector<32x128xbf16>, vector<128x128xbf16>, vector<32x128xf32> -> vector<32x128xf32>
    %62 = arith.addf %56, %61 : vector<32x128xf32>
    %c0_65 = arith.constant 0 : index
    %c0_66 = arith.constant 0 : index
    %63 = vector.load %arg2[%c0_65, %c0_66] : memref<1x128xf32, #tpu.memory_space<vmem>>, vector<1x128xf32>
    %64 = vector.broadcast %63 : vector<1x128xf32> to vector<32x128xf32>
    %65 = arith.addf %62, %64 : vector<32x128xf32>
    %66 = arith.negf %65 : vector<32x128xf32>
    %67 = math.exp %66 : vector<32x128xf32>
    %cst_67 = arith.constant 1.000000e+00 : f32
    %68 = vector.broadcast %cst_67 : f32 to vector<32x128xf32>
    %69 = arith.addf %68, %67 : vector<32x128xf32>
    %70 = arith.divf %68, %69 : vector<32x128xf32>
    %71 = arith.mulf %65, %70 : vector<32x128xf32>
    %72 = arith.truncf %71 : vector<32x128xf32> to vector<32x128xbf16>
    %c1_68 = arith.constant 1 : index
    %c0_69 = arith.constant 0 : index
    %c0_70 = arith.constant 0 : index
    %73 = vector.load %arg3[%c1_68, %c0_69, %c0_70] : memref<4x32x128xbf16, #tpu.memory_space<vmem>>, vector<1x32x128xbf16>
    %74 = vector.shape_cast %73 : vector<1x32x128xbf16> to vector<32x128xbf16>
    %75 = vector.shape_cast %72 : vector<32x128xbf16> to vector<1x32x128xbf16>
    tpu.vector_store %arg3[%c1_68, %c0_69, %c0_70], %75 {strides = array<i32>} : memref<4x32x128xbf16, #tpu.memory_space<vmem>>, vector<1x32x128xbf16>,
    %cst_71 = arith.constant 0.000000e+00 : f32
    %76 = vector.broadcast %cst_71 : f32 to vector<32x128xf32>
    %c3_72 = arith.constant 3 : index
    %c0_73 = arith.constant 0 : index
    %c0_74 = arith.constant 0 : index
    %77 = vector.load %arg0[%c3_72, %c0_73, %c0_74] : memref<9x32x128xbf16, #tpu.memory_space<vmem>>, vector<1x32x128xbf16>
    %78 = vector.shape_cast %77 : vector<1x32x128xbf16> to vector<32x128xbf16>
    %c2_75 = arith.constant 2 : index
    %c0_76 = arith.constant 0 : index
    %c0_77 = arith.constant 0 : index
    %c0_78 = arith.constant 0 : index
    %79 = vector.load %arg1[%c2_75, %c0_76, %c0_77, %c0_78] : memref<4x4x128x128xbf16, #tpu.memory_space<vmem>>, vector<1x1x128x128xbf16>
    %80 = vector.shape_cast %79 : vector<1x1x128x128xbf16> to vector<128x128xbf16>
    %cst_79 = arith.constant dense<0.000000e+00> : vector<32x128xf32>
    %81 = tpu.matmul %78, %80, %cst_79 {dimension_numbers = #tpu.dot_dimension_numbers<[1], [0], [0], [1], [0, 0, 1, 1], [], []>} : vector<32x128xbf16>, vector<128x128xbf16>, vector<32x128xf32> -> vector<32x128xf32>
    %82 = arith.addf %76, %81 : vector<32x128xf32>
    %c4_80 = arith.constant 4 : index
    %c0_81 = arith.constant 0 : index
    %c0_82 = arith.constant 0 : index
    %83 = vector.load %arg0[%c4_80, %c0_81, %c0_82] : memref<9x32x128xbf16, #tpu.memory_space<vmem>>, vector<1x32x128xbf16>
    %84 = vector.shape_cast %83 : vector<1x32x128xbf16> to vector<32x128xbf16>
    %c2_83 = arith.constant 2 : index
    %c1_84 = arith.constant 1 : index
    %c0_85 = arith.constant 0 : index
    %c0_86 = arith.constant 0 : index
    %85 = vector.load %arg1[%c2_83, %c1_84, %c0_85, %c0_86] : memref<4x4x128x128xbf16, #tpu.memory_space<vmem>>, vector<1x1x128x128xbf16>
    %86 = vector.shape_cast %85 : vector<1x1x128x128xbf16> to vector<128x128xbf16>
    %cst_87 = arith.constant dense<0.000000e+00> : vector<32x128xf32>
    %87 = tpu.matmul %84, %86, %cst_87 {dimension_numbers = #tpu.dot_dimension_numbers<[1], [0], [0], [1], [0, 0, 1, 1], [], []>} : vector<32x128xbf16>, vector<128x128xbf16>, vector<32x128xf32> -> vector<32x128xf32>
    %88 = arith.addf %82, %87 : vector<32x128xf32>
    %c6 = arith.constant 6 : index
    %c0_88 = arith.constant 0 : index
    %c0_89 = arith.constant 0 : index
    %89 = vector.load %arg0[%c6, %c0_88, %c0_89] : memref<9x32x128xbf16, #tpu.memory_space<vmem>>, vector<1x32x128xbf16>
    %90 = vector.shape_cast %89 : vector<1x32x128xbf16> to vector<32x128xbf16>
    %c2_90 = arith.constant 2 : index
    %c2_91 = arith.constant 2 : index
    %c0_92 = arith.constant 0 : index
    %c0_93 = arith.constant 0 : index
    %91 = vector.load %arg1[%c2_90, %c2_91, %c0_92, %c0_93] : memref<4x4x128x128xbf16, #tpu.memory_space<vmem>>, vector<1x1x128x128xbf16>
    %92 = vector.shape_cast %91 : vector<1x1x128x128xbf16> to vector<128x128xbf16>
    %cst_94 = arith.constant dense<0.000000e+00> : vector<32x128xf32>
    %93 = tpu.matmul %90, %92, %cst_94 {dimension_numbers = #tpu.dot_dimension_numbers<[1], [0], [0], [1], [0, 0, 1, 1], [], []>} : vector<32x128xbf16>, vector<128x128xbf16>, vector<32x128xf32> -> vector<32x128xf32>
    %94 = arith.addf %88, %93 : vector<32x128xf32>
    %c7 = arith.constant 7 : index
    %c0_95 = arith.constant 0 : index
    %c0_96 = arith.constant 0 : index
    %95 = vector.load %arg0[%c7, %c0_95, %c0_96] : memref<9x32x128xbf16, #tpu.memory_space<vmem>>, vector<1x32x128xbf16>
    %96 = vector.shape_cast %95 : vector<1x32x128xbf16> to vector<32x128xbf16>
    %c2_97 = arith.constant 2 : index
    %c3_98 = arith.constant 3 : index
    %c0_99 = arith.constant 0 : index
    %c0_100 = arith.constant 0 : index
    %97 = vector.load %arg1[%c2_97, %c3_98, %c0_99, %c0_100] : memref<4x4x128x128xbf16, #tpu.memory_space<vmem>>, vector<1x1x128x128xbf16>
    %98 = vector.shape_cast %97 : vector<1x1x128x128xbf16> to vector<128x128xbf16>
    %cst_101 = arith.constant dense<0.000000e+00> : vector<32x128xf32>
    %99 = tpu.matmul %96, %98, %cst_101 {dimension_numbers = #tpu.dot_dimension_numbers<[1], [0], [0], [1], [0, 0, 1, 1], [], []>} : vector<32x128xbf16>, vector<128x128xbf16>, vector<32x128xf32> -> vector<32x128xf32>
    %100 = arith.addf %94, %99 : vector<32x128xf32>
    %c0_102 = arith.constant 0 : index
    %c0_103 = arith.constant 0 : index
    %101 = vector.load %arg2[%c0_102, %c0_103] : memref<1x128xf32, #tpu.memory_space<vmem>>, vector<1x128xf32>
    %102 = vector.broadcast %101 : vector<1x128xf32> to vector<32x128xf32>
    %103 = arith.addf %100, %102 : vector<32x128xf32>
    %104 = arith.negf %103 : vector<32x128xf32>
    %105 = math.exp %104 : vector<32x128xf32>
    %cst_104 = arith.constant 1.000000e+00 : f32
    %106 = vector.broadcast %cst_104 : f32 to vector<32x128xf32>
    %107 = arith.addf %106, %105 : vector<32x128xf32>
    %108 = arith.divf %106, %107 : vector<32x128xf32>
    %109 = arith.mulf %103, %108 : vector<32x128xf32>
    %110 = arith.truncf %109 : vector<32x128xf32> to vector<32x128xbf16>
    %c2_105 = arith.constant 2 : index
    %c0_106 = arith.constant 0 : index
    %c0_107 = arith.constant 0 : index
    %111 = vector.load %arg3[%c2_105, %c0_106, %c0_107] : memref<4x32x128xbf16, #tpu.memory_space<vmem>>, vector<1x32x128xbf16>
    %112 = vector.shape_cast %111 : vector<1x32x128xbf16> to vector<32x128xbf16>
    %113 = vector.shape_cast %110 : vector<32x128xbf16> to vector<1x32x128xbf16>
    tpu.vector_store %arg3[%c2_105, %c0_106, %c0_107], %113 {strides = array<i32>} : memref<4x32x128xbf16, #tpu.memory_space<vmem>>, vector<1x32x128xbf16>,
    %cst_108 = arith.constant 0.000000e+00 : f32
    %114 = vector.broadcast %cst_108 : f32 to vector<32x128xf32>
    %c4_109 = arith.constant 4 : index
    %c0_110 = arith.constant 0 : index
    %c0_111 = arith.constant 0 : index
    %115 = vector.load %arg0[%c4_109, %c0_110, %c0_111] : memref<9x32x128xbf16, #tpu.memory_space<vmem>>, vector<1x32x128xbf16>
    %116 = vector.shape_cast %115 : vector<1x32x128xbf16> to vector<32x128xbf16>
    %c3_112 = arith.constant 3 : index
    %c0_113 = arith.constant 0 : index
    %c0_114 = arith.constant 0 : index
    %c0_115 = arith.constant 0 : index
    %117 = vector.load %arg1[%c3_112, %c0_113, %c0_114, %c0_115] : memref<4x4x128x128xbf16, #tpu.memory_space<vmem>>, vector<1x1x128x128xbf16>
    %118 = vector.shape_cast %117 : vector<1x1x128x128xbf16> to vector<128x128xbf16>
    %cst_116 = arith.constant dense<0.000000e+00> : vector<32x128xf32>
    %119 = tpu.matmul %116, %118, %cst_116 {dimension_numbers = #tpu.dot_dimension_numbers<[1], [0], [0], [1], [0, 0, 1, 1], [], []>} : vector<32x128xbf16>, vector<128x128xbf16>, vector<32x128xf32> -> vector<32x128xf32>
    %120 = arith.addf %114, %119 : vector<32x128xf32>
    %c5_117 = arith.constant 5 : index
    %c0_118 = arith.constant 0 : index
    %c0_119 = arith.constant 0 : index
    %121 = vector.load %arg0[%c5_117, %c0_118, %c0_119] : memref<9x32x128xbf16, #tpu.memory_space<vmem>>, vector<1x32x128xbf16>
    %122 = vector.shape_cast %121 : vector<1x32x128xbf16> to vector<32x128xbf16>
    %c3_120 = arith.constant 3 : index
    %c1_121 = arith.constant 1 : index
    %c0_122 = arith.constant 0 : index
    %c0_123 = arith.constant 0 : index
    %123 = vector.load %arg1[%c3_120, %c1_121, %c0_122, %c0_123] : memref<4x4x128x128xbf16, #tpu.memory_space<vmem>>, vector<1x1x128x128xbf16>
    %124 = vector.shape_cast %123 : vector<1x1x128x128xbf16> to vector<128x128xbf16>
    %cst_124 = arith.constant dense<0.000000e+00> : vector<32x128xf32>
    %125 = tpu.matmul %122, %124, %cst_124 {dimension_numbers = #tpu.dot_dimension_numbers<[1], [0], [0], [1], [0, 0, 1, 1], [], []>} : vector<32x128xbf16>, vector<128x128xbf16>, vector<32x128xf32> -> vector<32x128xf32>
    %126 = arith.addf %120, %125 : vector<32x128xf32>
    %c7_125 = arith.constant 7 : index
    %c0_126 = arith.constant 0 : index
    %c0_127 = arith.constant 0 : index
    %127 = vector.load %arg0[%c7_125, %c0_126, %c0_127] : memref<9x32x128xbf16, #tpu.memory_space<vmem>>, vector<1x32x128xbf16>
    %128 = vector.shape_cast %127 : vector<1x32x128xbf16> to vector<32x128xbf16>
    %c3_128 = arith.constant 3 : index
    %c2_129 = arith.constant 2 : index
    %c0_130 = arith.constant 0 : index
    %c0_131 = arith.constant 0 : index
    %129 = vector.load %arg1[%c3_128, %c2_129, %c0_130, %c0_131] : memref<4x4x128x128xbf16, #tpu.memory_space<vmem>>, vector<1x1x128x128xbf16>
    %130 = vector.shape_cast %129 : vector<1x1x128x128xbf16> to vector<128x128xbf16>
    %cst_132 = arith.constant dense<0.000000e+00> : vector<32x128xf32>
    %131 = tpu.matmul %128, %130, %cst_132 {dimension_numbers = #tpu.dot_dimension_numbers<[1], [0], [0], [1], [0, 0, 1, 1], [], []>} : vector<32x128xbf16>, vector<128x128xbf16>, vector<32x128xf32> -> vector<32x128xf32>
    %132 = arith.addf %126, %131 : vector<32x128xf32>
    %c8 = arith.constant 8 : index
    %c0_133 = arith.constant 0 : index
    %c0_134 = arith.constant 0 : index
    %133 = vector.load %arg0[%c8, %c0_133, %c0_134] : memref<9x32x128xbf16, #tpu.memory_space<vmem>>, vector<1x32x128xbf16>
    %134 = vector.shape_cast %133 : vector<1x32x128xbf16> to vector<32x128xbf16>
    %c3_135 = arith.constant 3 : index
    %c3_136 = arith.constant 3 : index
    %c0_137 = arith.constant 0 : index
    %c0_138 = arith.constant 0 : index
    %135 = vector.load %arg1[%c3_135, %c3_136, %c0_137, %c0_138] : memref<4x4x128x128xbf16, #tpu.memory_space<vmem>>, vector<1x1x128x128xbf16>
    %136 = vector.shape_cast %135 : vector<1x1x128x128xbf16> to vector<128x128xbf16>
    %cst_139 = arith.constant dense<0.000000e+00> : vector<32x128xf32>
    %137 = tpu.matmul %134, %136, %cst_139 {dimension_numbers = #tpu.dot_dimension_numbers<[1], [0], [0], [1], [0, 0, 1, 1], [], []>} : vector<32x128xbf16>, vector<128x128xbf16>, vector<32x128xf32> -> vector<32x128xf32>
    %138 = arith.addf %132, %137 : vector<32x128xf32>
    %c0_140 = arith.constant 0 : index
    %c0_141 = arith.constant 0 : index
    %139 = vector.load %arg2[%c0_140, %c0_141] : memref<1x128xf32, #tpu.memory_space<vmem>>, vector<1x128xf32>
    %140 = vector.broadcast %139 : vector<1x128xf32> to vector<32x128xf32>
    %141 = arith.addf %138, %140 : vector<32x128xf32>
    %142 = arith.negf %141 : vector<32x128xf32>
    %143 = math.exp %142 : vector<32x128xf32>
    %cst_142 = arith.constant 1.000000e+00 : f32
    %144 = vector.broadcast %cst_142 : f32 to vector<32x128xf32>
    %145 = arith.addf %144, %143 : vector<32x128xf32>
    %146 = arith.divf %144, %145 : vector<32x128xf32>
    %147 = arith.mulf %141, %146 : vector<32x128xf32>
    %148 = arith.truncf %147 : vector<32x128xf32> to vector<32x128xbf16>
    %c3_143 = arith.constant 3 : index
    %c0_144 = arith.constant 0 : index
    %c0_145 = arith.constant 0 : index
    %149 = vector.load %arg3[%c3_143, %c0_144, %c0_145] : memref<4x32x128xbf16, #tpu.memory_space<vmem>>, vector<1x32x128xbf16>
    %150 = vector.shape_cast %149 : vector<1x32x128xbf16> to vector<32x128xbf16>
    %151 = vector.shape_cast %148 : vector<32x128xbf16> to vector<1x32x128xbf16>
    tpu.vector_store %arg3[%c3_143, %c0_144, %c0_145], %151 {strides = array<i32>} : memref<4x32x128xbf16, #tpu.memory_space<vmem>>, vector<1x32x128xbf16>,
    return
  }
}

module attributes {stable_mosaic.version = 11 : i64} {
  func.func @_upconv_kernel(%arg0: memref<9x128x128xbf16, #tpu.memory_space<vmem>>, %arg1: memref<4x4x128x128xbf16, #tpu.memory_space<vmem>>, %arg2: memref<1x128xf32, #tpu.memory_space<vmem>>, %arg3: memref<4x128x128xbf16, #tpu.memory_space<vmem>>) attributes {dimension_semantics = [], scalar_prefetch = 0 : i64, scratch_operands = 0 : i64, tpu.core_type = #tpu.core_type<tc>} {
    %cst = arith.constant 0.000000e+00 : f32
    %0 = vector.broadcast %cst : f32 to vector<128x128xf32>
    %c0 = arith.constant 0 : index
    %c0_0 = arith.constant 0 : index
    %c0_1 = arith.constant 0 : index
    %1 = vector.load %arg0[%c0, %c0_0, %c0_1] : memref<9x128x128xbf16, #tpu.memory_space<vmem>>, vector<1x128x128xbf16>
    %2 = vector.shape_cast %1 : vector<1x128x128xbf16> to vector<128x128xbf16>
    %c0_2 = arith.constant 0 : index
    %c0_3 = arith.constant 0 : index
    %c0_4 = arith.constant 0 : index
    %c0_5 = arith.constant 0 : index
    %3 = vector.load %arg1[%c0_2, %c0_3, %c0_4, %c0_5] : memref<4x4x128x128xbf16, #tpu.memory_space<vmem>>, vector<1x1x128x128xbf16>
    %4 = vector.shape_cast %3 : vector<1x1x128x128xbf16> to vector<128x128xbf16>
    %cst_6 = arith.constant dense<0.000000e+00> : vector<128x128xf32>
    %5 = tpu.matmul %2, %4, %cst_6 {dimension_numbers = #tpu.dot_dimension_numbers<[1], [0], [0], [1], [0, 0, 1, 1], [], []>} : vector<128x128xbf16>, vector<128x128xbf16>, vector<128x128xf32> -> vector<128x128xf32>
    %6 = arith.addf %0, %5 : vector<128x128xf32>
    %c1 = arith.constant 1 : index
    %c0_7 = arith.constant 0 : index
    %c0_8 = arith.constant 0 : index
    %7 = vector.load %arg0[%c1, %c0_7, %c0_8] : memref<9x128x128xbf16, #tpu.memory_space<vmem>>, vector<1x128x128xbf16>
    %8 = vector.shape_cast %7 : vector<1x128x128xbf16> to vector<128x128xbf16>
    %c0_9 = arith.constant 0 : index
    %c1_10 = arith.constant 1 : index
    %c0_11 = arith.constant 0 : index
    %c0_12 = arith.constant 0 : index
    %9 = vector.load %arg1[%c0_9, %c1_10, %c0_11, %c0_12] : memref<4x4x128x128xbf16, #tpu.memory_space<vmem>>, vector<1x1x128x128xbf16>
    %10 = vector.shape_cast %9 : vector<1x1x128x128xbf16> to vector<128x128xbf16>
    %cst_13 = arith.constant dense<0.000000e+00> : vector<128x128xf32>
    %11 = tpu.matmul %8, %10, %cst_13 {dimension_numbers = #tpu.dot_dimension_numbers<[1], [0], [0], [1], [0, 0, 1, 1], [], []>} : vector<128x128xbf16>, vector<128x128xbf16>, vector<128x128xf32> -> vector<128x128xf32>
    %12 = arith.addf %6, %11 : vector<128x128xf32>
    %c3 = arith.constant 3 : index
    %c0_14 = arith.constant 0 : index
    %c0_15 = arith.constant 0 : index
    %13 = vector.load %arg0[%c3, %c0_14, %c0_15] : memref<9x128x128xbf16, #tpu.memory_space<vmem>>, vector<1x128x128xbf16>
    %14 = vector.shape_cast %13 : vector<1x128x128xbf16> to vector<128x128xbf16>
    %c0_16 = arith.constant 0 : index
    %c2 = arith.constant 2 : index
    %c0_17 = arith.constant 0 : index
    %c0_18 = arith.constant 0 : index
    %15 = vector.load %arg1[%c0_16, %c2, %c0_17, %c0_18] : memref<4x4x128x128xbf16, #tpu.memory_space<vmem>>, vector<1x1x128x128xbf16>
    %16 = vector.shape_cast %15 : vector<1x1x128x128xbf16> to vector<128x128xbf16>
    %cst_19 = arith.constant dense<0.000000e+00> : vector<128x128xf32>
    %17 = tpu.matmul %14, %16, %cst_19 {dimension_numbers = #tpu.dot_dimension_numbers<[1], [0], [0], [1], [0, 0, 1, 1], [], []>} : vector<128x128xbf16>, vector<128x128xbf16>, vector<128x128xf32> -> vector<128x128xf32>
    %18 = arith.addf %12, %17 : vector<128x128xf32>
    %c4 = arith.constant 4 : index
    %c0_20 = arith.constant 0 : index
    %c0_21 = arith.constant 0 : index
    %19 = vector.load %arg0[%c4, %c0_20, %c0_21] : memref<9x128x128xbf16, #tpu.memory_space<vmem>>, vector<1x128x128xbf16>
    %20 = vector.shape_cast %19 : vector<1x128x128xbf16> to vector<128x128xbf16>
    %c0_22 = arith.constant 0 : index
    %c3_23 = arith.constant 3 : index
    %c0_24 = arith.constant 0 : index
    %c0_25 = arith.constant 0 : index
    %21 = vector.load %arg1[%c0_22, %c3_23, %c0_24, %c0_25] : memref<4x4x128x128xbf16, #tpu.memory_space<vmem>>, vector<1x1x128x128xbf16>
    %22 = vector.shape_cast %21 : vector<1x1x128x128xbf16> to vector<128x128xbf16>
    %cst_26 = arith.constant dense<0.000000e+00> : vector<128x128xf32>
    %23 = tpu.matmul %20, %22, %cst_26 {dimension_numbers = #tpu.dot_dimension_numbers<[1], [0], [0], [1], [0, 0, 1, 1], [], []>} : vector<128x128xbf16>, vector<128x128xbf16>, vector<128x128xf32> -> vector<128x128xf32>
    %24 = arith.addf %18, %23 : vector<128x128xf32>
    %c0_27 = arith.constant 0 : index
    %c0_28 = arith.constant 0 : index
    %25 = vector.load %arg2[%c0_27, %c0_28] : memref<1x128xf32, #tpu.memory_space<vmem>>, vector<1x128xf32>
    %26 = vector.broadcast %25 : vector<1x128xf32> to vector<128x128xf32>
    %27 = arith.addf %24, %26 : vector<128x128xf32>
    %28 = arith.negf %27 : vector<128x128xf32>
    %29 = math.exp %28 : vector<128x128xf32>
    %cst_29 = arith.constant 1.000000e+00 : f32
    %30 = vector.broadcast %cst_29 : f32 to vector<128x128xf32>
    %31 = arith.addf %30, %29 : vector<128x128xf32>
    %32 = arith.divf %30, %31 : vector<128x128xf32>
    %33 = arith.mulf %27, %32 : vector<128x128xf32>
    %34 = arith.truncf %33 : vector<128x128xf32> to vector<128x128xbf16>
    %c0_30 = arith.constant 0 : index
    %c0_31 = arith.constant 0 : index
    %c0_32 = arith.constant 0 : index
    %35 = vector.load %arg3[%c0_30, %c0_31, %c0_32] : memref<4x128x128xbf16, #tpu.memory_space<vmem>>, vector<1x128x128xbf16>
    %36 = vector.shape_cast %35 : vector<1x128x128xbf16> to vector<128x128xbf16>
    %37 = vector.shape_cast %34 : vector<128x128xbf16> to vector<1x128x128xbf16>
    tpu.vector_store %arg3[%c0_30, %c0_31, %c0_32], %37 {strides = array<i32>} : memref<4x128x128xbf16, #tpu.memory_space<vmem>>, vector<1x128x128xbf16>,
    %cst_33 = arith.constant 0.000000e+00 : f32
    %38 = vector.broadcast %cst_33 : f32 to vector<128x128xf32>
    %c1_34 = arith.constant 1 : index
    %c0_35 = arith.constant 0 : index
    %c0_36 = arith.constant 0 : index
    %39 = vector.load %arg0[%c1_34, %c0_35, %c0_36] : memref<9x128x128xbf16, #tpu.memory_space<vmem>>, vector<1x128x128xbf16>
    %40 = vector.shape_cast %39 : vector<1x128x128xbf16> to vector<128x128xbf16>
    %c1_37 = arith.constant 1 : index
    %c0_38 = arith.constant 0 : index
    %c0_39 = arith.constant 0 : index
    %c0_40 = arith.constant 0 : index
    %41 = vector.load %arg1[%c1_37, %c0_38, %c0_39, %c0_40] : memref<4x4x128x128xbf16, #tpu.memory_space<vmem>>, vector<1x1x128x128xbf16>
    %42 = vector.shape_cast %41 : vector<1x1x128x128xbf16> to vector<128x128xbf16>
    %cst_41 = arith.constant dense<0.000000e+00> : vector<128x128xf32>
    %43 = tpu.matmul %40, %42, %cst_41 {dimension_numbers = #tpu.dot_dimension_numbers<[1], [0], [0], [1], [0, 0, 1, 1], [], []>} : vector<128x128xbf16>, vector<128x128xbf16>, vector<128x128xf32> -> vector<128x128xf32>
    %44 = arith.addf %38, %43 : vector<128x128xf32>
    %c2_42 = arith.constant 2 : index
    %c0_43 = arith.constant 0 : index
    %c0_44 = arith.constant 0 : index
    %45 = vector.load %arg0[%c2_42, %c0_43, %c0_44] : memref<9x128x128xbf16, #tpu.memory_space<vmem>>, vector<1x128x128xbf16>
    %46 = vector.shape_cast %45 : vector<1x128x128xbf16> to vector<128x128xbf16>
    %c1_45 = arith.constant 1 : index
    %c1_46 = arith.constant 1 : index
    %c0_47 = arith.constant 0 : index
    %c0_48 = arith.constant 0 : index
    %47 = vector.load %arg1[%c1_45, %c1_46, %c0_47, %c0_48] : memref<4x4x128x128xbf16, #tpu.memory_space<vmem>>, vector<1x1x128x128xbf16>
    %48 = vector.shape_cast %47 : vector<1x1x128x128xbf16> to vector<128x128xbf16>
    %cst_49 = arith.constant dense<0.000000e+00> : vector<128x128xf32>
    %49 = tpu.matmul %46, %48, %cst_49 {dimension_numbers = #tpu.dot_dimension_numbers<[1], [0], [0], [1], [0, 0, 1, 1], [], []>} : vector<128x128xbf16>, vector<128x128xbf16>, vector<128x128xf32> -> vector<128x128xf32>
    %50 = arith.addf %44, %49 : vector<128x128xf32>
    %c4_50 = arith.constant 4 : index
    %c0_51 = arith.constant 0 : index
    %c0_52 = arith.constant 0 : index
    %51 = vector.load %arg0[%c4_50, %c0_51, %c0_52] : memref<9x128x128xbf16, #tpu.memory_space<vmem>>, vector<1x128x128xbf16>
    %52 = vector.shape_cast %51 : vector<1x128x128xbf16> to vector<128x128xbf16>
    %c1_53 = arith.constant 1 : index
    %c2_54 = arith.constant 2 : index
    %c0_55 = arith.constant 0 : index
    %c0_56 = arith.constant 0 : index
    %53 = vector.load %arg1[%c1_53, %c2_54, %c0_55, %c0_56] : memref<4x4x128x128xbf16, #tpu.memory_space<vmem>>, vector<1x1x128x128xbf16>
    %54 = vector.shape_cast %53 : vector<1x1x128x128xbf16> to vector<128x128xbf16>
    %cst_57 = arith.constant dense<0.000000e+00> : vector<128x128xf32>
    %55 = tpu.matmul %52, %54, %cst_57 {dimension_numbers = #tpu.dot_dimension_numbers<[1], [0], [0], [1], [0, 0, 1, 1], [], []>} : vector<128x128xbf16>, vector<128x128xbf16>, vector<128x128xf32> -> vector<128x128xf32>
    %56 = arith.addf %50, %55 : vector<128x128xf32>
    %c5 = arith.constant 5 : index
    %c0_58 = arith.constant 0 : index
    %c0_59 = arith.constant 0 : index
    %57 = vector.load %arg0[%c5, %c0_58, %c0_59] : memref<9x128x128xbf16, #tpu.memory_space<vmem>>, vector<1x128x128xbf16>
    %58 = vector.shape_cast %57 : vector<1x128x128xbf16> to vector<128x128xbf16>
    %c1_60 = arith.constant 1 : index
    %c3_61 = arith.constant 3 : index
    %c0_62 = arith.constant 0 : index
    %c0_63 = arith.constant 0 : index
    %59 = vector.load %arg1[%c1_60, %c3_61, %c0_62, %c0_63] : memref<4x4x128x128xbf16, #tpu.memory_space<vmem>>, vector<1x1x128x128xbf16>
    %60 = vector.shape_cast %59 : vector<1x1x128x128xbf16> to vector<128x128xbf16>
    %cst_64 = arith.constant dense<0.000000e+00> : vector<128x128xf32>
    %61 = tpu.matmul %58, %60, %cst_64 {dimension_numbers = #tpu.dot_dimension_numbers<[1], [0], [0], [1], [0, 0, 1, 1], [], []>} : vector<128x128xbf16>, vector<128x128xbf16>, vector<128x128xf32> -> vector<128x128xf32>
    %62 = arith.addf %56, %61 : vector<128x128xf32>
    %c0_65 = arith.constant 0 : index
    %c0_66 = arith.constant 0 : index
    %63 = vector.load %arg2[%c0_65, %c0_66] : memref<1x128xf32, #tpu.memory_space<vmem>>, vector<1x128xf32>
    %64 = vector.broadcast %63 : vector<1x128xf32> to vector<128x128xf32>
    %65 = arith.addf %62, %64 : vector<128x128xf32>
    %66 = arith.negf %65 : vector<128x128xf32>
    %67 = math.exp %66 : vector<128x128xf32>
    %cst_67 = arith.constant 1.000000e+00 : f32
    %68 = vector.broadcast %cst_67 : f32 to vector<128x128xf32>
    %69 = arith.addf %68, %67 : vector<128x128xf32>
    %70 = arith.divf %68, %69 : vector<128x128xf32>
    %71 = arith.mulf %65, %70 : vector<128x128xf32>
    %72 = arith.truncf %71 : vector<128x128xf32> to vector<128x128xbf16>
    %c1_68 = arith.constant 1 : index
    %c0_69 = arith.constant 0 : index
    %c0_70 = arith.constant 0 : index
    %73 = vector.load %arg3[%c1_68, %c0_69, %c0_70] : memref<4x128x128xbf16, #tpu.memory_space<vmem>>, vector<1x128x128xbf16>
    %74 = vector.shape_cast %73 : vector<1x128x128xbf16> to vector<128x128xbf16>
    %75 = vector.shape_cast %72 : vector<128x128xbf16> to vector<1x128x128xbf16>
    tpu.vector_store %arg3[%c1_68, %c0_69, %c0_70], %75 {strides = array<i32>} : memref<4x128x128xbf16, #tpu.memory_space<vmem>>, vector<1x128x128xbf16>,
    %cst_71 = arith.constant 0.000000e+00 : f32
    %76 = vector.broadcast %cst_71 : f32 to vector<128x128xf32>
    %c3_72 = arith.constant 3 : index
    %c0_73 = arith.constant 0 : index
    %c0_74 = arith.constant 0 : index
    %77 = vector.load %arg0[%c3_72, %c0_73, %c0_74] : memref<9x128x128xbf16, #tpu.memory_space<vmem>>, vector<1x128x128xbf16>
    %78 = vector.shape_cast %77 : vector<1x128x128xbf16> to vector<128x128xbf16>
    %c2_75 = arith.constant 2 : index
    %c0_76 = arith.constant 0 : index
    %c0_77 = arith.constant 0 : index
    %c0_78 = arith.constant 0 : index
    %79 = vector.load %arg1[%c2_75, %c0_76, %c0_77, %c0_78] : memref<4x4x128x128xbf16, #tpu.memory_space<vmem>>, vector<1x1x128x128xbf16>
    %80 = vector.shape_cast %79 : vector<1x1x128x128xbf16> to vector<128x128xbf16>
    %cst_79 = arith.constant dense<0.000000e+00> : vector<128x128xf32>
    %81 = tpu.matmul %78, %80, %cst_79 {dimension_numbers = #tpu.dot_dimension_numbers<[1], [0], [0], [1], [0, 0, 1, 1], [], []>} : vector<128x128xbf16>, vector<128x128xbf16>, vector<128x128xf32> -> vector<128x128xf32>
    %82 = arith.addf %76, %81 : vector<128x128xf32>
    %c4_80 = arith.constant 4 : index
    %c0_81 = arith.constant 0 : index
    %c0_82 = arith.constant 0 : index
    %83 = vector.load %arg0[%c4_80, %c0_81, %c0_82] : memref<9x128x128xbf16, #tpu.memory_space<vmem>>, vector<1x128x128xbf16>
    %84 = vector.shape_cast %83 : vector<1x128x128xbf16> to vector<128x128xbf16>
    %c2_83 = arith.constant 2 : index
    %c1_84 = arith.constant 1 : index
    %c0_85 = arith.constant 0 : index
    %c0_86 = arith.constant 0 : index
    %85 = vector.load %arg1[%c2_83, %c1_84, %c0_85, %c0_86] : memref<4x4x128x128xbf16, #tpu.memory_space<vmem>>, vector<1x1x128x128xbf16>
    %86 = vector.shape_cast %85 : vector<1x1x128x128xbf16> to vector<128x128xbf16>
    %cst_87 = arith.constant dense<0.000000e+00> : vector<128x128xf32>
    %87 = tpu.matmul %84, %86, %cst_87 {dimension_numbers = #tpu.dot_dimension_numbers<[1], [0], [0], [1], [0, 0, 1, 1], [], []>} : vector<128x128xbf16>, vector<128x128xbf16>, vector<128x128xf32> -> vector<128x128xf32>
    %88 = arith.addf %82, %87 : vector<128x128xf32>
    %c6 = arith.constant 6 : index
    %c0_88 = arith.constant 0 : index
    %c0_89 = arith.constant 0 : index
    %89 = vector.load %arg0[%c6, %c0_88, %c0_89] : memref<9x128x128xbf16, #tpu.memory_space<vmem>>, vector<1x128x128xbf16>
    %90 = vector.shape_cast %89 : vector<1x128x128xbf16> to vector<128x128xbf16>
    %c2_90 = arith.constant 2 : index
    %c2_91 = arith.constant 2 : index
    %c0_92 = arith.constant 0 : index
    %c0_93 = arith.constant 0 : index
    %91 = vector.load %arg1[%c2_90, %c2_91, %c0_92, %c0_93] : memref<4x4x128x128xbf16, #tpu.memory_space<vmem>>, vector<1x1x128x128xbf16>
    %92 = vector.shape_cast %91 : vector<1x1x128x128xbf16> to vector<128x128xbf16>
    %cst_94 = arith.constant dense<0.000000e+00> : vector<128x128xf32>
    %93 = tpu.matmul %90, %92, %cst_94 {dimension_numbers = #tpu.dot_dimension_numbers<[1], [0], [0], [1], [0, 0, 1, 1], [], []>} : vector<128x128xbf16>, vector<128x128xbf16>, vector<128x128xf32> -> vector<128x128xf32>
    %94 = arith.addf %88, %93 : vector<128x128xf32>
    %c7 = arith.constant 7 : index
    %c0_95 = arith.constant 0 : index
    %c0_96 = arith.constant 0 : index
    %95 = vector.load %arg0[%c7, %c0_95, %c0_96] : memref<9x128x128xbf16, #tpu.memory_space<vmem>>, vector<1x128x128xbf16>
    %96 = vector.shape_cast %95 : vector<1x128x128xbf16> to vector<128x128xbf16>
    %c2_97 = arith.constant 2 : index
    %c3_98 = arith.constant 3 : index
    %c0_99 = arith.constant 0 : index
    %c0_100 = arith.constant 0 : index
    %97 = vector.load %arg1[%c2_97, %c3_98, %c0_99, %c0_100] : memref<4x4x128x128xbf16, #tpu.memory_space<vmem>>, vector<1x1x128x128xbf16>
    %98 = vector.shape_cast %97 : vector<1x1x128x128xbf16> to vector<128x128xbf16>
    %cst_101 = arith.constant dense<0.000000e+00> : vector<128x128xf32>
    %99 = tpu.matmul %96, %98, %cst_101 {dimension_numbers = #tpu.dot_dimension_numbers<[1], [0], [0], [1], [0, 0, 1, 1], [], []>} : vector<128x128xbf16>, vector<128x128xbf16>, vector<128x128xf32> -> vector<128x128xf32>
    %100 = arith.addf %94, %99 : vector<128x128xf32>
    %c0_102 = arith.constant 0 : index
    %c0_103 = arith.constant 0 : index
    %101 = vector.load %arg2[%c0_102, %c0_103] : memref<1x128xf32, #tpu.memory_space<vmem>>, vector<1x128xf32>
    %102 = vector.broadcast %101 : vector<1x128xf32> to vector<128x128xf32>
    %103 = arith.addf %100, %102 : vector<128x128xf32>
    %104 = arith.negf %103 : vector<128x128xf32>
    %105 = math.exp %104 : vector<128x128xf32>
    %cst_104 = arith.constant 1.000000e+00 : f32
    %106 = vector.broadcast %cst_104 : f32 to vector<128x128xf32>
    %107 = arith.addf %106, %105 : vector<128x128xf32>
    %108 = arith.divf %106, %107 : vector<128x128xf32>
    %109 = arith.mulf %103, %108 : vector<128x128xf32>
    %110 = arith.truncf %109 : vector<128x128xf32> to vector<128x128xbf16>
    %c2_105 = arith.constant 2 : index
    %c0_106 = arith.constant 0 : index
    %c0_107 = arith.constant 0 : index
    %111 = vector.load %arg3[%c2_105, %c0_106, %c0_107] : memref<4x128x128xbf16, #tpu.memory_space<vmem>>, vector<1x128x128xbf16>
    %112 = vector.shape_cast %111 : vector<1x128x128xbf16> to vector<128x128xbf16>
    %113 = vector.shape_cast %110 : vector<128x128xbf16> to vector<1x128x128xbf16>
    tpu.vector_store %arg3[%c2_105, %c0_106, %c0_107], %113 {strides = array<i32>} : memref<4x128x128xbf16, #tpu.memory_space<vmem>>, vector<1x128x128xbf16>,
    %cst_108 = arith.constant 0.000000e+00 : f32
    %114 = vector.broadcast %cst_108 : f32 to vector<128x128xf32>
    %c4_109 = arith.constant 4 : index
    %c0_110 = arith.constant 0 : index
    %c0_111 = arith.constant 0 : index
    %115 = vector.load %arg0[%c4_109, %c0_110, %c0_111] : memref<9x128x128xbf16, #tpu.memory_space<vmem>>, vector<1x128x128xbf16>
    %116 = vector.shape_cast %115 : vector<1x128x128xbf16> to vector<128x128xbf16>
    %c3_112 = arith.constant 3 : index
    %c0_113 = arith.constant 0 : index
    %c0_114 = arith.constant 0 : index
    %c0_115 = arith.constant 0 : index
    %117 = vector.load %arg1[%c3_112, %c0_113, %c0_114, %c0_115] : memref<4x4x128x128xbf16, #tpu.memory_space<vmem>>, vector<1x1x128x128xbf16>
    %118 = vector.shape_cast %117 : vector<1x1x128x128xbf16> to vector<128x128xbf16>
    %cst_116 = arith.constant dense<0.000000e+00> : vector<128x128xf32>
    %119 = tpu.matmul %116, %118, %cst_116 {dimension_numbers = #tpu.dot_dimension_numbers<[1], [0], [0], [1], [0, 0, 1, 1], [], []>} : vector<128x128xbf16>, vector<128x128xbf16>, vector<128x128xf32> -> vector<128x128xf32>
    %120 = arith.addf %114, %119 : vector<128x128xf32>
    %c5_117 = arith.constant 5 : index
    %c0_118 = arith.constant 0 : index
    %c0_119 = arith.constant 0 : index
    %121 = vector.load %arg0[%c5_117, %c0_118, %c0_119] : memref<9x128x128xbf16, #tpu.memory_space<vmem>>, vector<1x128x128xbf16>
    %122 = vector.shape_cast %121 : vector<1x128x128xbf16> to vector<128x128xbf16>
    %c3_120 = arith.constant 3 : index
    %c1_121 = arith.constant 1 : index
    %c0_122 = arith.constant 0 : index
    %c0_123 = arith.constant 0 : index
    %123 = vector.load %arg1[%c3_120, %c1_121, %c0_122, %c0_123] : memref<4x4x128x128xbf16, #tpu.memory_space<vmem>>, vector<1x1x128x128xbf16>
    %124 = vector.shape_cast %123 : vector<1x1x128x128xbf16> to vector<128x128xbf16>
    %cst_124 = arith.constant dense<0.000000e+00> : vector<128x128xf32>
    %125 = tpu.matmul %122, %124, %cst_124 {dimension_numbers = #tpu.dot_dimension_numbers<[1], [0], [0], [1], [0, 0, 1, 1], [], []>} : vector<128x128xbf16>, vector<128x128xbf16>, vector<128x128xf32> -> vector<128x128xf32>
    %126 = arith.addf %120, %125 : vector<128x128xf32>
    %c7_125 = arith.constant 7 : index
    %c0_126 = arith.constant 0 : index
    %c0_127 = arith.constant 0 : index
    %127 = vector.load %arg0[%c7_125, %c0_126, %c0_127] : memref<9x128x128xbf16, #tpu.memory_space<vmem>>, vector<1x128x128xbf16>
    %128 = vector.shape_cast %127 : vector<1x128x128xbf16> to vector<128x128xbf16>
    %c3_128 = arith.constant 3 : index
    %c2_129 = arith.constant 2 : index
    %c0_130 = arith.constant 0 : index
    %c0_131 = arith.constant 0 : index
    %129 = vector.load %arg1[%c3_128, %c2_129, %c0_130, %c0_131] : memref<4x4x128x128xbf16, #tpu.memory_space<vmem>>, vector<1x1x128x128xbf16>
    %130 = vector.shape_cast %129 : vector<1x1x128x128xbf16> to vector<128x128xbf16>
    %cst_132 = arith.constant dense<0.000000e+00> : vector<128x128xf32>
    %131 = tpu.matmul %128, %130, %cst_132 {dimension_numbers = #tpu.dot_dimension_numbers<[1], [0], [0], [1], [0, 0, 1, 1], [], []>} : vector<128x128xbf16>, vector<128x128xbf16>, vector<128x128xf32> -> vector<128x128xf32>
    %132 = arith.addf %126, %131 : vector<128x128xf32>
    %c8 = arith.constant 8 : index
    %c0_133 = arith.constant 0 : index
    %c0_134 = arith.constant 0 : index
    %133 = vector.load %arg0[%c8, %c0_133, %c0_134] : memref<9x128x128xbf16, #tpu.memory_space<vmem>>, vector<1x128x128xbf16>
    %134 = vector.shape_cast %133 : vector<1x128x128xbf16> to vector<128x128xbf16>
    %c3_135 = arith.constant 3 : index
    %c3_136 = arith.constant 3 : index
    %c0_137 = arith.constant 0 : index
    %c0_138 = arith.constant 0 : index
    %135 = vector.load %arg1[%c3_135, %c3_136, %c0_137, %c0_138] : memref<4x4x128x128xbf16, #tpu.memory_space<vmem>>, vector<1x1x128x128xbf16>
    %136 = vector.shape_cast %135 : vector<1x1x128x128xbf16> to vector<128x128xbf16>
    %cst_139 = arith.constant dense<0.000000e+00> : vector<128x128xf32>
    %137 = tpu.matmul %134, %136, %cst_139 {dimension_numbers = #tpu.dot_dimension_numbers<[1], [0], [0], [1], [0, 0, 1, 1], [], []>} : vector<128x128xbf16>, vector<128x128xbf16>, vector<128x128xf32> -> vector<128x128xf32>
    %138 = arith.addf %132, %137 : vector<128x128xf32>
    %c0_140 = arith.constant 0 : index
    %c0_141 = arith.constant 0 : index
    %139 = vector.load %arg2[%c0_140, %c0_141] : memref<1x128xf32, #tpu.memory_space<vmem>>, vector<1x128xf32>
    %140 = vector.broadcast %139 : vector<1x128xf32> to vector<128x128xf32>
    %141 = arith.addf %138, %140 : vector<128x128xf32>
    %142 = arith.negf %141 : vector<128x128xf32>
    %143 = math.exp %142 : vector<128x128xf32>
    %cst_142 = arith.constant 1.000000e+00 : f32
    %144 = vector.broadcast %cst_142 : f32 to vector<128x128xf32>
    %145 = arith.addf %144, %143 : vector<128x128xf32>
    %146 = arith.divf %144, %145 : vector<128x128xf32>
    %147 = arith.mulf %141, %146 : vector<128x128xf32>
    %148 = arith.truncf %147 : vector<128x128xf32> to vector<128x128xbf16>
    %c3_143 = arith.constant 3 : index
    %c0_144 = arith.constant 0 : index
    %c0_145 = arith.constant 0 : index
    %149 = vector.load %arg3[%c3_143, %c0_144, %c0_145] : memref<4x128x128xbf16, #tpu.memory_space<vmem>>, vector<1x128x128xbf16>
    %150 = vector.shape_cast %149 : vector<1x128x128xbf16> to vector<128x128xbf16>
    %151 = vector.shape_cast %148 : vector<128x128xbf16> to vector<1x128x128xbf16>
    tpu.vector_store %arg3[%c3_143, %c0_144, %c0_145], %151 {strides = array<i32>} : memref<4x128x128xbf16, #tpu.memory_space<vmem>>, vector<1x128x128xbf16>,
    return
  }
}

module attributes {stable_mosaic.version = 11 : i64} {
  func.func @_conv3x3_kernel(%arg0: i32, %arg1: memref<1x18x18x128xbf16, #tpu.memory_space<vmem>>, %arg2: memref<9x128x128xbf16, #tpu.memory_space<vmem>>, %arg3: memref<1x128xf32, #tpu.memory_space<vmem>>, %arg4: memref<256x128xf32, #tpu.memory_space<vmem>>, %arg5: memref<256x128xbf16, #tpu.memory_space<vmem>>, %arg6: memref<8x128xf32, #tpu.memory_space<vmem>>) attributes {dimension_semantics = [#tpu.dimension_semantics<parallel>], iteration_bounds = array<i64: 2>, scalar_prefetch = 0 : i64, scratch_operands = 0 : i64, tpu.core_type = #tpu.core_type<tc>, window_params = [{transform_indices = @transform_0, window_bounds = array<i64: 1, 18, 18, 128>}, {pipeline_mode = #tpu.pipeline_mode<synchronous>, transform_indices = @transform_1, window_bounds = array<i64: 9, 128, 128>}, {pipeline_mode = #tpu.pipeline_mode<synchronous>, transform_indices = @transform_2, window_bounds = array<i64: 1, 128>}, {transform_indices = @transform_3, window_bounds = array<i64: 256, 128>}, {transform_indices = @transform_4, window_bounds = array<i64: 256, 128>}, {transform_indices = @transform_5, window_bounds = array<i64: 8, 128>}]} {
    %c0 = arith.constant 0 : index
    %c0_0 = arith.constant 0 : index
    %c0_1 = arith.constant 0 : index
    %c0_2 = arith.constant 0 : index
    %0 = vector.load %arg1[%c0, %c0_0, %c0_1, %c0_2] : memref<1x18x18x128xbf16, #tpu.memory_space<vmem>>, vector<1x18x18x128xbf16>
    %cst = arith.constant 0.000000e+00 : f32
    %1 = vector.broadcast %cst : f32 to vector<256x128xf32>
    %2 = vector.extract_strided_slice %0 {offsets = [0, 0, 0, 0], sizes = [1, 16, 16, 128], strides = [1, 1, 1, 1]} : vector<1x18x18x128xbf16> to vector<1x16x16x128xbf16>
    %3 = vector.shape_cast %2 : vector<1x16x16x128xbf16> to vector<256x128xbf16>
    %c0_3 = arith.constant 0 : index
    %c0_4 = arith.constant 0 : index
    %c0_5 = arith.constant 0 : index
    %4 = vector.load %arg2[%c0_3, %c0_4, %c0_5] : memref<9x128x128xbf16, #tpu.memory_space<vmem>>, vector<1x128x128xbf16>
    %5 = vector.shape_cast %4 : vector<1x128x128xbf16> to vector<128x128xbf16>
    %cst_6 = arith.constant dense<0.000000e+00> : vector<256x128xf32>
    %6 = tpu.matmul %3, %5, %cst_6 {dimension_numbers = #tpu.dot_dimension_numbers<[1], [0], [0], [1], [0, 0, 1, 1], [], []>} : vector<256x128xbf16>, vector<128x128xbf16>, vector<256x128xf32> -> vector<256x128xf32>
    %7 = arith.addf %1, %6 : vector<256x128xf32>
    %8 = vector.extract_strided_slice %0 {offsets = [0, 0, 1, 0], sizes = [1, 16, 16, 128], strides = [1, 1, 1, 1]} : vector<1x18x18x128xbf16> to vector<1x16x16x128xbf16>
    %9 = vector.shape_cast %8 : vector<1x16x16x128xbf16> to vector<256x128xbf16>
    %c1 = arith.constant 1 : index
    %c0_7 = arith.constant 0 : index
    %c0_8 = arith.constant 0 : index
    %10 = vector.load %arg2[%c1, %c0_7, %c0_8] : memref<9x128x128xbf16, #tpu.memory_space<vmem>>, vector<1x128x128xbf16>
    %11 = vector.shape_cast %10 : vector<1x128x128xbf16> to vector<128x128xbf16>
    %cst_9 = arith.constant dense<0.000000e+00> : vector<256x128xf32>
    %12 = tpu.matmul %9, %11, %cst_9 {dimension_numbers = #tpu.dot_dimension_numbers<[1], [0], [0], [1], [0, 0, 1, 1], [], []>} : vector<256x128xbf16>, vector<128x128xbf16>, vector<256x128xf32> -> vector<256x128xf32>
    %13 = arith.addf %7, %12 : vector<256x128xf32>
    %14 = vector.extract_strided_slice %0 {offsets = [0, 0, 2, 0], sizes = [1, 16, 16, 128], strides = [1, 1, 1, 1]} : vector<1x18x18x128xbf16> to vector<1x16x16x128xbf16>
    %15 = vector.shape_cast %14 : vector<1x16x16x128xbf16> to vector<256x128xbf16>
    %c2 = arith.constant 2 : index
    %c0_10 = arith.constant 0 : index
    %c0_11 = arith.constant 0 : index
    %16 = vector.load %arg2[%c2, %c0_10, %c0_11] : memref<9x128x128xbf16, #tpu.memory_space<vmem>>, vector<1x128x128xbf16>
    %17 = vector.shape_cast %16 : vector<1x128x128xbf16> to vector<128x128xbf16>
    %cst_12 = arith.constant dense<0.000000e+00> : vector<256x128xf32>
    %18 = tpu.matmul %15, %17, %cst_12 {dimension_numbers = #tpu.dot_dimension_numbers<[1], [0], [0], [1], [0, 0, 1, 1], [], []>} : vector<256x128xbf16>, vector<128x128xbf16>, vector<256x128xf32> -> vector<256x128xf32>
    %19 = arith.addf %13, %18 : vector<256x128xf32>
    %20 = vector.extract_strided_slice %0 {offsets = [0, 1, 0, 0], sizes = [1, 16, 16, 128], strides = [1, 1, 1, 1]} : vector<1x18x18x128xbf16> to vector<1x16x16x128xbf16>
    %21 = vector.shape_cast %20 : vector<1x16x16x128xbf16> to vector<256x128xbf16>
    %c3 = arith.constant 3 : index
    %c0_13 = arith.constant 0 : index
    %c0_14 = arith.constant 0 : index
    %22 = vector.load %arg2[%c3, %c0_13, %c0_14] : memref<9x128x128xbf16, #tpu.memory_space<vmem>>, vector<1x128x128xbf16>
    %23 = vector.shape_cast %22 : vector<1x128x128xbf16> to vector<128x128xbf16>
    %cst_15 = arith.constant dense<0.000000e+00> : vector<256x128xf32>
    %24 = tpu.matmul %21, %23, %cst_15 {dimension_numbers = #tpu.dot_dimension_numbers<[1], [0], [0], [1], [0, 0, 1, 1], [], []>} : vector<256x128xbf16>, vector<128x128xbf16>, vector<256x128xf32> -> vector<256x128xf32>
    %25 = arith.addf %19, %24 : vector<256x128xf32>
    %26 = vector.extract_strided_slice %0 {offsets = [0, 1, 1, 0], sizes = [1, 16, 16, 128], strides = [1, 1, 1, 1]} : vector<1x18x18x128xbf16> to vector<1x16x16x128xbf16>
    %27 = vector.shape_cast %26 : vector<1x16x16x128xbf16> to vector<256x128xbf16>
    %c4 = arith.constant 4 : index
    %c0_16 = arith.constant 0 : index
    %c0_17 = arith.constant 0 : index
    %28 = vector.load %arg2[%c4, %c0_16, %c0_17] : memref<9x128x128xbf16, #tpu.memory_space<vmem>>, vector<1x128x128xbf16>
    %29 = vector.shape_cast %28 : vector<1x128x128xbf16> to vector<128x128xbf16>
    %cst_18 = arith.constant dense<0.000000e+00> : vector<256x128xf32>
    %30 = tpu.matmul %27, %29, %cst_18 {dimension_numbers = #tpu.dot_dimension_numbers<[1], [0], [0], [1], [0, 0, 1, 1], [], []>} : vector<256x128xbf16>, vector<128x128xbf16>, vector<256x128xf32> -> vector<256x128xf32>
    %31 = arith.addf %25, %30 : vector<256x128xf32>
    %32 = vector.extract_strided_slice %0 {offsets = [0, 1, 2, 0], sizes = [1, 16, 16, 128], strides = [1, 1, 1, 1]} : vector<1x18x18x128xbf16> to vector<1x16x16x128xbf16>
    %33 = vector.shape_cast %32 : vector<1x16x16x128xbf16> to vector<256x128xbf16>
    %c5 = arith.constant 5 : index
    %c0_19 = arith.constant 0 : index
    %c0_20 = arith.constant 0 : index
    %34 = vector.load %arg2[%c5, %c0_19, %c0_20] : memref<9x128x128xbf16, #tpu.memory_space<vmem>>, vector<1x128x128xbf16>
    %35 = vector.shape_cast %34 : vector<1x128x128xbf16> to vector<128x128xbf16>
    %cst_21 = arith.constant dense<0.000000e+00> : vector<256x128xf32>
    %36 = tpu.matmul %33, %35, %cst_21 {dimension_numbers = #tpu.dot_dimension_numbers<[1], [0], [0], [1], [0, 0, 1, 1], [], []>} : vector<256x128xbf16>, vector<128x128xbf16>, vector<256x128xf32> -> vector<256x128xf32>
    %37 = arith.addf %31, %36 : vector<256x128xf32>
    %38 = vector.extract_strided_slice %0 {offsets = [0, 2, 0, 0], sizes = [1, 16, 16, 128], strides = [1, 1, 1, 1]} : vector<1x18x18x128xbf16> to vector<1x16x16x128xbf16>
    %39 = vector.shape_cast %38 : vector<1x16x16x128xbf16> to vector<256x128xbf16>
    %c6 = arith.constant 6 : index
    %c0_22 = arith.constant 0 : index
    %c0_23 = arith.constant 0 : index
    %40 = vector.load %arg2[%c6, %c0_22, %c0_23] : memref<9x128x128xbf16, #tpu.memory_space<vmem>>, vector<1x128x128xbf16>
    %41 = vector.shape_cast %40 : vector<1x128x128xbf16> to vector<128x128xbf16>
    %cst_24 = arith.constant dense<0.000000e+00> : vector<256x128xf32>
    %42 = tpu.matmul %39, %41, %cst_24 {dimension_numbers = #tpu.dot_dimension_numbers<[1], [0], [0], [1], [0, 0, 1, 1], [], []>} : vector<256x128xbf16>, vector<128x128xbf16>, vector<256x128xf32> -> vector<256x128xf32>
    %43 = arith.addf %37, %42 : vector<256x128xf32>
    %44 = vector.extract_strided_slice %0 {offsets = [0, 2, 1, 0], sizes = [1, 16, 16, 128], strides = [1, 1, 1, 1]} : vector<1x18x18x128xbf16> to vector<1x16x16x128xbf16>
    %45 = vector.shape_cast %44 : vector<1x16x16x128xbf16> to vector<256x128xbf16>
    %c7 = arith.constant 7 : index
    %c0_25 = arith.constant 0 : index
    %c0_26 = arith.constant 0 : index
    %46 = vector.load %arg2[%c7, %c0_25, %c0_26] : memref<9x128x128xbf16, #tpu.memory_space<vmem>>, vector<1x128x128xbf16>
    %47 = vector.shape_cast %46 : vector<1x128x128xbf16> to vector<128x128xbf16>
    %cst_27 = arith.constant dense<0.000000e+00> : vector<256x128xf32>
    %48 = tpu.matmul %45, %47, %cst_27 {dimension_numbers = #tpu.dot_dimension_numbers<[1], [0], [0], [1], [0, 0, 1, 1], [], []>} : vector<256x128xbf16>, vector<128x128xbf16>, vector<256x128xf32> -> vector<256x128xf32>
    %49 = arith.addf %43, %48 : vector<256x128xf32>
    %50 = vector.extract_strided_slice %0 {offsets = [0, 2, 2, 0], sizes = [1, 16, 16, 128], strides = [1, 1, 1, 1]} : vector<1x18x18x128xbf16> to vector<1x16x16x128xbf16>
    %51 = vector.shape_cast %50 : vector<1x16x16x128xbf16> to vector<256x128xbf16>
    %c8 = arith.constant 8 : index
    %c0_28 = arith.constant 0 : index
    %c0_29 = arith.constant 0 : index
    %52 = vector.load %arg2[%c8, %c0_28, %c0_29] : memref<9x128x128xbf16, #tpu.memory_space<vmem>>, vector<1x128x128xbf16>
    %53 = vector.shape_cast %52 : vector<1x128x128xbf16> to vector<128x128xbf16>
    %cst_30 = arith.constant dense<0.000000e+00> : vector<256x128xf32>
    %54 = tpu.matmul %51, %53, %cst_30 {dimension_numbers = #tpu.dot_dimension_numbers<[1], [0], [0], [1], [0, 0, 1, 1], [], []>} : vector<256x128xbf16>, vector<128x128xbf16>, vector<256x128xf32> -> vector<256x128xf32>
    %55 = arith.addf %49, %54 : vector<256x128xf32>
    %c0_31 = arith.constant 0 : index
    %c0_32 = arith.constant 0 : index
    %56 = vector.load %arg3[%c0_31, %c0_32] : memref<1x128xf32, #tpu.memory_space<vmem>>, vector<1x128xf32>
    %57 = vector.broadcast %56 : vector<1x128xf32> to vector<256x128xf32>
    %58 = arith.addf %55, %57 : vector<256x128xf32>
    %59 = arith.truncf %58 : vector<256x128xf32> to vector<256x128xbf16>
    %c0_33 = arith.constant 0 : index
    %c0_34 = arith.constant 0 : index
    %60 = vector.load %arg5[%c0_33, %c0_34] : memref<256x128xbf16, #tpu.memory_space<vmem>>, vector<256x128xbf16>
    tpu.vector_store %arg5[%c0_33, %c0_34], %59 {strides = array<i32>} : memref<256x128xbf16, #tpu.memory_space<vmem>>, vector<256x128xbf16>,
    %c0_35 = arith.constant 0 : index
    %c0_36 = arith.constant 0 : index
    %61 = vector.load %arg4[%c0_35, %c0_36] : memref<256x128xf32, #tpu.memory_space<vmem>>, vector<256x128xf32>
    %62 = arith.subf %58, %61 : vector<256x128xf32>
    %63 = arith.mulf %62, %62 : vector<256x128xf32>
    %cst_37 = arith.constant dense<0.000000e+00> : vector<128xf32>
    %64 = vector.multi_reduction <add>, %63, %cst_37 [0] : vector<256x128xf32> to vector<128xf32>
    %65 = vector.shape_cast %64 : vector<128xf32> to vector<1x128xf32>
    %66 = vector.shape_cast %65 : vector<1x128xf32> to vector<1x128xf32>
    %67 = vector.broadcast %66 : vector<1x128xf32> to vector<8x128xf32>
    %c0_38 = arith.constant 0 : index
    %c0_39 = arith.constant 0 : index
    %68 = vector.load %arg6[%c0_38, %c0_39] : memref<8x128xf32, #tpu.memory_space<vmem>>, vector<8x128xf32>
    tpu.vector_store %arg6[%c0_38, %c0_39], %67 {strides = array<i32>} : memref<8x128xf32, #tpu.memory_space<vmem>>, vector<8x128xf32>,
    return
  }
  func.func @transform_0(%arg0: i32) -> (i32, i32, i32, i32) {
    %c0_i32 = arith.constant 0 : i32
    %c0_i32_0 = arith.constant 0 : i32
    %c0_i32_1 = arith.constant 0 : i32
    %c0_i32_2 = arith.constant 0 : i32
    return %arg0, %c0_i32, %c0_i32_0, %c0_i32_1 : i32, i32, i32, i32
  }
  func.func @transform_1(%arg0: i32) -> (i32, i32, i32) {
    %c0_i32 = arith.constant 0 : i32
    %c0_i32_0 = arith.constant 0 : i32
    %c0_i32_1 = arith.constant 0 : i32
    %c0_i32_2 = arith.constant 0 : i32
    return %c0_i32, %c0_i32_0, %c0_i32_1 : i32, i32, i32
  }
  func.func @transform_2(%arg0: i32) -> (i32, i32) {
    %c0_i32 = arith.constant 0 : i32
    %c0_i32_0 = arith.constant 0 : i32
    %c0_i32_1 = arith.constant 0 : i32
    return %c0_i32, %c0_i32_0 : i32, i32
  }
  func.func @transform_3(%arg0: i32) -> (i32, i32) {
    %c0_i32 = arith.constant 0 : i32
    %c0_i32_0 = arith.constant 0 : i32
    return %arg0, %c0_i32 : i32, i32
  }
  func.func @transform_4(%arg0: i32) -> (i32, i32) {
    %c0_i32 = arith.constant 0 : i32
    %c0_i32_0 = arith.constant 0 : i32
    return %arg0, %c0_i32 : i32, i32
  }
  func.func @transform_5(%arg0: i32) -> (i32, i32) {
    %c0_i32 = arith.constant 0 : i32
    %c0_i32_0 = arith.constant 0 : i32
    return %arg0, %c0_i32 : i32, i32
  }
}

</mosaic_0001>

<bundles_post_ra>
// kernel: vqvae_forward.11
= control target key start
LH: loop header
LB: loop body
LE: loop exit
PB: predicated region body
PF: predicated region fallthrough
CT: control target
= control target key end

     0   :  { %s1069_s1 = inlined_call_operand.vmem [shape: bf16[4,128,128], index: 1, kind: input, shape index: {}]   ;;  %s1070_s0 = inlined_call_operand.vmem [shape: bf16[4,32,128], index: 0, kind: input, shape index: {}]   ;;  %s1071_s2 = inlined_call_operand.vmem [shape: f32[1,128], index: 2, kind: input, shape index: {}]   ;;  %s1072_s3 = inlined_call_operand.vmem [shape: bf16[32,128], index: 3, kind: output, shape index: {}]  }
   0x1   :  { %v864_v0 = vld [vmem:[%s1069_s1 + $0x40] sm:$0xff]   ;;  %v866_v2 = vld [vmem:[%s1069_s1 + $0x48] sm:$0xff]   ;;  %v868_v4 = vld [vmem:[%s1069_s1 + $0x50] sm:$0xff]  }
   0x2   :  { %v865_v1 = vld [vmem:[%s1069_s1 + $0x80] sm:$0xff]   ;;  %772 = vmatprep.subr.bf16.mxu1 %v864_v0  ;;  %v867_v3 = vld [vmem:[%s1069_s1 + $0x88] sm:$0xff]   ;;  %v869_v5 = vld [vmem:[%s1069_s1 + $0x90] sm:$0xff]  }
   0x3   :  { %812 = vmatprep.subr.bf16.mxu0 %v865_v1  ;;  %773 = vmatpush3.bf16.msra.mxu1 %v864_v0  ;;  %v870_v6 = vld [vmem:[%s1069_s1 + $0x58] sm:$0xff]   ;;  %v872_v8 = vld [vmem:[%s1069_s1 + $0x60] sm:$0xff]   ;;  %v874_v10 = vld [vmem:[%s1069_s1 + $0x68] sm:$0xff]  }
   0x4   :  { %813 = vmatpush3.bf16.msra.mxu0 %v865_v1  ;;  %774 = vmatprep.subr.bf16.mxu1 %v866_v2  ;;  %v871_v7 = vld [vmem:[%s1069_s1 + $0x98] sm:$0xff]   ;;  %v873_v9 = vld [vmem:[%s1069_s1 + $0xa0] sm:$0xff]   ;;  %v880_v11 = vld [vmem:[%s1070_s0 + $0x10] sm:$0xff]  }
   0x5   :  { %814 = vmatprep.subr.bf16.mxu0 %v867_v3  ;;  %v875_v12 = vld [vmem:[%s1069_s1 + $0xa8] sm:$0xff]   ;;  %788 = vmatprep.mubr.bf16.mxu1 %v880_v11  ;;  %v882_v13 = vld [vmem:[%s1070_s0 + $0x20] sm:$0xff]   ;;  %v876_v14 = vld [vmem:[%s1069_s1 + $0x70] sm:$0xff]  }
   0x6   :  { %v877_v15 = vld [vmem:[%s1069_s1 + $0xb0] sm:$0xff]   ;;  %828 = vmatprep.mubr.bf16.mxu0 %v882_v13  ;;  %v878_v16 = vld [vmem:[%s1069_s1 + $0x78] sm:$0xff]   ;;  %v881_v18 = vld [vmem:[%s1069_s1] sm:$0xff]  }
   0x7   :  { %775 = vmatpush3.bf16.msra.mxu1 %v866_v2  ;;  %v879_v17 = vld [vmem:[%s1069_s1 + $0xb8] sm:$0xff]   ;;  %v883_v19 = vld [vmem:[%s1069_s1 + $0xc0] sm:$0xff]   ;;  %v885_v21 = vld [vmem:[%s1070_s0 + $0x28] sm:$0xff]  }
   0x8   :  { %815 = vmatpush3.bf16.msra.mxu0 %v867_v3  ;;  %776 = vmatprep.subr.bf16.mxu1 %v868_v4  ;;  %v884_v20 = vld [vmem:[%s1070_s0 + $0x18] sm:$0xff]   ;;  %v886_v22 = vld [vmem:[%s1069_s1 + $0x8] sm:$0xff]   ;;  %v888_v24 = vld [vmem:[%s1069_s1 + $0x10] sm:$0xff]  }
   0x9   :  { %816 = vmatprep.subr.bf16.mxu0 %v869_v5  ;;  %v887_v23 = vld [vmem:[%s1069_s1 + $0xc8] sm:$0xff]   ;;  %v889_v25 = vld [vmem:[%s1069_s1 + $0xd0] sm:$0xff]   ;;  %v900_v26 = vld [vmem:[%s1070_s0] sm:$0xff]  }
   0xa   :  { %v901_v27 = vld [vmem:[%s1070_s0 + $0x30] sm:$0xff]   ;;  %v890_v28 = vld [vmem:[%s1069_s1 + $0x18] sm:$0xff]   ;;  %v892_v30 = vld [vmem:[%s1069_s1 + $0x20] sm:$0xff]  }
   0xb   :  { %777 = vmatpush3.bf16.msra.mxu1 %v868_v4  ;;  %v891_v29 = vld [vmem:[%s1069_s1 + $0xd8] sm:$0xff]   ;;  %v893_v31 = vld [vmem:[%s1069_s1 + $0xe0] sm:$0xff]   ;;  %v894_v32 = vld [vmem:[%s1069_s1 + $0x28] sm:$0xff]  }
   0xc   :  { %817 = vmatpush3.bf16.msra.mxu0 %v869_v5  ;;  %778 = vmatprep.subr.bf16.mxu1 %v870_v6  ;;  %v895_v33 = vld [vmem:[%s1069_s1 + $0xe8] sm:$0xff]   ;;  %v896_v34 = vld [vmem:[%s1069_s1 + $0x30] sm:$0xff]   ;;  %v898_v36 = vld [vmem:[%s1069_s1 + $0x38] sm:$0xff]  }
   0xd   :  { %818 = vmatprep.subr.bf16.mxu0 %v871_v7  ;;  %v897_v35 = vld [vmem:[%s1069_s1 + $0xf0] sm:$0xff]   ;;  %v899_v37 = vld [vmem:[%s1069_s1 + $0xf8] sm:$0xff]   ;;  %v902_v38 = vld [vmem:[%s1070_s0 + $0x8] sm:$0xff]  }
   0xe   :  { %v903_v39 = vld [vmem:[%s1070_s0 + $0x38] sm:$0xff]   ;;  %v708_v42 = vld [vmem:[%s1071_s2] ss:$0 sm:$0xff] }
   0xf   :  { %779 = vmatpush3.bf16.msra.mxu1 %v870_v6 }
  0x10   :  { %819 = vmatpush3.bf16.msra.mxu0 %v871_v7  ;;  %780 = vmatprep.subr.bf16.mxu1 %v872_v8 }
  0x11   :  { %820 = vmatprep.subr.bf16.mxu0 %v873_v9 }
  0x13   :  { %781 = vmatpush3.bf16.msra.mxu1 %v872_v8 }
  0x14   :  { %821 = vmatpush3.bf16.msra.mxu0 %v873_v9  ;;  %782 = vmatprep.subr.bf16.mxu1 %v874_v10 }
  0x15   :  { %822 = vmatprep.subr.bf16.mxu0 %v875_v12 }
  0x17   :  { %783 = vmatpush3.bf16.msra.mxu1 %v874_v10 }
  0x18   :  { %823 = vmatpush3.bf16.msra.mxu0 %v875_v12  ;;  %784 = vmatprep.subr.bf16.mxu1 %v876_v14 }
  0x19   :  { %824 = vmatprep.subr.bf16.mxu0 %v877_v15 }
  0x1b   :  { %785 = vmatpush3.bf16.msra.mxu1 %v876_v14 }
  0x1c   :  { %825 = vmatpush3.bf16.msra.mxu0 %v877_v15  ;;  %786 = vmatprep.subr.bf16.mxu1 %v878_v16 }
  0x1d   :  { %826 = vmatprep.subr.bf16.mxu0 %v879_v17 }
  0x1f   :  { %787 = vmatpush3.bf16.msra.mxu1 %v878_v16 }
  0x20   :  { %827 = vmatpush3.bf16.msra.mxu0 %v879_v17  ;;  %792 = vmatprep.subr.bf16.mxu1 %v881_v18 }
  0x21   :  { %832 = vmatprep.subr.bf16.mxu0 %v883_v19 }
  0x22   :  { %789 = vmatmul.mubr.bf16.vlgmr.msra.gmra.mrb[0].mxu1 %v884_v20 }
  0x23   :  { %793 = vmatpush3.bf16.msra.mxu1 %v881_v18  ;;  %829 = vmatmul.mubr.bf16.vlgmr.msra.gmra.mrb[0].mxu0 %v885_v21 }
  0x24   :  { %833 = vmatpush3.bf16.msra.mxu0 %v883_v19  ;;  %794 = vmatprep.subr.bf16.mxu1 %v886_v22 }
  0x25   :  { %834 = vmatprep.subr.bf16.mxu0 %v887_v23  ;;  %808 = vmatprep.mubr.bf16.mxu1 %v900_v26 }
  0x26   :  { %848 = vmatprep.mubr.bf16.mxu0 %v901_v27 }
  0x27   :  { %795 = vmatpush3.bf16.msra.mxu1 %v886_v22 }
  0x28   :  { %835 = vmatpush3.bf16.msra.mxu0 %v887_v23  ;;  %796 = vmatprep.subr.bf16.mxu1 %v888_v24 }
  0x29   :  { %836 = vmatprep.subr.bf16.mxu0 %v889_v25 }
  0x2b   :  { %797 = vmatpush3.bf16.msra.mxu1 %v888_v24 }
  0x2c   :  { %837 = vmatpush3.bf16.msra.mxu0 %v889_v25  ;;  %798 = vmatprep.subr.bf16.mxu1 %v890_v28 }
  0x2d   :  { %838 = vmatprep.subr.bf16.mxu0 %v891_v29 }
  0x2f   :  { %799 = vmatpush3.bf16.msra.mxu1 %v890_v28 }
  0x30   :  { %839 = vmatpush3.bf16.msra.mxu0 %v891_v29  ;;  %800 = vmatprep.subr.bf16.mxu1 %v892_v30 }
  0x31   :  { %840 = vmatprep.subr.bf16.mxu0 %v893_v31 }
  0x33   :  { %801 = vmatpush3.bf16.msra.mxu1 %v892_v30 }
  0x34   :  { %841 = vmatpush3.bf16.msra.mxu0 %v893_v31  ;;  %802 = vmatprep.subr.bf16.mxu1 %v894_v32 }
  0x35   :  { %842 = vmatprep.subr.bf16.mxu0 %v895_v33 }
  0x37   :  { %803 = vmatpush3.bf16.msra.mxu1 %v894_v32 }
  0x38   :  { %843 = vmatpush3.bf16.msra.mxu0 %v895_v33  ;;  %804 = vmatprep.subr.bf16.mxu1 %v896_v34 }
  0x39   :  { %844 = vmatprep.subr.bf16.mxu0 %v897_v35 }
  0x3b   :  { %805 = vmatpush3.bf16.msra.mxu1 %v896_v34 }
  0x3c   :  { %845 = vmatpush3.bf16.msra.mxu0 %v897_v35  ;;  %806 = vmatprep.subr.bf16.mxu1 %v898_v36 }
  0x3d   :  { %846 = vmatprep.subr.bf16.mxu0 %v899_v37 }
  0x3f   :  { %807 = vmatpush3.bf16.msra.mxu1 %v898_v36 }
  0x40   :  { %847 = vmatpush3.bf16.msra.mxu0 %v899_v37 }
  0x42   :  { %809 = vmatmul.mubr.bf16.vlgmr.msra.gmra.mrb[0].mxu1 %v902_v38 }
  0x43   :  { %849 = vmatmul.mubr.bf16.vlgmr.msra.gmra.mrb[0].mxu0 %v903_v39 }
 0x115   :  { %v810_v40 = vpop.f32.mrb[0].mxu1 }
 0x116   :  { %v850_v41 = vpop.f32.mrb[0].mxu0  ;;  %v260_v43 = vpop.f32.mrb[1].mxu1 }
 0x117   :  { %v852_v44 = vadd.f32 %v850_v41, %v810_v40  ;;  %v526_v45 = vpop.f32.mrb[1].mxu0  ;;  %v811_v46 = vpop.f32.mrb[2].mxu1 }
 0x118   :  { %v853_v47 = vadd.f32 %v526_v45, %v260_v43  ;;  %v851_v48 = vpop.f32.mrb[2].mxu0  ;;  %v263_v49 = vpop.f32.mrb[3].mxu1 }
 0x119   :  { %v554_v50 = vadd.f32 %v852_v44, %v708_v42  ;;  %v854_v51 = vadd.f32 %v851_v48, %v811_v46  ;;  %v529_v52 = vpop.f32.mrb[3].mxu0 }
 0x11a   :  { %v552_v53 = vadd.f32 %v853_v47, %v708_v42  ;;  %v855_v54 = vadd.f32 %v529_v52, %v263_v49 }
 0x11b   :  { %v711_v55 = vmul.f32 -1.442695, %v554_v50  ;;  %v555_v56 = vadd.f32 %v854_v51, %v708_v42 }
 0x11c   :  { %v709_v57 = vmul.f32 -1.442695, %v552_v53  ;;  %v553_v58 = vadd.f32 %v855_v54, %v708_v42 }
 0x11d   :  { %904 = vpow2.f32 %v711_v55  ;;  %v712_v59 = vmul.f32 -1.442695, %v555_v56 }
 0x11e   :  { %906 = vpow2.f32 %v709_v57  ;;  %v710_v60 = vmul.f32 -1.442695, %v553_v58 }
 0x11f   :  { %908 = vpow2.f32 %v712_v59 }
 0x120   :  { %910 = vpow2.f32 %v710_v60 }
 0x127   :  { %v905_v61 = vpop.eup %904 }
 0x128   :  { %v907_v62 = vpop.eup %906  ;;  %v570_v63 = vadd.f32 1.0, %v905_v61 }
 0x129   :  { %v909_v0 = vpop.eup %908  ;;  %v568_v1 = vadd.f32 1.0, %v907_v62 }
 0x12a   :  { %v911_v2 = vpop.eup %910  ;;  %912 = vrcp.f32 %v570_v63  ;;  %v571_v3 = vadd.f32 1.0, %v909_v0 }
 0x12b   :  { %914 = vrcp.f32 %v568_v1  ;;  %v569_v4 = vadd.f32 1.0, %v911_v2 }
 0x12c   :  { %916 = vrcp.f32 %v571_v3 }
 0x12d   :  { %918 = vrcp.f32 %v569_v4 }
 0x134   :  { %v913_v5 = vpop.eup %912 }
 0x135   :  { %v915_v6 = vpop.eup %914  ;;  %v582_v9 = vmul.f32 %v913_v5, %v554_v50 }
 0x136   :  { %v917_v7 = vpop.eup %916  ;;  %v580_v11 = vmul.f32 %v915_v6, %v552_v53 }
 0x137   :  { %v919_v8 = vpop.eup %918  ;;  %v583_v10 = vmul.f32 %v917_v7, %v555_v56 }
 0x138   :  { %v581_v12 = vmul.f32 %v919_v8, %v553_v58 }
 0x139   :  { %v729_v13 = vpack.c.bf16 %v583_v10, %v582_v9 }
 0x13a   :  { %v724_v14 = vpack.c.bf16 %v581_v12, %v580_v11 }
 0x13b   :  { %731 = vst [vmem:[%s1072_s3 + $0x8] sm:$0xff] %v729_v13  }
 0x13c   :  { %725 = vst [vmem:[%s1072_s3] sm:$0xff] %v724_v14  }

// kernel: vqvae_forward.10
= control target key start
LH: loop header
LB: loop body
LE: loop exit
PB: predicated region body
PF: predicated region fallthrough
CT: control target
= control target key end

     0   :  { %s2117_s1 = inlined_call_operand.vmem [shape: bf16[4,128,128], index: 1, kind: input, shape index: {}]   ;;  %s2118_s0 = inlined_call_operand.vmem [shape: bf16[4,128,128], index: 0, kind: input, shape index: {}]   ;;  %s2119_s2 = inlined_call_operand.vmem [shape: f32[1,128], index: 2, kind: input, shape index: {}]   ;;  %s2120_s3 = inlined_call_operand.vmem [shape: bf16[128,128], index: 3, kind: output, shape index: {}]  }
   0x1   :  { %v1668_v0 = vld [vmem:[%s2117_s1 + $0x40] sm:$0xff]   ;;  %v1670_v2 = vld [vmem:[%s2117_s1 + $0x48] sm:$0xff]   ;;  %v1672_v4 = vld [vmem:[%s2117_s1 + $0x50] sm:$0xff]  }
   0x2   :  { %v1669_v1 = vld [vmem:[%s2117_s1 + $0x80] sm:$0xff]   ;;  %1492 = vmatprep.subr.bf16.mxu1 %v1668_v0  ;;  %v1671_v3 = vld [vmem:[%s2117_s1 + $0x88] sm:$0xff]   ;;  %v1673_v5 = vld [vmem:[%s2117_s1 + $0x90] sm:$0xff]  }
   0x3   :  { %1556 = vmatprep.subr.bf16.mxu0 %v1669_v1  ;;  %1493 = vmatpush3.bf16.msra.mxu1 %v1668_v0  ;;  %v1674_v6 = vld [vmem:[%s2117_s1 + $0x58] sm:$0xff]   ;;  %v1676_v8 = vld [vmem:[%s2117_s1 + $0x60] sm:$0xff]   ;;  %v1678_v10 = vld [vmem:[%s2117_s1 + $0x68] sm:$0xff]  }
   0x4   :  { %1557 = vmatpush3.bf16.msra.mxu0 %v1669_v1  ;;  %1494 = vmatprep.subr.bf16.mxu1 %v1670_v2  ;;  %v1675_v7 = vld [vmem:[%s2117_s1 + $0x98] sm:$0xff]   ;;  %v1677_v9 = vld [vmem:[%s2117_s1 + $0xa0] sm:$0xff]   ;;  %v1679_v11 = vld [vmem:[%s2117_s1 + $0xa8] sm:$0xff]  }
   0x5   :  { %1558 = vmatprep.subr.bf16.mxu0 %v1671_v3  ;;  %v1684_v12 = vld [vmem:[%s2118_s0 + $0x40] sm:$0xff]   ;;  %v1680_v14 = vld [vmem:[%s2117_s1 + $0x70] sm:$0xff]   ;;  %v1682_v16 = vld [vmem:[%s2117_s1 + $0x78] sm:$0xff]  }
   0x6   :  { %v1685_v13 = vld [vmem:[%s2118_s0 + $0x80] sm:$0xff]   ;;  %1508 = vmatprep.mubr.bf16.mxu1 %v1684_v12  ;;  %v1681_v15 = vld [vmem:[%s2117_s1 + $0xb0] sm:$0xff]   ;;  %v1683_v17 = vld [vmem:[%s2117_s1 + $0xb8] sm:$0xff]  }
   0x7   :  { %1495 = vmatpush3.bf16.msra.mxu1 %v1670_v2  ;;  %1572 = vmatprep.mubr.bf16.mxu0 %v1685_v13  ;;  %v1686_v18 = vld [vmem:[%s2118_s0 + $0x48] sm:$0xff]   ;;  %v1687_v19 = vld [vmem:[%s2117_s1] sm:$0xff]   ;;  %v1692_v24 = vld [vmem:[%s2118_s0 + $0x50] sm:$0xff]  }
   0x8   :  { %1559 = vmatpush3.bf16.msra.mxu0 %v1671_v3  ;;  %1496 = vmatprep.subr.bf16.mxu1 %v1672_v4  ;;  %v1689_v20 = vld [vmem:[%s2117_s1 + $0xc0] sm:$0xff]   ;;  %v1688_v21 = vld [vmem:[%s2118_s0 + $0x88] sm:$0xff]   ;;  %v1693_v25 = vld [vmem:[%s2118_s0 + $0x90] sm:$0xff]  }
   0x9   :  { %1560 = vmatprep.subr.bf16.mxu0 %v1673_v5  ;;  %v1690_v22 = vld [vmem:[%s2117_s1 + $0x8] sm:$0xff]   ;;  %v1694_v26 = vld [vmem:[%s2118_s0 + $0x58] sm:$0xff]   ;;  %v1695_v27 = vld [vmem:[%s2117_s1 + $0x10] sm:$0xff]  }
   0xa   :  { %v1691_v23 = vld [vmem:[%s2117_s1 + $0xc8] sm:$0xff]   ;;  %v1697_v28 = vld [vmem:[%s2117_s1 + $0xd0] sm:$0xff]   ;;  %v1696_v29 = vld [vmem:[%s2118_s0 + $0x98] sm:$0xff]  }
   0xb   :  { %1497 = vmatpush3.bf16.msra.mxu1 %v1672_v4  ;;  %v1698_v30 = vld [vmem:[%s2117_s1 + $0x18] sm:$0xff]   ;;  %v1700_v32 = vld [vmem:[%s2118_s0 + $0x60] sm:$0xff]   ;;  %v1702_v34 = vld [vmem:[%s2118_s0 + $0x68] sm:$0xff]  }
   0xc   :  { %1561 = vmatpush3.bf16.msra.mxu0 %v1673_v5  ;;  %1498 = vmatprep.subr.bf16.mxu1 %v1674_v6  ;;  %v1699_v31 = vld [vmem:[%s2117_s1 + $0xd8] sm:$0xff]   ;;  %v1701_v33 = vld [vmem:[%s2118_s0 + $0xa0] sm:$0xff]   ;;  %v1704_v37 = vld [vmem:[%s2118_s0 + $0xa8] sm:$0xff]  }
   0xd   :  { %1562 = vmatprep.subr.bf16.mxu0 %v1675_v7  ;;  %v1703_v35 = vld [vmem:[%s2117_s1 + $0x20] sm:$0xff]   ;;  %v1706_v38 = vld [vmem:[%s2117_s1 + $0x28] sm:$0xff]   ;;  %v1708_v40 = vld [vmem:[%s2118_s0 + $0x70] sm:$0xff]  }
   0xe   :  { %v1705_v36 = vld [vmem:[%s2117_s1 + $0xe0] sm:$0xff]   ;;  %v1707_v39 = vld [vmem:[%s2117_s1 + $0xe8] sm:$0xff]   ;;  %v1709_v41 = vld [vmem:[%s2118_s0 + $0xb0] sm:$0xff]  }
   0xf   :  { %1499 = vmatpush3.bf16.msra.mxu1 %v1674_v6  ;;  %v1710_v42 = vld [vmem:[%s2118_s0 + $0x78] sm:$0xff]   ;;  %v1711_v43 = vld [vmem:[%s2117_s1 + $0x30] sm:$0xff]   ;;  %v1716_v48 = vld [vmem:[%s2118_s0] sm:$0xff]  }
  0x10   :  { %1563 = vmatpush3.bf16.msra.mxu0 %v1675_v7  ;;  %1500 = vmatprep.subr.bf16.mxu1 %v1676_v8  ;;  %v1713_v44 = vld [vmem:[%s2117_s1 + $0xf0] sm:$0xff]   ;;  %v1712_v45 = vld [vmem:[%s2118_s0 + $0xb8] sm:$0xff]   ;;  %v1717_v49 = vld [vmem:[%s2118_s0 + $0xc0] sm:$0xff]  }
  0x11   :  { %1564 = vmatprep.subr.bf16.mxu0 %v1677_v9  ;;  %v1714_v46 = vld [vmem:[%s2117_s1 + $0x38] sm:$0xff]   ;;  %v1718_v50 = vld [vmem:[%s2118_s0 + $0x8] sm:$0xff]   ;;  %v1720_v52 = vld [vmem:[%s2118_s0 + $0x10] sm:$0xff]  }
  0x12   :  { %v1715_v47 = vld [vmem:[%s2117_s1 + $0xf8] sm:$0xff]   ;;  %v1719_v51 = vld [vmem:[%s2118_s0 + $0xc8] sm:$0xff]   ;;  %v1721_v53 = vld [vmem:[%s2118_s0 + $0xd0] sm:$0xff]  }
  0x13   :  { %1501 = vmatpush3.bf16.msra.mxu1 %v1676_v8  ;;  %v1722_v54 = vld [vmem:[%s2118_s0 + $0x18] sm:$0xff]   ;;  %v1724_v56 = vld [vmem:[%s2118_s0 + $0x20] sm:$0xff]   ;;  %v1726_v58 = vld [vmem:[%s2118_s0 + $0x28] sm:$0xff]  }
  0x14   :  { %1565 = vmatpush3.bf16.msra.mxu0 %v1677_v9  ;;  %1502 = vmatprep.subr.bf16.mxu1 %v1678_v10  ;;  %v1723_v55 = vld [vmem:[%s2118_s0 + $0xd8] sm:$0xff]   ;;  %v1725_v57 = vld [vmem:[%s2118_s0 + $0xe0] sm:$0xff]   ;;  %v1727_v59 = vld [vmem:[%s2118_s0 + $0xe8] sm:$0xff]  }
  0x15   :  { %1566 = vmatprep.subr.bf16.mxu0 %v1679_v11  ;;  %v1728_v60 = vld [vmem:[%s2118_s0 + $0x30] sm:$0xff]   ;;  %v1730_v62 = vld [vmem:[%s2118_s0 + $0x38] sm:$0xff]   ;;  %v2011_v2 = vld [vmem:[%s2119_s2] ss:$0 sm:$0xff] }
  0x16   :  { %v1729_v61 = vld [vmem:[%s2118_s0 + $0xf0] sm:$0xff]   ;;  %v1731_v63 = vld [vmem:[%s2118_s0 + $0xf8] sm:$0xff]  }
  0x17   :  { %1503 = vmatpush3.bf16.msra.mxu1 %v1678_v10 }
  0x18   :  { %1567 = vmatpush3.bf16.msra.mxu0 %v1679_v11  ;;  %1504 = vmatprep.subr.bf16.mxu1 %v1680_v14 }
  0x19   :  { %1568 = vmatprep.subr.bf16.mxu0 %v1681_v15 }
  0x1b   :  { %1505 = vmatpush3.bf16.msra.mxu1 %v1680_v14 }
  0x1c   :  { %1569 = vmatpush3.bf16.msra.mxu0 %v1681_v15  ;;  %1506 = vmatprep.subr.bf16.mxu1 %v1682_v16 }
  0x1d   :  { %1570 = vmatprep.subr.bf16.mxu0 %v1683_v17 }
  0x1f   :  { %1507 = vmatpush3.bf16.msra.mxu1 %v1682_v16 }
  0x20   :  { %1571 = vmatpush3.bf16.msra.mxu0 %v1683_v17  ;;  %1524 = vmatprep.subr.bf16.mxu1 %v1687_v19 }
  0x21   :  { %1588 = vmatprep.subr.bf16.mxu0 %v1689_v20 }
  0x22   :  { %1509 = vmatmul.mubr.bf16.vlgmr.msra.gmra.mrb[0].mxu1 %v1686_v18 }
  0x23   :  { %1573 = vmatmul.mubr.bf16.vlgmr.msra.gmra.mrb[0].mxu0 %v1688_v21  ;;  %1525 = vmatpush3.bf16.msra.mxu1 %v1687_v19 }
  0x24   :  { %1589 = vmatpush3.bf16.msra.mxu0 %v1689_v20  ;;  %1526 = vmatprep.subr.bf16.mxu1 %v1690_v22 }
  0x25   :  { %1590 = vmatprep.subr.bf16.mxu0 %v1691_v23  ;;  %1512 = vmatprep.mubr.bf16.mxu1 %v1692_v24 }
  0x26   :  { %1576 = vmatprep.mubr.bf16.mxu0 %v1693_v25 }
  0x27   :  { %1527 = vmatpush3.bf16.msra.mxu1 %v1690_v22 }
  0x28   :  { %1591 = vmatpush3.bf16.msra.mxu0 %v1691_v23  ;;  %1528 = vmatprep.subr.bf16.mxu1 %v1695_v27 }
  0x29   :  { %1592 = vmatprep.subr.bf16.mxu0 %v1697_v28 }
  0x2a   :  { %1513 = vmatmul.mubr.bf16.gmra.mrb[4].mxu1 %v1694_v26 }
  0x2b   :  { %1577 = vmatmul.mubr.bf16.gmra.mrb[4].mxu0 %v1696_v29  ;;  %1529 = vmatpush3.bf16.msra.mxu1 %v1695_v27 }
  0x2c   :  { %1593 = vmatpush3.bf16.msra.mxu0 %v1697_v28  ;;  %1530 = vmatprep.subr.bf16.mxu1 %v1698_v30 }
  0x2d   :  { %1594 = vmatprep.subr.bf16.mxu0 %v1699_v31  ;;  %1516 = vmatprep.mubr.bf16.mxu1 %v1700_v32 }
  0x2e   :  { %1580 = vmatprep.mubr.bf16.mxu0 %v1701_v33 }
  0x2f   :  { %1531 = vmatpush3.bf16.msra.mxu1 %v1698_v30 }
  0x30   :  { %1595 = vmatpush3.bf16.msra.mxu0 %v1699_v31  ;;  %1532 = vmatprep.subr.bf16.mxu1 %v1703_v35 }
  0x31   :  { %1596 = vmatprep.subr.bf16.mxu0 %v1705_v36 }
  0x32   :  { %1517 = vmatmul.mubr.bf16.gmra.mrb[8].mxu1 %v1702_v34 }
  0x33   :  { %1581 = vmatmul.mubr.bf16.gmra.mrb[8].mxu0 %v1704_v37  ;;  %1533 = vmatpush3.bf16.msra.mxu1 %v1703_v35 }
  0x34   :  { %1597 = vmatpush3.bf16.msra.mxu0 %v1705_v36  ;;  %1534 = vmatprep.subr.bf16.mxu1 %v1706_v38 }
  0x35   :  { %1598 = vmatprep.subr.bf16.mxu0 %v1707_v39  ;;  %1520 = vmatprep.mubr.bf16.mxu1 %v1708_v40 }
  0x36   :  { %1584 = vmatprep.mubr.bf16.mxu0 %v1709_v41 }
  0x37   :  { %1535 = vmatpush3.bf16.msra.mxu1 %v1706_v38 }
  0x38   :  { %1599 = vmatpush3.bf16.msra.mxu0 %v1707_v39  ;;  %1536 = vmatprep.subr.bf16.mxu1 %v1711_v43 }
  0x39   :  { %1600 = vmatprep.subr.bf16.mxu0 %v1713_v44 }
  0x3a   :  { %1521 = vmatmul.mubr.bf16.gmra.mrb[12].mxu1 %v1710_v42 }
  0x3b   :  { %1585 = vmatmul.mubr.bf16.gmra.mrb[12].mxu0 %v1712_v45  ;;  %1537 = vmatpush3.bf16.msra.mxu1 %v1711_v43 }
  0x3c   :  { %1601 = vmatpush3.bf16.msra.mxu0 %v1713_v44  ;;  %1538 = vmatprep.subr.bf16.mxu1 %v1714_v46 }
  0x3d   :  { %1602 = vmatprep.subr.bf16.mxu0 %v1715_v47  ;;  %1540 = vmatprep.mubr.bf16.mxu1 %v1716_v48 }
  0x3e   :  { %1604 = vmatprep.mubr.bf16.mxu0 %v1717_v49 }
  0x3f   :  { %1539 = vmatpush3.bf16.msra.mxu1 %v1714_v46 }
  0x40   :  { %1603 = vmatpush3.bf16.msra.mxu0 %v1715_v47 }
  0x42   :  { %1541 = vmatmul.mubr.bf16.vlgmr.msra.gmra.mrb[0].mxu1 %v1718_v50 }
  0x43   :  { %1605 = vmatmul.mubr.bf16.vlgmr.msra.gmra.mrb[0].mxu0 %v1719_v51  ;;  %1544 = vmatprep.mubr.bf16.mxu1 %v1720_v52 }
  0x44   :  { %1608 = vmatprep.mubr.bf16.mxu0 %v1721_v53 }
  0x4a   :  { %1545 = vmatmul.mubr.bf16.gmra.mrb[4].mxu1 %v1722_v54 }
  0x4b   :  { %1609 = vmatmul.mubr.bf16.gmra.mrb[4].mxu0 %v1723_v55  ;;  %1548 = vmatprep.mubr.bf16.mxu1 %v1724_v56 }
  0x4c   :  { %1612 = vmatprep.mubr.bf16.mxu0 %v1725_v57 }
  0x52   :  { %1549 = vmatmul.mubr.bf16.gmra.mrb[8].mxu1 %v1726_v58 }
  0x53   :  { %1613 = vmatmul.mubr.bf16.gmra.mrb[8].mxu0 %v1727_v59  ;;  %1552 = vmatprep.mubr.bf16.mxu1 %v1728_v60 }
  0x54   :  { %1616 = vmatprep.mubr.bf16.mxu0 %v1729_v61 }
  0x5a   :  { %1553 = vmatmul.mubr.bf16.gmra.mrb[12].mxu1 %v1730_v62 }
  0x5b   :  { %1617 = vmatmul.mubr.bf16.gmra.mrb[12].mxu0 %v1731_v63 }
 0x115   :  { %v1542_v0 = vpop.f32.mrb[0].mxu1 }
 0x116   :  { %v1606_v1 = vpop.f32.mrb[0].mxu0  ;;  %v404_v3 = vpop.f32.mrb[1].mxu1 }
 0x117   :  { %v1620_v4 = vadd.f32 %v1606_v1, %v1542_v0  ;;  %v874_v5 = vpop.f32.mrb[1].mxu0  ;;  %v1543_v6 = vpop.f32.mrb[2].mxu1 }
 0x118   :  { %v1621_v7 = vadd.f32 %v874_v5, %v404_v3  ;;  %v1607_v8 = vpop.f32.mrb[2].mxu0  ;;  %v407_v9 = vpop.f32.mrb[3].mxu1 }
 0x119   :  { %v2014_v10 = vadd.f32 %v1620_v4, %v2011_v2  ;;  %v1622_v11 = vadd.f32 %v1607_v8, %v1543_v6  ;;  %v877_v12 = vpop.f32.mrb[3].mxu0 }
 0x11a   :  { %v2017_v13 = vadd.f32 %v1621_v7, %v2011_v2  ;;  %v1623_v14 = vadd.f32 %v877_v12, %v407_v9 }
 0x11b   :  { %v1335_v15 = vmul.f32 -1.442695, %v2014_v10  ;;  %v2021_v16 = vadd.f32 %v1622_v11, %v2011_v2 }
 0x11c   :  { %v1333_v17 = vmul.f32 -1.442695, %v2017_v13  ;;  %v2025_v18 = vadd.f32 %v1623_v14, %v2011_v2 }
 0x11d   :  { %1732 = vpow2.f32 %v1335_v15  ;;  %v1336_v19 = vmul.f32 -1.442695, %v2021_v16  ;;  %v1546_v20 = vpop.f32.mrb[4].mxu1 }
 0x11e   :  { %1734 = vpow2.f32 %v1333_v17  ;;  %v1334_v21 = vmul.f32 -1.442695, %v2025_v18  ;;  %v1610_v22 = vpop.f32.mrb[4].mxu0  ;;  %v420_v23 = vpop.f32.mrb[5].mxu1 }
 0x11f   :  { %1736 = vpow2.f32 %v1336_v19  ;;  %v1624_v24 = vadd.f32 %v1610_v22, %v1546_v20  ;;  %v890_v25 = vpop.f32.mrb[5].mxu0  ;;  %v1547_v26 = vpop.f32.mrb[6].mxu1 }
 0x120   :  { %1738 = vpow2.f32 %v1334_v21  ;;  %v1625_v27 = vadd.f32 %v890_v25, %v420_v23  ;;  %v1611_v28 = vpop.f32.mrb[6].mxu0  ;;  %v423_v29 = vpop.f32.mrb[7].mxu1 }
 0x121   :  { %v2030_v30 = vadd.f32 %v1624_v24, %v2011_v2  ;;  %v1626_v31 = vadd.f32 %v1611_v28, %v1547_v26  ;;  %v893_v32 = vpop.f32.mrb[7].mxu0 }
 0x122   :  { %v2033_v33 = vadd.f32 %v1625_v27, %v2011_v2  ;;  %v1627_v34 = vadd.f32 %v893_v32, %v423_v29 }
 0x123   :  { %v1339_v35 = vmul.f32 -1.442695, %v2030_v30  ;;  %v2037_v36 = vadd.f32 %v1626_v31, %v2011_v2 }
 0x124   :  { %v1337_v37 = vmul.f32 -1.442695, %v2033_v33  ;;  %v2041_v38 = vadd.f32 %v1627_v34, %v2011_v2 }
 0x125   :  { %1740 = vpow2.f32 %v1339_v35  ;;  %v1340_v39 = vmul.f32 -1.442695, %v2037_v36  ;;  %v1550_v40 = vpop.f32.mrb[8].mxu1 }
 0x126   :  { %1742 = vpow2.f32 %v1337_v37  ;;  %v1338_v41 = vmul.f32 -1.442695, %v2041_v38  ;;  %v1614_v42 = vpop.f32.mrb[8].mxu0  ;;  %v436_v43 = vpop.f32.mrb[9].mxu1 }
 0x127   :  { %v1733_v44 = vpop.eup %1732  ;;  %1744 = vpow2.f32 %v1340_v39  ;;  %v1628_v45 = vadd.f32 %v1614_v42, %v1550_v40  ;;  %v906_v46 = vpop.f32.mrb[9].mxu0 }
 0x128   :  { %v1551_v47 = vpop.f32.mrb[10].mxu1  ;;  %v1735_v48 = vpop.eup %1734  ;;  %v1026_v49 = vadd.f32 1.0, %v1733_v44  ;;  %1746 = vpow2.f32 %v1338_v41  ;;  %v1629_v50 = vadd.f32 %v906_v46, %v436_v43 }
 0x129   :  { %v1615_v51 = vpop.f32.mrb[10].mxu0  ;;  %v439_v52 = vpop.f32.mrb[11].mxu1  ;;  %v1024_v54 = vadd.f32 1.0, %v1735_v48  ;;  %v2046_v55 = vadd.f32 %v1628_v45, %v2011_v2 }
 0x12a   :  { %v1737_v53 = vpop.eup %1736  ;;  %v1630_v56 = vadd.f32 %v1615_v51, %v1551_v47  ;;  %v909_v57 = vpop.f32.mrb[11].mxu0  ;;  %1748 = vrcp.f32 %v1026_v49  ;;  %v2049_v60 = vadd.f32 %v1629_v50, %v2011_v2 }
 0x12b   :  { %v1739_v58 = vpop.eup %1738  ;;  %v1027_v59 = vadd.f32 1.0, %v1737_v53  ;;  %v1631_v61 = vadd.f32 %v909_v57, %v439_v52  ;;  %1750 = vrcp.f32 %v1024_v54  ;;  %v1343_v63 = vmul.f32 -1.442695, %v2046_v55 }
 0x12c   :  { %v1025_v62 = vadd.f32 1.0, %v1739_v58  ;;  %v2053_v0 = vadd.f32 %v1630_v56, %v2011_v2  ;;  %v1341_v1 = vmul.f32 -1.442695, %v2049_v60 }
 0x12d   :  { %1752 = vrcp.f32 %v1027_v59  ;;  %v2057_v3 = vadd.f32 %v1631_v61, %v2011_v2  ;;  %v1554_v5 = vpop.f32.mrb[12].mxu1 }
 0x12e   :  { %1754 = vrcp.f32 %v1025_v62  ;;  %v1344_v4 = vmul.f32 -1.442695, %v2053_v0  ;;  %v1618_v7 = vpop.f32.mrb[12].mxu0  ;;  %v452_v8 = vpop.f32.mrb[13].mxu1 }
 0x12f   :  { %1756 = vpow2.f32 %v1343_v63  ;;  %v1342_v6 = vmul.f32 -1.442695, %v2057_v3  ;;  %v1741_v9 = vpop.eup %1740  ;;  %v1632_v11 = vadd.f32 %v1618_v7, %v1554_v5  ;;  %v922_v12 = vpop.f32.mrb[13].mxu0 }
 0x130   :  { %1758 = vpow2.f32 %v1341_v1  ;;  %v1555_v14 = vpop.f32.mrb[14].mxu1  ;;  %v1743_v15 = vpop.eup %1742  ;;  %v1030_v17 = vadd.f32 1.0, %v1741_v9  ;;  %v1633_v19 = vadd.f32 %v922_v12, %v452_v8 }
 0x131   :  { %1760 = vpow2.f32 %v1344_v4  ;;  %v1619_v20 = vpop.f32.mrb[14].mxu0  ;;  %v455_v21 = vpop.f32.mrb[15].mxu1  ;;  %v1028_v23 = vadd.f32 1.0, %v1743_v15  ;;  %v2062_v24 = vadd.f32 %v1632_v11, %v2011_v2 }
 0x132   :  { %v1745_v22 = vpop.eup %1744  ;;  %1762 = vpow2.f32 %v1342_v6  ;;  %v1634_v25 = vadd.f32 %v1619_v20, %v1555_v14  ;;  %v925_v26 = vpop.f32.mrb[15].mxu0  ;;  %v2065_v29 = vadd.f32 %v1633_v19, %v2011_v2 }
 0x133   :  { %v1747_v27 = vpop.eup %1746  ;;  %1764 = vrcp.f32 %v1030_v17  ;;  %v1031_v28 = vadd.f32 1.0, %v1745_v22  ;;  %v1635_v31 = vadd.f32 %v925_v26, %v455_v21  ;;  %v1347_v34 = vmul.f32 -1.442695, %v2062_v24 }
 0x134   :  { %1766 = vrcp.f32 %v1028_v23  ;;  %v1029_v32 = vadd.f32 1.0, %v1747_v27  ;;  %v2069_v35 = vadd.f32 %v1634_v25, %v2011_v2  ;;  %v1749_v37 = vpop.eup %1748  ;;  %v1345_v39 = vmul.f32 -1.442695, %v2065_v29 }
 0x135   :  { %1768 = vrcp.f32 %v1031_v28  ;;  %v2073_v40 = vadd.f32 %v1635_v31, %v2011_v2  ;;  %v1751_v41 = vpop.eup %1750  ;;  %v1074_v46 = vmul.f32 %v1749_v37, %v2014_v10 }
 0x136   :  { %1770 = vrcp.f32 %v1029_v32  ;;  %v1348_v42 = vmul.f32 -1.442695, %v2069_v35  ;;  %v1072_v49 = vmul.f32 %v1751_v41, %v2017_v13 }
 0x137   :  { %v1753_v43 = vpop.eup %1752  ;;  %1772 = vpow2.f32 %v1347_v34  ;;  %v1346_v44 = vmul.f32 -1.442695, %v2073_v40 }
 0x138   :  { %v1755_v45 = vpop.eup %1754  ;;  %v1075_v47 = vmul.f32 %v1753_v43, %v2021_v16  ;;  %1774 = vpow2.f32 %v1345_v39 }
 0x139   :  { %v1757_v48 = vpop.eup %1756  ;;  %v1073_v2 = vmul.f32 %v1755_v45, %v2025_v18  ;;  %1776 = vpow2.f32 %v1348_v42 }
 0x13a   :  { %v1759_v50 = vpop.eup %1758  ;;  %v1389_v51 = vpack.c.bf16 %v1075_v47, %v1074_v46  ;;  %v1034_v52 = vadd.f32 1.0, %v1757_v48  ;;  %1778 = vpow2.f32 %v1346_v44 }
 0x13b   :  { %v1761_v53 = vpop.eup %1760  ;;  %v1384_v54 = vpack.c.bf16 %v1073_v2, %v1072_v49  ;;  %v1032_v56 = vadd.f32 1.0, %v1759_v50 }
 0x13c   :  { %v1763_v57 = vpop.eup %1762  ;;  %1421 = vst [vmem:[%s2120_s3 + $0x8] sm:$0xff] %v1389_v51   ;;  %1780 = vrcp.f32 %v1034_v52  ;;  %v1035_v10 = vadd.f32 1.0, %v1761_v53 }
 0x13d   :  { %v1765_v16 = vpop.eup %1764  ;;  %1385 = vst [vmem:[%s2120_s3] sm:$0xff] %v1384_v54   ;;  %1782 = vrcp.f32 %v1032_v56  ;;  %v1033_v13 = vadd.f32 1.0, %v1763_v57 }
 0x13e   :  { %v1767_v18 = vpop.eup %1766  ;;  %1784 = vrcp.f32 %v1035_v10  ;;  %v1078_v61 = vmul.f32 %v1765_v16, %v2030_v30 }
 0x13f   :  { %v1769_v58 = vpop.eup %1768  ;;  %1786 = vrcp.f32 %v1033_v13  ;;  %v1076_v1 = vmul.f32 %v1767_v18, %v2033_v33 }
 0x140   :  { %v1771_v59 = vpop.eup %1770  ;;  %v1079_v62 = vmul.f32 %v1769_v58, %v2037_v36 }
 0x141   :  { %v1773_v63 = vpop.eup %1772  ;;  %v1077_v4 = vmul.f32 %v1771_v59, %v2041_v38 }
 0x142   :  { %v1775_v5 = vpop.eup %1774  ;;  %v1399_v6 = vpack.c.bf16 %v1079_v62, %v1078_v61  ;;  %v1038_v7 = vadd.f32 1.0, %v1773_v63 }
 0x143   :  { %v1777_v8 = vpop.eup %1776  ;;  %v1394_v9 = vpack.c.bf16 %v1077_v4, %v1076_v1  ;;  %v1036_v11 = vadd.f32 1.0, %v1775_v5 }
 0x144   :  { %v1779_v12 = vpop.eup %1778  ;;  %1423 = vst [vmem:[%s2120_s3 + $0x18] sm:$0xff] %v1399_v6   ;;  %1788 = vrcp.f32 %v1038_v7  ;;  %v1039_v30 = vadd.f32 1.0, %v1777_v8 }
 0x145   :  { %1422 = vst [vmem:[%s2120_s3 + $0x10] sm:$0xff] %v1394_v9   ;;  %1790 = vrcp.f32 %v1036_v11  ;;  %v1037_v33 = vadd.f32 1.0, %v1779_v12 }
 0x146   :  { %v1781_v36 = vpop.eup %1780  ;;  %1792 = vrcp.f32 %v1039_v30 }
 0x147   :  { %v1783_v38 = vpop.eup %1782  ;;  %1794 = vrcp.f32 %v1037_v33  ;;  %v1082_v17 = vmul.f32 %v1781_v36, %v2046_v55 }
 0x148   :  { %v1785_v14 = vpop.eup %1784  ;;  %v1080_v20 = vmul.f32 %v1783_v38, %v2049_v60 }
 0x149   :  { %v1787_v15 = vpop.eup %1786  ;;  %v1083_v19 = vmul.f32 %v1785_v14, %v2053_v0 }
 0x14a   :  { %v1081_v21 = vmul.f32 %v1787_v15, %v2057_v3 }
 0x14b   :  { %v1409_v22 = vpack.c.bf16 %v1083_v19, %v1082_v17 }
 0x14c   :  { %v1404_v23 = vpack.c.bf16 %v1081_v21, %v1080_v20 }
 0x14d   :  { %1425 = vst [vmem:[%s2120_s3 + $0x28] sm:$0xff] %v1409_v22  }
 0x14e   :  { %v1789_v25 = vpop.eup %1788  ;;  %1424 = vst [vmem:[%s2120_s3 + $0x20] sm:$0xff] %v1404_v23  }
 0x14f   :  { %v1791_v26 = vpop.eup %1790  ;;  %v1086_v0 = vmul.f32 %v1789_v25, %v2062_v24 }
 0x150   :  { %v1793_v27 = vpop.eup %1792  ;;  %v1084_v3 = vmul.f32 %v1791_v26, %v2065_v29 }
 0x151   :  { %v1795_v55 = vpop.eup %1794  ;;  %v1087_v60 = vmul.f32 %v1793_v27, %v2069_v35 }
 0x152   :  { %v1085_v28 = vmul.f32 %v1795_v55, %v2073_v40 }
 0x153   :  { %v1419_v31 = vpack.c.bf16 %v1087_v60, %v1086_v0 }
 0x154   :  { %v1414_v32 = vpack.c.bf16 %v1085_v28, %v1084_v3 }
 0x155   :  { %1427 = vst [vmem:[%s2120_s3 + $0x38] sm:$0xff] %v1419_v31  }
 0x156   :  { %1426 = vst [vmem:[%s2120_s3 + $0x30] sm:$0xff] %v1414_v32  }

// kernel: vqvae_forward.9
= control target key start
LH: loop header
LB: loop body
LE: loop exit
PB: predicated region body
PF: predicated region fallthrough
CT: control target
= control target key end

     0   :  { %s5463_s12 = smov 0   ;;  %s6668_s0 = inlined_call_operand.vmem [shape: bf16[2,18,18,128], index: 0, kind: input, shape index: {}]   ;;  %s6669_s1 = inlined_call_operand.vmem [shape: bf16[9,128,128], index: 1, kind: input, shape index: {}]   ;;  %s6670_s2 = inlined_call_operand.vmem [shape: f32[1,128], index: 2, kind: input, shape index: {}]   ;;  %s6671_s3 = inlined_call_operand.vmem [shape: bf16[512,128], index: 3, kind: output, shape index: {}]  }
   0x1 LB: > { %s5469_s13 = sadd.s32 4294967295, %s5441_s12   ;;  %p3801_p0 = scmp.ge.s32.totalorder %s5441_s12, 1  ;;  %s5441_s12 = sphi %s5463_s12, %s13_s12  }
   0x2   : > { %p137_p1 = scmp.lt.s32.totalorder %s5441_s12, 3 }
   0x4   : > { %p138_p2 = pnand %p3801_p0, %p137_p1 }
   0x6   : > { %141 = sbr.rel (%p138_p2) target bundleno = 592 (0x250), region = 32 }
   0xd   : > { %v5200_v0 = vld [vmem:[%s6669_s1 + $0x40] sm:$0xff]   ;;  %p161_p3 = scmp.lt.s32.totalorder %s5469_s13, 1  ;;  %v5202_v2 = vld [vmem:[%s6669_s1 + $0x48] sm:$0xff]   ;;  %v5204_v4 = vld [vmem:[%s6669_s1 + $0x50] sm:$0xff]   ;;  %vm243_vm0 = vsmask.f32 3328 }
   0xe   : > { %v5201_v1 = vld [vmem:[%s6669_s1 + $0x100] sm:$0xff]   ;;  %4487 = vmatprep.subr.bf16.mxu1 %v5200_v0  ;;  %v5203_v3 = vld [vmem:[%s6669_s1 + $0x108] sm:$0xff]   ;;  %v5205_v5 = vld [vmem:[%s6669_s1 + $0x110] sm:$0xff]   ;;  %vm244_vm1 = vsmask.f32 7440  ;;  %vm1241_vm3 = vcmask 1042432  }
   0xf   : > { %4679 = vmatprep.subr.bf16.mxu0 %v5201_v1  ;;  %4488 = vmatpush3.bf16.msra.mxu1 %v5200_v0  ;;  %s162_s26 = scalar_select %p161_p3, %s5469_s13, 1  ;;  %v5206_v6 = vld [vmem:[%s6669_s1 + $0x58] sm:$0xff]   ;;  %v5208_v8 = vld [vmem:[%s6669_s1 + $0x60] sm:$0xff]   ;;  %v5210_v10 = vld [vmem:[%s6669_s1 + $0x68] sm:$0xff]   ;;  %vm1242_vm4 = vcmask 1046532  }
  0x10   : > { %4680 = vmatpush3.bf16.msra.mxu0 %v5201_v1  ;;  %4489 = vmatprep.subr.bf16.mxu1 %v5202_v2  ;;  %v5207_v7 = vld [vmem:[%s6669_s1 + $0x118] sm:$0xff]   ;;  %v5209_v9 = vld [vmem:[%s6669_s1 + $0x120] sm:$0xff]   ;;  %v5211_v11 = vld [vmem:[%s6669_s1 + $0x128] sm:$0xff]   ;;  %s3803_s8 = sshll.u32 %s5469_s13, 5 }
  0x11   : > { %4681 = vmatprep.subr.bf16.mxu0 %v5203_v3  ;;  %s5191_s4 = smul.u32 216, %s162_s26  ;;  %v5212_v17 = vld [vmem:[%s6669_s1 + $0x70] sm:$0xff]   ;;  %v5214_v36 = vld [vmem:[%s6669_s1 + $0x78] sm:$0xff]   ;;  %vm5553_vm2 = vmor %vm243_vm0, %vm244_vm1  ;;  %p6517_p4 = scmp.lt.s32.totalorder %s3803_s8, 63 }
  0x12   : > { %v5213_v31 = vld [vmem:[%s6669_s1 + $0x130] sm:$0xff]   ;;  %v5215_v53 = vld [vmem:[%s6669_s1 + $0x138] sm:$0xff]   ;;  %v5216_v1 = vld [vmem:[%s6669_s1] sm:$0xff]  }
  0x13   : > { %4490 = vmatpush3.bf16.msra.mxu1 %v5202_v2  ;;  %s5508_s11 = scalar_lea.vmem %s6668_s0, %s5191_s4  ;;  %vm5760_vm5 = vmor %vm1241_vm3, %vm1242_vm4  ;;  %v5434_v37 = vld [vmem:[%s6669_s1 + $0x138] sm:$0xff]   ;;  %s6717_s8 = smov (!%p6517_p4, %s3803_s8), 63 }
  0x14   : > { %4682 = vmatpush3.bf16.msra.mxu0 %v5203_v3  ;;  %4491 = vmatprep.subr.bf16.mxu1 %v5204_v4  ;;  %v5517_v12 = vld [vmem:[%s5508_s11] sm:$0xf]  ;;  %v5520_v13 = vld [vmem:[%s5508_s11 + $0x4] sm:$0xf]  ;;  %v175_v14 = vld [vmem:[%s5508_s11 + $0x8] sm:$0x1] }
  0x15   : > { %4683 = vmatprep.subr.bf16.mxu0 %v5205_v5  ;;  %v247_v15 = vshrl.u32 %v5517_v12, 16  ;;  %v250_v16 = vshll.u32 %v5517_v12, 16  ;;  %v256_v18 = vshll.u32 %v5520_v13, 16  ;;  %v260_v19 = vshrl.u32 %v5520_v13, 16  ;;  %v5531_v21 = vld [vmem:[%s5508_s11 + $0xc] sm:$0xf] }
  0x16   : > { %v266_v20 = vshll.u32 %v175_v14, 16  ;;  %v5534_v24 = vld [vmem:[%s5508_s11 + $0x10] sm:$0xf]  ;;  %v5537_v25 = vld [vmem:[%s5508_s11 + $0x14] sm:$0x1]  ;;  %v271_v30 = vshrl.u32 %v5531_v21, 16 }
  0x17   : > { %4492 = vmatpush3.bf16.msra.mxu1 %v5204_v4  ;;  %v249_v22 = vrot.slane %v247_v15, 4  ;;  %v252_v23 = vrot.slane %v250_v16, 5  ;;  %v258_v27 = vrot.slane %v256_v18, 5  ;;  %v262_v28 = vrot.slane %v260_v19, 4  ;;  %v5559_v41 = vld [vmem:[%s5508_s11 + $0x18] sm:$0xf] }
  0x18   : > { %4684 = vmatpush3.bf16.msra.mxu0 %v5205_v5  ;;  %4493 = vmatprep.subr.bf16.mxu1 %v5206_v6  ;;  %v268_v29 = vrot.slane %v266_v20, 5  ;;  %v274_v33 = vshll.u32 %v5531_v21, 16  ;;  %v280_v34 = vshll.u32 %v5534_v24, 16  ;;  %v284_v35 = vshrl.u32 %v5534_v24, 16  ;;  %v5562_v42 = vld [vmem:[%s5508_s11 + $0x1c] sm:$0xf] }
  0x19   : > { %4685 = vmatprep.subr.bf16.mxu0 %v5207_v7  ;;  %v253_v32 = vor.u32 %v252_v23, %v249_v22  ;;  %v263_v38 = vor.u32 %v262_v28, %v258_v27  ;;  %v273_v39 = vrot.slane %v271_v30, 4  ;;  %v290_v40 = vshll.u32 %v5537_v25, 16  ;;  %v5569_v48 = vld [vmem:[%s5508_s11 + $0x20] sm:$0x1]  ;;  %v5586_v3 = vld [vmem:[%s5508_s11 + $0x24] sm:$0xf] }
  0x1a   : > { %v5566_v43 = vcombine.low %v5531_v21, %v5534_v24  ;;  %v276_v45 = vrot.slane %v274_v33, 5  ;;  %v282_v46 = vrot.slane %v280_v34, 5  ;;  %v286_v47 = vrot.slane %v284_v35, 4  ;;  %v5601_v14 = vld [vmem:[%s5508_s11 + $0x2c] sm:$0x1]  ;;  %s3804_s9 = sshll.u32 %s6717_s8, 2 }
  0x1b   : > { %4494 = vmatpush3.bf16.msra.mxu1 %v5206_v6  ;;  %v254_v44 = vrot.slane %v253_v32, 4  ;;  %v264_v49 = vrot.slane %v263_v38, 4  ;;  %v292_v50 = vrot.slane %v290_v40, 5  ;;  %v295_v51 = vshrl.u32 %v5559_v41, 16  ;;  %v5606_v22 = vld [vmem:[%s5508_s11 + $0x30] sm:$0xf]  ;;  %s6554_s15 = scalar_lea.vmem %s6671_s3, %s3804_s9 }
  0x1c   : > { %4686 = vmatpush3.bf16.msra.mxu0 %v5207_v7  ;;  %4495 = vmatprep.subr.bf16.mxu1 %v5208_v8  ;;  %v298_v52 = vshll.u32 %v5559_v41, 16  ;;  %v277_v55 = vor.u32 %v276_v45, %v273_v39  ;;  %v287_v56 = vor.u32 %v286_v47, %v282_v46  ;;  %v304_v57 = vshll.u32 %v5562_v42, 16  ;;  %v5611_v30 = vld [vmem:[%s5508_s11 + $0x34] sm:$0xf]  ;;  %v5219_v34 = vld [vmem:[%s6669_s1 + $0x8] sm:$0xff]  }
  0x1d   : > { %4687 = vmatprep.subr.bf16.mxu0 %v5209_v9  ;;  %v259_v54 = vsel %vm5553_vm2, %v254_v44, %v258_v27  ;;  %v269_v58 = vsel %vm5553_vm2, %v264_v49, %v268_v29  ;;  %v297_v59 = vrot.slane %v295_v51, 4  ;;  %v308_v61 = vshrl.u32 %v5562_v42, 16  ;;  %v5620_v35 = vld [vmem:[%s5508_s11 + $0x38] sm:$0x1] }
  0x1e   : > { %v300_v60 = vrot.slane %v298_v52, 5  ;;  %v3821_v62 = vcombine.low %v259_v54, %v269_v58  ;;  %v278_v63 = vrot.slane %v277_v55, 4  ;;  %v288_v0 = vrot.slane %v287_v56, 4  ;;  %v5635_v58 = vld [vmem:[%s5508_s11 + $0x3c] sm:$0xf] }
  0x1f   : > { %4496 = vmatpush3.bf16.msra.mxu1 %v5208_v8  ;;  %v306_v2 = vrot.slane %v304_v57, 5  ;;  %v310_v5 = vrot.slane %v308_v61, 4  ;;  %v314_v6 = vshll.u32 %v5569_v48, 16  ;;  %v1263_v7 = vrot.slane %v5569_v48, 5  ;;  %v5217_v8 = vld [vmem:[%s6669_s1 + $0x140] sm:$0xff]  }
  0x20   : > { %4688 = vmatpush3.bf16.msra.mxu0 %v5209_v9  ;;  %4497 = vmatprep.subr.bf16.mxu1 %v5210_v10  ;;  %v301_v4 = vor.u32 %v300_v60, %v297_v59  ;;  %v5594_v9 = vld [vmem:[%s5508_s11 + $0x28] sm:$0xf]  ;;  %v319_v15 = vshrl.u32 %v5586_v3, 16  ;;  %v322_v16 = vshll.u32 %v5586_v3, 16  ;;  %v338_v33 = vshll.u32 %v5601_v14, 16  ;;  %v5222_v59 = vld [vmem:[%s6669_s1 + $0x10] sm:$0xff]  }
  0x21   : > { %4689 = vmatprep.subr.bf16.mxu0 %v5211_v11  ;;  %4503 = vmatprep.mubr.bf16.mxu1 %v3821_v62  ;;  %v311_v19 = vor.u32 %v310_v5, %v306_v2  ;;  %v316_v20 = vrot.slane %v314_v6, 5  ;;  %v328_v28 = vshll.u32 %v5594_v9, 16  ;;  %v332_v29 = vshrl.u32 %v5594_v9, 16 }
  0x22   : > { %v302_v18 = vrot.slane %v301_v4, 4  ;;  %v321_v23 = vrot.slane %v319_v15, 4  ;;  %v324_v27 = vrot.slane %v322_v16, 5  ;;  %v346_v44 = vshll.u32 %v5606_v22, 16  ;;  %v5220_v16 = vld [vmem:[%s6669_s1 + $0x150] sm:$0xff]  }
  0x23   : > { %4498 = vmatpush3.bf16.msra.mxu1 %v5210_v10  ;;  %v283_v10 = vsel %vm5553_vm2, %v278_v63, %v282_v46  ;;  %v312_v32 = vrot.slane %v311_v19, 4  ;;  %v330_v39 = vrot.slane %v328_v28, 5  ;;  %v334_v40 = vrot.slane %v332_v29, 4  ;;  %v5218_v46 = vld [vmem:[%s6669_s1 + $0x148] sm:$0xff]  }
  0x24   : > { %4690 = vmatpush3.bf16.msra.mxu0 %v5211_v11  ;;  %4499 = vmatprep.subr.bf16.mxu1 %v5212_v17  ;;  %v293_v11 = vsel %vm5553_vm2, %v288_v0, %v292_v50  ;;  %v325_v38 = vor.u32 %v324_v27, %v321_v23  ;;  %v340_v47 = vrot.slane %v338_v33, 5  ;;  %v352_v50 = vshll.u32 %v5611_v30, 16  ;;  %v5649_v0 = vld [vmem:[%s5508_s11 + $0x40] sm:$0xf]  ;;  %v5666_v27 = vld [vmem:[%s5508_s11 + $0x48] sm:$0xf] }
  0x25   : > { %4691 = vmatprep.subr.bf16.mxu0 %v5213_v31  ;;  %v317_v45 = vsel %vm5553_vm2, %v312_v32, %v316_v20  ;;  %v348_v54 = vrot.slane %v346_v44, 5  ;;  %v356_v56 = vshrl.u32 %v5611_v30, 16  ;;  %v362_v57 = vshll.u32 %v5620_v35, 16  ;;  %v5669_v28 = vld [vmem:[%s5508_s11 + $0x4c] sm:$0xf] }
  0x26   : > { %v326_v52 = vrot.slane %v325_v38, 4  ;;  %v354_v55 = vrot.slane %v352_v50, 5  ;;  %v5642_v60 = vcombine.low %v5559_v41, %v5562_v42  ;;  %v370_v6 = vshll.u32 %v5635_v58, 16  ;;  %v5675_v33 = vld [vmem:[%s5508_s11 + $0x50] sm:$0x1] }
  0x27   : > { %4500 = vmatpush3.bf16.msra.mxu1 %v5212_v17  ;;  %v3822_v17 = vcombine.low %v283_v10, %v293_v11  ;;  %v358_v4 = vrot.slane %v356_v56, 4  ;;  %v364_v5 = vrot.slane %v362_v57, 5  ;;  %v376_v10 = vshll.u32 %v5649_v0, 16 }
  0x28   : > { %4692 = vmatpush3.bf16.msra.mxu0 %v5213_v31  ;;  %4501 = vmatprep.subr.bf16.mxu1 %v5214_v36  ;;  %v307_v31 = vsel %vm5553_vm2, %v302_v18, %v306_v2  ;;  %v331_v61 = vsel %vm5553_vm2, %v326_v52, %v330_v39  ;;  %v367_v2 = vshrl.u32 %v5635_v58, 16  ;;  %v372_v20 = vrot.slane %v370_v6, 5  ;;  %v5706_v6 = vld [vmem:[%s5508_s11 + $0x58] sm:$0xf] }
  0x29   : > { %4693 = vmatprep.subr.bf16.mxu0 %v5215_v53  ;;  %4695 = vmatprep.mubr.bf16.mxu0 %v3822_v17  ;;  %v5630_v51 = vcombine.low %v307_v31, %v317_v45  ;;  %v359_v19 = vor.u32 %v358_v4, %v354_v55  ;;  %v378_v23 = vrot.slane %v376_v10, 5  ;;  %v400_v44 = vshll.u32 %v5669_v28, 16  ;;  %v5221_v45 = vld [vmem:[%s6669_s1 + $0x158] sm:$0xff]  }
  0x2a   : > { %v404_v50 = vshrl.u32 %v5669_v28, 16  ;;  %v5709_v10 = vld [vmem:[%s5508_s11 + $0x5c] sm:$0x1] }
  0x2b   : > { %4502 = vmatpush3.bf16.msra.mxu1 %v5214_v36  ;;  %v343_v36 = vshrl.u32 %v5606_v22, 16  ;;  %v360_v38 = vrot.slane %v359_v19, 4 }
  0x2c   : > { %4694 = vmatpush3.bf16.msra.mxu0 %v5215_v53  ;;  %4535 = vmatprep.subr.bf16.mxu1 %v5216_v1  ;;  %v335_v53 = vor.u32 %v334_v40, %v330_v39  ;;  %v394_v40 = vshll.u32 %v5666_v27, 16 }
  0x2d   : > { %4727 = vmatprep.subr.bf16.mxu0 %v5217_v8  ;;  %v345_v49 = vrot.slane %v343_v36, 4  ;;  %v5225_v36 = vld [vmem:[%s6669_s1 + $0x18] sm:$0xff]   ;;  %v365_v52 = vsel %vm5553_vm2, %v360_v38, %v364_v5  ;;  %v5703_v5 = vld [vmem:[%s5508_s11 + $0x54] sm:$0xf] }
  0x2e   : > { %4504 = vmatmul.mubr.bf16.vlgmr.msra.gmra.mrb[0].mxu1 %v3822_v17  ;;  %v336_v62 = vrot.slane %v335_v53, 4  ;;  %v380_v17 = vshrl.u32 %v5649_v0, 16  ;;  %v415_v19 = vshrl.u32 %v5703_v5, 16 }
  0x2f   : > { %4536 = vmatpush3.bf16.msra.mxu1 %v5216_v1  ;;  %4696 = vmatmul.mubr.bf16.vlgmr.msra.gmra.mrb[0].mxu0 %v5630_v51  ;;  %v349_v63 = vor.u32 %v348_v54, %v345_v49  ;;  %v5652_v1 = vld [vmem:[%s5508_s11 + $0x44] sm:$0x1]  ;;  %v396_v54 = vrot.slane %v394_v40, 5  ;;  %v428_v40 = vshrl.u32 %v5706_v6, 16 }
  0x30   : > { %4537 = vmatprep.subr.bf16.mxu1 %v5219_v34  ;;  %4507 = vmatprep.mubr.bf16.mxu1 %v5630_v51  ;;  %v341_v11 = vsel %vm5553_vm2, %v336_v62, %v340_v47  ;;  %v382_v31 = vrot.slane %v380_v17, 4  ;;  %v386_v32 = vshll.u32 %v5652_v1, 16  ;;  %v410_v62 = vshll.u32 %v5675_v33, 16 }
  0x31   : > { %4728 = vmatpush3.bf16.msra.mxu0 %v5217_v8  ;;  %v350_v15 = vrot.slane %v349_v63, 4  ;;  %v369_v8 = vrot.slane %v367_v2, 4  ;;  %v5663_v18 = vcombine.low %v331_v61, %v341_v11  ;;  %v406_v61 = vrot.slane %v404_v50, 4  ;;  %v5223_v63 = vld [vmem:[%s6669_s1 + $0x160] sm:$0xff]   ;;  %v5743_v50 = vld [vmem:[%s5508_s11 + $0x68] sm:$0x1] }
  0x32   : > { %4729 = vmatprep.subr.bf16.mxu0 %v5218_v46  ;;  %v383_v47 = vor.u32 %v382_v31, %v378_v23  ;;  %v388_v49 = vrot.slane %v386_v32, 5  ;;  %v5228_v2 = vld [vmem:[%s6669_s1 + $0x20] sm:$0xff]   ;;  %v5713_v11 = vcombine.low %v5586_v3, %v5594_v9  ;;  %v412_v17 = vrot.slane %v410_v62, 5 }
  0x33   : > { %4538 = vmatpush3.bf16.msra.mxu1 %v5219_v34  ;;  %6690 = vst [vmem:[#allocation2_spill] sm:$0xff] %v5663_v18  ;;  %v355_v29 = vsel %vm5553_vm2, %v350_v15, %v354_v55  ;;  %v391_v34 = vshrl.u32 %v5666_v27, 16  ;;  %4699 = vmatprep.mubr.bf16.mxu0 %v5663_v18  ;;  %v373_v39 = vor.u32 %v372_v20, %v369_v8  ;;  %v402_v55 = vrot.slane %v400_v44, 5  ;;  %v5729_v32 = vld [vmem:[%s5508_s11 + $0x60] sm:$0xf] }
  0x34   : > { %4539 = vmatprep.subr.bf16.mxu1 %v5222_v59  ;;  %v5691_v56 = vcombine.low %v355_v29, %v365_v52  ;;  %v384_v57 = vrot.slane %v383_v47, 4  ;;  %v5717_v15 = vcombine.low %v5606_v22, %v5611_v30  ;;  %v418_v29 = vshll.u32 %v5703_v5, 16  ;;  %v5737_v47 = vld [vmem:[%s5508_s11 + $0x64] sm:$0xf] }
  0x35   : > { %4730 = vmatpush3.bf16.msra.mxu0 %v5218_v46  ;;  %v393_v46 = vrot.slane %v391_v34, 4  ;;  %v374_v53 = vrot.slane %v373_v39, 4  ;;  %v407_v8 = vor.u32 %v406_v61, %v402_v55  ;;  %v424_v31 = vshll.u32 %v5706_v6, 16  ;;  %v5230_v34 = vld [vmem:[%s6669_s1 + $0x28] sm:$0xff]  }
  0x36   : > { %4508 = vmatmul.mubr.bf16.gmra.mrb[4].mxu1 %v5663_v18  ;;  %4731 = vmatprep.subr.bf16.mxu0 %v5220_v16  ;;  %6691 = vst [vmem:[#allocation3_spill] sm:$0xff] %v5691_v56  ;;  %v417_v39 = vrot.slane %v415_v19, 4  ;;  %v434_v44 = vshll.u32 %v5709_v10, 16  ;;  %v439_v52 = vshrl.u32 %v5729_v32, 16  ;;  %v458_v19 = vshll.u32 %v5743_v50, 16 }
  0x37   : > { %4540 = vmatpush3.bf16.msra.mxu1 %v5222_v59  ;;  %v379_v4 = vsel %vm5553_vm2, %v374_v53, %v378_v23  ;;  %v397_v59 = vor.u32 %v396_v54, %v393_v46  ;;  %4700 = vmatmul.mubr.bf16.gmra.mrb[4].mxu0 %v5691_v56  ;;  %v408_v38 = vrot.slane %v407_v8, 4  ;;  %v426_v46 = vrot.slane %v424_v31, 5 }
  0x38   : > { %4541 = vmatprep.subr.bf16.mxu1 %v5225_v36  ;;  %4511 = vmatprep.mubr.bf16.mxu1 %v5691_v56  ;;  %v430_v54 = vrot.slane %v428_v40, 4  ;;  %v5771_v40 = vld [vmem:[%s5508_s11 + $0x6c] sm:$0xf] }
  0x39   : > { %4732 = vmatpush3.bf16.msra.mxu0 %v5220_v16  ;;  %v389_v16 = vsel %vm5553_vm2, %v384_v57, %v388_v49  ;;  %v398_v23 = vrot.slane %v397_v59, 4  ;;  %v413_v53 = vsel %vm5553_vm2, %v408_v38, %v412_v17  ;;  %v436_v57 = vrot.slane %v434_v44, 5 }
  0x3a   : > { %4733 = vmatprep.subr.bf16.mxu0 %v5221_v45  ;;  %v5724_v20 = vcombine.low %v379_v4, %v389_v16  ;;  %v441_v4 = vrot.slane %v439_v52, 4  ;;  %v448_v59 = vshll.u32 %v5737_v47, 16  ;;  %v431_v16 = vor.u32 %v430_v54, %v426_v46 }
  0x3b   : > { %4542 = vmatpush3.bf16.msra.mxu1 %v5225_v36  ;;  %v403_v49 = vsel %vm5553_vm2, %v398_v23, %v402_v55  ;;  %v420_v36 = vrot.slane %v418_v29, 5  ;;  %v442_v55 = vshll.u32 %v5729_v32, 16  ;;  %v452_v17 = vshrl.u32 %v5737_v47, 16  ;;  %v5232_v29 = vld [vmem:[%s6669_s1 + $0x30] sm:$0xff]  }
  0x3c   : > { %6692 = vst [vmem:[#allocation4_spill] sm:$0xff] %v5724_v20  ;;  %4543 = vmatprep.subr.bf16.mxu1 %v5228_v2  ;;  %4703 = vmatprep.mubr.bf16.mxu0 %v5724_v20  ;;  %v5753_v61 = vcombine.low %v403_v49, %v413_v53  ;;  %v450_v31 = vrot.slane %v448_v59, 5  ;;  %v3870_v38 = vrot.slane %v5531_v21, 9  ;;  %v432_v44 = vrot.slane %v431_v16, 4  ;;  %v5778_v53 = vld [vmem:[%s5508_s11 + $0x70] sm:$0xf] }
  0x3d   : > { %4734 = vmatpush3.bf16.msra.mxu0 %v5221_v45  ;;  %v5224_v45 = vld [vmem:[%s6669_s1 + $0x168] sm:$0xff]   ;;  %v421_v62 = vor.u32 %v420_v36, %v417_v39  ;;  %v444_v8 = vrot.slane %v442_v55, 5  ;;  %v1253_v39 = vrot.slane %v5534_v24, 5  ;;  %v454_v36 = vrot.slane %v452_v17, 4 }
  0x3e   : > { %4512 = vmatmul.mubr.bf16.gmra.mrb[8].mxu1 %v5724_v20  ;;  %4735 = vmatprep.subr.bf16.mxu0 %v5223_v63  ;;  %6693 = vst [vmem:[#allocation5_spill] sm:$0xff] %v5753_v61  ;;  %v460_v52 = vrot.slane %v458_v19, 5  ;;  %v1256_v55 = vrot.slane %v5537_v25, 5  ;;  %v437_v59 = vsel %vm5553_vm2, %v432_v44, %v436_v57  ;;  %v472_v19 = vshll.u32 %v5778_v53, 16 }
  0x3f   : > { %4544 = vmatpush3.bf16.msra.mxu1 %v5228_v2  ;;  %4515 = vmatprep.mubr.bf16.mxu1 %v5753_v61  ;;  %v422_v2 = vrot.slane %v421_v62, 4  ;;  %v445_v49 = vor.u32 %v444_v8, %v441_v4  ;;  %v1254_v24 = vsel %vm5760_vm5, %v3870_v38, %v1253_v39  ;;  %v1255_v54 = vrot.slane %v1253_v39, 4  ;;  %v5786_v62 = vld [vmem:[%s5508_s11 + $0x74] sm:$0x1]  ;;  %v5234_v4 = vld [vmem:[%s6669_s1 + $0x38] sm:$0xff]  }
  0x40   : > { %4545 = vmatprep.subr.bf16.mxu1 %v5230_v34  ;;  %4704 = vmatmul.mubr.bf16.gmra.mrb[8].mxu0 %v5753_v61  ;;  %v455_v8 = vor.u32 %v454_v36, %v450_v31  ;;  %v474_v36 = vrot.slane %v472_v19, 5  ;;  %v1274_v20 = vrot.slane %v5611_v30, 5 }
  0x41   : > { %4736 = vmatpush3.bf16.msra.mxu0 %v5223_v63  ;;  %v5226_v63 = vld [vmem:[%s6669_s1 + $0x170] sm:$0xff]   ;;  %v427_v21 = vsel %vm5553_vm2, %v422_v2, %v426_v46  ;;  %v446_v16 = vrot.slane %v445_v49, 4  ;;  %v463_v46 = vshrl.u32 %v5771_v40, 16  ;;  %v1257_v25 = vsel %vm5760_vm5, %v1255_v54, %v1256_v55  ;;  %v5801_v2 = vld [vmem:[%s5508_s11 + $0x78] sm:$0xf] }
  0x42   : > { %4737 = vmatprep.subr.bf16.mxu0 %v5224_v45  ;;  %v5794_v17 = vcombine.low %v427_v21, %v437_v59  ;;  %v456_v38 = vrot.slane %v455_v8, 4  ;;  %v5808_v39 = vcombine.low %v1254_v24, %v1257_v25  ;;  %v476_v21 = vshrl.u32 %v5778_v53, 16  ;;  %v5815_v54 = vld [vmem:[%s5508_s11 + $0x7c] sm:$0xf] }
  0x43   : > { %4546 = vmatpush3.bf16.msra.mxu1 %v5230_v34  ;;  %v466_v34 = vshll.u32 %v5771_v40, 16  ;;  %v451_v57 = vsel %vm5553_vm2, %v446_v16, %v450_v31  ;;  %v465_v44 = vrot.slane %v463_v46, 4  ;;  %v482_v31 = vshll.u32 %v5786_v62, 16  ;;  %v5822_v16 = vld [vmem:[%s5508_s11 + $0x80] sm:$0x1] }
  0x44   : > { %4547 = vmatprep.subr.bf16.mxu1 %v5232_v29  ;;  %6696 = vst [vmem:[#allocation6_spill] sm:$0xff] %v5794_v17  ;;  %4707 = vmatprep.mubr.bf16.mxu0 %v5794_v17  ;;  %v461_v55 = vsel %vm5553_vm2, %v456_v38, %v460_v52  ;;  %v3871_v59 = vrot.slane %v5559_v41, 9  ;;  %v1260_v24 = vrot.slane %v5562_v42, 5  ;;  %v487_v8 = vshrl.u32 %v5801_v2, 16  ;;  %v5830_v52 = vld [vmem:[%s6669_s1 + $0x80] sm:$0xff]  }
  0x45   : > { %4738 = vmatpush3.bf16.msra.mxu0 %v5224_v45  ;;  %v5227_v45 = vld [vmem:[%s6669_s1 + $0x178] sm:$0xff]   ;;  %v468_v49 = vrot.slane %v466_v34, 5  ;;  %v5825_v46 = vcombine.low %v451_v57, %v461_v55  ;;  %v478_v34 = vrot.slane %v476_v21, 4  ;;  %v484_v19 = vrot.slane %v482_v31, 5  ;;  %v5839_v38 = vld [vmem:[%s5508_s11 + $0x84] sm:$0xf] }
  0x46   : > { %4739 = vmatprep.subr.bf16.mxu0 %v5226_v63  ;;  %4516 = vmatmul.mubr.bf16.gmra.mrb[12].mxu1 %v5794_v17  ;;  %v1261_v41 = vsel %vm5760_vm5, %v3871_v59, %v1260_v24  ;;  %v1262_v42 = vrot.slane %v1260_v24, 4  ;;  %v489_v57 = vrot.slane %v487_v8, 4  ;;  %v496_v21 = vshll.u32 %v5815_v54, 16 }
  0x47   : > { %4548 = vmatpush3.bf16.msra.mxu1 %v5232_v29  ;;  %6697 = vst [vmem:[#allocation7_spill] sm:$0xff] %v5825_v46  ;;  %v469_v25 = vor.u32 %v468_v49, %v465_v44  ;;  %v5229_v29 = vld [vmem:[%s6669_s1 + $0x180] sm:$0xff]   ;;  %4519 = vmatprep.mubr.bf16.mxu1 %v5825_v46  ;;  %v479_v49 = vor.u32 %v478_v34, %v474_v36  ;;  %v500_v31 = vshrl.u32 %v5815_v54, 16  ;;  %v506_v24 = vshll.u32 %v5822_v16, 16 }
  0x48   : > { %4549 = vmatprep.subr.bf16.mxu1 %v5234_v4  ;;  %4708 = vmatmul.mubr.bf16.gmra.mrb[12].mxu0 %v5825_v46  ;;  %v1264_v55 = vsel %vm5760_vm5, %v1262_v42, %v1263_v7  ;;  %v3872_v8 = vrot.slane %v5586_v3, 9  ;;  %v498_v46 = vrot.slane %v496_v21, 5  ;;  %v5859_v3 = vld [vmem:[%s5508_s11 + $0x88] sm:$0xf] }
  0x49   : > { %4740 = vmatpush3.bf16.msra.mxu0 %v5226_v63  ;;  %v490_v63 = vshll.u32 %v5801_v2, 16  ;;  %v470_v44 = vrot.slane %v469_v25, 4  ;;  %4743 = vmatprep.mubr.bf16.mxu0 %v5808_v39  ;;  %v480_v34 = vrot.slane %v479_v49, 4  ;;  %v5854_v26 = vcombine.low %v1261_v41, %v1264_v55 }
  0x4a   : > { %4741 = vmatprep.subr.bf16.mxu0 %v5227_v45  ;;  %v502_v7 = vrot.slane %v500_v31, 4  ;;  %v508_v42 = vrot.slane %v506_v24, 5  ;;  %v511_v41 = vshrl.u32 %v5839_v38, 16  ;;  %v5231_v31 = vld [vmem:[%s6669_s1 + $0x188] sm:$0xff]   ;;  %v5878_v24 = vld [vmem:[%s5508_s11 + $0x90] sm:$0xf] }
  0x4b   : > { %v492_v59 = vrot.slane %v490_v63, 5  ;;  %4550 = vmatpush3.bf16.msra.mxu1 %v5234_v4  ;;  %v475_v25 = vsel %vm5553_vm2, %v470_v44, %v474_v36  ;;  %v1267_v63 = vrot.slane %v5594_v9, 5  ;;  %v485_v4 = vsel %vm5553_vm2, %v480_v34, %v484_v19  ;;  %v5865_v36 = vld [vmem:[%s5508_s11 + $0x8c] sm:$0x1]  ;;  %v5881_v34 = vld [vmem:[%s5508_s11 + $0x94] sm:$0xf] }
  0x4c   : > { %4583 = vmatprep.subr.bf16.mxu1 %v5830_v52  ;;  %v514_v44 = vshll.u32 %v5839_v38, 16  ;;  %v503_v21 = vor.u32 %v502_v7, %v498_v46  ;;  %v513_v55 = vrot.slane %v511_v41, 4  ;;  %v530_v7 = vshll.u32 %v5865_v36, 16 }
  0x4d   : > { %4742 = vmatpush3.bf16.msra.mxu0 %v5227_v45  ;;  %v493_v48 = vor.u32 %v492_v59, %v489_v57  ;;  %v1270_v45 = vrot.slane %v5601_v14, 5  ;;  %v5869_v57 = vcombine.low %v475_v25, %v485_v4  ;;  %v1268_v9 = vsel %vm5760_vm5, %v3872_v8, %v1267_v63 }
  0x4e   : > { %4775 = vmatprep.subr.bf16.mxu0 %v5229_v29  ;;  %v1269_v19 = vrot.slane %v1267_v63, 4  ;;  %v516_v14 = vrot.slane %v514_v44, 5  ;;  %v520_v59 = vshll.u32 %v5859_v3, 16  ;;  %v524_v8 = vshrl.u32 %v5859_v3, 16 }
  0x4f   : > { %6698 = vst [vmem:[#allocation8_spill] sm:$0xff] %v5869_v57  ;;  %v494_v49 = vrot.slane %v493_v48, 4  ;;  %4520 = vmatmul.mubr.bf16.gmra.mrb[16].mxu1 %v5869_v57  ;;  %v504_v48 = vrot.slane %v503_v21, 4  ;;  %v3873_v44 = vrot.slane %v5606_v22, 9  ;;  %v532_v21 = vrot.slane %v530_v7, 5  ;;  %v5233_v22 = vld [vmem:[%s6669_s1 + $0x190] sm:$0xff]  }
  0x50   : > { %4744 = vmatmul.mubr.bf16.vlgmr.msra.gmra.mrb[0].mxu0 %v5854_v26  ;;  %v1271_v63 = vsel %vm5760_vm5, %v1269_v19, %v1270_v45  ;;  %v517_v4 = vor.u32 %v516_v14, %v513_v55  ;;  %v522_v41 = vrot.slane %v520_v59, 5  ;;  %v1277_v45 = vrot.slane %v5620_v35, 5  ;;  %v5917_v59 = vld [vmem:[%s5508_s11 + $0x9c] sm:$0xf] }
  0x51   : > { %v499_v25 = vsel %vm5553_vm2, %v494_v49, %v498_v46  ;;  %4776 = vmatpush3.bf16.msra.mxu0 %v5229_v29  ;;  %v509_v57 = vsel %vm5553_vm2, %v504_v48, %v508_v42  ;;  %v5894_v46 = vcombine.low %v1268_v9, %v1271_v63  ;;  %v526_v49 = vrot.slane %v524_v8, 4  ;;  %v5905_v42 = vld [vmem:[%s5508_s11 + $0x98] sm:$0x1]  ;;  %v5920_v63 = vld [vmem:[%s5508_s11 + $0xa0] sm:$0xf] }
  0x52   : > { %v5896_v17 = vcombine.low %v499_v25, %v509_v57  ;;  %v518_v61 = vrot.slane %v517_v4, 4  ;;  %4777 = vmatprep.subr.bf16.mxu0 %v5231_v31  ;;  %v535_v57 = vshrl.u32 %v5878_v24, 16  ;;  %v538_v9 = vshll.u32 %v5878_v24, 16 }
  0x53   : > { %4747 = vmatprep.mubr.bf16.mxu0 %v5894_v46  ;;  %v527_v29 = vor.u32 %v526_v49, %v522_v41  ;;  %v544_v19 = vshll.u32 %v5881_v34, 16  ;;  %v1275_v35 = vsel %vm5760_vm5, %v3873_v44, %v1274_v20  ;;  %v1276_v55 = vrot.slane %v1274_v20, 4  ;;  %v5927_v20 = vld [vmem:[%s5508_s11 + $0xa4] sm:$0x1] }
  0x54   : > { %6699 = vst [vmem:[#allocation9_spill] sm:$0xff] %v5896_v17  ;;  %4523 = vmatprep.mubr.bf16.mxu1 %v5896_v17  ;;  %v523_v30 = vsel %vm5553_vm2, %v518_v61, %v522_v41  ;;  %v548_v14 = vshrl.u32 %v5881_v34, 16  ;;  %v537_v48 = vrot.slane %v535_v57, 4  ;;  %v540_v8 = vrot.slane %v538_v9, 5 }
  0x55   : > { %v528_v25 = vrot.slane %v527_v29, 4  ;;  %4778 = vmatpush3.bf16.msra.mxu0 %v5231_v31  ;;  %v546_v7 = vrot.slane %v544_v19, 5  ;;  %v1278_v4 = vsel %vm5760_vm5, %v1276_v55, %v1277_v45  ;;  %v554_v61 = vshll.u32 %v5905_v42, 16  ;;  %v5235_v45 = vld [vmem:[%s6669_s1 + $0x198] sm:$0xff]  }
  0x56   : > { %v550_v49 = vrot.slane %v548_v14, 4  ;;  %v3874_v41 = vrot.slane %v5635_v58, 9  ;;  %4779 = vmatprep.subr.bf16.mxu0 %v5233_v22  ;;  %v5931_v44 = vcombine.low %v1275_v35, %v1278_v4  ;;  %v541_v29 = vor.u32 %v540_v8, %v537_v48 }
  0x57   : > { %v533_v31 = vsel %vm5553_vm2, %v528_v25, %v532_v21  ;;  %v1281_v57 = vrot.slane %v5649_v0, 5  ;;  %v556_v58 = vrot.slane %v554_v61, 5  ;;  %v1284_v55 = vrot.slane %v5652_v1, 5  ;;  %v5945_v25 = vld [vmem:[%s5508_s11 + $0xa8] sm:$0xf] }
  0x58   : > { %v5937_v9 = vcombine.low %v523_v30, %v533_v31  ;;  %v551_v19 = vor.u32 %v550_v49, %v546_v7  ;;  %4748 = vmatmul.mubr.bf16.gmra.mrb[4].mxu0 %v5931_v44  ;;  %v542_v14 = vrot.slane %v541_v29, 4  ;;  %v559_v0 = vshrl.u32 %v5917_v59, 16  ;;  %v5239_v30 = vld [vmem:[%s6669_s1 + $0x1a0] sm:$0xff]   ;;  %v5955_v49 = vld [vmem:[%s5508_s11 + $0xac] sm:$0xf] }
  0x59   : > { %v1282_v21 = vsel %vm5760_vm5, %v3874_v41, %v1281_v57  ;;  %v1283_v35 = vrot.slane %v1281_v57, 4  ;;  %v562_v1 = vshll.u32 %v5917_v59, 16  ;;  %v568_v8 = vshll.u32 %v5920_v63, 16  ;;  %4780 = vmatpush3.bf16.msra.mxu0 %v5233_v22 }
  0x5a   : > { %6700 = vst [vmem:[#allocation10_spill] sm:$0xff] %v5937_v9  ;;  %4524 = vmatmul.mubr.bf16.gmra.mrb[20].mxu1 %v5937_v9  ;;  %v552_v48 = vrot.slane %v551_v19, 4  ;;  %v572_v4 = vshrl.u32 %v5920_v63, 16  ;;  %v547_v61 = vsel %vm5553_vm2, %v542_v14, %v546_v7  ;;  %v561_v31 = vrot.slane %v559_v0, 4  ;;  %4781 = vmatprep.subr.bf16.mxu0 %v5235_v45  ;;  %v5970_v14 = vld [vmem:[%s5508_s11 + $0xb0] sm:$0x1] }
  0x5b   : > { %v1285_v41 = vsel %vm5760_vm5, %v1283_v35, %v1284_v55  ;;  %v578_v29 = vshll.u32 %v5927_v20, 16  ;;  %v564_v9 = vrot.slane %v562_v1, 5  ;;  %v570_v17 = vrot.slane %v568_v8, 5 }
  0x5c   : > { %v557_v57 = vsel %vm5553_vm2, %v552_v48, %v556_v58  ;;  %v5964_v19 = vcombine.low %v1282_v21, %v1285_v41  ;;  %v574_v56 = vrot.slane %v572_v4, 4  ;;  %v3875_v7 = vrot.slane %v5666_v27, 9 }
  0x5d   : > { %v5966_v22 = vcombine.low %v547_v61, %v557_v57  ;;  %v580_v18 = vrot.slane %v578_v29, 5  ;;  %v565_v55 = vor.u32 %v564_v9, %v561_v31  ;;  %v1288_v35 = vrot.slane %v5669_v28, 5  ;;  %4782 = vmatpush3.bf16.msra.mxu0 %v5235_v45  ;;  %v5243_v28 = vld [vmem:[%s6669_s1 + $0x1a8] sm:$0xff]  }
  0x5e   : > { %4751 = vmatprep.mubr.bf16.mxu0 %v5964_v19  ;;  %v1291_v0 = vrot.slane %v5675_v33, 5  ;;  %v583_v58 = vshrl.u32 %v5945_v25, 16  ;;  %v575_v21 = vor.u32 %v574_v56, %v570_v17  ;;  %v586_v48 = vshll.u32 %v5945_v25, 16  ;;  %4783 = vmatprep.subr.bf16.mxu0 %v5239_v30 }
  0x5f   : > { %6701 = vst [vmem:[#allocation11_spill] sm:$0xff] %v5966_v22  ;;  %4527 = vmatprep.mubr.bf16.mxu1 %v5966_v22  ;;  %v592_v1 = vshll.u32 %v5955_v49, 16  ;;  %v596_v27 = vshrl.u32 %v5955_v49, 16  ;;  %v566_v9 = vrot.slane %v565_v55, 4  ;;  %v1289_v33 = vsel %vm5760_vm5, %v3875_v7, %v1288_v35  ;;  %v5992_v22 = vld [vmem:[%s5508_s11 + $0xb4] sm:$0xf] }
  0x60   : > { %v1290_v45 = vrot.slane %v1288_v35, 4  ;;  %v585_v8 = vrot.slane %v583_v58, 4  ;;  %v576_v56 = vrot.slane %v575_v21, 4  ;;  %v588_v4 = vrot.slane %v586_v48, 5  ;;  %v5999_v48 = vld [vmem:[%s5508_s11 + $0xb8] sm:$0xf] }
  0x61   : > { %v594_v61 = vrot.slane %v592_v1, 5  ;;  %v598_v41 = vrot.slane %v596_v27, 4  ;;  %v571_v31 = vsel %vm5553_vm2, %v566_v9, %v570_v17  ;;  %v602_v57 = vshll.u32 %v5970_v14, 16  ;;  %4784 = vmatpush3.bf16.msra.mxu0 %v5239_v30  ;;  %v5247_v17 = vld [vmem:[%s6669_s1 + $0x1b0] sm:$0xff]   ;;  %v6009_v27 = vld [vmem:[%s5508_s11 + $0xbc] sm:$0x1] }
  0x62   : > { %v1292_v29 = vsel %vm5760_vm5, %v1290_v45, %v1291_v0  ;;  %v3876_v55 = vrot.slane %v5703_v5, 9  ;;  %v581_v7 = vsel %vm5553_vm2, %v576_v56, %v580_v18  ;;  %v589_v58 = vor.u32 %v588_v4, %v585_v8  ;;  %4785 = vmatprep.subr.bf16.mxu0 %v5243_v28  ;;  %v5251_v4 = vld [vmem:[%s6669_s1 + $0x1b8] sm:$0xff]  }
  0x63   : > { %v5996_v35 = vcombine.low %v1289_v33, %v1292_v29  ;;  %v599_v21 = vor.u32 %v598_v41, %v594_v61  ;;  %v6004_v0 = vcombine.low %v571_v31, %v581_v7  ;;  %v604_v5 = vrot.slane %v602_v57, 5 }
  0x64   : > { %v1295_v1 = vrot.slane %v5706_v6, 5  ;;  %v1298_v30 = vrot.slane %v5709_v10, 5  ;;  %v590_v18 = vrot.slane %v589_v58, 4  ;;  %v607_v33 = vshrl.u32 %v5992_v22, 16 }
  0x65   : > { %6702 = vst [vmem:[#allocation12_spill] sm:$0xff] %v6004_v0  ;;  %4752 = vmatmul.mubr.bf16.gmra.mrb[8].mxu0 %v5996_v35  ;;  %v600_v9 = vrot.slane %v599_v21, 4  ;;  %v610_v45 = vshll.u32 %v5992_v22, 16  ;;  %4528 = vmatmul.mubr.bf16.gmra.mrb[24].mxu1 %v6004_v0  ;;  %v616_v6 = vshll.u32 %v5999_v48, 16  ;;  %v620_v10 = vshrl.u32 %v5999_v48, 16 }
  0x66   : > { %v1296_v8 = vsel %vm5760_vm5, %v3876_v55, %v1295_v1  ;;  %v1297_v56 = vrot.slane %v1295_v1, 4  ;;  %4786 = vmatpush3.bf16.msra.mxu0 %v5243_v28  ;;  %v595_v41 = vsel %vm5553_vm2, %v590_v18, %v594_v61  ;;  %v609_v29 = vrot.slane %v607_v33, 4 }
  0x67   : > { %v605_v31 = vsel %vm5553_vm2, %v600_v9, %v604_v5  ;;  %v612_v57 = vrot.slane %v610_v45, 5  ;;  %4787 = vmatprep.subr.bf16.mxu0 %v5247_v17  ;;  %v618_v58 = vrot.slane %v616_v6, 5  ;;  %v622_v28 = vrot.slane %v620_v10, 4 }
  0x68   : > { %v6026_v55 = vcombine.low %v595_v41, %v605_v31  ;;  %v1299_v7 = vsel %vm5760_vm5, %v1297_v56, %v1298_v30  ;;  %v626_v0 = vshll.u32 %v6009_v27, 16  ;;  %v3877_v61 = vrot.slane %v5729_v32, 9  ;;  %v6041_v30 = vld [vmem:[%s6669_s1 + $0x1c0] sm:$0xff]  }
  0x69   : > { %v6030_v21 = vcombine.low %v1296_v8, %v1299_v7  ;;  %v613_v1 = vor.u32 %v612_v57, %v609_v29  ;;  %v623_v5 = vor.u32 %v622_v28, %v618_v58  ;;  %v1302_v18 = vrot.slane %v5737_v47, 5 }
  0x6a   : > { %4531 = vmatprep.mubr.bf16.mxu1 %v6026_v55  ;;  %v1305_v9 = vrot.slane %v5743_v50, 5  ;;  %v3878_v33 = vrot.slane %v5771_v40, 9  ;;  %4788 = vmatpush3.bf16.msra.mxu0 %v5247_v17  ;;  %v628_v8 = vrot.slane %v626_v0, 5  ;;  %v1309_v56 = vrot.slane %v5778_v53, 5 }
  0x6b   : > { %4755 = vmatprep.mubr.bf16.mxu0 %v6030_v21  ;;  %v614_v45 = vrot.slane %v613_v1, 4  ;;  %v1312_v6 = vrot.slane %v5786_v62, 5  ;;  %4789 = vmatprep.subr.bf16.mxu0 %v5251_v4  ;;  %v624_v10 = vrot.slane %v623_v5, 4  ;;  %v1303_v50 = vsel %vm5760_vm5, %v3877_v61, %v1302_v18 }
  0x6c   : > { %v1304_v41 = vrot.slane %v1302_v18, 4  ;;  %v3879_v17 = vrot.slane %v5801_v2, 9  ;;  %v1310_v29 = vsel %vm5760_vm5, %v3878_v33, %v1309_v56  ;;  %v1311_v57 = vrot.slane %v1309_v56, 4 }
  0x6d   : > { %v619_v31 = vsel %vm5553_vm2, %v614_v45, %v618_v58  ;;  %v1316_v0 = vrot.slane %v5815_v54, 5  ;;  %v629_v62 = vsel %vm5553_vm2, %v624_v10, %v628_v8  ;;  %v1319_v28 = vrot.slane %v5822_v16, 5 }
  0x6e   : > { %v1306_v7 = vsel %vm5760_vm5, %v1304_v41, %v1305_v9  ;;  %v3880_v1 = vrot.slane %v5839_v38, 9  ;;  %4790 = vmatpush3.bf16.msra.mxu0 %v5251_v4  ;;  %v6060_v61 = vcombine.low %v619_v31, %v629_v62  ;;  %v1313_v5 = vsel %vm5760_vm5, %v1311_v57, %v1312_v6  ;;  %v5242_v57 = vld [vmem:[%s6669_s1 + $0x88] sm:$0xff]  }
  0x6f   : > { %v6062_v58 = vcombine.low %v1303_v50, %v1306_v7  ;;  %4823 = vmatprep.subr.bf16.mxu0 %v6041_v30  ;;  %v6067_v18 = vcombine.low %v1310_v29, %v1313_v5  ;;  %v1318_v33 = vrot.slane %v1316_v0, 4  ;;  %v1323_v45 = vrot.slane %v5859_v3, 5 }
  0x70   : > { %v1326_v9 = vrot.slane %v5865_v36, 5  ;;  %4532 = vmatmul.mubr.bf16.gmra.mrb[28].mxu1 %v6060_v61  ;;  %v6703_v16 = vcombine.low %v5517_v12, %v5520_v13  ;;  %v1317_v4 = vsel %vm5760_vm5, %v3879_v17, %v1316_v0  ;;  %v1330_v6 = vrot.slane %v5881_v34, 5 }
  0x71   : > { %4756 = vmatmul.mubr.bf16.gmra.mrb[12].mxu0 %v6062_v58  ;;  %v1320_v8 = vsel %vm5760_vm5, %v1318_v33, %v1319_v28  ;;  %v1325_v56 = vrot.slane %v1323_v45, 4  ;;  %v1337_v36 = vrot.slane %v5920_v63, 5  ;;  %v1324_v10 = vsel %vm5760_vm5, %v3880_v1, %v1323_v45 }
  0x72   : > { %4551 = vmatprep.mubr.bf16.mxu1 %v6703_v16  ;;  %4759 = vmatprep.mubr.bf16.mxu0 %v6067_v18  ;;  %v6087_v13 = vcombine.low %v1317_v4, %v1320_v8  ;;  %v3881_v50 = vrot.slane %v5878_v24, 9  ;;  %v1333_v41 = vrot.slane %v5905_v42, 5  ;;  %v1332_v17 = vrot.slane %v1330_v6, 4 }
  0x73   : > { %v1327_v12 = vsel %vm5760_vm5, %v1325_v56, %v1326_v9  ;;  %v3882_v31 = vrot.slane %v5917_v59, 9  ;;  %v1339_v0 = vrot.slane %v1337_v36, 4  ;;  %v1340_v62 = vrot.slane %v5927_v20, 5 }
  0x74   : > { %v6092_v29 = vcombine.low %v1324_v10, %v1327_v12  ;;  %v1331_v7 = vsel %vm5760_vm5, %v3881_v50, %v1330_v6  ;;  %v1344_v42 = vrot.slane %v5955_v49, 5  ;;  %v6105_v28 = vcombine.low %v5729_v32, %v5737_v47  ;;  %v5246_v47 = vld [vmem:[%s6669_s1 + $0x90] sm:$0xff]   ;;  %v223_v6 = vld [vmem:[%s5508_s11 + $0xc8] sm:$0x1]  ;;  %v5419_v10 = vld [vmem:[%s5508_s11 + $0x40] sm:$0xf] }
  0x75   : > { %v1334_v20 = vsel %vm5760_vm5, %v1332_v17, %v1333_v41  ;;  %v1338_v1 = vsel %vm5760_vm5, %v3882_v31, %v1337_v36  ;;  %v3883_v5 = vrot.slane %v5945_v25, 9  ;;  %v6116_v33 = vcombine.low %v5771_v40, %v5778_v53  ;;  %v5418_v36 = vld [vmem:[%s5508_s11 + $0x3c] sm:$0xf]  ;;  %v5420_v41 = vld [vmem:[%s5508_s11 + $0x48] sm:$0xf] }
  0x76   : > { %v1341_v32 = vsel %vm5760_vm5, %v1339_v0, %v1340_v62  ;;  %v6127_v45 = vcombine.low %v5801_v2, %v5815_v54  ;;  %v6131_v40 = vcombine.low %v5839_v38, %v5859_v3  ;;  %v6135_v53 = vcombine.low %v5878_v24, %v5881_v34  ;;  %v6155_v24 = vld [vmem:[%s5508_s11 + $0xc4] sm:$0xf]  ;;  %v5421_v17 = vld [vmem:[%s5508_s11 + $0x4c] sm:$0xf] }
  0x77   : > { %v6139_v9 = vcombine.low %v5917_v59, %v5920_v63  ;;  %v6143_v16 = vcombine.low %v5945_v25, %v5955_v49  ;;  %v6145_v4 = vcombine.low %v1331_v7, %v1334_v20  ;;  %v1346_v2 = vrot.slane %v1344_v42, 4  ;;  %v5250_v25 = vld [vmem:[%s6669_s1 + $0x98] sm:$0xff]  }
  0x78   : > { %4552 = vmatmul.mubr.bf16.vlgmr.msra.gmra.mrb[0].mxu1 %v5566_v43  ;;  %v1347_v54 = vrot.slane %v5970_v14, 5  ;;  %v6150_v38 = vcombine.low %v5992_v22, %v5999_v48  ;;  %v6152_v3 = vcombine.low %v1338_v1, %v1341_v32  ;;  %v3884_v34 = vrot.slane %v5992_v22, 9  ;;  %v6169_v14 = vld [vmem:[%s5508_s11 + $0xc0] sm:$0xf] }
  0x79   : > { %4760 = vmatmul.mubr.bf16.gmra.mrb[16].mxu0 %v6087_v13  ;;  %4584 = vmatpush3.bf16.msra.mxu1 %v5830_v52  ;;  %v1351_v52 = vrot.slane %v5999_v48, 5  ;;  %v1354_v63 = vrot.slane %v6009_v27, 5  ;;  %v1345_v49 = vsel %vm5760_vm5, %v3883_v5, %v1344_v42  ;;  %v2231_v48 = vrot.slane %v6155_v24, 5  ;;  %v5254_v27 = vld [vmem:[%s6669_s1 + $0xa0] sm:$0xff]  }
  0x7a   : > { %4555 = vmatprep.mubr.bf16.mxu1 %v5642_v60  ;;  %4763 = vmatprep.mubr.bf16.mxu0 %v6092_v29  ;;  %v1348_v22 = vsel %vm5760_vm5, %v1346_v2, %v1347_v54  ;;  %v6184_v12 = vcombine.low %v5418_v36, %v5419_v10  ;;  %v6190_v31 = vcombine.low %v5420_v41, %v5421_v17  ;;  %v1946_v0 = vshll.u32 %v6169_v14, 16  ;;  %v5258_v54 = vld [vmem:[%s6669_s1 + $0xa8] sm:$0xff]   ;;  %v5262_v36 = vld [vmem:[%s6669_s1 + $0xb0] sm:$0xff]   ;;  %v5423_v10 = vld [vmem:[%s5508_s11 + $0x58] sm:$0xf] }
  0x7b   : > { %4585 = vmatprep.subr.bf16.mxu1 %v5242_v57  ;;  %v1353_v59 = vrot.slane %v1351_v52, 4  ;;  %v1352_v8 = vsel %vm5760_vm5, %v3884_v34, %v1351_v52  ;;  %v6186_v50 = vcombine.low %v1345_v49, %v1348_v22  ;;  %v1952_v62 = vshll.u32 %v6155_v24, 16 }
  0x7c   : > { %v1956_v7 = vshrl.u32 %v6155_v24, 16  ;;  %v3975_v20 = vrot.slane %v6169_v14, 9  ;;  %v2233_v1 = vrot.slane %v2231_v48, 4  ;;  %v2234_v5 = vrot.slane %v223_v6, 5 }
  0x7d   : > { %4586 = vmatpush3.bf16.msra.mxu1 %v5242_v57  ;;  %v1355_v56 = vsel %vm5760_vm5, %v1353_v59, %v1354_v63  ;;  %v1943_v57 = vshrl.u32 %v6169_v14, 16  ;;  %v1954_v52 = vrot.slane %v1952_v62, 5  ;;  %v1962_v63 = vshll.u32 %v223_v6, 16  ;;  %v5422_v6 = vld [vmem:[%s5508_s11 + $0x54] sm:$0xf]  ;;  %v5268_v62 = vld [vmem:[%s6669_s1 + $0xc0] sm:$0xff]  }
  0x7e   : > { %4587 = vmatprep.subr.bf16.mxu1 %v5246_v47  ;;  %v6196_v42 = vcombine.low %v1352_v8, %v1355_v56  ;;  %v1958_v2 = vrot.slane %v1956_v7, 4  ;;  %v2235_v49 = vsel %vm5760_vm5, %v2233_v1, %v2234_v5  ;;  %v6215_v41 = vcombine.low %v5422_v6, %v5423_v10  ;;  %v5259_v7 = vld [vmem:[%s6669_s1 + $0x1c8] sm:$0xff]   ;;  %v5267_v1 = vld [vmem:[%s6669_s1 + $0x1d8] sm:$0xff]   ;;  %v5272_v6 = vld [vmem:[%s6669_s1 + $0xd0] sm:$0xff]  }
  0x7f   : > { %v1945_v32 = vrot.slane %v1943_v57, 4  ;;  %v1964_v56 = vrot.slane %v1962_v63, 5  ;;  %v5275_v10 = vld [vmem:[%s6669_s1 + $0xd8] sm:$0xff]  }
  0x80   : > { %4556 = vmatmul.mubr.bf16.gmra.mrb[4].mxu1 %v5713_v11  ;;  %v1959_v59 = vor.u32 %v1958_v2, %v1954_v52  ;;  %v5426_v2 = vld [vmem:[%s5508_s11] sm:$0xf] }
  0x81   : > { %4764 = vmatmul.mubr.bf16.gmra.mrb[20].mxu0 %v6145_v4  ;;  %4559 = vmatprep.mubr.bf16.mxu1 %v5717_v15 }
  0x82   : > { %4767 = vmatprep.mubr.bf16.mxu0 %v6152_v3  ;;  %4588 = vmatpush3.bf16.msra.mxu1 %v5246_v47  ;;  %v1948_v47 = vrot.slane %v1946_v0, 5  ;;  %v1960_v8 = vrot.slane %v1959_v59, 4  ;;  %v5266_v0 = vld [vmem:[%s6669_s1 + $0xb8] sm:$0xff]   ;;  %v5271_v59 = vld [vmem:[%s6669_s1 + $0x1e8] sm:$0xff]  }
  0x83   : > { %4589 = vmatprep.subr.bf16.mxu1 %v5250_v25 }
  0x84   : > { %v1949_v34 = vor.u32 %v1948_v47, %v1945_v32  ;;  %v5269_v32 = vld [vmem:[%s6669_s1 + $0x1e0] sm:$0xff]   ;;  %v5425_v47 = vld [vmem:[%s5508_s11 + $0x8] sm:$0x1] }
  0x86   : > { %4590 = vmatpush3.bf16.msra.mxu1 %v5250_v25  ;;  %v2232_v25 = vsel %vm5760_vm5, %v3975_v20, %v2231_v48  ;;  %v1950_v22 = vrot.slane %v1949_v34, 4  ;;  %v5263_v20 = vld [vmem:[%s6669_s1 + $0x1d0] sm:$0xff]  }
  0x87   : > { %4591 = vmatprep.subr.bf16.mxu1 %v5254_v27  ;;  %v6217_v17 = vcombine.low %v2232_v25, %v2235_v49  ;;  %v5273_v49 = vld [vmem:[%s6669_s1 + $0x1f0] sm:$0xff]  }
  0x88   : > { %4560 = vmatmul.mubr.bf16.gmra.mrb[8].mxu1 %v6184_v12  ;;  %v1955_v48 = vsel %vm5553_vm2, %v1950_v22, %v1954_v52  ;;  %v1249_v52 = vrot.slane %v5425_v47, 5  ;;  %v6706_v47 = vld [vmem:[#allocation4_spill] sm:$0xff] }
  0x89   : > { %4768 = vmatmul.mubr.bf16.gmra.mrb[24].mxu0 %v6186_v50  ;;  %4563 = vmatprep.mubr.bf16.mxu1 %v6190_v31 }
  0x8a   : > { %4771 = vmatprep.mubr.bf16.mxu0 %v6196_v42  ;;  %4592 = vmatpush3.bf16.msra.mxu1 %v5254_v27  ;;  %v1965_v27 = vsel %vm5553_vm2, %v1960_v8, %v1964_v56  ;;  %v5277_v8 = vld [vmem:[%s6669_s1 + $0x1f8] sm:$0xff]   ;;  %v5279_v56 = vld [vmem:[%s6669_s1 + $0x200] sm:$0xff]  }
  0x8b   : > { %4593 = vmatprep.subr.bf16.mxu1 %v5258_v54  ;;  %v6223_v57 = vcombine.low %v1955_v48, %v1965_v27  ;;  %v6304_v48 = vcombine.low %v6169_v14, %v6155_v24  ;;  %v5280_v27 = vld [vmem:[%s6669_s1 + $0xe8] sm:$0xff]   ;;  %v5282_v24 = vld [vmem:[%s6669_s1 + $0xf0] sm:$0xff]  }
  0x8e   : > { %4594 = vmatpush3.bf16.msra.mxu1 %v5258_v54  ;;  %v3869_v54 = vrot.slane %v5426_v2, 9  ;;  %v5286_v2 = vld [vmem:[%s6669_s1 + $0x220] sm:$0xff]  }
  0x8f   : > { %4595 = vmatprep.subr.bf16.mxu1 %v5262_v36 }
  0x90   : > { %4564 = vmatmul.mubr.bf16.gmra.mrb[12].mxu1 %v6215_v41 }
  0x91   : > { %4772 = vmatmul.mubr.bf16.gmra.mrb[28].mxu0 %v6217_v17  ;;  %4567 = vmatprep.mubr.bf16.mxu1 %v6105_v28 }
  0x92   : > { %4791 = vmatprep.mubr.bf16.mxu0 %v5642_v60  ;;  %4596 = vmatpush3.bf16.msra.mxu1 %v5262_v36  ;;  %v5270_v36 = vld [vmem:[%s6669_s1 + $0xc8] sm:$0xff]  }
  0x93   : > { %4597 = vmatprep.subr.bf16.mxu1 %v5266_v0 }
  0x96   : > { %4598 = vmatpush3.bf16.msra.mxu1 %v5266_v0  ;;  %v6314_v0 = vld [vmem:[%s5508_s11 + $0xcc] sm:$0xf] }
  0x97   : > { %4631 = vmatprep.subr.bf16.mxu1 %v5268_v62 }
  0x98   : > { %4568 = vmatmul.mubr.bf16.gmra.mrb[16].mxu1 %v6116_v33 }
  0x99   : > { %4792 = vmatmul.mubr.bf16.vlgmr.msra.gmra.mrb[0].mxu0 %v5713_v11  ;;  %4571 = vmatprep.mubr.bf16.mxu1 %v6127_v45 }
  0x9a   : > { %4824 = vmatpush3.bf16.msra.mxu0 %v6041_v30  ;;  %4795 = vmatprep.mubr.bf16.mxu0 %v5717_v15  ;;  %v5424_v30 = vld [vmem:[%s5508_s11 + $0x4] sm:$0xf] }
  0x9b   : > { %4825 = vmatprep.subr.bf16.mxu0 %v5259_v7  ;;  %v1246_v5 = vrot.slane %v5424_v30, 5  ;;  %v6704_v30 = vld [vmem:[#allocation2_spill] sm:$0xff] }
  0x9d   : > { %v1248_v34 = vrot.slane %v1246_v5, 4  ;;  %v1247_v63 = vsel %vm5760_vm5, %v3869_v54, %v1246_v5  ;;  %v5283_v5 = vld [vmem:[%s6669_s1 + $0x210] sm:$0xff]   ;;  %v5287_v54 = vld [vmem:[%s6669_s1 + $0x228] sm:$0xff]  }
  0x9e   : > { %4826 = vmatpush3.bf16.msra.mxu0 %v5259_v7  ;;  %v5284_v7 = vld [vmem:[%s6669_s1 + $0xf8] sm:$0xff]  }
  0x9f   : > { %4827 = vmatprep.subr.bf16.mxu0 %v5263_v20  ;;  %v1250_v25 = vsel %vm5760_vm5, %v1248_v34, %v1249_v52  ;;  %v6707_v52 = vld [vmem:[#allocation5_spill] sm:$0xff]  ;;  %v6708_v34 = vld [vmem:[#allocation6_spill] sm:$0xff] }
  0xa0   : > { %4572 = vmatmul.mubr.bf16.gmra.mrb[20].mxu1 %v6131_v40  ;;  %v3901_v22 = vcombine.low %v1247_v63, %v1250_v25  ;;  %v5288_v63 = vld [vmem:[%s6669_s1 + $0x230] sm:$0xff]   ;;  %v5289_v25 = vld [vmem:[%s6669_s1 + $0x238] sm:$0xff]  }
  0xa1   : > { %4796 = vmatmul.mubr.bf16.gmra.mrb[4].mxu0 %v6184_v12  ;;  %4575 = vmatprep.mubr.bf16.mxu1 %v6135_v53 }
  0xa2   : > { %4799 = vmatprep.mubr.bf16.mxu0 %v6190_v31  ;;  %4828 = vmatpush3.bf16.msra.mxu0 %v5263_v20  ;;  %v5281_v20 = vld [vmem:[%s6669_s1 + $0x208] sm:$0xff]  }
  0xa3   : > { %4829 = vmatprep.subr.bf16.mxu0 %v5267_v1 }
  0xa6   : > { %4830 = vmatpush3.bf16.msra.mxu0 %v5267_v1  ;;  %v5427_v1 = vld [vmem:[%s6669_s1 + $0x100] sm:$0xff]  }
  0xa7   : > { %4831 = vmatprep.subr.bf16.mxu0 %v5269_v32 }
  0xa8   : > { %4576 = vmatmul.mubr.bf16.gmra.mrb[24].mxu1 %v6139_v9 }
  0xa9   : > { %4800 = vmatmul.mubr.bf16.gmra.mrb[8].mxu0 %v6215_v41  ;;  %4579 = vmatprep.mubr.bf16.mxu1 %v6143_v16 }
  0xaa   : > { %4803 = vmatprep.mubr.bf16.mxu0 %v6105_v28  ;;  %4832 = vmatpush3.bf16.msra.mxu0 %v5269_v32  ;;  %v5285_v32 = vld [vmem:[%s6669_s1 + $0x218] sm:$0xff]  }
  0xab   : > { %4833 = vmatprep.subr.bf16.mxu0 %v5271_v59 }
  0xae   : > { %4834 = vmatpush3.bf16.msra.mxu0 %v5271_v59  ;;  %v6709_v59 = vld [vmem:[#allocation7_spill] sm:$0xff] }
  0xaf   : > { %4835 = vmatprep.subr.bf16.mxu0 %v5273_v49 }
  0xb0   : > { %4580 = vmatmul.mubr.bf16.gmra.mrb[28].mxu1 %v6150_v38 }
  0xb1   : > { %4804 = vmatmul.mubr.bf16.gmra.mrb[12].mxu0 %v6116_v33  ;;  %4599 = vmatprep.mubr.bf16.mxu1 %v3901_v22  ;;  %v6711_v22 = vld [vmem:[#allocation9_spill] sm:$0xff] }
  0xb2   : > { %4807 = vmatprep.mubr.bf16.mxu0 %v6127_v45  ;;  %4836 = vmatpush3.bf16.msra.mxu0 %v5273_v49  ;;  %v6710_v49 = vld [vmem:[#allocation8_spill] sm:$0xff] }
  0xb3   : > { %4837 = vmatprep.subr.bf16.mxu0 %v5277_v8 }
  0xb6   : > { %4838 = vmatpush3.bf16.msra.mxu0 %v5277_v8  ;;  %v6712_v8 = vld [vmem:[#allocation10_spill] sm:$0xff] }
  0xb7   : > { %4871 = vmatprep.subr.bf16.mxu0 %v5279_v56 }
  0xb8   : > { %4600 = vmatmul.mubr.bf16.vlgmr.msra.gmra.mrb[0].mxu1 %v5808_v39  ;;  %v5278_v39 = vld [vmem:[%s6669_s1 + $0xe0] sm:$0xff]  }
  0xb9   : > { %4808 = vmatmul.mubr.bf16.gmra.mrb[16].mxu0 %v6131_v40  ;;  %4632 = vmatpush3.bf16.msra.mxu1 %v5268_v62  ;;  %v6317_v62 = vld [vmem:[%s5508_s11 + $0xd0] sm:$0xf] }
  0xba   : > { %4603 = vmatprep.mubr.bf16.mxu1 %v5854_v26  ;;  %4811 = vmatprep.mubr.bf16.mxu0 %v6135_v53  ;;  %v4017_v14 = vcombine.low %v6314_v0, %v6317_v62 }
  0xbb   : > { %4633 = vmatprep.subr.bf16.mxu1 %v5270_v36 }
  0xbd   : > { %4634 = vmatpush3.bf16.msra.mxu1 %v5270_v36  ;;  %v2766_v36 = vshll.u32 %v6314_v0, 16 }
  0xbe   : > { %4635 = vmatprep.subr.bf16.mxu1 %v5272_v6 }
  0xc0   : > { %4604 = vmatmul.mubr.bf16.gmra.mrb[4].mxu1 %v5894_v46 }
  0xc1   : > { %4812 = vmatmul.mubr.bf16.gmra.mrb[20].mxu0 %v6139_v9  ;;  %4607 = vmatprep.mubr.bf16.mxu1 %v5931_v44 }
  0xc2   : > { %4815 = vmatprep.mubr.bf16.mxu0 %v6143_v16  ;;  %4636 = vmatpush3.bf16.msra.mxu1 %v5272_v6  ;;  %v2776_v6 = vshrl.u32 %v6317_v62, 16 }
  0xc3   : > { %4637 = vmatprep.subr.bf16.mxu1 %v5275_v10 }
  0xc6   : > { %4638 = vmatpush3.bf16.msra.mxu1 %v5275_v10  ;;  %v6713_v10 = vld [vmem:[#allocation11_spill] sm:$0xff] }
  0xc7   : > { %4639 = vmatprep.subr.bf16.mxu1 %v5278_v39 }
  0xc8   : > { %4608 = vmatmul.mubr.bf16.gmra.mrb[8].mxu1 %v5964_v19 }
  0xc9   : > { %4816 = vmatmul.mubr.bf16.gmra.mrb[24].mxu0 %v6150_v38  ;;  %4611 = vmatprep.mubr.bf16.mxu1 %v5996_v35 }
  0xca   : > { %4819 = vmatprep.mubr.bf16.mxu0 %v6304_v48  ;;  %4640 = vmatpush3.bf16.msra.mxu1 %v5278_v39 }
  0xcb   : > { %4641 = vmatprep.subr.bf16.mxu1 %v5280_v27 }
  0xce   : > { %4642 = vmatpush3.bf16.msra.mxu1 %v5280_v27  ;;  %v2768_v27 = vrot.slane %v2766_v36, 5 }
  0xcf   : > { %4643 = vmatprep.subr.bf16.mxu1 %v5282_v24 }
  0xd0   : > { %4612 = vmatmul.mubr.bf16.gmra.mrb[12].mxu1 %v6030_v21 }
  0xd1   : > { %4820 = vmatmul.mubr.bf16.gmra.mrb[28].mxu0 %v4017_v14  ;;  %4615 = vmatprep.mubr.bf16.mxu1 %v6062_v58  ;;  %v2778_v14 = vrot.slane %v2776_v6, 4 }
  0xd2   : > { %4839 = vmatprep.mubr.bf16.mxu0 %v5630_v51  ;;  %4644 = vmatpush3.bf16.msra.mxu1 %v5282_v24  ;;  %v6705_v51 = vld [vmem:[#allocation3_spill] sm:$0xff] }
  0xd3   : > { %4645 = vmatprep.subr.bf16.mxu1 %v5284_v7 }
  0xd6   : > { %4646 = vmatpush3.bf16.msra.mxu1 %v5284_v7  ;;  %v5429_v7 = vld [vmem:[%s6669_s1 + $0x110] sm:$0xff]  }
  0xd7   : > { %4919 = vmatprep.subr.bf16.mxu1 %v5427_v1 }
  0xd8   : > { %4616 = vmatmul.mubr.bf16.gmra.mrb[16].mxu1 %v6067_v18 }
  0xd9   : > { %4840 = vmatmul.mubr.bf16.vlgmr.msra.gmra.mrb[0].mxu0 %v6704_v30  ;;  %4619 = vmatprep.mubr.bf16.mxu1 %v6087_v13 }
  0xda   : > { %4872 = vmatpush3.bf16.msra.mxu0 %v5279_v56  ;;  %4843 = vmatprep.mubr.bf16.mxu0 %v6705_v51  ;;  %v2763_v56 = vshrl.u32 %v6314_v0, 16 }
  0xdb   : > { %4873 = vmatprep.subr.bf16.mxu0 %v5281_v20 }
  0xdc   : > { %v2765_v39 = vrot.slane %v2763_v56, 4 }
  0xde   : > { %4874 = vmatpush3.bf16.msra.mxu0 %v5281_v20  ;;  %v6714_v20 = vld [vmem:[#allocation12_spill] sm:$0xff] }
  0xdf   : > { %4875 = vmatprep.subr.bf16.mxu0 %v5283_v5 }
  0xe0   : > { %4620 = vmatmul.mubr.bf16.gmra.mrb[20].mxu1 %v6092_v29 }
  0xe1   : > { %4844 = vmatmul.mubr.bf16.gmra.mrb[4].mxu0 %v6706_v47  ;;  %4623 = vmatprep.mubr.bf16.mxu1 %v6145_v4 }
  0xe2   : > { %4847 = vmatprep.mubr.bf16.mxu0 %v6707_v52  ;;  %4876 = vmatpush3.bf16.msra.mxu0 %v5283_v5  ;;  %v5430_v5 = vld [vmem:[%s6669_s1 + $0x118] sm:$0xff]  }
  0xe3   : > { %4877 = vmatprep.subr.bf16.mxu0 %v5285_v32 }
  0xe6   : > { %4878 = vmatpush3.bf16.msra.mxu0 %v5285_v32 }
  0xe7   : > { %4879 = vmatprep.subr.bf16.mxu0 %v5286_v2 }
  0xe8   : > { %4624 = vmatmul.mubr.bf16.gmra.mrb[24].mxu1 %v6152_v3 }
  0xe9   : > { %4848 = vmatmul.mubr.bf16.gmra.mrb[8].mxu0 %v6708_v34  ;;  %4627 = vmatprep.mubr.bf16.mxu1 %v6186_v50 }
  0xea   : > { %4851 = vmatprep.mubr.bf16.mxu0 %v6709_v59  ;;  %4880 = vmatpush3.bf16.msra.mxu0 %v5286_v2 }
  0xeb   : > { %4881 = vmatprep.subr.bf16.mxu0 %v5287_v54 }
  0xee   : > { %4882 = vmatpush3.bf16.msra.mxu0 %v5287_v54  ;;  %v5432_v54 = vld [vmem:[%s6669_s1 + $0x128] sm:$0xff]  }
  0xef   : > { %4883 = vmatprep.subr.bf16.mxu0 %v5288_v63 }
  0xf0   : > { %4628 = vmatmul.mubr.bf16.gmra.mrb[28].mxu1 %v6196_v42 }
  0xf1   : > { %4852 = vmatmul.mubr.bf16.gmra.mrb[12].mxu0 %v6710_v49  ;;  %4647 = vmatprep.mubr.bf16.mxu1 %v5566_v43  ;;  %v2772_v43 = vshll.u32 %v6317_v62, 16 }
  0xf2   : > { %4855 = vmatprep.mubr.bf16.mxu0 %v6711_v22  ;;  %4884 = vmatpush3.bf16.msra.mxu0 %v5288_v63 }
  0xf3   : > { %4885 = vmatprep.subr.bf16.mxu0 %v5289_v25  ;;  %v2774_v24 = vrot.slane %v2772_v43, 5 }
  0xf5   : > { %v2779_v30 = vor.u32 %v2778_v14, %v2774_v24 }
  0xf6   : > { %4886 = vmatpush3.bf16.msra.mxu0 %v5289_v25 }
  0xf7   : > { %v2780_v47 = vrot.slane %v2779_v30, 4 }
  0xf8   : > { %4648 = vmatmul.mubr.bf16.vlgmr.msra.gmra.mrb[0].mxu1 %v5642_v60  ;;  %v5428_v60 = vld [vmem:[%s6669_s1 + $0x108] sm:$0xff]  }
  0xf9   : > { %4856 = vmatmul.mubr.bf16.gmra.mrb[16].mxu0 %v6712_v8  ;;  %4927 = vmatpush3.bf16.msra.mxu1 %v5427_v1  ;;  %v2769_v1 = vor.u32 %v2768_v27, %v2765_v39 }
  0xfa   : > { %4651 = vmatprep.mubr.bf16.mxu1 %v5713_v11  ;;  %4859 = vmatprep.mubr.bf16.mxu0 %v6713_v10  ;;  %v6385_v11 = vld [vmem:[%s5508_s11 + $0xd4] sm:$0x1] }
  0xfb   : > { %4920 = vmatprep.subr.bf16.mxu1 %v5428_v60  ;;  %v2782_v51 = vshll.u32 %v6385_v11, 16  ;;  %v2770_v32 = vrot.slane %v2769_v1, 4 }
  0xfd   : > { %4928 = vmatpush3.bf16.msra.mxu1 %v5428_v60  ;;  %v2784_v52 = vrot.slane %v2782_v51, 5 }
  0xfe   : > { %4921 = vmatprep.subr.bf16.mxu1 %v5429_v7 }
  0xff   : > { %v2785_v2 = vsel %vm5553_vm2, %v2780_v47, %v2784_v52 }
 0x100   : > { %4652 = vmatmul.mubr.bf16.gmra.mrb[4].mxu1 %v5717_v15  ;;  %v5431_v15 = vld [vmem:[%s6669_s1 + $0x120] sm:$0xff]  }
 0x101   : > { %4860 = vmatmul.mubr.bf16.gmra.mrb[20].mxu0 %v6714_v20  ;;  %4655 = vmatprep.mubr.bf16.mxu1 %v6184_v12  ;;  %v2775_v12 = vsel %vm5553_vm2, %v2770_v32, %v2774_v24 }
 0x102   : > { %4863 = vmatprep.mubr.bf16.mxu0 %v6026_v55  ;;  %4929 = vmatpush3.bf16.msra.mxu1 %v5429_v7  ;;  %v4042_v34 = vcombine.low %v2775_v12, %v2785_v2 }
 0x103   : > { %4922 = vmatprep.subr.bf16.mxu1 %v5430_v5 }
 0x106   : > { %4930 = vmatpush3.bf16.msra.mxu1 %v5430_v5 }
 0x107   : > { %4923 = vmatprep.subr.bf16.mxu1 %v5431_v15 }
 0x108   : > { %4656 = vmatmul.mubr.bf16.gmra.mrb[8].mxu1 %v6190_v31  ;;  %v5433_v31 = vld [vmem:[%s6669_s1 + $0x130] sm:$0xff]  }
 0x109   : > { %4864 = vmatmul.mubr.bf16.gmra.mrb[24].mxu0 %v6060_v61  ;;  %4659 = vmatprep.mubr.bf16.mxu1 %v6215_v41 }
 0x10a   : > { %4867 = vmatprep.mubr.bf16.mxu0 %v6223_v57  ;;  %4931 = vmatpush3.bf16.msra.mxu1 %v5431_v15 }
 0x10b   : > { %4924 = vmatprep.subr.bf16.mxu1 %v5432_v54 }
 0x10e   : > { %4932 = vmatpush3.bf16.msra.mxu1 %v5432_v54 }
 0x10f   : > { %4925 = vmatprep.subr.bf16.mxu1 %v5433_v31 }
 0x110   : > { %4660 = vmatmul.mubr.bf16.gmra.mrb[12].mxu1 %v6105_v28 }
 0x111   : > { %4868 = vmatmul.mubr.bf16.gmra.mrb[28].mxu0 %v4042_v34  ;;  %4663 = vmatprep.mubr.bf16.mxu1 %v6116_v33 }
 0x112   : > { %4887 = vmatprep.mubr.bf16.mxu0 %v5854_v26  ;;  %4933 = vmatpush3.bf16.msra.mxu1 %v5433_v31  ;;  %v3051_v26 = vrot.slane %v6317_v62, 5 }
 0x113   : > { %4926 = vmatprep.subr.bf16.mxu1 %v5434_v37 }
 0x116   : > { %4934 = vmatpush3.bf16.msra.mxu1 %v5434_v37 }
 0x118   : > { %4664 = vmatmul.mubr.bf16.gmra.mrb[16].mxu1 %v6127_v45 }
 0x119   : > { %4888 = vmatmul.mubr.bf16.vlgmr.msra.gmra.mrb[0].mxu0 %v5894_v46  ;;  %4667 = vmatprep.mubr.bf16.mxu1 %v6131_v40  ;;  %v4051_v46 = vrot.slane %v6314_v0, 9 }
 0x11a   : > { %4891 = vmatprep.mubr.bf16.mxu0 %v5931_v44  ;;  %v3053_v44 = vrot.slane %v3051_v26, 4 }
 0x120   : > { %4668 = vmatmul.mubr.bf16.gmra.mrb[20].mxu1 %v6135_v53 }
 0x121   : > { %4892 = vmatmul.mubr.bf16.gmra.mrb[4].mxu0 %v5964_v19  ;;  %4671 = vmatprep.mubr.bf16.mxu1 %v6139_v9  ;;  %v3054_v19 = vrot.slane %v6385_v11, 5 }
 0x122   : > { %4895 = vmatprep.mubr.bf16.mxu0 %v5996_v35  ;;  %v3052_v35 = vsel %vm5760_vm5, %v4051_v46, %v3051_v26 }
 0x128   : > { %4672 = vmatmul.mubr.bf16.gmra.mrb[24].mxu1 %v6143_v16 }
 0x129   : > { %4896 = vmatmul.mubr.bf16.gmra.mrb[8].mxu0 %v6030_v21  ;;  %4675 = vmatprep.mubr.bf16.mxu1 %v6150_v38  ;;  %v3055_v21 = vsel %vm5760_vm5, %v3053_v44, %v3054_v19 }
 0x12a   : > { %4899 = vmatprep.mubr.bf16.mxu0 %v6062_v58  ;;  %v4068_v58 = vcombine.low %v3052_v35, %v3055_v21 }
 0x130   : > { %4676 = vmatmul.mubr.bf16.gmra.mrb[28].mxu1 %v6304_v48 }
 0x131   : > { %4900 = vmatmul.mubr.bf16.gmra.mrb[12].mxu0 %v6067_v18  ;;  %4711 = vmatprep.mubr.bf16.mxu1 %v6710_v49 }
 0x132   : > { %4903 = vmatprep.mubr.bf16.mxu0 %v6087_v13 }
 0x138   : > { %4712 = vmatmul.mubr.bf16.vlgmr.msra.gmra.mrb[16].mxu1 %v6711_v22 }
 0x139   : > { %4904 = vmatmul.mubr.bf16.gmra.mrb[16].mxu0 %v6092_v29  ;;  %4715 = vmatprep.mubr.bf16.mxu1 %v6712_v8 }
 0x13a   : > { %4907 = vmatprep.mubr.bf16.mxu0 %v6145_v4 }
 0x140   : > { %4716 = vmatmul.mubr.bf16.gmra.mrb[20].mxu1 %v6713_v10 }
 0x141   : > { %4908 = vmatmul.mubr.bf16.gmra.mrb[20].mxu0 %v6152_v3  ;;  %4719 = vmatprep.mubr.bf16.mxu1 %v6714_v20 }
 0x142   : > { %4911 = vmatprep.mubr.bf16.mxu0 %v6186_v50 }
 0x148   : > { %4720 = vmatmul.mubr.bf16.gmra.mrb[24].mxu1 %v6026_v55 }
 0x149   : > { %4912 = vmatmul.mubr.bf16.gmra.mrb[24].mxu0 %v6196_v42  ;;  %4723 = vmatprep.mubr.bf16.mxu1 %v6060_v61  ;;  %v6467_v42 = vld [vmem:[%s6670_s2] ss:$0 sm:$0xff] }
 0x14a   : > { %4915 = vmatprep.mubr.bf16.mxu0 %v6217_v17 }
 0x150   : > { %4724 = vmatmul.mubr.bf16.gmra.mrb[28].mxu1 %v6223_v57 }
 0x151   : > { %4916 = vmatmul.mubr.bf16.gmra.mrb[28].mxu0 %v4068_v58 }
 0x1cb   : > { %v4649_v18 = vpop.f32.mrb[0].mxu1 }
 0x1cc   : > { %v1783_v13 = vpop.f32.mrb[1].mxu1 }
 0x1cd   : > { %v4650_v29 = vpop.f32.mrb[2].mxu1 }
 0x1ce   : > { %v1786_v55 = vpop.f32.mrb[3].mxu1 }
 0x1d3   : > { %v4653_v28 = vpop.f32.mrb[4].mxu1 }
 0x1d4   : > { %v1799_v33 = vpop.f32.mrb[5].mxu1 }
 0x1d5   : > { %v4654_v45 = vpop.f32.mrb[6].mxu1 }
 0x1d6   : > { %v1802_v61 = vpop.f32.mrb[7].mxu1 }
 0x1db   : > { %v4657_v40 = vpop.f32.mrb[8].mxu1 }
 0x1dc   : > { %v1815_v53 = vpop.f32.mrb[9].mxu1 }
 0x1dd   : > { %v4658_v9 = vpop.f32.mrb[10].mxu1 }
 0x1de   : > { %v6454_v16 = vpop.f32.mrb[11].mxu1 }
 0x1e3   : > { %v6456_v4 = vpop.f32.mrb[12].mxu1 }
 0x1e4   : > { %v6458_v23 = vpop.f32.mrb[13].mxu1 }
 0x1e5   : > { %v6460_v38 = vpop.f32.mrb[14].mxu1 }
 0x1e6   : > { %v6462_v3 = vpop.f32.mrb[15].mxu1 }
 0x1ec   : > { %v4889_v50 = vpop.f32.mrb[0].mxu0 }
 0x1ed   : > { %v4935_v41 = vadd.f32 %v4889_v50, %v4649_v18  ;;  %v3159_v17 = vpop.f32.mrb[1].mxu0 }
 0x1ee   : > { %v4936_v57 = vadd.f32 %v3159_v17, %v1783_v13  ;;  %v4890_v48 = vpop.f32.mrb[2].mxu0 }
 0x1ef   : > { %v6470_v0 = vadd.f32 %v4935_v41, %v6467_v42  ;;  %v4937_v62 = vadd.f32 %v4890_v48, %v4650_v29  ;;  %v3162_v59 = vpop.f32.mrb[3].mxu0 }
 0x1f0   : > { %v6473_v63 = vadd.f32 %v4936_v57, %v6467_v42  ;;  %v4938_v25 = vadd.f32 %v3162_v59, %v1786_v55 }
 0x1f1   : > { %v4080_v49 = vmul.f32 -1.442695, %v6470_v0  ;;  %v6477_v22 = vadd.f32 %v4937_v62, %v6467_v42 }
 0x1f2   : > { %v4078_v8 = vmul.f32 -1.442695, %v6473_v63  ;;  %v6481_v56 = vadd.f32 %v4938_v25, %v6467_v42 }
 0x1f3   : > { %5290 = vpow2.f32 %v4080_v49  ;;  %v4081_v36 = vmul.f32 -1.442695, %v6477_v22 }
 0x1f4   : > { %5292 = vpow2.f32 %v4078_v8  ;;  %v4079_v6 = vmul.f32 -1.442695, %v6481_v56  ;;  %v4893_v43 = vpop.f32.mrb[4].mxu0 }
 0x1f5   : > { %5294 = vpow2.f32 %v4081_v36  ;;  %v4939_v10 = vadd.f32 %v4893_v43, %v4653_v28  ;;  %v3175_v60 = vpop.f32.mrb[5].mxu0 }
 0x1f6   : > { %5296 = vpow2.f32 %v4079_v6  ;;  %v4940_v39 = vadd.f32 %v3175_v60, %v1799_v33  ;;  %v4894_v27 = vpop.f32.mrb[6].mxu0 }
 0x1f7   : > { %v6486_v24 = vadd.f32 %v4939_v10, %v6467_v42  ;;  %v4941_v14 = vadd.f32 %v4894_v27, %v4654_v45  ;;  %v3178_v7 = vpop.f32.mrb[7].mxu0 }
 0x1f8   : > { %v6489_v11 = vadd.f32 %v4940_v39, %v6467_v42  ;;  %v4942_v20 = vadd.f32 %v3178_v7, %v1802_v61 }
 0x1f9   : > { %v4084_v1 = vmul.f32 -1.442695, %v6486_v24  ;;  %v6493_v30 = vadd.f32 %v4941_v14, %v6467_v42 }
 0x1fa   : > { %v4082_v51 = vmul.f32 -1.442695, %v6489_v11  ;;  %v6497_v5 = vadd.f32 %v4942_v20, %v6467_v42 }
 0x1fb   : > { %5298 = vpow2.f32 %v4084_v1  ;;  %v4085_v32 = vmul.f32 -1.442695, %v6493_v30 }
 0x1fc   : > { %5300 = vpow2.f32 %v4082_v51  ;;  %v4083_v47 = vmul.f32 -1.442695, %v6497_v5  ;;  %v4897_v52 = vpop.f32.mrb[8].mxu0 }
 0x1fd   : > { %v5291_v15 = vpop.eup %5290  ;;  %5302 = vpow2.f32 %v4085_v32  ;;  %v4943_v12 = vadd.f32 %v4897_v52, %v4657_v40  ;;  %v3191_v2 = vpop.f32.mrb[9].mxu0 }
 0x1fe   : > { %v5293_v54 = vpop.eup %5292  ;;  %v3455_v34 = vadd.f32 1.0, %v5291_v15  ;;  %5304 = vpow2.f32 %v4083_v47  ;;  %v4944_v31 = vadd.f32 %v3191_v2, %v1815_v53  ;;  %v4898_v37 = vpop.f32.mrb[10].mxu0 }
 0x1ff   : > { %v5295_v26 = vpop.eup %5294  ;;  %v3453_v46 = vadd.f32 1.0, %v5293_v54  ;;  %v6502_v44 = vadd.f32 %v4943_v12, %v6467_v42  ;;  %v4945_v19 = vadd.f32 %v4898_v37, %v4658_v9  ;;  %v3194_v35 = vpop.f32.mrb[11].mxu0 }
 0x200   : > { %v5297_v21 = vpop.eup %5296  ;;  %5306 = vrcp.f32 %v3455_v34  ;;  %v3456_v58 = vadd.f32 1.0, %v5295_v26  ;;  %v6506_v18 = vadd.f32 %v4944_v31, %v6467_v42  ;;  %v4946_v13 = vadd.f32 %v3194_v35, %v6454_v16 }
 0x201   : > { %5308 = vrcp.f32 %v3453_v46  ;;  %v3454_v29 = vadd.f32 1.0, %v5297_v21  ;;  %v4088_v55 = vmul.f32 -1.442695, %v6502_v44  ;;  %v6511_v28 = vadd.f32 %v4945_v19, %v6467_v42 }
 0x202   : > { %5310 = vrcp.f32 %v3456_v58  ;;  %v4086_v33 = vmul.f32 -1.442695, %v6506_v18  ;;  %v6515_v45 = vadd.f32 %v4946_v13, %v6467_v42 }
 0x203   : > { %5312 = vrcp.f32 %v3454_v29  ;;  %v4089_v61 = vmul.f32 -1.442695, %v6511_v28 }
 0x204   : > { %5314 = vpow2.f32 %v4088_v55  ;;  %v4087_v40 = vmul.f32 -1.442695, %v6515_v45  ;;  %v4901_v53 = vpop.f32.mrb[12].mxu0 }
 0x205   : > { %v5299_v9 = vpop.eup %5298  ;;  %5316 = vpow2.f32 %v4086_v33  ;;  %v4947_v16 = vadd.f32 %v4901_v53, %v6456_v4  ;;  %v3207_v50 = vpop.f32.mrb[13].mxu0 }
 0x206   : > { %v5301_v41 = vpop.eup %5300  ;;  %v3459_v17 = vadd.f32 1.0, %v5299_v9  ;;  %5318 = vpow2.f32 %v4089_v61  ;;  %v4948_v57 = vadd.f32 %v3207_v50, %v6458_v23  ;;  %v4902_v48 = vpop.f32.mrb[14].mxu0 }
 0x207   : > { %v5303_v62 = vpop.eup %5302  ;;  %v3457_v59 = vadd.f32 1.0, %v5301_v41  ;;  %5320 = vpow2.f32 %v4087_v40  ;;  %v6530_v25 = vadd.f32 %v4947_v16, %v6467_v42  ;;  %v4949_v49 = vadd.f32 %v4902_v48, %v6460_v38  ;;  %v3210_v4 = vpop.f32.mrb[15].mxu0 }
 0x208   : > { %v5305_v8 = vpop.eup %5304  ;;  %5322 = vrcp.f32 %v3459_v17  ;;  %v3460_v36 = vadd.f32 1.0, %v5303_v62  ;;  %v6534_v6 = vadd.f32 %v4948_v57, %v6467_v42  ;;  %v4950_v23 = vadd.f32 %v3210_v4, %v6462_v3 }
 0x209   : > { %5324 = vrcp.f32 %v3457_v59  ;;  %v3458_v43 = vadd.f32 1.0, %v5305_v8  ;;  %v4092_v10 = vmul.f32 -1.442695, %v6530_v25  ;;  %v6539_v60 = vadd.f32 %v4949_v49, %v6467_v42 }
 0x20a   : > { %v5307_v39 = vpop.eup %5306  ;;  %5326 = vrcp.f32 %v3460_v36  ;;  %v4090_v38 = vmul.f32 -1.442695, %v6534_v6  ;;  %v6543_v27 = vadd.f32 %v4950_v23, %v6467_v42 }
 0x20b   : > { %v5309_v14 = vpop.eup %5308  ;;  %5328 = vrcp.f32 %v3458_v43  ;;  %v4093_v7 = vmul.f32 -1.442695, %v6539_v60  ;;  %v4713_v1 = vpop.f32.mrb[16].mxu1  ;;  %v3551_v47 = vmul.f32 %v5307_v39, %v6470_v0 }
 0x20c   : > { %v5311_v3 = vpop.eup %5310  ;;  %5330 = vpow2.f32 %v4092_v10  ;;  %v4091_v20 = vmul.f32 -1.442695, %v6543_v27  ;;  %v4905_v51 = vpop.f32.mrb[16].mxu0  ;;  %v3549_v34 = vmul.f32 %v5309_v14, %v6473_v63 }
 0x20d   : > { %v5313_v32 = vpop.eup %5312  ;;  %v3552_v52 = vmul.f32 %v5311_v3, %v6477_v22  ;;  %5332 = vpow2.f32 %v4090_v38  ;;  %v4951_v15 = vadd.f32 %v4905_v51, %v4713_v1  ;;  %v2133_v12 = vpop.f32.mrb[17].mxu1 }
 0x20e   : > { %v3223_v2 = vpop.f32.mrb[17].mxu0  ;;  %v5315_v54 = vpop.eup %5314  ;;  %v3550_v31 = vmul.f32 %v5313_v32, %v6481_v56  ;;  %5334 = vpow2.f32 %v4093_v7 }
 0x20f   : > { %v4952_v37 = vadd.f32 %v3223_v2, %v2133_v12  ;;  %v4714_v0 = vpop.f32.mrb[18].mxu1  ;;  %v4906_v26 = vpop.f32.mrb[18].mxu0  ;;  %v4184_v46 = vpack.c.bf16 %v3552_v52, %v3551_v47  ;;  %v3463_v19 = vadd.f32 1.0, %v5315_v54  ;;  %5336 = vpow2.f32 %v4091_v20 }
 0x210   : > { %v5317_v22 = vpop.eup %5316  ;;  %v6558_v35 = vadd.f32 %v4951_v15, %v6467_v42  ;;  %v2136_v63 = vpop.f32.mrb[19].mxu1  ;;  %v4179_v13 = vpack.c.bf16 %v3550_v31, %v3549_v34  ;;  %v4953_v55 = vadd.f32 %v4906_v26, %v4714_v0 }
 0x211   : > { %v3226_v21 = vpop.f32.mrb[19].mxu0  ;;  %v5319_v58 = vpop.eup %5318  ;;  %v3461_v29 = vadd.f32 1.0, %v5317_v22  ;;  %v6561_v56 = vadd.f32 %v4952_v37, %v6467_v42  ;;  %4256 = vst [vmem:[%s6554_s15 + $0x8] sm:$0xff] %v4184_v46   ;;  %5338 = vrcp.f32 %v3463_v19 }
 0x212   : > { %v5321_v33 = vpop.eup %5320  ;;  %v3464_v61 = vadd.f32 1.0, %v5319_v58  ;;  %v4096_v40 = vmul.f32 -1.442695, %v6558_v35  ;;  %v4954_v53 = vadd.f32 %v3226_v21, %v2136_v63  ;;  %4180 = vst [vmem:[%s6554_s15] sm:$0xff] %v4179_v13   ;;  %v6568_v41 = vadd.f32 %v4953_v55, %v6467_v42 }
 0x213   : > { %v5323_v9 = vpop.eup %5322  ;;  %5340 = vrcp.f32 %v3461_v29  ;;  %v3462_v16 = vadd.f32 1.0, %v5321_v33  ;;  %v4094_v50 = vmul.f32 -1.442695, %v6561_v56  ;;  %v4717_v49 = vpop.f32.mrb[20].mxu1 }
 0x214   : > { %v5325_v17 = vpop.eup %5324  ;;  %5342 = vrcp.f32 %v3464_v61  ;;  %v6571_v57 = vadd.f32 %v4954_v53, %v6467_v42  ;;  %v3555_v62 = vmul.f32 %v5323_v9, %v6486_v24  ;;  %v4097_v59 = vmul.f32 -1.442695, %v6568_v41  ;;  %v4909_v4 = vpop.f32.mrb[20].mxu0 }
 0x215   : > { %v5327_v48 = vpop.eup %5326  ;;  %5344 = vrcp.f32 %v3462_v16  ;;  %v4955_v43 = vadd.f32 %v4909_v4, %v4717_v49  ;;  %v2149_v10 = vpop.f32.mrb[21].mxu1  ;;  %v3553_v14 = vmul.f32 %v5325_v17, %v6489_v11 }
 0x216   : > { %v5329_v8 = vpop.eup %5328  ;;  %v3556_v36 = vmul.f32 %v5327_v48, %v6493_v30  ;;  %5346 = vpow2.f32 %v4096_v40  ;;  %v4095_v23 = vmul.f32 -1.442695, %v6571_v57  ;;  %v3239_v39 = vpop.f32.mrb[21].mxu0 }
 0x217   : > { %v5331_v38 = vpop.eup %5330  ;;  %v3554_v7 = vmul.f32 %v5329_v8, %v6497_v5  ;;  %5348 = vpow2.f32 %v4094_v50  ;;  %v4956_v24 = vadd.f32 %v3239_v39, %v2149_v10  ;;  %v4718_v3 = vpop.f32.mrb[22].mxu1  ;;  %v6580_v30 = vadd.f32 %v4955_v43, %v6467_v42 }
 0x218   : > { %v4910_v20 = vpop.f32.mrb[22].mxu0  ;;  %v5333_v1 = vpop.eup %5332  ;;  %v4194_v51 = vpack.c.bf16 %v3556_v36, %v3555_v62  ;;  %v3467_v32 = vadd.f32 1.0, %v5331_v38  ;;  %5350 = vpow2.f32 %v4097_v59 }
 0x219   : > { %v2152_v47 = vpop.f32.mrb[23].mxu1  ;;  %v3242_v52 = vpop.f32.mrb[23].mxu0  ;;  %v4189_v12 = vpack.c.bf16 %v3554_v7, %v3553_v14  ;;  %v3465_v11 = vadd.f32 1.0, %v5333_v1  ;;  %5352 = vpow2.f32 %v4095_v23  ;;  %v6583_v5 = vadd.f32 %v4956_v24, %v6467_v42 }
 0x21a   : > { %v5335_v15 = vpop.eup %5334  ;;  %4258 = vst [vmem:[%s6554_s15 + $0x18] sm:$0xff] %v4194_v51   ;;  %5354 = vrcp.f32 %v3467_v32  ;;  %v4100_v34 = vmul.f32 -1.442695, %v6580_v30  ;;  %v4957_v31 = vadd.f32 %v4910_v20, %v4718_v3  ;;  %v4958_v26 = vadd.f32 %v3242_v52, %v2152_v47 }
 0x21b   : > { %v5337_v2 = vpop.eup %5336  ;;  %v3468_v54 = vadd.f32 1.0, %v5335_v15  ;;  %4257 = vst [vmem:[%s6554_s15 + $0x10] sm:$0xff] %v4189_v12   ;;  %5356 = vrcp.f32 %v3465_v11  ;;  %v4098_v0 = vmul.f32 -1.442695, %v6583_v5  ;;  %v4721_v58 = vpop.f32.mrb[24].mxu1 }
 0x21c   : > { %v3466_v37 = vadd.f32 1.0, %v5337_v2  ;;  %v5339_v22 = vpop.eup %5338  ;;  %v6590_v46 = vadd.f32 %v4957_v31, %v6467_v42  ;;  %v6594_v21 = vadd.f32 %v4958_v26, %v6467_v42  ;;  %v4913_v13 = vpop.f32.mrb[24].mxu0 }
 0x21d   : > { %5358 = vrcp.f32 %v3468_v54  ;;  %v5341_v19 = vpop.eup %5340  ;;  %v3559_v63 = vmul.f32 %v5339_v22, %v6502_v44  ;;  %v4959_v61 = vadd.f32 %v4913_v13, %v4721_v58  ;;  %v2165_v40 = vpop.f32.mrb[25].mxu1 }
 0x21e   : > { %5360 = vrcp.f32 %v3466_v37  ;;  %v5343_v29 = vpop.eup %5342  ;;  %v3557_v55 = vmul.f32 %v5341_v19, %v6506_v18  ;;  %v4101_v33 = vmul.f32 -1.442695, %v6590_v46  ;;  %v3255_v53 = vpop.f32.mrb[25].mxu0  ;;  %v4099_v44 = vmul.f32 -1.442695, %v6594_v21 }
 0x21f   : > { %5362 = vpow2.f32 %v4100_v34  ;;  %v5345_v9 = vpop.eup %5344  ;;  %v3560_v16 = vmul.f32 %v5343_v29, %v6511_v28  ;;  %v4960_v50 = vadd.f32 %v3255_v53, %v2165_v40  ;;  %v4722_v17 = vpop.f32.mrb[26].mxu1  ;;  %v6602_v18 = vadd.f32 %v4959_v61, %v6467_v42 }
 0x220   : > { %5364 = vpow2.f32 %v4098_v0  ;;  %v4914_v48 = vpop.f32.mrb[26].mxu0  ;;  %v5347_v62 = vpop.eup %5346  ;;  %v3558_v59 = vmul.f32 %v5345_v9, %v6515_v45 }
 0x221   : > { %5366 = vpow2.f32 %v4101_v33  ;;  %v4961_v49 = vadd.f32 %v4914_v48, %v4722_v17  ;;  %v2168_v4 = vpop.f32.mrb[27].mxu1  ;;  %v3258_v8 = vpop.f32.mrb[27].mxu0  ;;  %v4204_v28 = vpack.c.bf16 %v3560_v16, %v3559_v63  ;;  %v3471_v23 = vadd.f32 1.0, %v5347_v62 }
 0x222   : > { %v5349_v36 = vpop.eup %5348  ;;  %5368 = vpow2.f32 %v4099_v44  ;;  %v6605_v43 = vadd.f32 %v4960_v50, %v6467_v42  ;;  %v4199_v39 = vpack.c.bf16 %v3558_v59, %v3557_v55  ;;  %v4104_v24 = vmul.f32 -1.442695, %v6602_v18 }
 0x223   : > { %v5351_v10 = vpop.eup %5350  ;;  %v3469_v38 = vadd.f32 1.0, %v5349_v36  ;;  %v6608_v45 = vadd.f32 %v4961_v49, %v6467_v42  ;;  %4260 = vst [vmem:[%s6554_s15 + $0x28] sm:$0xff] %v4204_v28   ;;  %5370 = vrcp.f32 %v3471_v23  ;;  %v4962_v3 = vadd.f32 %v3258_v8, %v2168_v4  ;;  %v4725_v15 = vpop.f32.mrb[28].mxu1 }
 0x224   : > { %v5353_v14 = vpop.eup %5352  ;;  %v3472_v7 = vadd.f32 1.0, %v5351_v10  ;;  %4259 = vst [vmem:[%s6554_s15 + $0x20] sm:$0xff] %v4199_v39   ;;  %v4102_v51 = vmul.f32 -1.442695, %v6605_v43  ;;  %v4917_v12 = vpop.f32.mrb[28].mxu0 }
 0x225   : > { %v5355_v20 = vpop.eup %5354  ;;  %5372 = vrcp.f32 %v3469_v38  ;;  %v3470_v1 = vadd.f32 1.0, %v5353_v14  ;;  %v4105_v47 = vmul.f32 -1.442695, %v6608_v45  ;;  %v6616_v52 = vadd.f32 %v4962_v3, %v6467_v42  ;;  %v2181_v31 = vpop.f32.mrb[29].mxu1 }
 0x226   : > { %v5357_v32 = vpop.eup %5356  ;;  %5374 = vrcp.f32 %v3472_v7  ;;  %v3563_v2 = vmul.f32 %v5355_v20, %v6530_v25  ;;  %v4963_v34 = vadd.f32 %v4917_v12, %v4725_v15  ;;  %v3271_v37 = vpop.f32.mrb[29].mxu0 }
 0x227   : > { %v5359_v11 = vpop.eup %5358  ;;  %v3561_v54 = vmul.f32 %v5357_v32, %v6534_v6  ;;  %5376 = vrcp.f32 %v3470_v1  ;;  %v4103_v22 = vmul.f32 -1.442695, %v6616_v52  ;;  %v4964_v19 = vadd.f32 %v3271_v37, %v2181_v31  ;;  %v4726_v63 = vpop.f32.mrb[30].mxu1 }
 0x228   : > { %v5361_v0 = vpop.eup %5360  ;;  %v3564_v26 = vmul.f32 %v5359_v11, %v6539_v60  ;;  %5378 = vpow2.f32 %v4104_v24  ;;  %v4918_v58 = vpop.f32.mrb[30].mxu0  ;;  %v6624_v25 = vadd.f32 %v4963_v34, %v6467_v42 }
 0x229   : > { %v5363_v13 = vpop.eup %5362  ;;  %v3562_v29 = vmul.f32 %v5361_v0, %v6543_v27  ;;  %5380 = vpow2.f32 %v4102_v51  ;;  %v4965_v6 = vadd.f32 %v4918_v58, %v4726_v63  ;;  %v2184_v55 = vpop.f32.mrb[31].mxu1  ;;  %v6627_v53 = vadd.f32 %v4964_v19, %v6467_v42 }
 0x22a   : > { %v3274_v33 = vpop.f32.mrb[31].mxu0  ;;  %v5365_v61 = vpop.eup %5364  ;;  %v4214_v60 = vpack.c.bf16 %v3564_v26, %v3563_v2  ;;  %v3475_v40 = vadd.f32 1.0, %v5363_v13  ;;  %5382 = vpow2.f32 %v4105_v47  ;;  %v4108_v17 = vmul.f32 -1.442695, %v6624_v25 }
 0x22b   : > { %v5367_v9 = vpop.eup %5366  ;;  %v4209_v16 = vpack.c.bf16 %v3562_v29, %v3561_v54  ;;  %v3473_v44 = vadd.f32 1.0, %v5365_v61  ;;  %5384 = vpow2.f32 %v4103_v22  ;;  %v6632_v48 = vadd.f32 %v4965_v6, %v6467_v42 }
 0x22c   : > { %v5369_v27 = vpop.eup %5368  ;;  %4262 = vst [vmem:[%s6554_s15 + $0x38] sm:$0xff] %v4214_v60   ;;  %5386 = vrcp.f32 %v3475_v40  ;;  %v3476_v50 = vadd.f32 1.0, %v5367_v9  ;;  %v4106_v59 = vmul.f32 -1.442695, %v6627_v53  ;;  %v4966_v49 = vadd.f32 %v3274_v33, %v2184_v55 }
 0x22d   : > { %4261 = vst [vmem:[%s6554_s15 + $0x30] sm:$0xff] %v4209_v16   ;;  %5388 = vrcp.f32 %v3473_v44  ;;  %v3474_v62 = vadd.f32 1.0, %v5369_v27  ;;  %v5371_v4 = vpop.eup %5370  ;;  %v4109_v8 = vmul.f32 -1.442695, %v6632_v48 }
 0x22e   : > { %5390 = vrcp.f32 %v3476_v50  ;;  %v6638_v28 = vadd.f32 %v4966_v49, %v6467_v42  ;;  %v3567_v39 = vmul.f32 %v5371_v4, %v6558_v35 }
 0x22f   : > { %v5373_v36 = vpop.eup %5372  ;;  %5392 = vrcp.f32 %v3474_v62 }
 0x230   : > { %v5375_v23 = vpop.eup %5374  ;;  %5394 = vpow2.f32 %v4108_v17  ;;  %v4107_v14 = vmul.f32 -1.442695, %v6638_v28  ;;  %v3565_v24 = vmul.f32 %v5373_v36, %v6561_v56 }
 0x231   : > { %v5377_v10 = vpop.eup %5376  ;;  %v3568_v38 = vmul.f32 %v5375_v23, %v6568_v41  ;;  %5396 = vpow2.f32 %v4106_v59 }
 0x232   : > { %v5379_v7 = vpop.eup %5378  ;;  %v3566_v3 = vmul.f32 %v5377_v10, %v6571_v57  ;;  %5398 = vpow2.f32 %v4109_v8 }
 0x233   : > { %v5381_v42 = vpop.eup %5380  ;;  %v4224_v20 = vpack.c.bf16 %v3568_v38, %v3567_v39  ;;  %v3479_v1 = vadd.f32 1.0, %v5379_v7  ;;  %5400 = vpow2.f32 %v4107_v14 }
 0x234   : > { %v5383_v51 = vpop.eup %5382  ;;  %v4219_v32 = vpack.c.bf16 %v3566_v3, %v3565_v24  ;;  %v3477_v35 = vadd.f32 1.0, %v5381_v42 }
 0x235   : > { %v5385_v47 = vpop.eup %5384  ;;  %4264 = vst [vmem:[%s6554_s15 + $0x48] sm:$0xff] %v4224_v20   ;;  %5402 = vrcp.f32 %v3479_v1  ;;  %v3480_v41 = vadd.f32 1.0, %v5383_v51 }
 0x236   : > { %v5387_v15 = vpop.eup %5386  ;;  %4263 = vst [vmem:[%s6554_s15 + $0x40] sm:$0xff] %v4219_v32   ;;  %5404 = vrcp.f32 %v3477_v35  ;;  %v3478_v12 = vadd.f32 1.0, %v5385_v47 }
 0x237   : > { %v5389_v11 = vpop.eup %5388  ;;  %5406 = vrcp.f32 %v3480_v41  ;;  %v3571_v2 = vmul.f32 %v5387_v15, %v6580_v30 }
 0x238   : > { %v5391_v56 = vpop.eup %5390  ;;  %5408 = vrcp.f32 %v3478_v12  ;;  %v3569_v31 = vmul.f32 %v5389_v11, %v6583_v5 }
 0x239   : > { %v5393_v57 = vpop.eup %5392  ;;  %v3572_v54 = vmul.f32 %v5391_v56, %v6590_v46 }
 0x23a   : > { %v5395_v34 = vpop.eup %5394  ;;  %v3570_v37 = vmul.f32 %v5393_v57, %v6594_v21 }
 0x23b   : > { %v5397_v0 = vpop.eup %5396  ;;  %v4234_v26 = vpack.c.bf16 %v3572_v54, %v3571_v2  ;;  %v3483_v22 = vadd.f32 1.0, %v5395_v34 }
 0x23c   : > { %v5399_v19 = vpop.eup %5398  ;;  %v4229_v63 = vpack.c.bf16 %v3570_v37, %v3569_v31  ;;  %v3481_v58 = vadd.f32 1.0, %v5397_v0 }
 0x23d   : > { %v5401_v13 = vpop.eup %5400  ;;  %4266 = vst [vmem:[%s6554_s15 + $0x58] sm:$0xff] %v4234_v26   ;;  %5410 = vrcp.f32 %v3483_v22  ;;  %v3484_v29 = vadd.f32 1.0, %v5399_v19 }
 0x23e   : > { %4265 = vst [vmem:[%s6554_s15 + $0x50] sm:$0xff] %v4229_v63   ;;  %5412 = vrcp.f32 %v3481_v58  ;;  %v3482_v30 = vadd.f32 1.0, %v5401_v13 }
 0x23f   : > { %v5403_v46 = vpop.eup %5402  ;;  %5414 = vrcp.f32 %v3484_v29 }
 0x240   : > { %v5405_v5 = vpop.eup %5404  ;;  %5416 = vrcp.f32 %v3482_v30  ;;  %v3575_v55 = vmul.f32 %v5403_v46, %v6602_v18 }
 0x241   : > { %v5407_v21 = vpop.eup %5406  ;;  %v3573_v61 = vmul.f32 %v5405_v5, %v6605_v43 }
 0x242   : > { %v5409_v6 = vpop.eup %5408  ;;  %v3576_v33 = vmul.f32 %v5407_v21, %v6608_v45 }
 0x243   : > { %v3574_v60 = vmul.f32 %v5409_v6, %v6616_v52 }
 0x244   : > { %v4244_v40 = vpack.c.bf16 %v3576_v33, %v3575_v55 }
 0x245   : > { %v4239_v9 = vpack.c.bf16 %v3574_v60, %v3573_v61 }
 0x246   : > { %4268 = vst [vmem:[%s6554_s15 + $0x68] sm:$0xff] %v4244_v40  }
 0x247   : > { %v5411_v16 = vpop.eup %5410  ;;  %4267 = vst [vmem:[%s6554_s15 + $0x60] sm:$0xff] %v4239_v9  }
 0x248   : > { %v5413_v44 = vpop.eup %5412  ;;  %v3579_v17 = vmul.f32 %v5411_v16, %v6624_v25 }
 0x249   : > { %v5415_v27 = vpop.eup %5414  ;;  %v3577_v45 = vmul.f32 %v5413_v44, %v6627_v53 }
 0x24a   : > { %v5417_v50 = vpop.eup %5416  ;;  %v3580_v18 = vmul.f32 %v5415_v27, %v6632_v48 }
 0x24b   : > { %v3578_v43 = vmul.f32 %v5417_v50, %v6638_v28 }
 0x24c   : > { %v4254_v62 = vpack.c.bf16 %v3580_v18, %v3579_v17 }
 0x24d   : > { %v4249_v59 = vpack.c.bf16 %v3578_v43, %v3577_v45 }
 0x24e   : > { %4270 = vst [vmem:[%s6554_s15 + $0x78] sm:$0xff] %v4254_v62  }
 0x24f   : > { %4269 = vst [vmem:[%s6554_s15 + $0x70] sm:$0xff] %v4249_v59  }
 0x250 PF: > { %s13_s12 = sadd.s32 1, %s5441_s12  }
 0x251   : > { %p10_p5 = scmp.ge.s32.totalorder %s13_s12, 4  }
 0x253   :  { %12 = sbr.rel (!%p10_p5) target bundleno = 1 (0x1), region = 70 }

// kernel: vqvae_forward.13
= control target key start
LH: loop header
LB: loop body
LE: loop exit
PB: predicated region body
PF: predicated region fallthrough
CT: control target
= control target key end

     0   :  { %s1307_s0 = inlined_call_operand.vmem [shape: bf16[32,128], index: 0, kind: input, shape index: {}]   ;;  %s1308_s1 = inlined_call_operand.vmem [shape: bf16[128,128], index: 1, kind: input, shape index: {}]   ;;  %s1309_s2 = inlined_call_operand.vmem [shape: f32[1,128], index: 2, kind: input, shape index: {}]   ;;  %s1310_s3 = inlined_call_operand.vmem [shape: f32[128,128], index: 3, kind: input, shape index: {}]   ;;  %s1311_s4 = inlined_call_operand.vmem [shape: f32[128,128], index: 4, kind: input, shape index: {}]   ;;  %s1312_s5 = inlined_call_operand.vmem [shape: f32[1,128], index: 5, kind: input, shape index: {}]   ;;  %s1313_s6 = inlined_call_operand.vmem [shape: bf16[128,128], index: 6, kind: input, shape index: {}]   ;;  %s1314_s7 = inlined_call_operand.vmem [shape: f32[1,128], index: 7, kind: input, shape index: {}]   ;;  %s1315_s8 = inlined_call_operand.vmem [shape: bf16[32,128], index: 8, kind: output, shape index: {0}]   ;;  %s1316_s9 = inlined_call_operand.vmem [shape: f32[1,128], index: 9, kind: output, shape index: {1}]   ;;  %s1317_s10 = inlined_call_operand.hbm [shape: f32[1,1], index: 10, kind: output, shape index: {2}]  }
   0x1   :  { %v984_v0 = vld [vmem:[%s1308_s1] sm:$0xff]   ;;  %v985_v1 = vld [vmem:[%s1308_s1 + $0x8] sm:$0xff]   ;;  %v986_v2 = vld [vmem:[%s1308_s1 + $0x10] sm:$0xff]  }
   0x2   :  { %799 = vmatprep.subr.bf16.mxu0 %v984_v0  ;;  %v987_v3 = vld [vmem:[%s1308_s1 + $0x18] sm:$0xff]   ;;  %v992_v4 = vld [vmem:[%s1307_s0] sm:$0xff]   ;;  %v194_v6 = vld [vmem:[%s1311_s4 + $0x8] sm:$0xff] }
   0x3   :  { %800 = vmatpush3.bf16.msra.mxu0 %v984_v0  ;;  %815 = vmatprep.mubr.bf16.mxu0 %v992_v4  ;;  %v193_v5 = vld [vmem:[%s1311_s4] sm:$0xff]  ;;  %v195_v7 = vld [vmem:[%s1311_s4 + $0x10] sm:$0xff]  ;;  %v196_v9 = vld [vmem:[%s1311_s4 + $0x18] sm:$0xff] }
   0x4   :  { %801 = vmatprep.subr.bf16.mxu0 %v985_v1  ;;  %v915_v8 = vpack.c.bf16 %v194_v6, %v193_v5  ;;  %v988_v10 = vld [vmem:[%s1308_s1 + $0x20] sm:$0xff]   ;;  %v919_v11 = vpack.c.bf16 %v196_v9, %v195_v7  ;;  %v198_v13 = vld [vmem:[%s1311_s4 + $0x28] sm:$0xff]  ;;  %v199_v15 = vld [vmem:[%s1311_s4 + $0x30] sm:$0xff] }
   0x5   :  { %v197_v12 = vld [vmem:[%s1311_s4 + $0x20] sm:$0xff]  ;;  %v989_v14 = vld [vmem:[%s1308_s1 + $0x28] sm:$0xff]   ;;  %v200_v16 = vld [vmem:[%s1311_s4 + $0x38] sm:$0xff] }
   0x6   :  { %916 = vmatprep.subr.bf16.mxu1 %v915_v8  ;;  %v923_v17 = vpack.c.bf16 %v198_v13, %v197_v12  ;;  %v990_v18 = vld [vmem:[%s1308_s1 + $0x30] sm:$0xff]   ;;  %v927_v19 = vpack.c.bf16 %v200_v16, %v199_v15  ;;  %v201_v20 = vld [vmem:[%s1311_s4 + $0x40] sm:$0xff]  ;;  %v202_v21 = vld [vmem:[%s1311_s4 + $0x48] sm:$0xff] }
   0x7   :  { %802 = vmatpush3.bf16.msra.mxu0 %v985_v1  ;;  %918 = vmatpush3.bf16.msra.mxu1 %v915_v8 }
   0x8   :  { %803 = vmatprep.subr.bf16.mxu0 %v986_v2  ;;  %920 = vmatprep.subr.bf16.mxu1 %v919_v11 }
   0xb   :  { %804 = vmatpush3.bf16.msra.mxu0 %v986_v2  ;;  %922 = vmatpush3.bf16.msra.mxu1 %v919_v11 }
   0xc   :  { %805 = vmatprep.subr.bf16.mxu0 %v987_v3  ;;  %924 = vmatprep.subr.bf16.mxu1 %v923_v17 }
   0xf   :  { %806 = vmatpush3.bf16.msra.mxu0 %v987_v3 }
  0x10   :  { %807 = vmatprep.subr.bf16.mxu0 %v988_v10 }
  0x13   :  { %808 = vmatpush3.bf16.msra.mxu0 %v988_v10 }
  0x14   :  { %809 = vmatprep.subr.bf16.mxu0 %v989_v14 }
  0x15   :  { %16 = vsyncpa [#allocation3], 0  ;;  %926 = vmatpush3.bf16.msra.mxu1 %v923_v17  ;;  %v931_v22 = vpack.c.bf16 %v202_v21, %v201_v20  ;;  %v991_v23 = vld [vmem:[%s1308_s1 + $0x38] sm:$0xff]   ;;  %v203_v24 = vld [vmem:[%s1311_s4 + $0x50] sm:$0xff]  ;;  %v302_v48 = vlaneseq  ;;  %vm525_vm13 = vcmask 0  }
  0x16   :  { %928 = vmatprep.subr.bf16.mxu1 %v927_v19  ;;  %v204_v25 = vld [vmem:[%s1311_s4 + $0x58] sm:$0xff]  ;;  %v205_v27 = vld [vmem:[%s1311_s4 + $0x60] sm:$0xff]  ;;  %v206_v28 = vld [vmem:[%s1311_s4 + $0x68] sm:$0xff] }
  0x17   :  { %810 = vmatpush3.bf16.msra.mxu0 %v989_v14  ;;  %v935_v26 = vpack.c.bf16 %v204_v25, %v203_v24  ;;  %v993_v29 = vld [vmem:[%s1307_s0 + $0x8] sm:$0xff]   ;;  %v939_v30 = vpack.c.bf16 %v206_v28, %v205_v27  ;;  %v207_v31 = vld [vmem:[%s1311_s4 + $0x70] sm:$0xff]  ;;  %v208_v32 = vld [vmem:[%s1311_s4 + $0x78] sm:$0xff]  ;;  %v1185_v51 = vand.u32 127, %v302_v48 }
  0x18   :  { %811 = vmatprep.subr.bf16.mxu0 %v990_v18  ;;  %v943_v33 = vpack.c.bf16 %v208_v32, %v207_v31  ;;  %v691_v34 = vld [vmem:[%s1309_s2] ss:$0 sm:$0xff]  ;;  %v394_v27 = vld [vmem:[%s1310_s3 + $0x8] sm:$0xff]  ;;  %v395_v28 = vld [vmem:[%s1310_s3 + $0x10] sm:$0xff] }
  0x19   :  { %930 = vmatpush3.bf16.msra.mxu1 %v927_v19  ;;  %v702_v52 = vld [vmem:[%s1312_s5] ss:$0 sm:$0xff]  ;;  %vm304_vm0 = vcmp.lt.s32.totalorder %v1185_v51, 64 }
  0x1a   :  { %932 = vmatprep.subr.bf16.mxu1 %v931_v22  ;;  %v397_v32 = vld [vmem:[%s1310_s3 + $0x20] sm:$0xff] }
  0x1b   :  { %812 = vmatpush3.bf16.msra.mxu0 %v990_v18  ;;  %v405_v48 = vld [vmem:[%s1310_s3 + $0x60] sm:$0xff] }
  0x1c   :  { %813 = vmatprep.subr.bf16.mxu0 %v991_v23 }
  0x1d   :  { %934 = vmatpush3.bf16.msra.mxu1 %v931_v22 }
  0x1e   :  { %936 = vmatprep.subr.bf16.mxu1 %v935_v26 }
  0x1f   :  { %814 = vmatpush3.bf16.msra.mxu0 %v991_v23 }
  0x21   :  { %938 = vmatpush3.bf16.msra.mxu1 %v935_v26  ;;  %v393_v26 = vld [vmem:[%s1310_s3] sm:$0xff] }
  0x22   :  { %816 = vmatmul.mubr.bf16.vlgmr.msra.gmra.mrb[0].mxu0 %v993_v29  ;;  %940 = vmatprep.subr.bf16.mxu1 %v939_v30  ;;  %v947_v29 = vpack.c.bf16 %v394_v27, %v393_v26 }
  0x24   :  { %948 = vmatprep.subr.bf16.mxu0 %v947_v29 }
  0x25   :  { %942 = vmatpush3.bf16.msra.mxu1 %v939_v30  ;;  %v396_v30 = vld [vmem:[%s1310_s3 + $0x18] sm:$0xff]  ;;  %950 = vmatpush3.bf16.msra.mxu0 %v947_v29 }
  0x26   :  { %944 = vmatprep.subr.bf16.mxu1 %v943_v33  ;;  %v951_v31 = vpack.c.bf16 %v396_v30, %v395_v28  ;;  %v1026_v30 = vmov 0.0  }
  0x28   :  { %952 = vmatprep.subr.bf16.mxu0 %v951_v31 }
  0x29   :  { %946 = vmatpush3.bf16.msra.mxu1 %v943_v33  ;;  %v398_v33 = vld [vmem:[%s1310_s3 + $0x28] sm:$0xff]  ;;  %954 = vmatpush3.bf16.msra.mxu0 %v951_v31 }
  0xf5   :  { %v817_v35 = vpop.f32.mrb[0].mxu0 }
  0xf6   :  { %v1165_v36 = vadd.f32 %v817_v35, %v691_v34  ;;  %v155_v37 = vpop.f32.mrb[1].mxu0  ;;  %v399_v35 = vld [vmem:[%s1310_s3 + $0x30] sm:$0xff] }
  0xf7   :  { %v1167_v38 = vadd.f32 %v691_v34, %v155_v37  ;;  %v818_v39 = vpop.f32.mrb[2].mxu0  ;;  %v400_v37 = vld [vmem:[%s1310_s3 + $0x38] sm:$0xff] }
  0xf8   :  { %v1169_v40 = vadd.f32 %v818_v39, %v691_v34  ;;  %v158_v41 = vpop.f32.mrb[3].mxu0  ;;  %v172_v42 = vmul.f32 %v1165_v36, %v1165_v36  ;;  %v959_v39 = vpack.c.bf16 %v400_v37, %v399_v35  ;;  %v1027_v35 = vmov 1.0  }
  0xf9   :  { %v1173_v43 = vadd.f32 %v691_v34, %v158_v41  ;;  %851 = vmatprep.mubr.f32.mxu1 %v1167_v38  ;;  %v170_v44 = vmul.f32 %v1167_v38, %v1167_v38  ;;  %v955_v34 = vpack.c.bf16 %v398_v33, %v397_v32  ;;  %v401_v41 = vld [vmem:[%s1310_s3 + $0x40] sm:$0xff] }
  0xfa   :  { %178 = vadd.xlane.f32.xlu1 %v172_v42  ;;  %v173_v45 = vmul.f32 %v1169_v40, %v1169_v40  ;;  %v402_v42 = vld [vmem:[%s1310_s3 + $0x48] sm:$0xff] }
  0xfb   :  { %852 = vmatmul.mubr.f32.vlgmr.msra.gmra.mrb[0].mxu1 %v1173_v43  ;;  %174 = vadd.xlane.f32.xlu0 %v170_v44  ;;  %v171_v46 = vmul.f32 %v1173_v43, %v1173_v43  ;;  %v963_v44 = vpack.c.bf16 %v402_v42, %v401_v41 }
  0xfc   :  { %854 = vmatprep.mubr.f32.mxu1 %v1165_v36  ;;  %956 = vmatprep.subr.bf16.mxu0 %v955_v34 }
  0xfd   :  { %958 = vmatpush3.bf16.msra.mxu0 %v955_v34 }
  0xfe   :  { %180 = vadd.xlane.f32.xlu1 %v173_v45  ;;  %960 = vmatprep.subr.bf16.mxu0 %v959_v39  ;;  %v403_v45 = vld [vmem:[%s1310_s3 + $0x50] sm:$0xff] }
  0xff   :  { %855 = vmatmul.mubr.f32.gmra.mrb[2].mxu1 %v1169_v40  ;;  %176 = vadd.xlane.f32.xlu0 %v171_v46  ;;  %v404_v46 = vld [vmem:[%s1310_s3 + $0x58] sm:$0xff] }
 0x101   :  { %962 = vmatpush3.bf16.msra.mxu0 %v959_v39 }
 0x102   :  { %964 = vmatprep.subr.bf16.mxu0 %v963_v44 }
 0x105   :  { %966 = vmatpush3.bf16.msra.mxu0 %v963_v44 }
 0x187   :  { %v179_v49 = vpop.xlane.xlu1 %178 }
 0x188   :  { %v175_v47 = vpop.xlane.xlu0 %174  ;;  %v191_v3 = vadd.f32 %v702_v52, %v179_v49  ;;  %v406_v49 = vld [vmem:[%s1310_s3 + $0x68] sm:$0xff] }
 0x189   :  { %v189_v57 = vadd.f32 %v702_v52, %v175_v47  ;;  %v967_v47 = vpack.c.bf16 %v404_v46, %v403_v45 }
 0x18b   :  { %v181_v58 = vpop.xlane.xlu1 %180  ;;  %968 = vmatprep.subr.bf16.mxu0 %v967_v47 }
 0x18c   :  { %v177_v50 = vpop.xlane.xlu0 %176  ;;  %v192_v63 = vadd.f32 %v702_v52, %v181_v58  ;;  %970 = vmatpush3.bf16.msra.mxu0 %v967_v47 }
 0x18d   :  { %v190_v54 = vadd.f32 %v702_v52, %v177_v50  ;;  %v971_v50 = vpack.c.bf16 %v406_v49, %v405_v48 }
 0x18f   :  { %972 = vmatprep.subr.bf16.mxu0 %v971_v50 }
 0x190   :  { %974 = vmatpush3.bf16.msra.mxu0 %v971_v50 }
 0x1ce   :  { %v853_v53 = vpop.f32.mrb[0].mxu1 }
 0x1cf   :  { %v295_v55 = vmul.f32 2.0, %v853_v53  ;;  %v275_v56 = vpop.f32.mrb[1].mxu1 }
 0x1d0   :  { %v294_v59 = vmul.f32 2.0, %v275_v56 }
 0x1d1   :  { %v299_v60 = vsub.f32 %v190_v54, %v295_v55 }
 0x1d2   :  { %v856_v61 = vpop.f32.mrb[2].mxu1  ;;  %v298_v62 = vsub.f32 %v189_v57, %v294_v59 }
 0x1d3   :  { %v297_v0 = vmul.f32 2.0, %v856_v61  ;;  %v285_v1 = vpop.f32.mrb[3].mxu1  ;;  %v306_v2 = vsel %vm304_vm0, %v299_v60, inf }
 0x1d4   :  { %v296_v4 = vmul.f32 2.0, %v285_v1  ;;  %311 = vmin.xlane.f32.xlu1 %v306_v2  ;;  %v305_v5 = vsel %vm304_vm0, %v298_v62, inf }
 0x1d5   :  { %309 = vmin.xlane.f32.xlu0 %v305_v5  ;;  %v301_v6 = vsub.f32 %v192_v63, %v297_v0 }
 0x1d6   :  { %v300_v7 = vsub.f32 %v191_v3, %v296_v4  ;;  %v407_v4 = vld [vmem:[%s1310_s3 + $0x70] sm:$0xff] }
 0x1d7   :  { %v308_v8 = vsel %vm304_vm0, %v301_v6, inf }
 0x1d8   :  { %315 = vmin.xlane.f32.xlu1 %v308_v8  ;;  %v307_v9 = vsel %vm304_vm0, %v300_v7, inf  ;;  %v994_v7 = vld [vmem:[%s1313_s6] sm:$0xff]  }
 0x1d9   :  { %313 = vmin.xlane.f32.xlu0 %v307_v9  ;;  %895 = vmatprep.subr.bf16.mxu1 %v994_v7 }
 0x1da   :  { %896 = vmatpush3.bf16.msra.mxu1 %v994_v7 }
 0x261   :  { %v312_v10 = vpop.xlane.xlu1 %311 }
 0x262   :  { %vm318_vm1 = vcmp.le.f32.partialorder %v306_v2, %v312_v10  ;;  %v310_v11 = vpop.xlane.xlu0 %309  ;;  %v997_v10 = vld [vmem:[%s1313_s6 + $0x18] sm:$0xff]  }
 0x263   :  { %v322_v12 = vsel %vm318_vm1, %v1185_v51, 128  ;;  %vm317_vm2 = vcmp.le.f32.partialorder %v305_v5, %v310_v11  ;;  %v408_v5 = vld [vmem:[%s1310_s3 + $0x78] sm:$0xff]  ;;  %v998_v11 = vld [vmem:[%s1313_s6 + $0x20] sm:$0xff]  }
 0x264   :  { %v321_v13 = vsel %vm317_vm2, %v1185_v51, 128  ;;  %v340_v14 = vshra.s32 %v322_v12, 16  ;;  %v339_v52 = vand.u32 65535, %v322_v12  ;;  %v975_v6 = vpack.c.bf16 %v408_v5, %v407_v4  ;;  %v999_v12 = vld [vmem:[%s1313_s6 + $0x28] sm:$0xff]  }
 0x265   :  { %v316_v15 = vpop.xlane.xlu1 %315  ;;  %v326_v16 = vshra.s32 %v321_v13, 16  ;;  %v325_v53 = vand.u32 65535, %v321_v13 }
 0x266   :  { %vm320_vm3 = vcmp.le.f32.partialorder %v308_v8, %v316_v15  ;;  %v314_v17 = vpop.xlane.xlu0 %313  ;;  %v342_v18 = vcvt.s32.f32 %v340_v14  ;;  %v341_v56 = vcvt.s32.f32 %v339_v52  ;;  %976 = vmatprep.subr.bf16.mxu0 %v975_v6  ;;  %v995_v8 = vld [vmem:[%s1313_s6 + $0x8] sm:$0xff]  }
 0x267   :  { %v324_v19 = vsel %vm320_vm3, %v1185_v51, 128  ;;  %vm319_vm4 = vcmp.le.f32.partialorder %v307_v9, %v314_v17  ;;  %v328_v20 = vcvt.s32.f32 %v326_v16  ;;  %v327_v59 = vcvt.s32.f32 %v325_v53  ;;  %978 = vmatpush3.bf16.msra.mxu0 %v975_v6  ;;  %897 = vmatprep.subr.bf16.mxu1 %v995_v8  ;;  %v996_v9 = vld [vmem:[%s1313_s6 + $0x10] sm:$0xff]   ;;  %v1001_v53 = vld [vmem:[%s1313_s6 + $0x38] sm:$0xff]  }
 0x268   :  { %v323_v21 = vsel %vm319_vm4, %v1185_v51, 128  ;;  %343 = vmin.xlane.f32.xlu1 %v342_v18  ;;  %v368_v22 = vshra.s32 %v324_v19, 16  ;;  %v367_v54 = vand.u32 65535, %v324_v19  ;;  %898 = vmatpush3.bf16.msra.mxu1 %v995_v8 }
 0x269   :  { %329 = vmin.xlane.f32.xlu0 %v328_v20  ;;  %v354_v23 = vshra.s32 %v323_v21, 16  ;;  %v353_v57 = vand.u32 65535, %v323_v21  ;;  %899 = vmatprep.subr.bf16.mxu1 %v996_v9 }
 0x26a   :  { %v370_v24 = vcvt.s32.f32 %v368_v22  ;;  %v369_v63 = vcvt.s32.f32 %v367_v54 }
 0x26b   :  { %v356_v25 = vcvt.s32.f32 %v354_v23  ;;  %v355_v1 = vcvt.s32.f32 %v353_v57 }
 0x26c   :  { %371 = vmin.xlane.f32.xlu1 %v370_v24  ;;  %900 = vmatpush3.bf16.msra.mxu1 %v996_v9 }
 0x26d   :  { %357 = vmin.xlane.f32.xlu0 %v356_v25  ;;  %901 = vmatprep.subr.bf16.mxu1 %v997_v10 }
 0x270   :  { %902 = vmatpush3.bf16.msra.mxu1 %v997_v10 }
 0x271   :  { %903 = vmatprep.subr.bf16.mxu1 %v998_v11 }
 0x274   :  { %904 = vmatpush3.bf16.msra.mxu1 %v998_v11 }
 0x275   :  { %905 = vmatprep.subr.bf16.mxu1 %v999_v12 }
 0x278   :  { %906 = vmatpush3.bf16.msra.mxu1 %v999_v12  ;;  %v711_v12 = vld [vmem:[%s1314_s7] ss:$0 sm:$0xff] }
 0x2f5   :  { %v344_v55 = vpop.xlane.xlu1 %343 }
 0x2f6   :  { %v330_v58 = vpop.xlane.xlu0 %329  ;;  %vm345_vm5 = vcmp.eq.f32.partialorder %v342_v18, %v344_v55  ;;  %v350_v13 = vcvt.f32.s32 %v344_v55 }
 0x2f7   :  { %v346_v60 = vsel %vm345_vm5, %v341_v56, inf  ;;  %vm331_vm6 = vcmp.eq.f32.partialorder %v328_v20, %v330_v58  ;;  %v336_v14 = vcvt.f32.s32 %v330_v58 }
 0x2f8   :  { %347 = vmin.xlane.f32.xlu1 %v346_v60  ;;  %v332_v61 = vsel %vm331_vm6, %v327_v59, inf  ;;  %v351_v16 = vshll.u32 %v350_v13, 16 }
 0x2f9   :  { %v372_v62 = vpop.xlane.xlu1 %371  ;;  %333 = vmin.xlane.f32.xlu0 %v332_v61  ;;  %v337_v20 = vshll.u32 %v336_v14, 16 }
 0x2fa   :  { %v358_v0 = vpop.xlane.xlu0 %357  ;;  %vm373_vm7 = vcmp.eq.f32.partialorder %v370_v24, %v372_v62  ;;  %v378_v17 = vcvt.f32.s32 %v372_v62 }
 0x2fb   :  { %v374_v2 = vsel %vm373_vm7, %v369_v63, inf  ;;  %vm359_vm8 = vcmp.eq.f32.partialorder %v356_v25, %v358_v0  ;;  %v364_v21 = vcvt.f32.s32 %v358_v0 }
 0x2fc   :  { %375 = vmin.xlane.f32.xlu1 %v374_v2  ;;  %v360_v3 = vsel %vm359_vm8, %v355_v1, inf  ;;  %v379_v26 = vshll.u32 %v378_v17, 16 }
 0x2fd   :  { %361 = vmin.xlane.f32.xlu0 %v360_v3  ;;  %v365_v29 = vshll.u32 %v364_v21, 16 }
 0x385   :  { %v348_v15 = vpop.xlane.xlu1 %347 }
 0x386   :  { %v349_v18 = vcvt.f32.s32 %v348_v15  ;;  %v334_v19 = vpop.xlane.xlu0 %333 }
 0x387   :  { %v335_v22 = vcvt.f32.s32 %v334_v19 }
 0x388   :  { %v352_v23 = vadd.s32 %v351_v16, %v349_v18 }
 0x389   :  { %v338_v24 = vadd.s32 %v337_v20, %v335_v22  ;;  %v376_v25 = vpop.xlane.xlu1 %375 }
 0x38a   :  { %vm382_vm9 = vcmp.eq.s32.totalorder %v1185_v51, %v352_v23  ;;  %v377_v27 = vcvt.f32.s32 %v376_v25  ;;  %v362_v28 = vpop.xlane.xlu0 %361 }
 0x38b   :  { %v704_v31 = vsel %vm382_vm9, 1.0, %v1026_v30  ;;  %v363_v32 = vcvt.f32.s32 %v362_v28  ;;  %vm381_vm10 = vcmp.eq.s32.totalorder %v1185_v51, %v338_v24 }
 0x38c   :  { %v380_v33 = vadd.s32 %v379_v26, %v377_v27  ;;  %v703_v34 = vsel %vm381_vm10, 1.0, %v1026_v30  ;;  %889 = vmatprep.mubr.msk.f32.mxu0 %vm381_vm10, %v1027_v35 }
 0x38d   :  { %v366_v37 = vadd.s32 %v365_v29, %v363_v32  ;;  %v494_v39 = vadd.f32 %v704_v31, %v703_v34  ;;  %890 = vmatmul.mubr.msk.f32.vlgmr.msra.gmra.mrb[4].mxu0 %vm382_vm9, %v1027_v35 }
 0x38e   :  { %vm384_vm12 = vcmp.eq.s32.totalorder %v1185_v51, %v380_v33 }
 0x38f   :  { %vm383_vm11 = vcmp.eq.s32.totalorder %v1185_v51, %v366_v37  ;;  %v706_v44 = vsel %vm384_vm12, 1.0, %v1026_v30  ;;  %v1000_v51 = vld [vmem:[%s1313_s6 + $0x30] sm:$0xff]   ;;  %s1028_s6 = smov [#allocation2]  }
 0x390   :  { %v705_v41 = vsel %vm383_vm11, 1.0, %v1026_v30  ;;  %892 = vmatprep.mubr.msk.f32.mxu0 %vm383_vm11, %v1027_v35  ;;  %907 = vmatprep.subr.bf16.mxu1 %v1000_v51 }
 0x391   :  { %v495_v42 = vadd.f32 %v705_v41, %v494_v39  ;;  %893 = vmatmul.mubr.msk.f32.gmra.mrb[6].mxu0 %vm384_vm12, %v1027_v35  ;;  %908 = vmatpush3.bf16.msra.mxu1 %v1000_v51 }
 0x392   :  { %909 = vmatprep.subr.bf16.mxu1 %v1001_v53 }
 0x393   :  { %v496_v45 = vadd.f32 %v706_v44, %v495_v42 }
 0x395   :  { %v497_v46 = vrot.slane %v496_v45, 4  ;;  %910 = vmatpush3.bf16.msra.mxu1 %v1001_v53 }
 0x397   :  { %v498_v47 = vadd.f32 %v497_v46, %v496_v45 }
 0x399   :  { %v499_v48 = vrot.slane %v498_v47, 2 }
 0x39b   :  { %v500_v49 = vadd.f32 %v499_v48, %v498_v47 }
 0x39d   :  { %v501_v50 = vrot.slane %v500_v49, 1 }
 0x39f   :  { %v502_v52 = vadd.f32 %v501_v50, %v500_v49 }
 0x3a1   :  { %503 = vst [vmem:[%s1316_s9] sm:$0x1] %v502_v52  ;;  %s679_s9 = sshll.u32 %s1028_s6, 4  ;;  %s680_s9 = int_to_ptr.vmem [resolvable:$true] %s679_s9 }
 0x3a2   :  { %s1002_s26 = scalar_lea.vmem %s680_s9, 16  ;;  %s1006_s27 = scalar_lea.vmem %s680_s9, 32 }
 0x3a3   :  { %p1003_p0 = scmp.ne.s32.totalorder %s680_s9, %s1002_s26  ;;  %p1007_p1 = scmp.lt.s32.totalorder %s680_s9, %s680_s9 }
 0x3a4   :  { %p1008_p2 = scmp.lt.s32.totalorder %s1006_s27, %s1002_s26 }
 0x3a6   :  { %p1009_p3 = por %p1008_p2, %p1007_p1 }
 0x3a8   :  { %p1010_p4 = pnand %p1009_p3, %p1003_p0 }
 0x460   :  { %v891_v54 = vpop.f32.mrb[4].mxu0 }
 0x461   :  { %v505_v55 = vsub.f32 %v891_v54, %v1173_v43  ;;  %v475_v56 = vpop.f32.mrb[5].mxu0 }
 0x462   :  { %v504_v57 = vsub.f32 %v475_v56, %v1167_v38  ;;  %v527_v58 = vpack.c.bf16 %v891_v54, %v475_v56 }
 0x463   :  { %v509_v59 = vmul.f32 %v505_v55, %v505_v55 }
 0x464   :  { %v508_v60 = vmul.f32 %v504_v57, %v504_v57  ;;  %v894_v61 = vpop.f32.mrb[6].mxu0  ;;  %911 = vmatprep.mubr.bf16.mxu1 %v527_v58 }
 0x465   :  { %v485_v62 = vpop.f32.mrb[7].mxu0  ;;  %v507_v0 = vsub.f32 %v894_v61, %v1169_v40 }
 0x466   :  { %v512_v63 = vadd.f32 %v509_v59, %v508_v60  ;;  %v506_v1 = vsub.f32 %v485_v62, %v1165_v36  ;;  %v528_v2 = vpack.c.bf16 %v894_v61, %v485_v62 }
 0x467   :  { %v511_v4 = vmul.f32 %v507_v0, %v507_v0 }
 0x468   :  { %v510_v3 = vmul.f32 %v506_v1, %v506_v1  ;;  %912 = vmatmul.mubr.bf16.vlgmr.msra.gmra.mrb[4].mxu1 %v528_v2 }
 0x46a   :  { %v513_v5 = vadd.f32 %v512_v63, %v510_v3 }
 0x46c   :  { %v514_v43 = vadd.f32 %v513_v5, %v511_v4 }
 0x46e   :  { %515 = vadd.xlane.f32.xlu0 %v514_v43 }
 0x4fb   :  { %v516_v6 = vpop.xlane.xlu0 %515 }
 0x4fc   :  { %v517_v38 = vrot.slane %v516_v6, 4 }
 0x4fe   :  { %v518_v7 = vadd.f32 %v517_v38, %v516_v6 }
 0x500   :  { %v519_v8 = vrot.slane %v518_v7, 2 }
 0x502   :  { %v520_v9 = vadd.f32 %v519_v8, %v518_v7 }
 0x504   :  { %v521_v10 = vrot.slane %v520_v9, 1 }
 0x506   :  { %v522_v11 = vadd.f32 %v521_v10, %v520_v9 }
 0x508   :  { %979 = vpush %v522_v11 }
 0x539   :  { %s980_s4 = spop %979 }
 0x53a   :  { %v524_v36 = vstv %s980_s4 }
 0x53b   :  { %526 = vst.msk [vmem:[#allocation2] sm:$0x1] %vm525_vm13, %v524_v36  ;;  %v913_v40 = vpop.f32.mrb[4].mxu1 }
 0x53c   :  { %v634_v13 = vpop.f32.mrb[5].mxu1 }
 0x53d   :  { %1013 = shalt.err (!%p1010_p4)
}
 0x53e   :  { %s1014_s30 = scalar_lea.hbm %s1317_s10, 16 }
 0x53f   :  { %p1015_p5 = scmp.ne.s32.totalorder %s1317_s10, %s1014_s30  ;;  %p1018_p6 = scmp.lt.u32.totalorder %s1014_s30, %s1317_s10 }
 0x541   :  { %p1020_p7 = pnand %p1018_p6, %p1015_p5 }
 0x543   :  { %1023 = shalt.err (!%p1020_p7)
}
 0x544   :  { %682 = dma.vmem_to_hbm [thread:$0]  %s680_s9, 16, %s1317_s10, [#allocation3]   ;;  %v914_v14 = vpop.f32.mrb[6].mxu1  ;;  %v643_v15 = vadd.f32 %v913_v40, %v711_v12  ;;  %v635_v18 = vadd.f32 %v711_v12, %v634_v13 }
 0x545   :  { %v646_v16 = vadd.f32 %v914_v14, %v711_v12  ;;  %v637_v17 = vpop.f32.mrb[7].mxu1 }
 0x546   :  { %v638_v19 = vadd.f32 %v711_v12, %v637_v17 }
 0x547   :  { %v736_v20 = vpack.c.bf16 %v646_v16, %v643_v15 }
 0x548   :  { %v731_v21 = vpack.c.bf16 %v638_v19, %v635_v18 }
 0x549   :  { %738 = vst [vmem:[%s1315_s8 + $0x8] sm:$0xff] %v736_v20  }
 0x54a   :  { %732 = vst [vmem:[%s1315_s8] sm:$0xff] %v731_v21  }
 0x54b   :  { %1024 = dma.done.wait [#allocation3], 16  }
 0x54c   :  { %1025 = vsyncadd [#allocation3], 4294967280 }
 0x54d   :  { %690 = vsyncpa [#allocation3], 1 }

// kernel: vqvae_forward.12
= control target key start
LH: loop header
LB: loop body
LE: loop exit
PB: predicated region body
PF: predicated region fallthrough
CT: control target
= control target key end

     0   :  { %s2216_s1 = inlined_call_operand.vmem [shape: bf16[9,128,128], index: 1, kind: input, shape index: {}]   ;;  %s2217_s0 = inlined_call_operand.vmem [shape: bf16[9,32,128], index: 0, kind: input, shape index: {}]   ;;  %s2218_s2 = inlined_call_operand.vmem [shape: f32[1,128], index: 2, kind: input, shape index: {}]   ;;  %s2219_s3 = inlined_call_operand.vmem [shape: bf16[32,128], index: 3, kind: output, shape index: {}]  }
   0x1   :  { %v1827_v0 = vld [vmem:[%s2216_s1 + $0x40] sm:$0xff]   ;;  %v1829_v2 = vld [vmem:[%s2216_s1 + $0x48] sm:$0xff]   ;;  %v1831_v4 = vld [vmem:[%s2216_s1 + $0x50] sm:$0xff]  }
   0x2   :  { %v1828_v1 = vld [vmem:[%s2216_s1 + $0x100] sm:$0xff]   ;;  %1615 = vmatprep.subr.bf16.mxu1 %v1827_v0  ;;  %v1830_v3 = vld [vmem:[%s2216_s1 + $0x108] sm:$0xff]   ;;  %v1832_v5 = vld [vmem:[%s2216_s1 + $0x110] sm:$0xff]  }
   0x3   :  { %1695 = vmatprep.subr.bf16.mxu0 %v1828_v1  ;;  %1616 = vmatpush3.bf16.msra.mxu1 %v1827_v0  ;;  %v1833_v6 = vld [vmem:[%s2216_s1 + $0x58] sm:$0xff]   ;;  %v1835_v8 = vld [vmem:[%s2216_s1 + $0x60] sm:$0xff]   ;;  %v1837_v10 = vld [vmem:[%s2216_s1 + $0x68] sm:$0xff]  }
   0x4   :  { %1696 = vmatpush3.bf16.msra.mxu0 %v1828_v1  ;;  %1617 = vmatprep.subr.bf16.mxu1 %v1829_v2  ;;  %v1834_v7 = vld [vmem:[%s2216_s1 + $0x118] sm:$0xff]   ;;  %v1836_v9 = vld [vmem:[%s2216_s1 + $0x120] sm:$0xff]   ;;  %v1843_v11 = vld [vmem:[%s2217_s0 + $0x10] sm:$0xff]  }
   0x5   :  { %1697 = vmatprep.subr.bf16.mxu0 %v1830_v3  ;;  %v1838_v12 = vld [vmem:[%s2216_s1 + $0x128] sm:$0xff]   ;;  %1631 = vmatprep.mubr.bf16.mxu1 %v1843_v11  ;;  %v1845_v13 = vld [vmem:[%s2217_s0 + $0x40] sm:$0xff]   ;;  %v1839_v14 = vld [vmem:[%s2216_s1 + $0x70] sm:$0xff]  }
   0x6   :  { %v1840_v15 = vld [vmem:[%s2216_s1 + $0x130] sm:$0xff]   ;;  %1711 = vmatprep.mubr.bf16.mxu0 %v1845_v13  ;;  %v1841_v16 = vld [vmem:[%s2216_s1 + $0x78] sm:$0xff]   ;;  %v1844_v18 = vld [vmem:[%s2216_s1] sm:$0xff]  }
   0x7   :  { %1618 = vmatpush3.bf16.msra.mxu1 %v1829_v2  ;;  %v1842_v17 = vld [vmem:[%s2216_s1 + $0x138] sm:$0xff]   ;;  %v1846_v19 = vld [vmem:[%s2216_s1 + $0x140] sm:$0xff]   ;;  %v1848_v21 = vld [vmem:[%s2217_s0 + $0x48] sm:$0xff]  }
   0x8   :  { %1698 = vmatpush3.bf16.msra.mxu0 %v1830_v3  ;;  %1619 = vmatprep.subr.bf16.mxu1 %v1831_v4  ;;  %v1847_v20 = vld [vmem:[%s2217_s0 + $0x18] sm:$0xff]   ;;  %v1849_v22 = vld [vmem:[%s2216_s1 + $0x8] sm:$0xff]   ;;  %v1851_v24 = vld [vmem:[%s2216_s1 + $0x10] sm:$0xff]  }
   0x9   :  { %1699 = vmatprep.subr.bf16.mxu0 %v1832_v5  ;;  %v1850_v23 = vld [vmem:[%s2216_s1 + $0x148] sm:$0xff]   ;;  %v1863_v25 = vld [vmem:[%s2217_s0] sm:$0xff]   ;;  %v1852_v26 = vld [vmem:[%s2216_s1 + $0x150] sm:$0xff]  }
   0xa   :  { %v1865_v27 = vld [vmem:[%s2217_s0 + $0x50] sm:$0xff]   ;;  %v1853_v28 = vld [vmem:[%s2216_s1 + $0x18] sm:$0xff]   ;;  %v1855_v30 = vld [vmem:[%s2216_s1 + $0x20] sm:$0xff]  }
   0xb   :  { %1620 = vmatpush3.bf16.msra.mxu1 %v1831_v4  ;;  %v1854_v29 = vld [vmem:[%s2216_s1 + $0x158] sm:$0xff]   ;;  %v1856_v31 = vld [vmem:[%s2216_s1 + $0x160] sm:$0xff]   ;;  %v1857_v32 = vld [vmem:[%s2216_s1 + $0x28] sm:$0xff]  }
   0xc   :  { %1700 = vmatpush3.bf16.msra.mxu0 %v1832_v5  ;;  %1621 = vmatprep.subr.bf16.mxu1 %v1833_v6  ;;  %v1858_v33 = vld [vmem:[%s2216_s1 + $0x168] sm:$0xff]   ;;  %v1859_v34 = vld [vmem:[%s2216_s1 + $0x30] sm:$0xff]   ;;  %v1861_v36 = vld [vmem:[%s2216_s1 + $0x38] sm:$0xff]  }
   0xd   :  { %1701 = vmatprep.subr.bf16.mxu0 %v1834_v7  ;;  %v1860_v35 = vld [vmem:[%s2216_s1 + $0x170] sm:$0xff]   ;;  %v1862_v37 = vld [vmem:[%s2216_s1 + $0x178] sm:$0xff]   ;;  %v1864_v38 = vld [vmem:[%s2216_s1 + $0x80] sm:$0xff]  }
   0xe   :  { %v1866_v39 = vld [vmem:[%s2216_s1 + $0x180] sm:$0xff]   ;;  %v1867_v40 = vld [vmem:[%s2217_s0 + $0x8] sm:$0xff]   ;;  %v1868_v41 = vld [vmem:[%s2217_s0 + $0x58] sm:$0xff]  }
   0xf   :  { %1622 = vmatpush3.bf16.msra.mxu1 %v1833_v6  ;;  %v1869_v42 = vld [vmem:[%s2216_s1 + $0x88] sm:$0xff]   ;;  %v1883_v44 = vld [vmem:[%s2217_s0 + $0x20] sm:$0xff]   ;;  %v1871_v46 = vld [vmem:[%s2216_s1 + $0x90] sm:$0xff]  }
  0x10   :  { %1702 = vmatpush3.bf16.msra.mxu0 %v1834_v7  ;;  %1623 = vmatprep.subr.bf16.mxu1 %v1835_v8  ;;  %v1870_v43 = vld [vmem:[%s2216_s1 + $0x188] sm:$0xff]   ;;  %v1885_v45 = vld [vmem:[%s2217_s0 + $0x60] sm:$0xff]   ;;  %v1872_v47 = vld [vmem:[%s2216_s1 + $0x190] sm:$0xff]  }
  0x11   :  { %1703 = vmatprep.subr.bf16.mxu0 %v1836_v9  ;;  %v1873_v48 = vld [vmem:[%s2216_s1 + $0x98] sm:$0xff]   ;;  %v1875_v50 = vld [vmem:[%s2216_s1 + $0xa0] sm:$0xff]   ;;  %v1877_v52 = vld [vmem:[%s2216_s1 + $0xa8] sm:$0xff]  }
  0x12   :  { %v1874_v49 = vld [vmem:[%s2216_s1 + $0x198] sm:$0xff]   ;;  %v1876_v51 = vld [vmem:[%s2216_s1 + $0x1a0] sm:$0xff]   ;;  %v1878_v53 = vld [vmem:[%s2216_s1 + $0x1a8] sm:$0xff]  }
  0x13   :  { %1624 = vmatpush3.bf16.msra.mxu1 %v1835_v8  ;;  %v1879_v54 = vld [vmem:[%s2216_s1 + $0xb0] sm:$0xff]   ;;  %v1881_v56 = vld [vmem:[%s2216_s1 + $0xb8] sm:$0xff]   ;;  %v1884_v58 = vld [vmem:[%s2216_s1 + $0xc0] sm:$0xff]  }
  0x14   :  { %1704 = vmatpush3.bf16.msra.mxu0 %v1836_v9  ;;  %1625 = vmatprep.subr.bf16.mxu1 %v1837_v10  ;;  %v1880_v55 = vld [vmem:[%s2216_s1 + $0x1b0] sm:$0xff]   ;;  %v1882_v57 = vld [vmem:[%s2216_s1 + $0x1b8] sm:$0xff]   ;;  %v1886_v59 = vld [vmem:[%s2216_s1 + $0x1c0] sm:$0xff]  }
  0x15   :  { %1705 = vmatprep.subr.bf16.mxu0 %v1838_v12  ;;  %v1887_v60 = vld [vmem:[%s2217_s0 + $0x28] sm:$0xff]   ;;  %v1903_v0 = vld [vmem:[%s2217_s0 + $0x30] sm:$0xff]   ;;  %v1893_v4 = vld [vmem:[%s2216_s1 + $0xd8] sm:$0xff]  }
  0x16   :  { %v1888_v61 = vld [vmem:[%s2217_s0 + $0x68] sm:$0xff]   ;;  %v1905_v1 = vld [vmem:[%s2217_s0 + $0x70] sm:$0xff]   ;;  %v1894_v5 = vld [vmem:[%s2216_s1 + $0x1d8] sm:$0xff]  }
  0x17   :  { %1626 = vmatpush3.bf16.msra.mxu1 %v1837_v10  ;;  %v1889_v62 = vld [vmem:[%s2216_s1 + $0xc8] sm:$0xff]   ;;  %v1891_v2 = vld [vmem:[%s2216_s1 + $0xd0] sm:$0xff]   ;;  %v1895_v6 = vld [vmem:[%s2216_s1 + $0xe0] sm:$0xff]  }
  0x18   :  { %1706 = vmatpush3.bf16.msra.mxu0 %v1838_v12  ;;  %1627 = vmatprep.subr.bf16.mxu1 %v1839_v14  ;;  %v1890_v63 = vld [vmem:[%s2216_s1 + $0x1c8] sm:$0xff]   ;;  %v1892_v3 = vld [vmem:[%s2216_s1 + $0x1d0] sm:$0xff]   ;;  %v1896_v7 = vld [vmem:[%s2216_s1 + $0x1e0] sm:$0xff]  }
  0x19   :  { %1707 = vmatprep.subr.bf16.mxu0 %v1840_v15  ;;  %v1897_v8 = vld [vmem:[%s2216_s1 + $0xe8] sm:$0xff]   ;;  %v1899_v10 = vld [vmem:[%s2216_s1 + $0xf0] sm:$0xff]   ;;  %v1901_v12 = vld [vmem:[%s2216_s1 + $0xf8] sm:$0xff]  }
  0x1a   :  { %v1898_v9 = vld [vmem:[%s2216_s1 + $0x1e8] sm:$0xff]   ;;  %v1900_v11 = vld [vmem:[%s2216_s1 + $0x1f0] sm:$0xff]   ;;  %v1902_v13 = vld [vmem:[%s2216_s1 + $0x1f8] sm:$0xff]  }
  0x1b   :  { %1628 = vmatpush3.bf16.msra.mxu1 %v1839_v14  ;;  %v1906_v14 = vld [vmem:[%s2216_s1 + $0x200] sm:$0xff]  }
  0x1c   :  { %1708 = vmatpush3.bf16.msra.mxu0 %v1840_v15  ;;  %1629 = vmatprep.subr.bf16.mxu1 %v1841_v16  ;;  %v1904_v15 = vld [vmem:[%s2217_s0 + $0x38] sm:$0xff]  }
  0x1d   :  { %1709 = vmatprep.subr.bf16.mxu0 %v1842_v17 }
  0x1f   :  { %1630 = vmatpush3.bf16.msra.mxu1 %v1841_v16  ;;  %v1907_v16 = vld [vmem:[%s2217_s0 + $0x78] sm:$0xff]  }
  0x20   :  { %1710 = vmatpush3.bf16.msra.mxu0 %v1842_v17  ;;  %1635 = vmatprep.subr.bf16.mxu1 %v1844_v18  ;;  %v1915_v17 = vld [vmem:[%s2217_s0 + $0x80] sm:$0xff]  }
  0x21   :  { %1715 = vmatprep.subr.bf16.mxu0 %v1846_v19 }
  0x22   :  { %1632 = vmatmul.mubr.bf16.vlgmr.msra.gmra.mrb[0].mxu1 %v1847_v20  ;;  %v1910_v20 = vld [vmem:[%s2216_s1 + $0x218] sm:$0xff]  }
  0x23   :  { %1636 = vmatpush3.bf16.msra.mxu1 %v1844_v18  ;;  %1712 = vmatmul.mubr.bf16.vlgmr.msra.gmra.mrb[0].mxu0 %v1848_v21  ;;  %v1908_v18 = vld [vmem:[%s2216_s1 + $0x208] sm:$0xff]   ;;  %v1911_v21 = vld [vmem:[%s2216_s1 + $0x220] sm:$0xff]  }
  0x24   :  { %1716 = vmatpush3.bf16.msra.mxu0 %v1846_v19  ;;  %1637 = vmatprep.subr.bf16.mxu1 %v1849_v22  ;;  %v1909_v19 = vld [vmem:[%s2216_s1 + $0x210] sm:$0xff]  }
  0x25   :  { %1717 = vmatprep.subr.bf16.mxu0 %v1850_v23  ;;  %1651 = vmatprep.mubr.bf16.mxu1 %v1863_v25  ;;  %v1916_v25 = vld [vmem:[%s2217_s0 + $0x88] sm:$0xff]  }
  0x26   :  { %1731 = vmatprep.mubr.bf16.mxu0 %v1865_v27 }
  0x27   :  { %1638 = vmatpush3.bf16.msra.mxu1 %v1849_v22  ;;  %v1912_v22 = vld [vmem:[%s2216_s1 + $0x228] sm:$0xff]  }
  0x28   :  { %1718 = vmatpush3.bf16.msra.mxu0 %v1850_v23  ;;  %1639 = vmatprep.subr.bf16.mxu1 %v1851_v24  ;;  %v1913_v23 = vld [vmem:[%s2216_s1 + $0x230] sm:$0xff]  }
  0x29   :  { %1719 = vmatprep.subr.bf16.mxu0 %v1852_v26 }
  0x2b   :  { %1640 = vmatpush3.bf16.msra.mxu1 %v1851_v24  ;;  %v1914_v24 = vld [vmem:[%s2216_s1 + $0x238] sm:$0xff]  }
  0x2c   :  { %1720 = vmatpush3.bf16.msra.mxu0 %v1852_v26  ;;  %1641 = vmatprep.subr.bf16.mxu1 %v1853_v28 }
  0x2d   :  { %1721 = vmatprep.subr.bf16.mxu0 %v1854_v29 }
  0x2f   :  { %1642 = vmatpush3.bf16.msra.mxu1 %v1853_v28 }
  0x30   :  { %1722 = vmatpush3.bf16.msra.mxu0 %v1854_v29  ;;  %1643 = vmatprep.subr.bf16.mxu1 %v1855_v30 }
  0x31   :  { %1723 = vmatprep.subr.bf16.mxu0 %v1856_v31 }
  0x33   :  { %1644 = vmatpush3.bf16.msra.mxu1 %v1855_v30 }
  0x34   :  { %1724 = vmatpush3.bf16.msra.mxu0 %v1856_v31  ;;  %1645 = vmatprep.subr.bf16.mxu1 %v1857_v32 }
  0x35   :  { %1725 = vmatprep.subr.bf16.mxu0 %v1858_v33 }
  0x37   :  { %1646 = vmatpush3.bf16.msra.mxu1 %v1857_v32 }
  0x38   :  { %1726 = vmatpush3.bf16.msra.mxu0 %v1858_v33  ;;  %1647 = vmatprep.subr.bf16.mxu1 %v1859_v34  ;;  %v1505_v33 = vld [vmem:[%s2218_s2] ss:$0 sm:$0xff] }
  0x39   :  { %1727 = vmatprep.subr.bf16.mxu0 %v1860_v35 }
  0x3b   :  { %1648 = vmatpush3.bf16.msra.mxu1 %v1859_v34 }
  0x3c   :  { %1728 = vmatpush3.bf16.msra.mxu0 %v1860_v35  ;;  %1649 = vmatprep.subr.bf16.mxu1 %v1861_v36 }
  0x3d   :  { %1729 = vmatprep.subr.bf16.mxu0 %v1862_v37 }
  0x3f   :  { %1650 = vmatpush3.bf16.msra.mxu1 %v1861_v36 }
  0x40   :  { %1730 = vmatpush3.bf16.msra.mxu0 %v1862_v37  ;;  %1655 = vmatprep.subr.bf16.mxu1 %v1864_v38 }
  0x41   :  { %1735 = vmatprep.subr.bf16.mxu0 %v1866_v39 }
  0x42   :  { %1652 = vmatmul.mubr.bf16.vlgmr.msra.gmra.mrb[0].mxu1 %v1867_v40 }
  0x43   :  { %1656 = vmatpush3.bf16.msra.mxu1 %v1864_v38  ;;  %1732 = vmatmul.mubr.bf16.vlgmr.msra.gmra.mrb[0].mxu0 %v1868_v41 }
  0x44   :  { %1736 = vmatpush3.bf16.msra.mxu0 %v1866_v39  ;;  %1657 = vmatprep.subr.bf16.mxu1 %v1869_v42 }
  0x45   :  { %1737 = vmatprep.subr.bf16.mxu0 %v1870_v43  ;;  %1671 = vmatprep.mubr.bf16.mxu1 %v1883_v44 }
  0x46   :  { %1751 = vmatprep.mubr.bf16.mxu0 %v1885_v45 }
  0x47   :  { %1658 = vmatpush3.bf16.msra.mxu1 %v1869_v42 }
  0x48   :  { %1738 = vmatpush3.bf16.msra.mxu0 %v1870_v43  ;;  %1659 = vmatprep.subr.bf16.mxu1 %v1871_v46 }
  0x49   :  { %1739 = vmatprep.subr.bf16.mxu0 %v1872_v47 }
  0x4b   :  { %1660 = vmatpush3.bf16.msra.mxu1 %v1871_v46 }
  0x4c   :  { %1740 = vmatpush3.bf16.msra.mxu0 %v1872_v47  ;;  %1661 = vmatprep.subr.bf16.mxu1 %v1873_v48 }
  0x4d   :  { %1741 = vmatprep.subr.bf16.mxu0 %v1874_v49 }
  0x4f   :  { %1662 = vmatpush3.bf16.msra.mxu1 %v1873_v48 }
  0x50   :  { %1742 = vmatpush3.bf16.msra.mxu0 %v1874_v49  ;;  %1663 = vmatprep.subr.bf16.mxu1 %v1875_v50 }
  0x51   :  { %1743 = vmatprep.subr.bf16.mxu0 %v1876_v51 }
  0x53   :  { %1664 = vmatpush3.bf16.msra.mxu1 %v1875_v50 }
  0x54   :  { %1744 = vmatpush3.bf16.msra.mxu0 %v1876_v51  ;;  %1665 = vmatprep.subr.bf16.mxu1 %v1877_v52 }
  0x55   :  { %1745 = vmatprep.subr.bf16.mxu0 %v1878_v53 }
  0x57   :  { %1666 = vmatpush3.bf16.msra.mxu1 %v1877_v52 }
  0x58   :  { %1746 = vmatpush3.bf16.msra.mxu0 %v1878_v53  ;;  %1667 = vmatprep.subr.bf16.mxu1 %v1879_v54 }
  0x59   :  { %1747 = vmatprep.subr.bf16.mxu0 %v1880_v55 }
  0x5b   :  { %1668 = vmatpush3.bf16.msra.mxu1 %v1879_v54 }
  0x5c   :  { %1748 = vmatpush3.bf16.msra.mxu0 %v1880_v55  ;;  %1669 = vmatprep.subr.bf16.mxu1 %v1881_v56 }
  0x5d   :  { %1749 = vmatprep.subr.bf16.mxu0 %v1882_v57 }
  0x5f   :  { %1670 = vmatpush3.bf16.msra.mxu1 %v1881_v56 }
  0x60   :  { %1750 = vmatpush3.bf16.msra.mxu0 %v1882_v57  ;;  %1675 = vmatprep.subr.bf16.mxu1 %v1884_v58 }
  0x61   :  { %1755 = vmatprep.subr.bf16.mxu0 %v1886_v59 }
  0x62   :  { %1672 = vmatmul.mubr.bf16.vlgmr.msra.gmra.mrb[0].mxu1 %v1887_v60 }
  0x63   :  { %1676 = vmatpush3.bf16.msra.mxu1 %v1884_v58  ;;  %1752 = vmatmul.mubr.bf16.vlgmr.msra.gmra.mrb[0].mxu0 %v1888_v61 }
  0x64   :  { %1756 = vmatpush3.bf16.msra.mxu0 %v1886_v59  ;;  %1677 = vmatprep.subr.bf16.mxu1 %v1889_v62 }
  0x65   :  { %1757 = vmatprep.subr.bf16.mxu0 %v1890_v63  ;;  %1691 = vmatprep.mubr.bf16.mxu1 %v1903_v0 }
  0x66   :  { %1771 = vmatprep.mubr.bf16.mxu0 %v1905_v1 }
  0x67   :  { %1678 = vmatpush3.bf16.msra.mxu1 %v1889_v62 }
  0x68   :  { %1758 = vmatpush3.bf16.msra.mxu0 %v1890_v63  ;;  %1679 = vmatprep.subr.bf16.mxu1 %v1891_v2 }
  0x69   :  { %1759 = vmatprep.subr.bf16.mxu0 %v1892_v3 }
  0x6b   :  { %1680 = vmatpush3.bf16.msra.mxu1 %v1891_v2 }
  0x6c   :  { %1760 = vmatpush3.bf16.msra.mxu0 %v1892_v3  ;;  %1681 = vmatprep.subr.bf16.mxu1 %v1893_v4 }
  0x6d   :  { %1761 = vmatprep.subr.bf16.mxu0 %v1894_v5 }
  0x6f   :  { %1682 = vmatpush3.bf16.msra.mxu1 %v1893_v4 }
  0x70   :  { %1762 = vmatpush3.bf16.msra.mxu0 %v1894_v5  ;;  %1683 = vmatprep.subr.bf16.mxu1 %v1895_v6 }
  0x71   :  { %1763 = vmatprep.subr.bf16.mxu0 %v1896_v7 }
  0x73   :  { %1684 = vmatpush3.bf16.msra.mxu1 %v1895_v6 }
  0x74   :  { %1764 = vmatpush3.bf16.msra.mxu0 %v1896_v7  ;;  %1685 = vmatprep.subr.bf16.mxu1 %v1897_v8 }
  0x75   :  { %1765 = vmatprep.subr.bf16.mxu0 %v1898_v9 }
  0x77   :  { %1686 = vmatpush3.bf16.msra.mxu1 %v1897_v8 }
  0x78   :  { %1766 = vmatpush3.bf16.msra.mxu0 %v1898_v9  ;;  %1687 = vmatprep.subr.bf16.mxu1 %v1899_v10 }
  0x79   :  { %1767 = vmatprep.subr.bf16.mxu0 %v1900_v11 }
  0x7b   :  { %1688 = vmatpush3.bf16.msra.mxu1 %v1899_v10 }
  0x7c   :  { %1768 = vmatpush3.bf16.msra.mxu0 %v1900_v11  ;;  %1689 = vmatprep.subr.bf16.mxu1 %v1901_v12 }
  0x7d   :  { %1769 = vmatprep.subr.bf16.mxu0 %v1902_v13 }
  0x7f   :  { %1690 = vmatpush3.bf16.msra.mxu1 %v1901_v12 }
  0x80   :  { %1770 = vmatpush3.bf16.msra.mxu0 %v1902_v13 }
  0x81   :  { %1775 = vmatprep.subr.bf16.mxu0 %v1906_v14 }
  0x82   :  { %1692 = vmatmul.mubr.bf16.vlgmr.msra.gmra.mrb[0].mxu1 %v1904_v15 }
  0x83   :  { %1772 = vmatmul.mubr.bf16.vlgmr.msra.gmra.mrb[0].mxu0 %v1907_v16 }
  0x84   :  { %1776 = vmatpush3.bf16.msra.mxu0 %v1906_v14  ;;  %1791 = vmatprep.mubr.bf16.mxu0 %v1915_v17 }
  0x85   :  { %1777 = vmatprep.subr.bf16.mxu0 %v1908_v18 }
  0x88   :  { %1778 = vmatpush3.bf16.msra.mxu0 %v1908_v18 }
  0x89   :  { %1779 = vmatprep.subr.bf16.mxu0 %v1909_v19 }
  0x8c   :  { %1780 = vmatpush3.bf16.msra.mxu0 %v1909_v19 }
  0x8d   :  { %1781 = vmatprep.subr.bf16.mxu0 %v1910_v20 }
  0x90   :  { %1782 = vmatpush3.bf16.msra.mxu0 %v1910_v20 }
  0x91   :  { %1783 = vmatprep.subr.bf16.mxu0 %v1911_v21 }
  0x94   :  { %1784 = vmatpush3.bf16.msra.mxu0 %v1911_v21 }
  0x95   :  { %1785 = vmatprep.subr.bf16.mxu0 %v1912_v22 }
  0x98   :  { %1786 = vmatpush3.bf16.msra.mxu0 %v1912_v22 }
  0x99   :  { %1787 = vmatprep.subr.bf16.mxu0 %v1913_v23 }
  0x9c   :  { %1788 = vmatpush3.bf16.msra.mxu0 %v1913_v23 }
  0x9d   :  { %1789 = vmatprep.subr.bf16.mxu0 %v1914_v24 }
  0xa0   :  { %1790 = vmatpush3.bf16.msra.mxu0 %v1914_v24 }
  0xa3   :  { %1792 = vmatmul.mubr.bf16.vlgmr.msra.gmra.mrb[0].mxu0 %v1916_v25 }
 0x155   :  { %v1693_v26 = vpop.f32.mrb[0].mxu1 }
 0x156   :  { %v526_v27 = vpop.f32.mrb[1].mxu1 }
 0x157   :  { %v1694_v28 = vpop.f32.mrb[2].mxu1 }
 0x158   :  { %v529_v29 = vpop.f32.mrb[3].mxu1 }
 0x176   :  { %v1793_v30 = vpop.f32.mrb[0].mxu0 }
 0x177   :  { %v1795_v31 = vadd.f32 %v1793_v30, %v1693_v26  ;;  %v1201_v32 = vpop.f32.mrb[1].mxu0 }
 0x178   :  { %v1796_v34 = vadd.f32 %v1201_v32, %v526_v27  ;;  %v1794_v35 = vpop.f32.mrb[2].mxu0 }
 0x179   :  { %v1797_v36 = vadd.f32 %v1794_v35, %v1694_v28  ;;  %v1204_v37 = vpop.f32.mrb[3].mxu0  ;;  %v1229_v39 = vadd.f32 %v1795_v31, %v1505_v33 }
 0x17a   :  { %v1798_v38 = vadd.f32 %v1204_v37, %v529_v29  ;;  %v1227_v41 = vadd.f32 %v1796_v34, %v1505_v33 }
 0x17b   :  { %v1230_v40 = vadd.f32 %v1797_v36, %v1505_v33 }
 0x17c   :  { %v1228_v42 = vadd.f32 %v1798_v38, %v1505_v33 }
 0x17d   :  { %v1522_v43 = vpack.c.bf16 %v1230_v40, %v1229_v39 }
 0x17e   :  { %v1517_v44 = vpack.c.bf16 %v1228_v42, %v1227_v41 }
 0x17f   :  { %1524 = vst [vmem:[%s2219_s3 + $0x8] sm:$0xff] %v1522_v43  }
 0x180   :  { %1518 = vst [vmem:[%s2219_s3] sm:$0xff] %v1517_v44  }

// kernel: vqvae_forward.14
= control target key start
LH: loop header
LB: loop body
LE: loop exit
PB: predicated region body
PF: predicated region fallthrough
CT: control target
= control target key end

     0   :  { %s2264_s1 = inlined_call_operand.vmem [shape: bf16[9,128,128], index: 1, kind: input, shape index: {}]   ;;  %s2265_s0 = inlined_call_operand.vmem [shape: bf16[9,32,128], index: 0, kind: input, shape index: {}]   ;;  %s2266_s2 = inlined_call_operand.vmem [shape: f32[1,128], index: 2, kind: input, shape index: {}]   ;;  %s2267_s3 = inlined_call_operand.vmem [shape: bf16[32,128], index: 3, kind: output, shape index: {}]  }
   0x1   :  { %v1859_v0 = vld [vmem:[%s2264_s1 + $0x40] sm:$0xff]   ;;  %v1861_v2 = vld [vmem:[%s2264_s1 + $0x48] sm:$0xff]   ;;  %v1863_v4 = vld [vmem:[%s2264_s1 + $0x50] sm:$0xff]  }
   0x2   :  { %v1860_v1 = vld [vmem:[%s2264_s1 + $0x100] sm:$0xff]   ;;  %1647 = vmatprep.subr.bf16.mxu1 %v1859_v0  ;;  %v1862_v3 = vld [vmem:[%s2264_s1 + $0x108] sm:$0xff]   ;;  %v1864_v5 = vld [vmem:[%s2264_s1 + $0x110] sm:$0xff]  }
   0x3   :  { %1727 = vmatprep.subr.bf16.mxu0 %v1860_v1  ;;  %1648 = vmatpush3.bf16.msra.mxu1 %v1859_v0  ;;  %v1865_v6 = vld [vmem:[%s2264_s1 + $0x58] sm:$0xff]   ;;  %v1867_v8 = vld [vmem:[%s2264_s1 + $0x60] sm:$0xff]   ;;  %v1869_v10 = vld [vmem:[%s2264_s1 + $0x68] sm:$0xff]  }
   0x4   :  { %1728 = vmatpush3.bf16.msra.mxu0 %v1860_v1  ;;  %1649 = vmatprep.subr.bf16.mxu1 %v1861_v2  ;;  %v1866_v7 = vld [vmem:[%s2264_s1 + $0x118] sm:$0xff]   ;;  %v1868_v9 = vld [vmem:[%s2264_s1 + $0x120] sm:$0xff]   ;;  %v1875_v11 = vld [vmem:[%s2265_s0 + $0x10] sm:$0xff]  }
   0x5   :  { %1729 = vmatprep.subr.bf16.mxu0 %v1862_v3  ;;  %v1870_v12 = vld [vmem:[%s2264_s1 + $0x128] sm:$0xff]   ;;  %1663 = vmatprep.mubr.bf16.mxu1 %v1875_v11  ;;  %v1877_v13 = vld [vmem:[%s2265_s0 + $0x40] sm:$0xff]   ;;  %v1871_v14 = vld [vmem:[%s2264_s1 + $0x70] sm:$0xff]  }
   0x6   :  { %v1872_v15 = vld [vmem:[%s2264_s1 + $0x130] sm:$0xff]   ;;  %1743 = vmatprep.mubr.bf16.mxu0 %v1877_v13  ;;  %v1873_v16 = vld [vmem:[%s2264_s1 + $0x78] sm:$0xff]   ;;  %v1876_v18 = vld [vmem:[%s2264_s1] sm:$0xff]  }
   0x7   :  { %1650 = vmatpush3.bf16.msra.mxu1 %v1861_v2  ;;  %v1874_v17 = vld [vmem:[%s2264_s1 + $0x138] sm:$0xff]   ;;  %v1878_v19 = vld [vmem:[%s2264_s1 + $0x140] sm:$0xff]   ;;  %v1880_v21 = vld [vmem:[%s2265_s0 + $0x48] sm:$0xff]  }
   0x8   :  { %1730 = vmatpush3.bf16.msra.mxu0 %v1862_v3  ;;  %1651 = vmatprep.subr.bf16.mxu1 %v1863_v4  ;;  %v1879_v20 = vld [vmem:[%s2265_s0 + $0x18] sm:$0xff]   ;;  %v1881_v22 = vld [vmem:[%s2264_s1 + $0x8] sm:$0xff]   ;;  %v1883_v24 = vld [vmem:[%s2264_s1 + $0x10] sm:$0xff]  }
   0x9   :  { %1731 = vmatprep.subr.bf16.mxu0 %v1864_v5  ;;  %v1882_v23 = vld [vmem:[%s2264_s1 + $0x148] sm:$0xff]   ;;  %v1895_v25 = vld [vmem:[%s2265_s0] sm:$0xff]   ;;  %v1884_v26 = vld [vmem:[%s2264_s1 + $0x150] sm:$0xff]  }
   0xa   :  { %v1897_v27 = vld [vmem:[%s2265_s0 + $0x50] sm:$0xff]   ;;  %v1885_v28 = vld [vmem:[%s2264_s1 + $0x18] sm:$0xff]   ;;  %v1887_v30 = vld [vmem:[%s2264_s1 + $0x20] sm:$0xff]  }
   0xb   :  { %1652 = vmatpush3.bf16.msra.mxu1 %v1863_v4  ;;  %v1886_v29 = vld [vmem:[%s2264_s1 + $0x158] sm:$0xff]   ;;  %v1888_v31 = vld [vmem:[%s2264_s1 + $0x160] sm:$0xff]   ;;  %v1889_v32 = vld [vmem:[%s2264_s1 + $0x28] sm:$0xff]  }
   0xc   :  { %1732 = vmatpush3.bf16.msra.mxu0 %v1864_v5  ;;  %1653 = vmatprep.subr.bf16.mxu1 %v1865_v6  ;;  %v1890_v33 = vld [vmem:[%s2264_s1 + $0x168] sm:$0xff]   ;;  %v1891_v34 = vld [vmem:[%s2264_s1 + $0x30] sm:$0xff]   ;;  %v1893_v36 = vld [vmem:[%s2264_s1 + $0x38] sm:$0xff]  }
   0xd   :  { %1733 = vmatprep.subr.bf16.mxu0 %v1866_v7  ;;  %v1892_v35 = vld [vmem:[%s2264_s1 + $0x170] sm:$0xff]   ;;  %v1894_v37 = vld [vmem:[%s2264_s1 + $0x178] sm:$0xff]   ;;  %v1896_v38 = vld [vmem:[%s2264_s1 + $0x80] sm:$0xff]  }
   0xe   :  { %v1898_v39 = vld [vmem:[%s2264_s1 + $0x180] sm:$0xff]   ;;  %v1899_v40 = vld [vmem:[%s2265_s0 + $0x8] sm:$0xff]   ;;  %v1900_v41 = vld [vmem:[%s2265_s0 + $0x58] sm:$0xff]  }
   0xf   :  { %1654 = vmatpush3.bf16.msra.mxu1 %v1865_v6  ;;  %v1901_v42 = vld [vmem:[%s2264_s1 + $0x88] sm:$0xff]   ;;  %v1915_v44 = vld [vmem:[%s2265_s0 + $0x20] sm:$0xff]   ;;  %v1903_v46 = vld [vmem:[%s2264_s1 + $0x90] sm:$0xff]  }
  0x10   :  { %1734 = vmatpush3.bf16.msra.mxu0 %v1866_v7  ;;  %1655 = vmatprep.subr.bf16.mxu1 %v1867_v8  ;;  %v1902_v43 = vld [vmem:[%s2264_s1 + $0x188] sm:$0xff]   ;;  %v1917_v45 = vld [vmem:[%s2265_s0 + $0x60] sm:$0xff]   ;;  %v1904_v47 = vld [vmem:[%s2264_s1 + $0x190] sm:$0xff]  }
  0x11   :  { %1735 = vmatprep.subr.bf16.mxu0 %v1868_v9  ;;  %v1905_v48 = vld [vmem:[%s2264_s1 + $0x98] sm:$0xff]   ;;  %v1907_v50 = vld [vmem:[%s2264_s1 + $0xa0] sm:$0xff]   ;;  %v1909_v52 = vld [vmem:[%s2264_s1 + $0xa8] sm:$0xff]  }
  0x12   :  { %v1906_v49 = vld [vmem:[%s2264_s1 + $0x198] sm:$0xff]   ;;  %v1908_v51 = vld [vmem:[%s2264_s1 + $0x1a0] sm:$0xff]   ;;  %v1910_v53 = vld [vmem:[%s2264_s1 + $0x1a8] sm:$0xff]  }
  0x13   :  { %1656 = vmatpush3.bf16.msra.mxu1 %v1867_v8  ;;  %v1911_v54 = vld [vmem:[%s2264_s1 + $0xb0] sm:$0xff]   ;;  %v1913_v56 = vld [vmem:[%s2264_s1 + $0xb8] sm:$0xff]   ;;  %v1916_v58 = vld [vmem:[%s2264_s1 + $0xc0] sm:$0xff]  }
  0x14   :  { %1736 = vmatpush3.bf16.msra.mxu0 %v1868_v9  ;;  %1657 = vmatprep.subr.bf16.mxu1 %v1869_v10  ;;  %v1912_v55 = vld [vmem:[%s2264_s1 + $0x1b0] sm:$0xff]   ;;  %v1914_v57 = vld [vmem:[%s2264_s1 + $0x1b8] sm:$0xff]   ;;  %v1918_v59 = vld [vmem:[%s2264_s1 + $0x1c0] sm:$0xff]  }
  0x15   :  { %1737 = vmatprep.subr.bf16.mxu0 %v1870_v12  ;;  %v1919_v60 = vld [vmem:[%s2265_s0 + $0x28] sm:$0xff]   ;;  %v1935_v0 = vld [vmem:[%s2265_s0 + $0x30] sm:$0xff]   ;;  %v1925_v4 = vld [vmem:[%s2264_s1 + $0xd8] sm:$0xff]  }
  0x16   :  { %v1920_v61 = vld [vmem:[%s2265_s0 + $0x68] sm:$0xff]   ;;  %v1937_v1 = vld [vmem:[%s2265_s0 + $0x70] sm:$0xff]   ;;  %v1926_v5 = vld [vmem:[%s2264_s1 + $0x1d8] sm:$0xff]  }
  0x17   :  { %1658 = vmatpush3.bf16.msra.mxu1 %v1869_v10  ;;  %v1921_v62 = vld [vmem:[%s2264_s1 + $0xc8] sm:$0xff]   ;;  %v1923_v2 = vld [vmem:[%s2264_s1 + $0xd0] sm:$0xff]   ;;  %v1927_v6 = vld [vmem:[%s2264_s1 + $0xe0] sm:$0xff]  }
  0x18   :  { %1738 = vmatpush3.bf16.msra.mxu0 %v1870_v12  ;;  %1659 = vmatprep.subr.bf16.mxu1 %v1871_v14  ;;  %v1922_v63 = vld [vmem:[%s2264_s1 + $0x1c8] sm:$0xff]   ;;  %v1924_v3 = vld [vmem:[%s2264_s1 + $0x1d0] sm:$0xff]   ;;  %v1928_v7 = vld [vmem:[%s2264_s1 + $0x1e0] sm:$0xff]  }
  0x19   :  { %1739 = vmatprep.subr.bf16.mxu0 %v1872_v15  ;;  %v1929_v8 = vld [vmem:[%s2264_s1 + $0xe8] sm:$0xff]   ;;  %v1931_v10 = vld [vmem:[%s2264_s1 + $0xf0] sm:$0xff]   ;;  %v1933_v12 = vld [vmem:[%s2264_s1 + $0xf8] sm:$0xff]  }
  0x1a   :  { %v1930_v9 = vld [vmem:[%s2264_s1 + $0x1e8] sm:$0xff]   ;;  %v1932_v11 = vld [vmem:[%s2264_s1 + $0x1f0] sm:$0xff]   ;;  %v1934_v13 = vld [vmem:[%s2264_s1 + $0x1f8] sm:$0xff]  }
  0x1b   :  { %1660 = vmatpush3.bf16.msra.mxu1 %v1871_v14  ;;  %v1938_v14 = vld [vmem:[%s2264_s1 + $0x200] sm:$0xff]  }
  0x1c   :  { %1740 = vmatpush3.bf16.msra.mxu0 %v1872_v15  ;;  %1661 = vmatprep.subr.bf16.mxu1 %v1873_v16  ;;  %v1936_v15 = vld [vmem:[%s2265_s0 + $0x38] sm:$0xff]  }
  0x1d   :  { %1741 = vmatprep.subr.bf16.mxu0 %v1874_v17 }
  0x1f   :  { %1662 = vmatpush3.bf16.msra.mxu1 %v1873_v16  ;;  %v1939_v16 = vld [vmem:[%s2265_s0 + $0x78] sm:$0xff]  }
  0x20   :  { %1742 = vmatpush3.bf16.msra.mxu0 %v1874_v17  ;;  %1667 = vmatprep.subr.bf16.mxu1 %v1876_v18  ;;  %v1947_v17 = vld [vmem:[%s2265_s0 + $0x80] sm:$0xff]  }
  0x21   :  { %1747 = vmatprep.subr.bf16.mxu0 %v1878_v19 }
  0x22   :  { %1664 = vmatmul.mubr.bf16.vlgmr.msra.gmra.mrb[0].mxu1 %v1879_v20  ;;  %v1942_v20 = vld [vmem:[%s2264_s1 + $0x218] sm:$0xff]  }
  0x23   :  { %1668 = vmatpush3.bf16.msra.mxu1 %v1876_v18  ;;  %1744 = vmatmul.mubr.bf16.vlgmr.msra.gmra.mrb[0].mxu0 %v1880_v21  ;;  %v1940_v18 = vld [vmem:[%s2264_s1 + $0x208] sm:$0xff]   ;;  %v1943_v21 = vld [vmem:[%s2264_s1 + $0x220] sm:$0xff]  }
  0x24   :  { %1748 = vmatpush3.bf16.msra.mxu0 %v1878_v19  ;;  %1669 = vmatprep.subr.bf16.mxu1 %v1881_v22  ;;  %v1941_v19 = vld [vmem:[%s2264_s1 + $0x210] sm:$0xff]  }
  0x25   :  { %1749 = vmatprep.subr.bf16.mxu0 %v1882_v23  ;;  %1683 = vmatprep.mubr.bf16.mxu1 %v1895_v25  ;;  %v1948_v25 = vld [vmem:[%s2265_s0 + $0x88] sm:$0xff]  }
  0x26   :  { %1763 = vmatprep.mubr.bf16.mxu0 %v1897_v27 }
  0x27   :  { %1670 = vmatpush3.bf16.msra.mxu1 %v1881_v22  ;;  %v1944_v22 = vld [vmem:[%s2264_s1 + $0x228] sm:$0xff]  }
  0x28   :  { %1750 = vmatpush3.bf16.msra.mxu0 %v1882_v23  ;;  %1671 = vmatprep.subr.bf16.mxu1 %v1883_v24  ;;  %v1945_v23 = vld [vmem:[%s2264_s1 + $0x230] sm:$0xff]  }
  0x29   :  { %1751 = vmatprep.subr.bf16.mxu0 %v1884_v26 }
  0x2b   :  { %1672 = vmatpush3.bf16.msra.mxu1 %v1883_v24  ;;  %v1946_v24 = vld [vmem:[%s2264_s1 + $0x238] sm:$0xff]  }
  0x2c   :  { %1752 = vmatpush3.bf16.msra.mxu0 %v1884_v26  ;;  %1673 = vmatprep.subr.bf16.mxu1 %v1885_v28 }
  0x2d   :  { %1753 = vmatprep.subr.bf16.mxu0 %v1886_v29 }
  0x2f   :  { %1674 = vmatpush3.bf16.msra.mxu1 %v1885_v28 }
  0x30   :  { %1754 = vmatpush3.bf16.msra.mxu0 %v1886_v29  ;;  %1675 = vmatprep.subr.bf16.mxu1 %v1887_v30 }
  0x31   :  { %1755 = vmatprep.subr.bf16.mxu0 %v1888_v31 }
  0x33   :  { %1676 = vmatpush3.bf16.msra.mxu1 %v1887_v30 }
  0x34   :  { %1756 = vmatpush3.bf16.msra.mxu0 %v1888_v31  ;;  %1677 = vmatprep.subr.bf16.mxu1 %v1889_v32  ;;  %v1533_v31 = vld [vmem:[%s2266_s2] ss:$0 sm:$0xff] }
  0x35   :  { %1757 = vmatprep.subr.bf16.mxu0 %v1890_v33 }
  0x37   :  { %1678 = vmatpush3.bf16.msra.mxu1 %v1889_v32 }
  0x38   :  { %1758 = vmatpush3.bf16.msra.mxu0 %v1890_v33  ;;  %1679 = vmatprep.subr.bf16.mxu1 %v1891_v34 }
  0x39   :  { %1759 = vmatprep.subr.bf16.mxu0 %v1892_v35 }
  0x3b   :  { %1680 = vmatpush3.bf16.msra.mxu1 %v1891_v34 }
  0x3c   :  { %1760 = vmatpush3.bf16.msra.mxu0 %v1892_v35  ;;  %1681 = vmatprep.subr.bf16.mxu1 %v1893_v36 }
  0x3d   :  { %1761 = vmatprep.subr.bf16.mxu0 %v1894_v37 }
  0x3f   :  { %1682 = vmatpush3.bf16.msra.mxu1 %v1893_v36 }
  0x40   :  { %1762 = vmatpush3.bf16.msra.mxu0 %v1894_v37  ;;  %1687 = vmatprep.subr.bf16.mxu1 %v1896_v38 }
  0x41   :  { %1767 = vmatprep.subr.bf16.mxu0 %v1898_v39 }
  0x42   :  { %1684 = vmatmul.mubr.bf16.vlgmr.msra.gmra.mrb[0].mxu1 %v1899_v40 }
  0x43   :  { %1688 = vmatpush3.bf16.msra.mxu1 %v1896_v38  ;;  %1764 = vmatmul.mubr.bf16.vlgmr.msra.gmra.mrb[0].mxu0 %v1900_v41 }
  0x44   :  { %1768 = vmatpush3.bf16.msra.mxu0 %v1898_v39  ;;  %1689 = vmatprep.subr.bf16.mxu1 %v1901_v42 }
  0x45   :  { %1769 = vmatprep.subr.bf16.mxu0 %v1902_v43  ;;  %1703 = vmatprep.mubr.bf16.mxu1 %v1915_v44 }
  0x46   :  { %1783 = vmatprep.mubr.bf16.mxu0 %v1917_v45 }
  0x47   :  { %1690 = vmatpush3.bf16.msra.mxu1 %v1901_v42 }
  0x48   :  { %1770 = vmatpush3.bf16.msra.mxu0 %v1902_v43  ;;  %1691 = vmatprep.subr.bf16.mxu1 %v1903_v46 }
  0x49   :  { %1771 = vmatprep.subr.bf16.mxu0 %v1904_v47 }
  0x4b   :  { %1692 = vmatpush3.bf16.msra.mxu1 %v1903_v46 }
  0x4c   :  { %1772 = vmatpush3.bf16.msra.mxu0 %v1904_v47  ;;  %1693 = vmatprep.subr.bf16.mxu1 %v1905_v48 }
  0x4d   :  { %1773 = vmatprep.subr.bf16.mxu0 %v1906_v49 }
  0x4f   :  { %1694 = vmatpush3.bf16.msra.mxu1 %v1905_v48 }
  0x50   :  { %1774 = vmatpush3.bf16.msra.mxu0 %v1906_v49  ;;  %1695 = vmatprep.subr.bf16.mxu1 %v1907_v50 }
  0x51   :  { %1775 = vmatprep.subr.bf16.mxu0 %v1908_v51 }
  0x53   :  { %1696 = vmatpush3.bf16.msra.mxu1 %v1907_v50 }
  0x54   :  { %1776 = vmatpush3.bf16.msra.mxu0 %v1908_v51  ;;  %1697 = vmatprep.subr.bf16.mxu1 %v1909_v52 }
  0x55   :  { %1777 = vmatprep.subr.bf16.mxu0 %v1910_v53 }
  0x57   :  { %1698 = vmatpush3.bf16.msra.mxu1 %v1909_v52 }
  0x58   :  { %1778 = vmatpush3.bf16.msra.mxu0 %v1910_v53  ;;  %1699 = vmatprep.subr.bf16.mxu1 %v1911_v54 }
  0x59   :  { %1779 = vmatprep.subr.bf16.mxu0 %v1912_v55 }
  0x5b   :  { %1700 = vmatpush3.bf16.msra.mxu1 %v1911_v54 }
  0x5c   :  { %1780 = vmatpush3.bf16.msra.mxu0 %v1912_v55  ;;  %1701 = vmatprep.subr.bf16.mxu1 %v1913_v56 }
  0x5d   :  { %1781 = vmatprep.subr.bf16.mxu0 %v1914_v57 }
  0x5f   :  { %1702 = vmatpush3.bf16.msra.mxu1 %v1913_v56 }
  0x60   :  { %1782 = vmatpush3.bf16.msra.mxu0 %v1914_v57  ;;  %1707 = vmatprep.subr.bf16.mxu1 %v1916_v58 }
  0x61   :  { %1787 = vmatprep.subr.bf16.mxu0 %v1918_v59 }
  0x62   :  { %1704 = vmatmul.mubr.bf16.vlgmr.msra.gmra.mrb[0].mxu1 %v1919_v60 }
  0x63   :  { %1708 = vmatpush3.bf16.msra.mxu1 %v1916_v58  ;;  %1784 = vmatmul.mubr.bf16.vlgmr.msra.gmra.mrb[0].mxu0 %v1920_v61 }
  0x64   :  { %1788 = vmatpush3.bf16.msra.mxu0 %v1918_v59  ;;  %1709 = vmatprep.subr.bf16.mxu1 %v1921_v62 }
  0x65   :  { %1789 = vmatprep.subr.bf16.mxu0 %v1922_v63  ;;  %1723 = vmatprep.mubr.bf16.mxu1 %v1935_v0 }
  0x66   :  { %1803 = vmatprep.mubr.bf16.mxu0 %v1937_v1 }
  0x67   :  { %1710 = vmatpush3.bf16.msra.mxu1 %v1921_v62 }
  0x68   :  { %1790 = vmatpush3.bf16.msra.mxu0 %v1922_v63  ;;  %1711 = vmatprep.subr.bf16.mxu1 %v1923_v2 }
  0x69   :  { %1791 = vmatprep.subr.bf16.mxu0 %v1924_v3 }
  0x6b   :  { %1712 = vmatpush3.bf16.msra.mxu1 %v1923_v2 }
  0x6c   :  { %1792 = vmatpush3.bf16.msra.mxu0 %v1924_v3  ;;  %1713 = vmatprep.subr.bf16.mxu1 %v1925_v4 }
  0x6d   :  { %1793 = vmatprep.subr.bf16.mxu0 %v1926_v5 }
  0x6f   :  { %1714 = vmatpush3.bf16.msra.mxu1 %v1925_v4 }
  0x70   :  { %1794 = vmatpush3.bf16.msra.mxu0 %v1926_v5  ;;  %1715 = vmatprep.subr.bf16.mxu1 %v1927_v6 }
  0x71   :  { %1795 = vmatprep.subr.bf16.mxu0 %v1928_v7 }
  0x73   :  { %1716 = vmatpush3.bf16.msra.mxu1 %v1927_v6 }
  0x74   :  { %1796 = vmatpush3.bf16.msra.mxu0 %v1928_v7  ;;  %1717 = vmatprep.subr.bf16.mxu1 %v1929_v8 }
  0x75   :  { %1797 = vmatprep.subr.bf16.mxu0 %v1930_v9 }
  0x77   :  { %1718 = vmatpush3.bf16.msra.mxu1 %v1929_v8 }
  0x78   :  { %1798 = vmatpush3.bf16.msra.mxu0 %v1930_v9  ;;  %1719 = vmatprep.subr.bf16.mxu1 %v1931_v10 }
  0x79   :  { %1799 = vmatprep.subr.bf16.mxu0 %v1932_v11 }
  0x7b   :  { %1720 = vmatpush3.bf16.msra.mxu1 %v1931_v10 }
  0x7c   :  { %1800 = vmatpush3.bf16.msra.mxu0 %v1932_v11  ;;  %1721 = vmatprep.subr.bf16.mxu1 %v1933_v12 }
  0x7d   :  { %1801 = vmatprep.subr.bf16.mxu0 %v1934_v13 }
  0x7f   :  { %1722 = vmatpush3.bf16.msra.mxu1 %v1933_v12 }
  0x80   :  { %1802 = vmatpush3.bf16.msra.mxu0 %v1934_v13 }
  0x81   :  { %1807 = vmatprep.subr.bf16.mxu0 %v1938_v14 }
  0x82   :  { %1724 = vmatmul.mubr.bf16.vlgmr.msra.gmra.mrb[0].mxu1 %v1936_v15 }
  0x83   :  { %1804 = vmatmul.mubr.bf16.vlgmr.msra.gmra.mrb[0].mxu0 %v1939_v16 }
  0x84   :  { %1808 = vmatpush3.bf16.msra.mxu0 %v1938_v14  ;;  %1823 = vmatprep.mubr.bf16.mxu0 %v1947_v17 }
  0x85   :  { %1809 = vmatprep.subr.bf16.mxu0 %v1940_v18 }
  0x88   :  { %1810 = vmatpush3.bf16.msra.mxu0 %v1940_v18 }
  0x89   :  { %1811 = vmatprep.subr.bf16.mxu0 %v1941_v19 }
  0x8c   :  { %1812 = vmatpush3.bf16.msra.mxu0 %v1941_v19 }
  0x8d   :  { %1813 = vmatprep.subr.bf16.mxu0 %v1942_v20 }
  0x90   :  { %1814 = vmatpush3.bf16.msra.mxu0 %v1942_v20 }
  0x91   :  { %1815 = vmatprep.subr.bf16.mxu0 %v1943_v21 }
  0x94   :  { %1816 = vmatpush3.bf16.msra.mxu0 %v1943_v21 }
  0x95   :  { %1817 = vmatprep.subr.bf16.mxu0 %v1944_v22 }
  0x98   :  { %1818 = vmatpush3.bf16.msra.mxu0 %v1944_v22 }
  0x99   :  { %1819 = vmatprep.subr.bf16.mxu0 %v1945_v23 }
  0x9c   :  { %1820 = vmatpush3.bf16.msra.mxu0 %v1945_v23 }
  0x9d   :  { %1821 = vmatprep.subr.bf16.mxu0 %v1946_v24 }
  0xa0   :  { %1822 = vmatpush3.bf16.msra.mxu0 %v1946_v24 }
  0xa3   :  { %1824 = vmatmul.mubr.bf16.vlgmr.msra.gmra.mrb[0].mxu0 %v1948_v25 }
 0x155   :  { %v1725_v26 = vpop.f32.mrb[0].mxu1 }
 0x156   :  { %v526_v27 = vpop.f32.mrb[1].mxu1 }
 0x157   :  { %v1726_v28 = vpop.f32.mrb[2].mxu1 }
 0x158   :  { %v529_v29 = vpop.f32.mrb[3].mxu1 }
 0x176   :  { %v1825_v30 = vpop.f32.mrb[0].mxu0 }
 0x177   :  { %v1827_v32 = vadd.f32 %v1825_v30, %v1725_v26  ;;  %v1201_v33 = vpop.f32.mrb[1].mxu0 }
 0x178   :  { %v1828_v34 = vadd.f32 %v1201_v33, %v526_v27  ;;  %v1826_v35 = vpop.f32.mrb[2].mxu0 }
 0x179   :  { %v1229_v36 = vadd.f32 %v1827_v32, %v1533_v31  ;;  %v1829_v37 = vadd.f32 %v1826_v35, %v1726_v28  ;;  %v1204_v38 = vpop.f32.mrb[3].mxu0 }
 0x17a   :  { %v1227_v39 = vadd.f32 %v1828_v34, %v1533_v31  ;;  %v1830_v40 = vadd.f32 %v1204_v38, %v529_v29 }
 0x17b   :  { %v1536_v41 = vmul.f32 -1.442695, %v1229_v36  ;;  %v1230_v42 = vadd.f32 %v1829_v37, %v1533_v31 }
 0x17c   :  { %v1534_v43 = vmul.f32 -1.442695, %v1227_v39  ;;  %v1228_v44 = vadd.f32 %v1830_v40, %v1533_v31 }
 0x17d   :  { %1949 = vpow2.f32 %v1536_v41  ;;  %v1537_v45 = vmul.f32 -1.442695, %v1230_v42 }
 0x17e   :  { %1951 = vpow2.f32 %v1534_v43  ;;  %v1535_v46 = vmul.f32 -1.442695, %v1228_v44 }
 0x17f   :  { %1953 = vpow2.f32 %v1537_v45 }
 0x180   :  { %1955 = vpow2.f32 %v1535_v46 }
 0x187   :  { %v1950_v47 = vpop.eup %1949 }
 0x188   :  { %v1952_v48 = vpop.eup %1951  ;;  %v1245_v49 = vadd.f32 1.0, %v1950_v47 }
 0x189   :  { %v1954_v50 = vpop.eup %1953  ;;  %v1243_v51 = vadd.f32 1.0, %v1952_v48 }
 0x18a   :  { %v1956_v52 = vpop.eup %1955  ;;  %1957 = vrcp.f32 %v1245_v49  ;;  %v1246_v53 = vadd.f32 1.0, %v1954_v50 }
 0x18b   :  { %1959 = vrcp.f32 %v1243_v51  ;;  %v1244_v54 = vadd.f32 1.0, %v1956_v52 }
 0x18c   :  { %1961 = vrcp.f32 %v1246_v53 }
 0x18d   :  { %1963 = vrcp.f32 %v1244_v54 }
 0x194   :  { %v1958_v55 = vpop.eup %1957 }
 0x195   :  { %v1960_v56 = vpop.eup %1959  ;;  %v1257_v59 = vmul.f32 %v1958_v55, %v1229_v36 }
 0x196   :  { %v1962_v57 = vpop.eup %1961  ;;  %v1255_v61 = vmul.f32 %v1960_v56, %v1227_v39 }
 0x197   :  { %v1964_v58 = vpop.eup %1963  ;;  %v1258_v60 = vmul.f32 %v1962_v57, %v1230_v42 }
 0x198   :  { %v1256_v62 = vmul.f32 %v1964_v58, %v1228_v44 }
 0x199   :  { %v1554_v63 = vpack.c.bf16 %v1258_v60, %v1257_v59 }
 0x19a   :  { %v1549_v0 = vpack.c.bf16 %v1256_v62, %v1255_v61 }
 0x19b   :  { %1556 = vst [vmem:[%s2267_s3 + $0x8] sm:$0xff] %v1554_v63  }
 0x19c   :  { %1550 = vst [vmem:[%s2267_s3] sm:$0xff] %v1549_v0  }

// kernel: vqvae_forward.15
= control target key start
LH: loop header
LB: loop body
LE: loop exit
PB: predicated region body
PF: predicated region fallthrough
CT: control target
= control target key end

     0   :  { %s4257_s1 = inlined_call_operand.vmem [shape: bf16[4,4,128,128], index: 1, kind: input, shape index: {}]   ;;  %s4258_s0 = inlined_call_operand.vmem [shape: bf16[9,32,128], index: 0, kind: input, shape index: {}]   ;;  %s4259_s2 = inlined_call_operand.vmem [shape: f32[1,128], index: 2, kind: input, shape index: {}]   ;;  %s4260_s3 = inlined_call_operand.vmem [shape: bf16[4,32,128], index: 3, kind: output, shape index: {}]  }
   0x1   :  { %v3476_v0 = vld [vmem:[%s4257_s1 + $0x40] sm:$0xff]   ;;  %v3478_v2 = vld [vmem:[%s4257_s1 + $0x48] sm:$0xff]   ;;  %v3480_v4 = vld [vmem:[%s4257_s1 + $0x50] sm:$0xff]  }
   0x2   :  { %v3477_v1 = vld [vmem:[%s4257_s1 + $0x140] sm:$0xff]   ;;  %3108 = vmatprep.subr.bf16.mxu0 %v3476_v0  ;;  %v3479_v3 = vld [vmem:[%s4257_s1 + $0x148] sm:$0xff]   ;;  %v3481_v5 = vld [vmem:[%s4257_s1 + $0x150] sm:$0xff]  }
   0x3   :  { %3188 = vmatprep.subr.bf16.mxu1 %v3477_v1  ;;  %3109 = vmatpush3.bf16.msra.mxu0 %v3476_v0  ;;  %v3482_v6 = vld [vmem:[%s4257_s1 + $0x58] sm:$0xff]   ;;  %v3484_v8 = vld [vmem:[%s4257_s1 + $0x60] sm:$0xff]   ;;  %v3486_v10 = vld [vmem:[%s4257_s1 + $0x68] sm:$0xff]  }
   0x4   :  { %3189 = vmatpush3.bf16.msra.mxu1 %v3477_v1  ;;  %3110 = vmatprep.subr.bf16.mxu0 %v3478_v2  ;;  %v3483_v7 = vld [vmem:[%s4257_s1 + $0x158] sm:$0xff]   ;;  %v3485_v9 = vld [vmem:[%s4257_s1 + $0x160] sm:$0xff]   ;;  %v3492_v11 = vld [vmem:[%s4258_s0 + $0x10] sm:$0xff]  }
   0x5   :  { %3190 = vmatprep.subr.bf16.mxu1 %v3479_v3  ;;  %v3487_v12 = vld [vmem:[%s4257_s1 + $0x168] sm:$0xff]   ;;  %3124 = vmatprep.mubr.bf16.mxu0 %v3492_v11  ;;  %v3494_v13 = vld [vmem:[%s4258_s0 + $0x20] sm:$0xff]   ;;  %v3488_v14 = vld [vmem:[%s4257_s1 + $0x70] sm:$0xff]  }
   0x6   :  { %v3489_v15 = vld [vmem:[%s4257_s1 + $0x170] sm:$0xff]   ;;  %3204 = vmatprep.mubr.bf16.mxu1 %v3494_v13  ;;  %v3490_v16 = vld [vmem:[%s4257_s1 + $0x78] sm:$0xff]   ;;  %v3493_v18 = vld [vmem:[%s4257_s1] sm:$0xff]  }
   0x7   :  { %3111 = vmatpush3.bf16.msra.mxu0 %v3478_v2  ;;  %v3491_v17 = vld [vmem:[%s4257_s1 + $0x178] sm:$0xff]   ;;  %v3495_v19 = vld [vmem:[%s4257_s1 + $0x100] sm:$0xff]   ;;  %v3497_v21 = vld [vmem:[%s4258_s0 + $0x28] sm:$0xff]  }
   0x8   :  { %3191 = vmatpush3.bf16.msra.mxu1 %v3479_v3  ;;  %3112 = vmatprep.subr.bf16.mxu0 %v3480_v4  ;;  %v3496_v20 = vld [vmem:[%s4258_s0 + $0x18] sm:$0xff]   ;;  %v3498_v22 = vld [vmem:[%s4257_s1 + $0x8] sm:$0xff]   ;;  %v3500_v24 = vld [vmem:[%s4257_s1 + $0x10] sm:$0xff]  }
   0x9   :  { %3192 = vmatprep.subr.bf16.mxu1 %v3481_v5  ;;  %v3499_v23 = vld [vmem:[%s4257_s1 + $0x108] sm:$0xff]   ;;  %v3512_v25 = vld [vmem:[%s4258_s0] sm:$0xff]   ;;  %v3501_v26 = vld [vmem:[%s4257_s1 + $0x110] sm:$0xff]  }
   0xa   :  { %v3514_v27 = vld [vmem:[%s4258_s0 + $0x10] sm:$0xff]   ;;  %v3502_v28 = vld [vmem:[%s4257_s1 + $0x18] sm:$0xff]   ;;  %v3504_v30 = vld [vmem:[%s4257_s1 + $0x20] sm:$0xff]  }
   0xb   :  { %3113 = vmatpush3.bf16.msra.mxu0 %v3480_v4  ;;  %v3503_v29 = vld [vmem:[%s4257_s1 + $0x118] sm:$0xff]   ;;  %v3505_v31 = vld [vmem:[%s4257_s1 + $0x120] sm:$0xff]   ;;  %v3506_v32 = vld [vmem:[%s4257_s1 + $0x28] sm:$0xff]  }
   0xc   :  { %3193 = vmatpush3.bf16.msra.mxu1 %v3481_v5  ;;  %3114 = vmatprep.subr.bf16.mxu0 %v3482_v6  ;;  %v3507_v33 = vld [vmem:[%s4257_s1 + $0x128] sm:$0xff]   ;;  %v3508_v34 = vld [vmem:[%s4257_s1 + $0x30] sm:$0xff]   ;;  %v3510_v36 = vld [vmem:[%s4257_s1 + $0x38] sm:$0xff]  }
   0xd   :  { %3194 = vmatprep.subr.bf16.mxu1 %v3483_v7  ;;  %v3509_v35 = vld [vmem:[%s4257_s1 + $0x130] sm:$0xff]   ;;  %v3511_v37 = vld [vmem:[%s4257_s1 + $0x138] sm:$0xff]   ;;  %v3513_v38 = vld [vmem:[%s4257_s1 + $0x80] sm:$0xff]  }
   0xe   :  { %v3515_v39 = vld [vmem:[%s4257_s1 + $0x180] sm:$0xff]   ;;  %v3516_v40 = vld [vmem:[%s4258_s0 + $0x8] sm:$0xff]   ;;  %v3517_v41 = vld [vmem:[%s4258_s0 + $0x18] sm:$0xff]  }
   0xf   :  { %3115 = vmatpush3.bf16.msra.mxu0 %v3482_v6  ;;  %v3518_v42 = vld [vmem:[%s4257_s1 + $0x88] sm:$0xff]   ;;  %v3532_v44 = vld [vmem:[%s4258_s0 + $0x30] sm:$0xff]   ;;  %v3534_v45 = vld [vmem:[%s4258_s0 + $0x40] sm:$0xff]  }
  0x10   :  { %3195 = vmatpush3.bf16.msra.mxu1 %v3483_v7  ;;  %3116 = vmatprep.subr.bf16.mxu0 %v3484_v8  ;;  %v3519_v43 = vld [vmem:[%s4257_s1 + $0x188] sm:$0xff]   ;;  %v3520_v46 = vld [vmem:[%s4257_s1 + $0x90] sm:$0xff]   ;;  %v3522_v48 = vld [vmem:[%s4257_s1 + $0x98] sm:$0xff]  }
  0x11   :  { %3196 = vmatprep.subr.bf16.mxu1 %v3485_v9  ;;  %v3521_v47 = vld [vmem:[%s4257_s1 + $0x190] sm:$0xff]   ;;  %v3523_v49 = vld [vmem:[%s4257_s1 + $0x198] sm:$0xff]   ;;  %v3524_v50 = vld [vmem:[%s4257_s1 + $0xa0] sm:$0xff]  }
  0x12   :  { %v3525_v51 = vld [vmem:[%s4257_s1 + $0x1a0] sm:$0xff]   ;;  %v3526_v52 = vld [vmem:[%s4257_s1 + $0xa8] sm:$0xff]   ;;  %v3528_v54 = vld [vmem:[%s4257_s1 + $0xb0] sm:$0xff]  }
  0x13   :  { %3117 = vmatpush3.bf16.msra.mxu0 %v3484_v8  ;;  %v3527_v53 = vld [vmem:[%s4257_s1 + $0x1a8] sm:$0xff]   ;;  %v3529_v55 = vld [vmem:[%s4257_s1 + $0x1b0] sm:$0xff]   ;;  %v3530_v56 = vld [vmem:[%s4257_s1 + $0xb8] sm:$0xff]  }
  0x14   :  { %3197 = vmatpush3.bf16.msra.mxu1 %v3485_v9  ;;  %3118 = vmatprep.subr.bf16.mxu0 %v3486_v10  ;;  %v3531_v57 = vld [vmem:[%s4257_s1 + $0x1b8] sm:$0xff]   ;;  %v3533_v58 = vld [vmem:[%s4257_s1 + $0xc0] sm:$0xff]   ;;  %v3537_v61 = vld [vmem:[%s4258_s0 + $0x48] sm:$0xff]  }
  0x15   :  { %3198 = vmatprep.subr.bf16.mxu1 %v3487_v12  ;;  %v3535_v59 = vld [vmem:[%s4257_s1 + $0x1c0] sm:$0xff]   ;;  %v3536_v60 = vld [vmem:[%s4258_s0 + $0x38] sm:$0xff]   ;;  %v3538_v62 = vld [vmem:[%s4257_s1 + $0xc8] sm:$0xff]  }
  0x16   :  { %v3539_v63 = vld [vmem:[%s4257_s1 + $0x1c8] sm:$0xff]   ;;  %v3552_v0 = vld [vmem:[%s4258_s0 + $0x40] sm:$0xff]   ;;  %v3553_v1 = vld [vmem:[%s4258_s0 + $0x50] sm:$0xff]  }
  0x17   :  { %3119 = vmatpush3.bf16.msra.mxu0 %v3486_v10  ;;  %v3540_v2 = vld [vmem:[%s4257_s1 + $0xd0] sm:$0xff]   ;;  %v3542_v4 = vld [vmem:[%s4257_s1 + $0xd8] sm:$0xff]   ;;  %v3544_v6 = vld [vmem:[%s4257_s1 + $0xe0] sm:$0xff]  }
  0x18   :  { %3199 = vmatpush3.bf16.msra.mxu1 %v3487_v12  ;;  %3120 = vmatprep.subr.bf16.mxu0 %v3488_v14  ;;  %v3541_v3 = vld [vmem:[%s4257_s1 + $0x1d0] sm:$0xff]   ;;  %v3543_v5 = vld [vmem:[%s4257_s1 + $0x1d8] sm:$0xff]   ;;  %v3545_v7 = vld [vmem:[%s4257_s1 + $0x1e0] sm:$0xff]  }
  0x19   :  { %3200 = vmatprep.subr.bf16.mxu1 %v3489_v15  ;;  %v3546_v8 = vld [vmem:[%s4257_s1 + $0xe8] sm:$0xff]   ;;  %v3548_v10 = vld [vmem:[%s4257_s1 + $0xf0] sm:$0xff]   ;;  %v3550_v12 = vld [vmem:[%s4257_s1 + $0xf8] sm:$0xff]  }
  0x1a   :  { %v3547_v9 = vld [vmem:[%s4257_s1 + $0x1e8] sm:$0xff]   ;;  %v3549_v11 = vld [vmem:[%s4257_s1 + $0x1f0] sm:$0xff]   ;;  %v3551_v13 = vld [vmem:[%s4257_s1 + $0x1f8] sm:$0xff]  }
  0x1b   :  { %3121 = vmatpush3.bf16.msra.mxu0 %v3488_v14  ;;  %v3554_v14 = vld [vmem:[%s4258_s0 + $0x48] sm:$0xff]  }
  0x1c   :  { %3201 = vmatpush3.bf16.msra.mxu1 %v3489_v15  ;;  %3122 = vmatprep.subr.bf16.mxu0 %v3490_v16  ;;  %v3556_v15 = vld [vmem:[%s4257_s1 + $0x240] sm:$0xff]  }
  0x1d   :  { %3202 = vmatprep.subr.bf16.mxu1 %v3491_v17 }
  0x1f   :  { %3123 = vmatpush3.bf16.msra.mxu0 %v3490_v16  ;;  %v3557_v16 = vld [vmem:[%s4257_s1 + $0x340] sm:$0xff]  }
  0x20   :  { %3203 = vmatpush3.bf16.msra.mxu1 %v3491_v17  ;;  %3128 = vmatprep.subr.bf16.mxu0 %v3493_v18  ;;  %v3555_v17 = vld [vmem:[%s4258_s0 + $0x58] sm:$0xff]  }
  0x21   :  { %3208 = vmatprep.subr.bf16.mxu1 %v3495_v19 }
  0x22   :  { %3125 = vmatmul.mubr.bf16.vlgmr.msra.gmra.mrb[0].mxu0 %v3496_v20  ;;  %v3572_v20 = vld [vmem:[%s4258_s0 + $0x40] sm:$0xff]  }
  0x23   :  { %3129 = vmatpush3.bf16.msra.mxu0 %v3493_v18  ;;  %3205 = vmatmul.mubr.bf16.vlgmr.msra.gmra.mrb[0].mxu1 %v3497_v21  ;;  %v3558_v18 = vld [vmem:[%s4257_s1 + $0x248] sm:$0xff]   ;;  %v3574_v21 = vld [vmem:[%s4258_s0 + $0x50] sm:$0xff]  }
  0x24   :  { %3209 = vmatpush3.bf16.msra.mxu1 %v3495_v19  ;;  %3130 = vmatprep.subr.bf16.mxu0 %v3498_v22  ;;  %v3559_v19 = vld [vmem:[%s4257_s1 + $0x348] sm:$0xff]  }
  0x25   :  { %3210 = vmatprep.subr.bf16.mxu1 %v3499_v23  ;;  %3144 = vmatprep.mubr.bf16.mxu0 %v3512_v25  ;;  %v3563_v25 = vld [vmem:[%s4257_s1 + $0x358] sm:$0xff]  }
  0x26   :  { %3224 = vmatprep.mubr.bf16.mxu1 %v3514_v27  ;;  %v3565_v27 = vld [vmem:[%s4257_s1 + $0x360] sm:$0xff]  }
  0x27   :  { %3131 = vmatpush3.bf16.msra.mxu0 %v3498_v22  ;;  %v3560_v22 = vld [vmem:[%s4257_s1 + $0x250] sm:$0xff]  }
  0x28   :  { %3211 = vmatpush3.bf16.msra.mxu1 %v3499_v23  ;;  %3132 = vmatprep.subr.bf16.mxu0 %v3500_v24  ;;  %v3561_v23 = vld [vmem:[%s4257_s1 + $0x350] sm:$0xff]  }
  0x29   :  { %3212 = vmatprep.subr.bf16.mxu1 %v3501_v26 }
  0x2b   :  { %3133 = vmatpush3.bf16.msra.mxu0 %v3500_v24  ;;  %v3562_v24 = vld [vmem:[%s4257_s1 + $0x258] sm:$0xff]  }
  0x2c   :  { %3213 = vmatpush3.bf16.msra.mxu1 %v3501_v26  ;;  %3134 = vmatprep.subr.bf16.mxu0 %v3502_v28  ;;  %v3564_v26 = vld [vmem:[%s4257_s1 + $0x260] sm:$0xff]  }
  0x2d   :  { %3214 = vmatprep.subr.bf16.mxu1 %v3503_v29 }
  0x2f   :  { %3135 = vmatpush3.bf16.msra.mxu0 %v3502_v28  ;;  %v3566_v28 = vld [vmem:[%s4257_s1 + $0x268] sm:$0xff]  }
  0x30   :  { %3215 = vmatpush3.bf16.msra.mxu1 %v3503_v29  ;;  %3136 = vmatprep.subr.bf16.mxu0 %v3504_v30  ;;  %v3567_v29 = vld [vmem:[%s4257_s1 + $0x368] sm:$0xff]  }
  0x31   :  { %3216 = vmatprep.subr.bf16.mxu1 %v3505_v31 }
  0x33   :  { %3137 = vmatpush3.bf16.msra.mxu0 %v3504_v30  ;;  %v3568_v30 = vld [vmem:[%s4257_s1 + $0x270] sm:$0xff]  }
  0x34   :  { %3217 = vmatpush3.bf16.msra.mxu1 %v3505_v31  ;;  %3138 = vmatprep.subr.bf16.mxu0 %v3506_v32  ;;  %v3569_v31 = vld [vmem:[%s4257_s1 + $0x370] sm:$0xff]  }
  0x35   :  { %3218 = vmatprep.subr.bf16.mxu1 %v3507_v33 }
  0x37   :  { %3139 = vmatpush3.bf16.msra.mxu0 %v3506_v32  ;;  %v3570_v32 = vld [vmem:[%s4257_s1 + $0x278] sm:$0xff]  }
  0x38   :  { %3219 = vmatpush3.bf16.msra.mxu1 %v3507_v33  ;;  %3140 = vmatprep.subr.bf16.mxu0 %v3508_v34  ;;  %v3571_v33 = vld [vmem:[%s4257_s1 + $0x378] sm:$0xff]  }
  0x39   :  { %3220 = vmatprep.subr.bf16.mxu1 %v3509_v35 }
  0x3b   :  { %3141 = vmatpush3.bf16.msra.mxu0 %v3508_v34  ;;  %v3573_v34 = vld [vmem:[%s4257_s1 + $0x200] sm:$0xff]  }
  0x3c   :  { %3221 = vmatpush3.bf16.msra.mxu1 %v3509_v35  ;;  %3142 = vmatprep.subr.bf16.mxu0 %v3510_v36  ;;  %v3575_v35 = vld [vmem:[%s4257_s1 + $0x300] sm:$0xff]  }
  0x3d   :  { %3222 = vmatprep.subr.bf16.mxu1 %v3511_v37 }
  0x3f   :  { %3143 = vmatpush3.bf16.msra.mxu0 %v3510_v36  ;;  %v3576_v36 = vld [vmem:[%s4258_s0 + $0x48] sm:$0xff]  }
  0x40   :  { %3223 = vmatpush3.bf16.msra.mxu1 %v3511_v37  ;;  %3148 = vmatprep.subr.bf16.mxu0 %v3513_v38  ;;  %v3577_v37 = vld [vmem:[%s4258_s0 + $0x58] sm:$0xff]  }
  0x41   :  { %3228 = vmatprep.subr.bf16.mxu1 %v3515_v39 }
  0x42   :  { %3145 = vmatmul.mubr.bf16.vlgmr.msra.gmra.mrb[0].mxu0 %v3516_v40  ;;  %v3592_v40 = vld [vmem:[%s4258_s0 + $0x30] sm:$0xff]  }
  0x43   :  { %3149 = vmatpush3.bf16.msra.mxu0 %v3513_v38  ;;  %3225 = vmatmul.mubr.bf16.vlgmr.msra.gmra.mrb[0].mxu1 %v3517_v41  ;;  %v3578_v38 = vld [vmem:[%s4257_s1 + $0x208] sm:$0xff]   ;;  %v3594_v41 = vld [vmem:[%s4258_s0 + $0x40] sm:$0xff]  }
  0x44   :  { %3229 = vmatpush3.bf16.msra.mxu1 %v3515_v39  ;;  %3150 = vmatprep.subr.bf16.mxu0 %v3518_v42  ;;  %v3579_v39 = vld [vmem:[%s4257_s1 + $0x308] sm:$0xff]  }
  0x45   :  { %3230 = vmatprep.subr.bf16.mxu1 %v3519_v43  ;;  %3164 = vmatprep.mubr.bf16.mxu0 %v3532_v44  ;;  %v3582_v44 = vld [vmem:[%s4257_s1 + $0x218] sm:$0xff]  }
  0x46   :  { %3244 = vmatprep.mubr.bf16.mxu1 %v3534_v45  ;;  %v3583_v45 = vld [vmem:[%s4257_s1 + $0x318] sm:$0xff]  }
  0x47   :  { %3151 = vmatpush3.bf16.msra.mxu0 %v3518_v42  ;;  %v3580_v42 = vld [vmem:[%s4257_s1 + $0x210] sm:$0xff]  }
  0x48   :  { %3231 = vmatpush3.bf16.msra.mxu1 %v3519_v43  ;;  %3152 = vmatprep.subr.bf16.mxu0 %v3520_v46  ;;  %v3581_v43 = vld [vmem:[%s4257_s1 + $0x310] sm:$0xff]  }
  0x49   :  { %3232 = vmatprep.subr.bf16.mxu1 %v3521_v47 }
  0x4b   :  { %3153 = vmatpush3.bf16.msra.mxu0 %v3520_v46  ;;  %v3584_v46 = vld [vmem:[%s4257_s1 + $0x220] sm:$0xff]  }
  0x4c   :  { %3233 = vmatpush3.bf16.msra.mxu1 %v3521_v47  ;;  %3154 = vmatprep.subr.bf16.mxu0 %v3522_v48  ;;  %v3585_v47 = vld [vmem:[%s4257_s1 + $0x320] sm:$0xff]  }
  0x4d   :  { %3234 = vmatprep.subr.bf16.mxu1 %v3523_v49 }
  0x4f   :  { %3155 = vmatpush3.bf16.msra.mxu0 %v3522_v48  ;;  %v3586_v48 = vld [vmem:[%s4257_s1 + $0x228] sm:$0xff]  }
  0x50   :  { %3235 = vmatpush3.bf16.msra.mxu1 %v3523_v49  ;;  %3156 = vmatprep.subr.bf16.mxu0 %v3524_v50  ;;  %v3587_v49 = vld [vmem:[%s4257_s1 + $0x328] sm:$0xff]  }
  0x51   :  { %3236 = vmatprep.subr.bf16.mxu1 %v3525_v51 }
  0x53   :  { %3157 = vmatpush3.bf16.msra.mxu0 %v3524_v50  ;;  %v3588_v50 = vld [vmem:[%s4257_s1 + $0x230] sm:$0xff]  }
  0x54   :  { %3237 = vmatpush3.bf16.msra.mxu1 %v3525_v51  ;;  %3158 = vmatprep.subr.bf16.mxu0 %v3526_v52  ;;  %v3589_v51 = vld [vmem:[%s4257_s1 + $0x330] sm:$0xff]  }
  0x55   :  { %3238 = vmatprep.subr.bf16.mxu1 %v3527_v53 }
  0x57   :  { %3159 = vmatpush3.bf16.msra.mxu0 %v3526_v52  ;;  %v3590_v52 = vld [vmem:[%s4257_s1 + $0x238] sm:$0xff]  }
  0x58   :  { %3239 = vmatpush3.bf16.msra.mxu1 %v3527_v53  ;;  %3160 = vmatprep.subr.bf16.mxu0 %v3528_v54  ;;  %v3591_v53 = vld [vmem:[%s4257_s1 + $0x338] sm:$0xff]  }
  0x59   :  { %3240 = vmatprep.subr.bf16.mxu1 %v3529_v55 }
  0x5b   :  { %3161 = vmatpush3.bf16.msra.mxu0 %v3528_v54  ;;  %v3593_v54 = vld [vmem:[%s4257_s1 + $0x280] sm:$0xff]  }
  0x5c   :  { %3241 = vmatpush3.bf16.msra.mxu1 %v3529_v55  ;;  %3162 = vmatprep.subr.bf16.mxu0 %v3530_v56  ;;  %v3595_v55 = vld [vmem:[%s4257_s1 + $0x380] sm:$0xff]  }
  0x5d   :  { %3242 = vmatprep.subr.bf16.mxu1 %v3531_v57 }
  0x5f   :  { %3163 = vmatpush3.bf16.msra.mxu0 %v3530_v56  ;;  %v3596_v56 = vld [vmem:[%s4258_s0 + $0x38] sm:$0xff]  }
  0x60   :  { %3243 = vmatpush3.bf16.msra.mxu1 %v3531_v57  ;;  %3168 = vmatprep.subr.bf16.mxu0 %v3533_v58  ;;  %v3597_v57 = vld [vmem:[%s4258_s0 + $0x48] sm:$0xff]  }
  0x61   :  { %3248 = vmatprep.subr.bf16.mxu1 %v3535_v59 }
  0x62   :  { %3165 = vmatmul.mubr.bf16.vlgmr.msra.gmra.mrb[0].mxu0 %v3536_v60  ;;  %v3612_v60 = vld [vmem:[%s4258_s0 + $0x60] sm:$0xff]  }
  0x63   :  { %3169 = vmatpush3.bf16.msra.mxu0 %v3533_v58  ;;  %3245 = vmatmul.mubr.bf16.vlgmr.msra.gmra.mrb[0].mxu1 %v3537_v61  ;;  %v3598_v58 = vld [vmem:[%s4257_s1 + $0x288] sm:$0xff]   ;;  %v3614_v61 = vld [vmem:[%s4258_s0 + $0x70] sm:$0xff]  }
  0x64   :  { %3249 = vmatpush3.bf16.msra.mxu1 %v3535_v59  ;;  %3170 = vmatprep.subr.bf16.mxu0 %v3538_v62  ;;  %v3599_v59 = vld [vmem:[%s4257_s1 + $0x388] sm:$0xff]  }
  0x65   :  { %3250 = vmatprep.subr.bf16.mxu1 %v3539_v63  ;;  %3184 = vmatprep.mubr.bf16.mxu0 %v3552_v0  ;;  %v3602_v0 = vld [vmem:[%s4257_s1 + $0x298] sm:$0xff]  }
  0x66   :  { %3264 = vmatprep.mubr.bf16.mxu1 %v3553_v1  ;;  %v3603_v1 = vld [vmem:[%s4257_s1 + $0x398] sm:$0xff]  }
  0x67   :  { %3171 = vmatpush3.bf16.msra.mxu0 %v3538_v62  ;;  %v3600_v62 = vld [vmem:[%s4257_s1 + $0x290] sm:$0xff]  }
  0x68   :  { %3251 = vmatpush3.bf16.msra.mxu1 %v3539_v63  ;;  %3172 = vmatprep.subr.bf16.mxu0 %v3540_v2  ;;  %v3601_v63 = vld [vmem:[%s4257_s1 + $0x390] sm:$0xff]  }
  0x69   :  { %3252 = vmatprep.subr.bf16.mxu1 %v3541_v3 }
  0x6b   :  { %3173 = vmatpush3.bf16.msra.mxu0 %v3540_v2  ;;  %v3604_v2 = vld [vmem:[%s4257_s1 + $0x2a0] sm:$0xff]  }
  0x6c   :  { %3253 = vmatpush3.bf16.msra.mxu1 %v3541_v3  ;;  %3174 = vmatprep.subr.bf16.mxu0 %v3542_v4  ;;  %v3605_v3 = vld [vmem:[%s4257_s1 + $0x3a0] sm:$0xff]  }
  0x6d   :  { %3254 = vmatprep.subr.bf16.mxu1 %v3543_v5 }
  0x6f   :  { %3175 = vmatpush3.bf16.msra.mxu0 %v3542_v4  ;;  %v3606_v4 = vld [vmem:[%s4257_s1 + $0x2a8] sm:$0xff]  }
  0x70   :  { %3255 = vmatpush3.bf16.msra.mxu1 %v3543_v5  ;;  %3176 = vmatprep.subr.bf16.mxu0 %v3544_v6  ;;  %v3607_v5 = vld [vmem:[%s4257_s1 + $0x3a8] sm:$0xff]  }
  0x71   :  { %3256 = vmatprep.subr.bf16.mxu1 %v3545_v7 }
  0x73   :  { %3177 = vmatpush3.bf16.msra.mxu0 %v3544_v6  ;;  %v3608_v6 = vld [vmem:[%s4257_s1 + $0x2b0] sm:$0xff]  }
  0x74   :  { %3257 = vmatpush3.bf16.msra.mxu1 %v3545_v7  ;;  %3178 = vmatprep.subr.bf16.mxu0 %v3546_v8  ;;  %v3609_v7 = vld [vmem:[%s4257_s1 + $0x3b0] sm:$0xff]  }
  0x75   :  { %3258 = vmatprep.subr.bf16.mxu1 %v3547_v9 }
  0x77   :  { %3179 = vmatpush3.bf16.msra.mxu0 %v3546_v8  ;;  %v3610_v8 = vld [vmem:[%s4257_s1 + $0x2b8] sm:$0xff]  }
  0x78   :  { %3259 = vmatpush3.bf16.msra.mxu1 %v3547_v9  ;;  %3180 = vmatprep.subr.bf16.mxu0 %v3548_v10  ;;  %v3611_v9 = vld [vmem:[%s4257_s1 + $0x3b8] sm:$0xff]  }
  0x79   :  { %3260 = vmatprep.subr.bf16.mxu1 %v3549_v11 }
  0x7b   :  { %3181 = vmatpush3.bf16.msra.mxu0 %v3548_v10  ;;  %v3613_v10 = vld [vmem:[%s4257_s1 + $0x2c0] sm:$0xff]  }
  0x7c   :  { %3261 = vmatpush3.bf16.msra.mxu1 %v3549_v11  ;;  %3182 = vmatprep.subr.bf16.mxu0 %v3550_v12  ;;  %v3615_v11 = vld [vmem:[%s4257_s1 + $0x3c0] sm:$0xff]  }
  0x7d   :  { %3262 = vmatprep.subr.bf16.mxu1 %v3551_v13 }
  0x7f   :  { %3183 = vmatpush3.bf16.msra.mxu0 %v3550_v12  ;;  %v3616_v12 = vld [vmem:[%s4258_s0 + $0x68] sm:$0xff]  }
  0x80   :  { %3263 = vmatpush3.bf16.msra.mxu1 %v3551_v13  ;;  %3268 = vmatprep.subr.bf16.mxu0 %v3556_v15  ;;  %v3617_v13 = vld [vmem:[%s4258_s0 + $0x78] sm:$0xff]  }
  0x81   :  { %3348 = vmatprep.subr.bf16.mxu1 %v3557_v16 }
  0x82   :  { %3185 = vmatmul.mubr.bf16.vlgmr.msra.gmra.mrb[0].mxu0 %v3554_v14  ;;  %v3618_v14 = vld [vmem:[%s4257_s1 + $0x2c8] sm:$0xff]  }
  0x83   :  { %3265 = vmatmul.mubr.bf16.vlgmr.msra.gmra.mrb[0].mxu1 %v3555_v17  ;;  %3269 = vmatpush3.bf16.msra.mxu0 %v3556_v15  ;;  %v3619_v15 = vld [vmem:[%s4257_s1 + $0x3c8] sm:$0xff]   ;;  %v3633_v17 = vld [vmem:[%s4258_s0 + $0x80] sm:$0xff]  }
  0x84   :  { %3349 = vmatpush3.bf16.msra.mxu1 %v3557_v16  ;;  %3270 = vmatprep.subr.bf16.mxu0 %v3558_v18  ;;  %v3632_v16 = vld [vmem:[%s4258_s0 + $0x70] sm:$0xff]  }
  0x85   :  { %3350 = vmatprep.subr.bf16.mxu1 %v3559_v19  ;;  %3284 = vmatprep.mubr.bf16.mxu0 %v3572_v20  ;;  %v3622_v20 = vld [vmem:[%s4257_s1 + $0x2d8] sm:$0xff]  }
  0x86   :  { %3364 = vmatprep.mubr.bf16.mxu1 %v3574_v21  ;;  %v3623_v21 = vld [vmem:[%s4257_s1 + $0x3d8] sm:$0xff]  }
  0x87   :  { %3271 = vmatpush3.bf16.msra.mxu0 %v3558_v18  ;;  %v3620_v18 = vld [vmem:[%s4257_s1 + $0x2d0] sm:$0xff]  }
  0x88   :  { %3351 = vmatpush3.bf16.msra.mxu1 %v3559_v19  ;;  %3272 = vmatprep.subr.bf16.mxu0 %v3560_v22  ;;  %v3621_v19 = vld [vmem:[%s4257_s1 + $0x3d0] sm:$0xff]  }
  0x89   :  { %3352 = vmatprep.subr.bf16.mxu1 %v3561_v23 }
  0x8b   :  { %3273 = vmatpush3.bf16.msra.mxu0 %v3560_v22  ;;  %v3624_v22 = vld [vmem:[%s4257_s1 + $0x2e0] sm:$0xff]  }
  0x8c   :  { %3353 = vmatpush3.bf16.msra.mxu1 %v3561_v23  ;;  %3274 = vmatprep.subr.bf16.mxu0 %v3562_v24  ;;  %v3625_v23 = vld [vmem:[%s4257_s1 + $0x3e0] sm:$0xff]  }
  0x8d   :  { %3354 = vmatprep.subr.bf16.mxu1 %v3563_v25 }
  0x8f   :  { %3275 = vmatpush3.bf16.msra.mxu0 %v3562_v24  ;;  %v3626_v24 = vld [vmem:[%s4257_s1 + $0x2e8] sm:$0xff]  }
  0x90   :  { %3355 = vmatpush3.bf16.msra.mxu1 %v3563_v25  ;;  %3276 = vmatprep.subr.bf16.mxu0 %v3564_v26  ;;  %v3627_v25 = vld [vmem:[%s4257_s1 + $0x3e8] sm:$0xff]  }
  0x91   :  { %3356 = vmatprep.subr.bf16.mxu1 %v3565_v27 }
  0x93   :  { %3277 = vmatpush3.bf16.msra.mxu0 %v3564_v26  ;;  %v3628_v26 = vld [vmem:[%s4257_s1 + $0x2f0] sm:$0xff]  }
  0x94   :  { %3357 = vmatpush3.bf16.msra.mxu1 %v3565_v27  ;;  %3278 = vmatprep.subr.bf16.mxu0 %v3566_v28  ;;  %v3629_v27 = vld [vmem:[%s4257_s1 + $0x3f0] sm:$0xff]  }
  0x95   :  { %3358 = vmatprep.subr.bf16.mxu1 %v3567_v29 }
  0x97   :  { %3279 = vmatpush3.bf16.msra.mxu0 %v3566_v28  ;;  %v3630_v28 = vld [vmem:[%s4257_s1 + $0x2f8] sm:$0xff]  }
  0x98   :  { %3359 = vmatpush3.bf16.msra.mxu1 %v3567_v29  ;;  %3280 = vmatprep.subr.bf16.mxu0 %v3568_v30  ;;  %v3631_v29 = vld [vmem:[%s4257_s1 + $0x3f8] sm:$0xff]  }
  0x99   :  { %3360 = vmatprep.subr.bf16.mxu1 %v3569_v31 }
  0x9b   :  { %3281 = vmatpush3.bf16.msra.mxu0 %v3568_v30  ;;  %v3634_v30 = vld [vmem:[%s4258_s0 + $0x78] sm:$0xff]  }
  0x9c   :  { %3361 = vmatpush3.bf16.msra.mxu1 %v3569_v31  ;;  %3282 = vmatprep.subr.bf16.mxu0 %v3570_v32  ;;  %v3635_v31 = vld [vmem:[%s4258_s0 + $0x88] sm:$0xff]  }
  0x9d   :  { %3362 = vmatprep.subr.bf16.mxu1 %v3571_v33 }
  0x9f   :  { %3283 = vmatpush3.bf16.msra.mxu0 %v3570_v32  ;;  %v4203_v32 = vld [vmem:[%s4259_s2] ss:$0 sm:$0xff] }
  0xa0   :  { %3363 = vmatpush3.bf16.msra.mxu1 %v3571_v33  ;;  %3288 = vmatprep.subr.bf16.mxu0 %v3573_v34 }
  0xa1   :  { %3368 = vmatprep.subr.bf16.mxu1 %v3575_v35 }
  0xa2   :  { %3285 = vmatmul.mubr.bf16.vlgmr.msra.gmra.mrb[4].mxu0 %v3576_v36 }
  0xa3   :  { %3289 = vmatpush3.bf16.msra.mxu0 %v3573_v34  ;;  %3365 = vmatmul.mubr.bf16.vlgmr.msra.gmra.mrb[4].mxu1 %v3577_v37 }
  0xa4   :  { %3369 = vmatpush3.bf16.msra.mxu1 %v3575_v35  ;;  %3290 = vmatprep.subr.bf16.mxu0 %v3578_v38 }
  0xa5   :  { %3370 = vmatprep.subr.bf16.mxu1 %v3579_v39  ;;  %3304 = vmatprep.mubr.bf16.mxu0 %v3592_v40 }
  0xa6   :  { %3384 = vmatprep.mubr.bf16.mxu1 %v3594_v41 }
  0xa7   :  { %3291 = vmatpush3.bf16.msra.mxu0 %v3578_v38 }
  0xa8   :  { %3371 = vmatpush3.bf16.msra.mxu1 %v3579_v39  ;;  %3292 = vmatprep.subr.bf16.mxu0 %v3580_v42 }
  0xa9   :  { %3372 = vmatprep.subr.bf16.mxu1 %v3581_v43 }
  0xab   :  { %3293 = vmatpush3.bf16.msra.mxu0 %v3580_v42 }
  0xac   :  { %3373 = vmatpush3.bf16.msra.mxu1 %v3581_v43  ;;  %3294 = vmatprep.subr.bf16.mxu0 %v3582_v44 }
  0xad   :  { %3374 = vmatprep.subr.bf16.mxu1 %v3583_v45 }
  0xaf   :  { %3295 = vmatpush3.bf16.msra.mxu0 %v3582_v44 }
  0xb0   :  { %3375 = vmatpush3.bf16.msra.mxu1 %v3583_v45  ;;  %3296 = vmatprep.subr.bf16.mxu0 %v3584_v46 }
  0xb1   :  { %3376 = vmatprep.subr.bf16.mxu1 %v3585_v47 }
  0xb3   :  { %3297 = vmatpush3.bf16.msra.mxu0 %v3584_v46 }
  0xb4   :  { %3377 = vmatpush3.bf16.msra.mxu1 %v3585_v47  ;;  %3298 = vmatprep.subr.bf16.mxu0 %v3586_v48 }
  0xb5   :  { %3378 = vmatprep.subr.bf16.mxu1 %v3587_v49 }
  0xb7   :  { %3299 = vmatpush3.bf16.msra.mxu0 %v3586_v48 }
  0xb8   :  { %3379 = vmatpush3.bf16.msra.mxu1 %v3587_v49  ;;  %3300 = vmatprep.subr.bf16.mxu0 %v3588_v50 }
  0xb9   :  { %3380 = vmatprep.subr.bf16.mxu1 %v3589_v51 }
  0xbb   :  { %3301 = vmatpush3.bf16.msra.mxu0 %v3588_v50 }
  0xbc   :  { %3381 = vmatpush3.bf16.msra.mxu1 %v3589_v51  ;;  %3302 = vmatprep.subr.bf16.mxu0 %v3590_v52 }
  0xbd   :  { %3382 = vmatprep.subr.bf16.mxu1 %v3591_v53 }
  0xbf   :  { %3303 = vmatpush3.bf16.msra.mxu0 %v3590_v52 }
  0xc0   :  { %3383 = vmatpush3.bf16.msra.mxu1 %v3591_v53  ;;  %3308 = vmatprep.subr.bf16.mxu0 %v3593_v54 }
  0xc1   :  { %3388 = vmatprep.subr.bf16.mxu1 %v3595_v55 }
  0xc2   :  { %3305 = vmatmul.mubr.bf16.vlgmr.msra.gmra.mrb[4].mxu0 %v3596_v56 }
  0xc3   :  { %3309 = vmatpush3.bf16.msra.mxu0 %v3593_v54  ;;  %3385 = vmatmul.mubr.bf16.vlgmr.msra.gmra.mrb[4].mxu1 %v3597_v57 }
  0xc4   :  { %3389 = vmatpush3.bf16.msra.mxu1 %v3595_v55  ;;  %3310 = vmatprep.subr.bf16.mxu0 %v3598_v58 }
  0xc5   :  { %3390 = vmatprep.subr.bf16.mxu1 %v3599_v59  ;;  %3324 = vmatprep.mubr.bf16.mxu0 %v3612_v60 }
  0xc6   :  { %3404 = vmatprep.mubr.bf16.mxu1 %v3614_v61 }
  0xc7   :  { %3311 = vmatpush3.bf16.msra.mxu0 %v3598_v58 }
  0xc8   :  { %3391 = vmatpush3.bf16.msra.mxu1 %v3599_v59  ;;  %3312 = vmatprep.subr.bf16.mxu0 %v3600_v62 }
  0xc9   :  { %3392 = vmatprep.subr.bf16.mxu1 %v3601_v63 }
  0xcb   :  { %3313 = vmatpush3.bf16.msra.mxu0 %v3600_v62 }
  0xcc   :  { %3393 = vmatpush3.bf16.msra.mxu1 %v3601_v63  ;;  %3314 = vmatprep.subr.bf16.mxu0 %v3602_v0 }
  0xcd   :  { %3394 = vmatprep.subr.bf16.mxu1 %v3603_v1 }
  0xcf   :  { %3315 = vmatpush3.bf16.msra.mxu0 %v3602_v0 }
  0xd0   :  { %3395 = vmatpush3.bf16.msra.mxu1 %v3603_v1  ;;  %3316 = vmatprep.subr.bf16.mxu0 %v3604_v2 }
  0xd1   :  { %3396 = vmatprep.subr.bf16.mxu1 %v3605_v3 }
  0xd3   :  { %3317 = vmatpush3.bf16.msra.mxu0 %v3604_v2 }
  0xd4   :  { %3397 = vmatpush3.bf16.msra.mxu1 %v3605_v3  ;;  %3318 = vmatprep.subr.bf16.mxu0 %v3606_v4 }
  0xd5   :  { %3398 = vmatprep.subr.bf16.mxu1 %v3607_v5 }
  0xd7   :  { %3319 = vmatpush3.bf16.msra.mxu0 %v3606_v4 }
  0xd8   :  { %3399 = vmatpush3.bf16.msra.mxu1 %v3607_v5  ;;  %3320 = vmatprep.subr.bf16.mxu0 %v3608_v6 }
  0xd9   :  { %3400 = vmatprep.subr.bf16.mxu1 %v3609_v7 }
  0xdb   :  { %3321 = vmatpush3.bf16.msra.mxu0 %v3608_v6 }
  0xdc   :  { %3401 = vmatpush3.bf16.msra.mxu1 %v3609_v7  ;;  %3322 = vmatprep.subr.bf16.mxu0 %v3610_v8 }
  0xdd   :  { %3402 = vmatprep.subr.bf16.mxu1 %v3611_v9 }
  0xdf   :  { %3323 = vmatpush3.bf16.msra.mxu0 %v3610_v8 }
  0xe0   :  { %3403 = vmatpush3.bf16.msra.mxu1 %v3611_v9  ;;  %3328 = vmatprep.subr.bf16.mxu0 %v3613_v10 }
  0xe1   :  { %3408 = vmatprep.subr.bf16.mxu1 %v3615_v11 }
  0xe2   :  { %3325 = vmatmul.mubr.bf16.vlgmr.msra.gmra.mrb[4].mxu0 %v3616_v12 }
  0xe3   :  { %3329 = vmatpush3.bf16.msra.mxu0 %v3613_v10  ;;  %3405 = vmatmul.mubr.bf16.vlgmr.msra.gmra.mrb[4].mxu1 %v3617_v13 }
  0xe4   :  { %3409 = vmatpush3.bf16.msra.mxu1 %v3615_v11  ;;  %3330 = vmatprep.subr.bf16.mxu0 %v3618_v14 }
  0xe5   :  { %3410 = vmatprep.subr.bf16.mxu1 %v3619_v15  ;;  %3344 = vmatprep.mubr.bf16.mxu0 %v3632_v16 }
  0xe6   :  { %3424 = vmatprep.mubr.bf16.mxu1 %v3633_v17 }
  0xe7   :  { %3331 = vmatpush3.bf16.msra.mxu0 %v3618_v14 }
  0xe8   :  { %3411 = vmatpush3.bf16.msra.mxu1 %v3619_v15  ;;  %3332 = vmatprep.subr.bf16.mxu0 %v3620_v18 }
  0xe9   :  { %3412 = vmatprep.subr.bf16.mxu1 %v3621_v19 }
  0xeb   :  { %3333 = vmatpush3.bf16.msra.mxu0 %v3620_v18 }
  0xec   :  { %3413 = vmatpush3.bf16.msra.mxu1 %v3621_v19  ;;  %3334 = vmatprep.subr.bf16.mxu0 %v3622_v20 }
  0xed   :  { %3414 = vmatprep.subr.bf16.mxu1 %v3623_v21 }
  0xef   :  { %3335 = vmatpush3.bf16.msra.mxu0 %v3622_v20 }
  0xf0   :  { %3415 = vmatpush3.bf16.msra.mxu1 %v3623_v21  ;;  %3336 = vmatprep.subr.bf16.mxu0 %v3624_v22 }
  0xf1   :  { %3416 = vmatprep.subr.bf16.mxu1 %v3625_v23 }
  0xf3   :  { %3337 = vmatpush3.bf16.msra.mxu0 %v3624_v22 }
  0xf4   :  { %3417 = vmatpush3.bf16.msra.mxu1 %v3625_v23  ;;  %3338 = vmatprep.subr.bf16.mxu0 %v3626_v24 }
  0xf5   :  { %3418 = vmatprep.subr.bf16.mxu1 %v3627_v25 }
  0xf7   :  { %3339 = vmatpush3.bf16.msra.mxu0 %v3626_v24 }
  0xf8   :  { %3419 = vmatpush3.bf16.msra.mxu1 %v3627_v25  ;;  %3340 = vmatprep.subr.bf16.mxu0 %v3628_v26 }
  0xf9   :  { %3420 = vmatprep.subr.bf16.mxu1 %v3629_v27 }
  0xfb   :  { %3341 = vmatpush3.bf16.msra.mxu0 %v3628_v26 }
  0xfc   :  { %3421 = vmatpush3.bf16.msra.mxu1 %v3629_v27  ;;  %3342 = vmatprep.subr.bf16.mxu0 %v3630_v28 }
  0xfd   :  { %3422 = vmatprep.subr.bf16.mxu1 %v3631_v29 }
  0xff   :  { %3343 = vmatpush3.bf16.msra.mxu0 %v3630_v28 }
 0x100   :  { %3423 = vmatpush3.bf16.msra.mxu1 %v3631_v29 }
 0x102   :  { %3345 = vmatmul.mubr.bf16.vlgmr.msra.gmra.mrb[4].mxu0 %v3634_v30 }
 0x103   :  { %3425 = vmatmul.mubr.bf16.vlgmr.msra.gmra.mrb[4].mxu1 %v3635_v31 }
 0x155   :  { %v3186_v33 = vpop.f32.mrb[0].mxu0 }
 0x156   :  { %v554_v34 = vadd.f32 %v3186_v33, %v4203_v32  ;;  %v3266_v35 = vpop.f32.mrb[0].mxu1  ;;  %v526_v36 = vpop.f32.mrb[1].mxu0 }
 0x157   :  { %v1143_v37 = vadd.f32 %v3266_v35, %v4203_v32  ;;  %v4208_v38 = vadd.f32 %v4203_v32, %v526_v36  ;;  %v1115_v39 = vpop.f32.mrb[1].mxu1  ;;  %v3187_v40 = vpop.f32.mrb[2].mxu0 }
 0x158   :  { %v2480_v41 = vmul.f32 -1.442695, %v554_v34  ;;  %v4211_v42 = vadd.f32 %v4203_v32, %v1115_v39  ;;  %v555_v43 = vadd.f32 %v3187_v40, %v4203_v32  ;;  %v3267_v44 = vpop.f32.mrb[2].mxu1  ;;  %v529_v45 = vpop.f32.mrb[3].mxu0 }
 0x159   :  { %v2609_v46 = vmul.f32 -1.442695, %v1143_v37  ;;  %v2478_v47 = vmul.f32 -1.442695, %v4208_v38  ;;  %v1144_v48 = vadd.f32 %v3267_v44, %v4203_v32  ;;  %v553_v49 = vadd.f32 %v4203_v32, %v529_v45  ;;  %v1118_v50 = vpop.f32.mrb[3].mxu1 }
 0x15a   :  { %3636 = vpow2.f32 %v2480_v41  ;;  %v2607_v51 = vmul.f32 -1.442695, %v4211_v42  ;;  %v2481_v52 = vmul.f32 -1.442695, %v555_v43  ;;  %v1142_v53 = vadd.f32 %v4203_v32, %v1118_v50 }
 0x15b   :  { %3638 = vpow2.f32 %v2609_v46  ;;  %v2610_v54 = vmul.f32 -1.442695, %v1144_v48  ;;  %v2479_v55 = vmul.f32 -1.442695, %v553_v49 }
 0x15c   :  { %3640 = vpow2.f32 %v2478_v47  ;;  %v2608_v56 = vmul.f32 -1.442695, %v1142_v53 }
 0x15d   :  { %3642 = vpow2.f32 %v2607_v51 }
 0x15e   :  { %3644 = vpow2.f32 %v2481_v52 }
 0x15f   :  { %3646 = vpow2.f32 %v2610_v54 }
 0x160   :  { %3648 = vpow2.f32 %v2479_v55 }
 0x161   :  { %3650 = vpow2.f32 %v2608_v56 }
 0x164   :  { %v3637_v57 = vpop.eup %3636 }
 0x165   :  { %v3639_v58 = vpop.eup %3638  ;;  %v570_v59 = vadd.f32 1.0, %v3637_v57 }
 0x166   :  { %v3641_v60 = vpop.eup %3640  ;;  %v1159_v61 = vadd.f32 1.0, %v3639_v58 }
 0x167   :  { %v3643_v62 = vpop.eup %3642  ;;  %3652 = vrcp.f32 %v570_v59  ;;  %v568_v63 = vadd.f32 1.0, %v3641_v60 }
 0x168   :  { %v3645_v0 = vpop.eup %3644  ;;  %3654 = vrcp.f32 %v1159_v61  ;;  %v1157_v1 = vadd.f32 1.0, %v3643_v62 }
 0x169   :  { %v3647_v2 = vpop.eup %3646  ;;  %3656 = vrcp.f32 %v568_v63  ;;  %v571_v3 = vadd.f32 1.0, %v3645_v0 }
 0x16a   :  { %v3649_v4 = vpop.eup %3648  ;;  %3658 = vrcp.f32 %v1157_v1  ;;  %v1160_v5 = vadd.f32 1.0, %v3647_v2 }
 0x16b   :  { %v3651_v6 = vpop.eup %3650  ;;  %3660 = vrcp.f32 %v571_v3  ;;  %v569_v7 = vadd.f32 1.0, %v3649_v4 }
 0x16c   :  { %3662 = vrcp.f32 %v1160_v5  ;;  %v1158_v8 = vadd.f32 1.0, %v3651_v6 }
 0x16d   :  { %3664 = vrcp.f32 %v569_v7 }
 0x16e   :  { %3666 = vrcp.f32 %v1158_v8 }
 0x171   :  { %v3653_v9 = vpop.eup %3652 }
 0x172   :  { %v3655_v10 = vpop.eup %3654  ;;  %v582_v15 = vmul.f32 %v3653_v9, %v554_v34 }
 0x173   :  { %v3657_v11 = vpop.eup %3656  ;;  %v1171_v18 = vmul.f32 %v3655_v10, %v1143_v37 }
 0x174   :  { %v3659_v12 = vpop.eup %3658  ;;  %v580_v21 = vmul.f32 %v3657_v11, %v4208_v38 }
 0x175   :  { %v3661_v13 = vpop.eup %3660  ;;  %v1169_v24 = vmul.f32 %v3659_v12, %v4211_v42 }
 0x176   :  { %v3663_v14 = vpop.eup %3662  ;;  %v583_v16 = vmul.f32 %v3661_v13, %v555_v43 }
 0x177   :  { %v3665_v17 = vpop.eup %3664  ;;  %v1172_v19 = vmul.f32 %v3663_v14, %v1144_v48 }
 0x178   :  { %v3667_v20 = vpop.eup %3666  ;;  %v2909_v22 = vpack.c.bf16 %v583_v16, %v582_v15  ;;  %v581_v23 = vmul.f32 %v3665_v17, %v553_v49 }
 0x179   :  { %v2919_v25 = vpack.c.bf16 %v1172_v19, %v1171_v18  ;;  %v1170_v26 = vmul.f32 %v3667_v20, %v1142_v53 }
 0x17a   :  { %2941 = vst [vmem:[%s4260_s3 + $0x8] sm:$0xff] %v2909_v22   ;;  %v2904_v27 = vpack.c.bf16 %v581_v23, %v580_v21 }
 0x17b   :  { %2943 = vst [vmem:[%s4260_s3 + $0x18] sm:$0xff] %v2919_v25   ;;  %v2914_v28 = vpack.c.bf16 %v1170_v26, %v1169_v24 }
 0x17c   :  { %2905 = vst [vmem:[%s4260_s3] sm:$0xff] %v2904_v27  }
 0x17d   :  { %2942 = vst [vmem:[%s4260_s3 + $0x10] sm:$0xff] %v2914_v28  }
 0x1d5   :  { %v3346_v29 = vpop.f32.mrb[4].mxu0 }
 0x1d6   :  { %v1733_v30 = vadd.f32 %v3346_v29, %v4203_v32  ;;  %v3426_v31 = vpop.f32.mrb[4].mxu1  ;;  %v1705_v33 = vpop.f32.mrb[5].mxu0 }
 0x1d7   :  { %v2322_v34 = vadd.f32 %v3426_v31, %v4203_v32  ;;  %v4236_v35 = vadd.f32 %v4203_v32, %v1705_v33  ;;  %v2294_v36 = vpop.f32.mrb[5].mxu1  ;;  %v3347_v37 = vpop.f32.mrb[6].mxu0 }
 0x1d8   :  { %v2742_v38 = vmul.f32 -1.442695, %v1733_v30  ;;  %v2320_v39 = vadd.f32 %v4203_v32, %v2294_v36  ;;  %v1734_v40 = vadd.f32 %v3347_v37, %v4203_v32  ;;  %v3427_v41 = vpop.f32.mrb[6].mxu1  ;;  %v1708_v42 = vpop.f32.mrb[7].mxu0 }
 0x1d9   :  { %v2875_v43 = vmul.f32 -1.442695, %v2322_v34  ;;  %v2740_v44 = vmul.f32 -1.442695, %v4236_v35  ;;  %v2323_v45 = vadd.f32 %v3427_v41, %v4203_v32  ;;  %v1732_v46 = vadd.f32 %v4203_v32, %v1708_v42  ;;  %v2297_v47 = vpop.f32.mrb[7].mxu1 }
 0x1da   :  { %3668 = vpow2.f32 %v2742_v38  ;;  %v2873_v48 = vmul.f32 -1.442695, %v2320_v39  ;;  %v2743_v49 = vmul.f32 -1.442695, %v1734_v40  ;;  %v2321_v50 = vadd.f32 %v4203_v32, %v2297_v47 }
 0x1db   :  { %3670 = vpow2.f32 %v2875_v43  ;;  %v2876_v51 = vmul.f32 -1.442695, %v2323_v45  ;;  %v2741_v52 = vmul.f32 -1.442695, %v1732_v46 }
 0x1dc   :  { %3672 = vpow2.f32 %v2740_v44  ;;  %v2874_v53 = vmul.f32 -1.442695, %v2321_v50 }
 0x1dd   :  { %3674 = vpow2.f32 %v2873_v48 }
 0x1de   :  { %3676 = vpow2.f32 %v2743_v49 }
 0x1df   :  { %3678 = vpow2.f32 %v2876_v51 }
 0x1e0   :  { %3680 = vpow2.f32 %v2741_v52 }
 0x1e1   :  { %3682 = vpow2.f32 %v2874_v53 }
 0x1e4   :  { %v3669_v54 = vpop.eup %3668 }
 0x1e5   :  { %v3671_v55 = vpop.eup %3670  ;;  %v1749_v56 = vadd.f32 1.0, %v3669_v54 }
 0x1e6   :  { %v3673_v57 = vpop.eup %3672  ;;  %v2338_v58 = vadd.f32 1.0, %v3671_v55 }
 0x1e7   :  { %v3675_v59 = vpop.eup %3674  ;;  %3684 = vrcp.f32 %v1749_v56  ;;  %v1747_v60 = vadd.f32 1.0, %v3673_v57 }
 0x1e8   :  { %v3677_v61 = vpop.eup %3676  ;;  %3686 = vrcp.f32 %v2338_v58  ;;  %v2336_v32 = vadd.f32 1.0, %v3675_v59 }
 0x1e9   :  { %v3679_v62 = vpop.eup %3678  ;;  %3688 = vrcp.f32 %v1747_v60  ;;  %v1750_v63 = vadd.f32 1.0, %v3677_v61 }
 0x1ea   :  { %v3681_v0 = vpop.eup %3680  ;;  %3690 = vrcp.f32 %v2336_v32  ;;  %v2339_v1 = vadd.f32 1.0, %v3679_v62 }
 0x1eb   :  { %v3683_v2 = vpop.eup %3682  ;;  %3692 = vrcp.f32 %v1750_v63  ;;  %v1748_v3 = vadd.f32 1.0, %v3681_v0 }
 0x1ec   :  { %3694 = vrcp.f32 %v2339_v1  ;;  %v2337_v4 = vadd.f32 1.0, %v3683_v2 }
 0x1ed   :  { %3696 = vrcp.f32 %v1748_v3 }
 0x1ee   :  { %3698 = vrcp.f32 %v2337_v4 }
 0x1f1   :  { %v3685_v5 = vpop.eup %3684 }
 0x1f2   :  { %v3687_v6 = vpop.eup %3686  ;;  %v1761_v11 = vmul.f32 %v3685_v5, %v1733_v30 }
 0x1f3   :  { %v3689_v7 = vpop.eup %3688  ;;  %v2350_v14 = vmul.f32 %v3687_v6, %v2322_v34 }
 0x1f4   :  { %v3691_v8 = vpop.eup %3690  ;;  %v1759_v17 = vmul.f32 %v3689_v7, %v4236_v35 }
 0x1f5   :  { %v3693_v9 = vpop.eup %3692  ;;  %v2348_v20 = vmul.f32 %v3691_v8, %v2320_v39 }
 0x1f6   :  { %v3695_v10 = vpop.eup %3694  ;;  %v1762_v12 = vmul.f32 %v3693_v9, %v1734_v40 }
 0x1f7   :  { %v3697_v13 = vpop.eup %3696  ;;  %v2351_v15 = vmul.f32 %v3695_v10, %v2323_v45 }
 0x1f8   :  { %v3699_v16 = vpop.eup %3698  ;;  %v2929_v18 = vpack.c.bf16 %v1762_v12, %v1761_v11  ;;  %v1760_v19 = vmul.f32 %v3697_v13, %v1732_v46 }
 0x1f9   :  { %v2939_v21 = vpack.c.bf16 %v2351_v15, %v2350_v14  ;;  %v2349_v22 = vmul.f32 %v3699_v16, %v2321_v50 }
 0x1fa   :  { %2945 = vst [vmem:[%s4260_s3 + $0x28] sm:$0xff] %v2929_v18   ;;  %v2924_v23 = vpack.c.bf16 %v1760_v19, %v1759_v17 }
 0x1fb   :  { %2947 = vst [vmem:[%s4260_s3 + $0x38] sm:$0xff] %v2939_v21   ;;  %v2934_v24 = vpack.c.bf16 %v2349_v22, %v2348_v20 }
 0x1fc   :  { %2944 = vst [vmem:[%s4260_s3 + $0x20] sm:$0xff] %v2924_v23  }
 0x1fd   :  { %2946 = vst [vmem:[%s4260_s3 + $0x30] sm:$0xff] %v2934_v24  }

// kernel: vqvae_forward.17
= control target key start
LH: loop header
LB: loop body
LE: loop exit
PB: predicated region body
PF: predicated region fallthrough
CT: control target
= control target key end

     0   :  { %11 = vsyncpa [#allocation3], 0  ;;  %s6676_s0 = inlined_call_operand.vmem [shape: bf16[2,18,18,128], index: 0, kind: input, shape index: {}]   ;;  %s6677_s1 = inlined_call_operand.vmem [shape: bf16[9,128,128], index: 1, kind: input, shape index: {}]   ;;  %s6678_s2 = inlined_call_operand.vmem [shape: f32[1,128], index: 2, kind: input, shape index: {}]   ;;  %s6679_s3 = inlined_call_operand.vmem [shape: f32[512,128], index: 3, kind: input, shape index: {}]   ;;  %s6680_s4 = inlined_call_operand.hbm [shape: bf16[512,128], index: 4, kind: output, shape index: {0}]   ;;  %s6681_s5 = inlined_call_operand.vmem [shape: f32[16,128], index: 5, kind: output, shape index: {1}]  }
   0x1   :  { %13 = vsyncpa [#allocation3 + $0x1], 0  ;;  %s5468_s18 = smov 0   ;;  %s5470_s19 = smov 0  }
   0x2   :  { %s5472_s20 = smov 0   ;;  %s5474_s21 = smov 0  }
   0x3 LB: > { %s5489_s22 = sadd.s32 4294967295, %s5433_s21   ;;  %s3855_s23 = sadd.s32 4294967294, %s5433_s21   ;;  %s5433_s21 = sphi %s5474_s21, %s6730_s21   ;;  %s5429_s20 = sphi %s5472_s20, %s6729_s20   ;;  %s5425_s19 = sphi %s5470_s19, %s6728_s19   ;;  %s5421_s18 = sphi %s5468_s18, %s6727_s18  }
   0x4   : > { %s5493_s24 = sadd.s32 1, %s5433_s21   ;;  %s120_s25 = sadd.s32 1, %s5429_s20 }
   0x5   : > { %s117_s26 = ssub.s32 %s5433_s21, %s5493_s24  ;;  %p130_p0 = scmp.ne.s32.totalorder %s5429_s20, %s5425_s19 }
   0x6   : > { %p118_p1 = scmp.eq.s32.totalorder %s117_s26, 0  ;;  %p131_p2 = scmp.eq.s32.totalorder %s5489_s22, 1 }
   0x7   : > { %p136_p3 = scmp.ne.s32.totalorder %s5425_s19, %s5421_s18  ;;  %p137_p4 = scmp.eq.s32.totalorder %s3855_s23, 1 }
   0x8   : > { %s5504_s27 = scalar_select %p118_p1, %s5429_s20, %s120_s25  }
   0x9   : > { %p5506_p5 = por %p131_p2, %p130_p0  ;;  %p5510_p6 = por %p137_p4, %p136_p3 }
   0xa   : > { %p3858_p7 = scmp.ge.s32.totalorder %s5433_s21, 1  ;;  %p204_p8 = scmp.lt.s32.totalorder %s5433_s21, 3 }
   0xc   : > { %p205_p9 = pnand %p3858_p7, %p204_p8 }
   0xe   : > { %208 = sbr.rel (%p205_p9) target bundleno = 598 (0x256), region = 36 }
  0x15   : > { %v5264_v0 = vld [vmem:[%s6677_s1 + $0x40] sm:$0xff]   ;;  %p241_p10 = scmp.lt.s32.totalorder %s5489_s22, 1  ;;  %v5266_v2 = vld [vmem:[%s6677_s1 + $0x48] sm:$0xff]   ;;  %v5268_v4 = vld [vmem:[%s6677_s1 + $0x50] sm:$0xff]   ;;  %vm328_vm0 = vsmask.f32 3328 }
  0x16   : > { %v5265_v1 = vld [vmem:[%s6677_s1 + $0x100] sm:$0xff]   ;;  %4518 = vmatprep.subr.bf16.mxu1 %v5264_v0  ;;  %v5267_v3 = vld [vmem:[%s6677_s1 + $0x108] sm:$0xff]   ;;  %v5269_v5 = vld [vmem:[%s6677_s1 + $0x110] sm:$0xff]   ;;  %vm329_vm1 = vsmask.f32 7440  ;;  %vm1326_vm3 = vcmask 1042432  }
  0x17   : > { %4710 = vmatprep.subr.bf16.mxu0 %v5265_v1  ;;  %4519 = vmatpush3.bf16.msra.mxu1 %v5264_v0  ;;  %s5536_s17 = scalar_select %p241_p10, %s5489_s22, 1  ;;  %v5270_v6 = vld [vmem:[%s6677_s1 + $0x58] sm:$0xff]   ;;  %v5272_v8 = vld [vmem:[%s6677_s1 + $0x60] sm:$0xff]   ;;  %v5274_v10 = vld [vmem:[%s6677_s1 + $0x68] sm:$0xff]   ;;  %vm1327_vm4 = vcmask 1046532  }
  0x18   : > { %4711 = vmatpush3.bf16.msra.mxu0 %v5265_v1  ;;  %4520 = vmatprep.subr.bf16.mxu1 %v5266_v2  ;;  %v5271_v7 = vld [vmem:[%s6677_s1 + $0x118] sm:$0xff]   ;;  %v5273_v9 = vld [vmem:[%s6677_s1 + $0x120] sm:$0xff]   ;;  %v5275_v11 = vld [vmem:[%s6677_s1 + $0x128] sm:$0xff]   ;;  %s3861_s12 = sshll.u32 %s5489_s22, 5  ;;  %s232_s25 = sand.u32 1, %s5425_s19  }
  0x19   : > { %4712 = vmatprep.subr.bf16.mxu0 %v5267_v3  ;;  %s5222_s6 = smul.u32 216, %s5536_s17  ;;  %v5276_v17 = vld [vmem:[%s6677_s1 + $0x70] sm:$0xff]   ;;  %v5278_v36 = vld [vmem:[%s6677_s1 + $0x78] sm:$0xff]   ;;  %vm5599_vm2 = vmor %vm328_vm0, %vm329_vm1  ;;  %p247_p11 = scmp.lt.s32.totalorder %s3861_s12, 63 }
  0x1a   : > { %v5277_v31 = vld [vmem:[%s6677_s1 + $0x130] sm:$0xff]   ;;  %v5279_v53 = vld [vmem:[%s6677_s1 + $0x138] sm:$0xff]   ;;  %v5280_v1 = vld [vmem:[%s6677_s1] sm:$0xff]   ;;  %s3859_s30 = sshll.u32 %s232_s25, 7  ;;  %s4206_s7 = sshll.u32 %s5489_s22, 11 }
  0x1b   : > { %4521 = vmatpush3.bf16.msra.mxu1 %v5266_v2  ;;  %s5554_s13 = scalar_lea.vmem %s6676_s0, %s5222_s6  ;;  %vm5806_vm5 = vmor %vm1326_vm3, %vm1327_vm4  ;;  %v5370_v37 = vld [vmem:[%s6677_s1 + $0x138] sm:$0xff]   ;;  %s6732_s12 = smov (!%p247_p11, %s3861_s12), 63 }
  0x1c   : > { %4713 = vmatpush3.bf16.msra.mxu0 %v5267_v3  ;;  %4522 = vmatprep.subr.bf16.mxu1 %v5268_v4  ;;  %v5563_v12 = vld [vmem:[%s5554_s13] sm:$0xf]  ;;  %v5566_v13 = vld [vmem:[%s5554_s13 + $0x4] sm:$0xf]  ;;  %v260_v14 = vld [vmem:[%s5554_s13 + $0x8] sm:$0x1]  ;;  %s6623_s22 = scalar_lea.hbm %s6680_s4, %s4206_s7 }
  0x1d   : > { %4714 = vmatprep.subr.bf16.mxu0 %v5269_v5  ;;  %v332_v15 = vshrl.u32 %v5563_v12, 16  ;;  %v335_v16 = vshll.u32 %v5563_v12, 16  ;;  %v341_v18 = vshll.u32 %v5566_v13, 16  ;;  %v345_v19 = vshrl.u32 %v5566_v13, 16  ;;  %v5577_v21 = vld [vmem:[%s5554_s13 + $0xc] sm:$0xf] }
  0x1e   : > { %v351_v20 = vshll.u32 %v260_v14, 16  ;;  %v5580_v24 = vld [vmem:[%s5554_s13 + $0x10] sm:$0xf]  ;;  %v5583_v25 = vld [vmem:[%s5554_s13 + $0x14] sm:$0x1]  ;;  %v356_v30 = vshrl.u32 %v5577_v21, 16 }
  0x1f   : > { %4523 = vmatpush3.bf16.msra.mxu1 %v5268_v4  ;;  %v334_v22 = vrot.slane %v332_v15, 4  ;;  %v337_v23 = vrot.slane %v335_v16, 5  ;;  %v343_v27 = vrot.slane %v341_v18, 5  ;;  %v347_v28 = vrot.slane %v345_v19, 4  ;;  %v5605_v41 = vld [vmem:[%s5554_s13 + $0x18] sm:$0xf] }
  0x20   : > { %4715 = vmatpush3.bf16.msra.mxu0 %v5269_v5  ;;  %4524 = vmatprep.subr.bf16.mxu1 %v5270_v6  ;;  %v353_v29 = vrot.slane %v351_v20, 5  ;;  %v359_v33 = vshll.u32 %v5577_v21, 16  ;;  %v365_v34 = vshll.u32 %v5580_v24, 16  ;;  %v369_v35 = vshrl.u32 %v5580_v24, 16  ;;  %v5608_v42 = vld [vmem:[%s5554_s13 + $0x1c] sm:$0xf] }
  0x21   : > { %4716 = vmatprep.subr.bf16.mxu0 %v5271_v7  ;;  %v338_v32 = vor.u32 %v337_v23, %v334_v22  ;;  %v348_v38 = vor.u32 %v347_v28, %v343_v27  ;;  %v358_v39 = vrot.slane %v356_v30, 4  ;;  %v375_v40 = vshll.u32 %v5583_v25, 16  ;;  %v5615_v48 = vld [vmem:[%s5554_s13 + $0x20] sm:$0x1]  ;;  %v5632_v3 = vld [vmem:[%s5554_s13 + $0x24] sm:$0xf] }
  0x22   : > { %v5612_v43 = vcombine.low %v5577_v21, %v5580_v24  ;;  %v361_v45 = vrot.slane %v359_v33, 5  ;;  %v367_v46 = vrot.slane %v365_v34, 5  ;;  %v371_v47 = vrot.slane %v369_v35, 4  ;;  %v5647_v14 = vld [vmem:[%s5554_s13 + $0x2c] sm:$0x1]  ;;  %s3862_s14 = sshll.u32 %s6732_s12, 3 }
  0x23   : > { %4525 = vmatpush3.bf16.msra.mxu1 %v5270_v6  ;;  %v339_v44 = vrot.slane %v338_v32, 4  ;;  %v349_v49 = vrot.slane %v348_v38, 4  ;;  %v377_v50 = vrot.slane %v375_v40, 5  ;;  %v380_v51 = vshrl.u32 %v5605_v41, 16  ;;  %v5652_v22 = vld [vmem:[%s5554_s13 + $0x30] sm:$0xf]  ;;  %s6520_s23 = scalar_lea.vmem %s6679_s3, %s3862_s14 }
  0x24   : > { %4717 = vmatpush3.bf16.msra.mxu0 %v5271_v7  ;;  %4526 = vmatprep.subr.bf16.mxu1 %v5272_v8  ;;  %v383_v52 = vshll.u32 %v5605_v41, 16  ;;  %v362_v55 = vor.u32 %v361_v45, %v358_v39  ;;  %v372_v56 = vor.u32 %v371_v47, %v367_v46  ;;  %v389_v57 = vshll.u32 %v5608_v42, 16  ;;  %v5657_v30 = vld [vmem:[%s5554_s13 + $0x34] sm:$0xf]  ;;  %v5283_v34 = vld [vmem:[%s6677_s1 + $0x8] sm:$0xff]   ;;  %s6538_s6 = scalar_lea.vmem [#allocation2], %s3859_s30 }
  0x25   : > { %4718 = vmatprep.subr.bf16.mxu0 %v5273_v9  ;;  %v344_v54 = vsel %vm5599_vm2, %v339_v44, %v343_v27  ;;  %v354_v58 = vsel %vm5599_vm2, %v349_v49, %v353_v29  ;;  %v382_v59 = vrot.slane %v380_v51, 4  ;;  %v393_v61 = vshrl.u32 %v5608_v42, 16  ;;  %v5666_v35 = vld [vmem:[%s5554_s13 + $0x38] sm:$0x1]  ;;  %s3754_s8 = sshll.u32 %s6538_s6, 4  ;;  %s6631_s11 = scalar_lea.sflag [#allocation3], %s232_s25  ;;  %s6625_s8 = int_to_ptr.vmem [resolvable:$true] %s3754_s8 }
  0x26   : > { %v385_v60 = vrot.slane %v383_v52, 5  ;;  %v3880_v62 = vcombine.low %v344_v54, %v354_v58  ;;  %v363_v63 = vrot.slane %v362_v55, 4  ;;  %v373_v0 = vrot.slane %v372_v56, 4  ;;  %v5681_v58 = vld [vmem:[%s5554_s13 + $0x3c] sm:$0xf]  ;;  %s5371_s12 = scalar_lea.vmem %s6625_s8, 2048 }
  0x27   : > { %4527 = vmatpush3.bf16.msra.mxu1 %v5272_v8  ;;  %v391_v2 = vrot.slane %v389_v57, 5  ;;  %v395_v5 = vrot.slane %v393_v61, 4  ;;  %v399_v6 = vshll.u32 %v5615_v48, 16  ;;  %v1348_v7 = vrot.slane %v5615_v48, 5  ;;  %v5281_v8 = vld [vmem:[%s6677_s1 + $0x140] sm:$0xff]   ;;  %p5372_p12 = scmp.ne.s32.totalorder %s6625_s8, %s5371_s12  ;;  %s5435_s14 = smov [#allocation2]  }
  0x28   : > { %4719 = vmatpush3.bf16.msra.mxu0 %v5273_v9  ;;  %4528 = vmatprep.subr.bf16.mxu1 %v5274_v10  ;;  %v386_v4 = vor.u32 %v385_v60, %v382_v59  ;;  %v5640_v9 = vld [vmem:[%s5554_s13 + $0x28] sm:$0xf]  ;;  %v404_v15 = vshrl.u32 %v5632_v3, 16  ;;  %v407_v16 = vshll.u32 %v5632_v3, 16  ;;  %v423_v33 = vshll.u32 %v5647_v14, 16  ;;  %v5286_v59 = vld [vmem:[%s6677_s1 + $0x10] sm:$0xff]  }
  0x29   : > { %4720 = vmatprep.subr.bf16.mxu0 %v5275_v11  ;;  %4534 = vmatprep.mubr.bf16.mxu1 %v3880_v62  ;;  %v396_v19 = vor.u32 %v395_v5, %v391_v2  ;;  %v401_v20 = vrot.slane %v399_v6, 5  ;;  %v413_v28 = vshll.u32 %v5640_v9, 16  ;;  %v417_v29 = vshrl.u32 %v5640_v9, 16  ;;  %p5373_p13 = pnand %p5372_p12, %p5506_p5  ;;  %s5375_s15 = sshll.u32 %s5435_s14, 4  ;;  %s5376_s15 = int_to_ptr.vmem [resolvable:$false] %s5375_s15 }
  0x2a   : > { %v387_v18 = vrot.slane %v386_v4, 4  ;;  %v406_v23 = vrot.slane %v404_v15, 4  ;;  %v409_v27 = vrot.slane %v407_v16, 5  ;;  %v431_v44 = vshll.u32 %v5652_v22, 16  ;;  %v5284_v16 = vld [vmem:[%s6677_s1 + $0x150] sm:$0xff]   ;;  %s5377_s16 = scalar_lea.vmem %s5376_s15, 4096  ;;  %p5378_p1 = scmp.lt.s32.totalorder %s6625_s8, %s5376_s15 }
  0x2b   : > { %4529 = vmatpush3.bf16.msra.mxu1 %v5274_v10  ;;  %v368_v10 = vsel %vm5599_vm2, %v363_v63, %v367_v46  ;;  %v397_v32 = vrot.slane %v396_v19, 4  ;;  %v415_v39 = vrot.slane %v413_v28, 5  ;;  %v419_v40 = vrot.slane %v417_v29, 4  ;;  %v5282_v46 = vld [vmem:[%s6677_s1 + $0x148] sm:$0xff]   ;;  %p5374_p0 = pneg %p5373_p13  ;;  %p5379_p2 = scmp.lt.s32.totalorder %s5377_s16, %s5371_s12 }
  0x2c   : > { %4721 = vmatpush3.bf16.msra.mxu0 %v5275_v11  ;;  %4530 = vmatprep.subr.bf16.mxu1 %v5276_v17  ;;  %v378_v11 = vsel %vm5599_vm2, %v373_v0, %v377_v50  ;;  %v410_v38 = vor.u32 %v409_v27, %v406_v23  ;;  %v425_v47 = vrot.slane %v423_v33, 5  ;;  %v437_v50 = vshll.u32 %v5657_v30, 16  ;;  %v5695_v0 = vld [vmem:[%s5554_s13 + $0x40] sm:$0xf]  ;;  %v5712_v27 = vld [vmem:[%s5554_s13 + $0x48] sm:$0xf] }
  0x2d   : > { %4722 = vmatprep.subr.bf16.mxu0 %v5277_v31  ;;  %v402_v45 = vsel %vm5599_vm2, %v397_v32, %v401_v20  ;;  %v433_v54 = vrot.slane %v431_v44, 5  ;;  %v441_v56 = vshrl.u32 %v5657_v30, 16  ;;  %v447_v57 = vshll.u32 %v5666_v35, 16  ;;  %v5715_v28 = vld [vmem:[%s5554_s13 + $0x4c] sm:$0xf]  ;;  %p5380_p3 = por %p5379_p2, %p5378_p1 }
  0x2e   : > { %v411_v52 = vrot.slane %v410_v38, 4  ;;  %v439_v55 = vrot.slane %v437_v50, 5  ;;  %v5688_v60 = vcombine.low %v5605_v41, %v5608_v42  ;;  %v455_v6 = vshll.u32 %v5681_v58, 16  ;;  %v5721_v33 = vld [vmem:[%s5554_s13 + $0x50] sm:$0x1] }
  0x2f   : > { %4531 = vmatpush3.bf16.msra.mxu1 %v5276_v17  ;;  %v3881_v17 = vcombine.low %v368_v10, %v378_v11  ;;  %v443_v4 = vrot.slane %v441_v56, 4  ;;  %v449_v5 = vrot.slane %v447_v57, 5  ;;  %v461_v10 = vshll.u32 %v5695_v0, 16  ;;  %p5381_p4 = pnand %p5380_p3, %p5374_p0 }
  0x30   : > { %4723 = vmatpush3.bf16.msra.mxu0 %v5277_v31  ;;  %4532 = vmatprep.subr.bf16.mxu1 %v5278_v36  ;;  %v392_v31 = vsel %vm5599_vm2, %v387_v18, %v391_v2  ;;  %v416_v61 = vsel %vm5599_vm2, %v411_v52, %v415_v39  ;;  %v452_v2 = vshrl.u32 %v5681_v58, 16  ;;  %v457_v20 = vrot.slane %v455_v6, 5  ;;  %v5752_v6 = vld [vmem:[%s5554_s13 + $0x58] sm:$0xf] }
  0x31   : > { %4724 = vmatprep.subr.bf16.mxu0 %v5279_v53  ;;  %4726 = vmatprep.mubr.bf16.mxu0 %v3881_v17  ;;  %v5676_v51 = vcombine.low %v392_v31, %v402_v45  ;;  %v444_v19 = vor.u32 %v443_v4, %v439_v55  ;;  %v463_v23 = vrot.slane %v461_v10, 5  ;;  %v485_v44 = vshll.u32 %v5715_v28, 16  ;;  %v5285_v45 = vld [vmem:[%s6677_s1 + $0x158] sm:$0xff]  }
  0x32   : > { %v489_v50 = vshrl.u32 %v5715_v28, 16  ;;  %v5755_v10 = vld [vmem:[%s5554_s13 + $0x5c] sm:$0x1] }
  0x33   : > { %4533 = vmatpush3.bf16.msra.mxu1 %v5278_v36  ;;  %v428_v36 = vshrl.u32 %v5652_v22, 16  ;;  %v445_v38 = vrot.slane %v444_v19, 4 }
  0x34   : > { %4725 = vmatpush3.bf16.msra.mxu0 %v5279_v53  ;;  %4566 = vmatprep.subr.bf16.mxu1 %v5280_v1  ;;  %v420_v53 = vor.u32 %v419_v40, %v415_v39  ;;  %v479_v40 = vshll.u32 %v5712_v27, 16 }
  0x35   : > { %4758 = vmatprep.subr.bf16.mxu0 %v5281_v8  ;;  %v430_v49 = vrot.slane %v428_v36, 4  ;;  %v5289_v36 = vld [vmem:[%s6677_s1 + $0x18] sm:$0xff]   ;;  %v450_v52 = vsel %vm5599_vm2, %v445_v38, %v449_v5  ;;  %v5749_v5 = vld [vmem:[%s5554_s13 + $0x54] sm:$0xf] }
  0x36   : > { %4535 = vmatmul.mubr.bf16.vlgmr.msra.gmra.mrb[0].mxu1 %v3881_v17  ;;  %v421_v62 = vrot.slane %v420_v53, 4  ;;  %v465_v17 = vshrl.u32 %v5695_v0, 16  ;;  %v500_v19 = vshrl.u32 %v5749_v5, 16 }
  0x37   : > { %4567 = vmatpush3.bf16.msra.mxu1 %v5280_v1  ;;  %4727 = vmatmul.mubr.bf16.vlgmr.msra.gmra.mrb[0].mxu0 %v5676_v51  ;;  %v434_v63 = vor.u32 %v433_v54, %v430_v49  ;;  %v5698_v1 = vld [vmem:[%s5554_s13 + $0x44] sm:$0x1]  ;;  %v481_v54 = vrot.slane %v479_v40, 5  ;;  %v513_v40 = vshrl.u32 %v5752_v6, 16 }
  0x38   : > { %4568 = vmatprep.subr.bf16.mxu1 %v5283_v34  ;;  %4538 = vmatprep.mubr.bf16.mxu1 %v5676_v51  ;;  %v426_v11 = vsel %vm5599_vm2, %v421_v62, %v425_v47  ;;  %v467_v31 = vrot.slane %v465_v17, 4  ;;  %v471_v32 = vshll.u32 %v5698_v1, 16  ;;  %v495_v62 = vshll.u32 %v5721_v33, 16 }
  0x39   : > { %4759 = vmatpush3.bf16.msra.mxu0 %v5281_v8  ;;  %v435_v15 = vrot.slane %v434_v63, 4  ;;  %v454_v8 = vrot.slane %v452_v2, 4  ;;  %v5709_v18 = vcombine.low %v416_v61, %v426_v11  ;;  %v491_v61 = vrot.slane %v489_v50, 4  ;;  %v5287_v63 = vld [vmem:[%s6677_s1 + $0x160] sm:$0xff]   ;;  %v5789_v50 = vld [vmem:[%s5554_s13 + $0x68] sm:$0x1] }
  0x3a   : > { %4760 = vmatprep.subr.bf16.mxu0 %v5282_v46  ;;  %v468_v47 = vor.u32 %v467_v31, %v463_v23  ;;  %v473_v49 = vrot.slane %v471_v32, 5  ;;  %v5292_v2 = vld [vmem:[%s6677_s1 + $0x20] sm:$0xff]   ;;  %v5759_v11 = vcombine.low %v5632_v3, %v5640_v9  ;;  %v497_v17 = vrot.slane %v495_v62, 5 }
  0x3b   : > { %4569 = vmatpush3.bf16.msra.mxu1 %v5283_v34  ;;  %6702 = vst [vmem:[#allocation5_spill] sm:$0xff] %v5709_v18  ;;  %v440_v29 = vsel %vm5599_vm2, %v435_v15, %v439_v55  ;;  %v476_v34 = vshrl.u32 %v5712_v27, 16  ;;  %4730 = vmatprep.mubr.bf16.mxu0 %v5709_v18  ;;  %v458_v39 = vor.u32 %v457_v20, %v454_v8  ;;  %v487_v55 = vrot.slane %v485_v44, 5  ;;  %v5775_v32 = vld [vmem:[%s5554_s13 + $0x60] sm:$0xf] }
  0x3c   : > { %4570 = vmatprep.subr.bf16.mxu1 %v5286_v59  ;;  %v5737_v56 = vcombine.low %v440_v29, %v450_v52  ;;  %v469_v57 = vrot.slane %v468_v47, 4  ;;  %v5763_v15 = vcombine.low %v5652_v22, %v5657_v30  ;;  %v503_v29 = vshll.u32 %v5749_v5, 16  ;;  %v5783_v47 = vld [vmem:[%s5554_s13 + $0x64] sm:$0xf] }
  0x3d   : > { %4761 = vmatpush3.bf16.msra.mxu0 %v5282_v46  ;;  %v478_v46 = vrot.slane %v476_v34, 4  ;;  %v459_v53 = vrot.slane %v458_v39, 4  ;;  %v492_v8 = vor.u32 %v491_v61, %v487_v55  ;;  %v509_v31 = vshll.u32 %v5752_v6, 16  ;;  %v5294_v34 = vld [vmem:[%s6677_s1 + $0x28] sm:$0xff]  }
  0x3e   : > { %4539 = vmatmul.mubr.bf16.gmra.mrb[4].mxu1 %v5709_v18  ;;  %4762 = vmatprep.subr.bf16.mxu0 %v5284_v16  ;;  %6703 = vst [vmem:[#allocation6_spill] sm:$0xff] %v5737_v56  ;;  %v502_v39 = vrot.slane %v500_v19, 4  ;;  %v519_v44 = vshll.u32 %v5755_v10, 16  ;;  %v524_v52 = vshrl.u32 %v5775_v32, 16  ;;  %v543_v19 = vshll.u32 %v5789_v50, 16 }
  0x3f   : > { %4571 = vmatpush3.bf16.msra.mxu1 %v5286_v59  ;;  %v464_v4 = vsel %vm5599_vm2, %v459_v53, %v463_v23  ;;  %v482_v59 = vor.u32 %v481_v54, %v478_v46  ;;  %4731 = vmatmul.mubr.bf16.gmra.mrb[4].mxu0 %v5737_v56  ;;  %v493_v38 = vrot.slane %v492_v8, 4  ;;  %v511_v46 = vrot.slane %v509_v31, 5 }
  0x40   : > { %4572 = vmatprep.subr.bf16.mxu1 %v5289_v36  ;;  %4542 = vmatprep.mubr.bf16.mxu1 %v5737_v56  ;;  %v515_v54 = vrot.slane %v513_v40, 4  ;;  %v5817_v40 = vld [vmem:[%s5554_s13 + $0x6c] sm:$0xf] }
  0x41   : > { %4763 = vmatpush3.bf16.msra.mxu0 %v5284_v16  ;;  %v474_v16 = vsel %vm5599_vm2, %v469_v57, %v473_v49  ;;  %v483_v23 = vrot.slane %v482_v59, 4  ;;  %v498_v53 = vsel %vm5599_vm2, %v493_v38, %v497_v17  ;;  %v521_v57 = vrot.slane %v519_v44, 5 }
  0x42   : > { %4764 = vmatprep.subr.bf16.mxu0 %v5285_v45  ;;  %v5770_v20 = vcombine.low %v464_v4, %v474_v16  ;;  %v526_v4 = vrot.slane %v524_v52, 4  ;;  %v533_v59 = vshll.u32 %v5783_v47, 16  ;;  %v516_v16 = vor.u32 %v515_v54, %v511_v46 }
  0x43   : > { %4573 = vmatpush3.bf16.msra.mxu1 %v5289_v36  ;;  %v488_v49 = vsel %vm5599_vm2, %v483_v23, %v487_v55  ;;  %v505_v36 = vrot.slane %v503_v29, 5  ;;  %v527_v55 = vshll.u32 %v5775_v32, 16  ;;  %v537_v17 = vshrl.u32 %v5783_v47, 16  ;;  %v5296_v29 = vld [vmem:[%s6677_s1 + $0x30] sm:$0xff]  }
  0x44   : > { %6704 = vst [vmem:[#allocation7_spill] sm:$0xff] %v5770_v20  ;;  %4574 = vmatprep.subr.bf16.mxu1 %v5292_v2  ;;  %4734 = vmatprep.mubr.bf16.mxu0 %v5770_v20  ;;  %v5799_v61 = vcombine.low %v488_v49, %v498_v53  ;;  %v535_v31 = vrot.slane %v533_v59, 5  ;;  %v3929_v38 = vrot.slane %v5577_v21, 9  ;;  %v517_v44 = vrot.slane %v516_v16, 4  ;;  %v5824_v53 = vld [vmem:[%s5554_s13 + $0x70] sm:$0xf] }
  0x45   : > { %4765 = vmatpush3.bf16.msra.mxu0 %v5285_v45  ;;  %v5288_v45 = vld [vmem:[%s6677_s1 + $0x168] sm:$0xff]   ;;  %v506_v62 = vor.u32 %v505_v36, %v502_v39  ;;  %v529_v8 = vrot.slane %v527_v55, 5  ;;  %v1338_v39 = vrot.slane %v5580_v24, 5  ;;  %v539_v36 = vrot.slane %v537_v17, 4 }
  0x46   : > { %4543 = vmatmul.mubr.bf16.gmra.mrb[8].mxu1 %v5770_v20  ;;  %4766 = vmatprep.subr.bf16.mxu0 %v5287_v63  ;;  %6705 = vst [vmem:[#allocation8_spill] sm:$0xff] %v5799_v61  ;;  %v545_v52 = vrot.slane %v543_v19, 5  ;;  %v1341_v55 = vrot.slane %v5583_v25, 5  ;;  %v522_v59 = vsel %vm5599_vm2, %v517_v44, %v521_v57  ;;  %v557_v19 = vshll.u32 %v5824_v53, 16 }
  0x47   : > { %4575 = vmatpush3.bf16.msra.mxu1 %v5292_v2  ;;  %4546 = vmatprep.mubr.bf16.mxu1 %v5799_v61  ;;  %v507_v2 = vrot.slane %v506_v62, 4  ;;  %v530_v49 = vor.u32 %v529_v8, %v526_v4  ;;  %v1339_v24 = vsel %vm5806_vm5, %v3929_v38, %v1338_v39  ;;  %v1340_v54 = vrot.slane %v1338_v39, 4  ;;  %v5832_v62 = vld [vmem:[%s5554_s13 + $0x74] sm:$0x1]  ;;  %v5298_v4 = vld [vmem:[%s6677_s1 + $0x38] sm:$0xff]  }
  0x48   : > { %4576 = vmatprep.subr.bf16.mxu1 %v5294_v34  ;;  %4735 = vmatmul.mubr.bf16.gmra.mrb[8].mxu0 %v5799_v61  ;;  %v540_v8 = vor.u32 %v539_v36, %v535_v31  ;;  %v559_v36 = vrot.slane %v557_v19, 5  ;;  %v1359_v20 = vrot.slane %v5657_v30, 5 }
  0x49   : > { %4767 = vmatpush3.bf16.msra.mxu0 %v5287_v63  ;;  %v5290_v63 = vld [vmem:[%s6677_s1 + $0x170] sm:$0xff]   ;;  %v512_v21 = vsel %vm5599_vm2, %v507_v2, %v511_v46  ;;  %v531_v16 = vrot.slane %v530_v49, 4  ;;  %v548_v46 = vshrl.u32 %v5817_v40, 16  ;;  %v1342_v25 = vsel %vm5806_vm5, %v1340_v54, %v1341_v55  ;;  %v5847_v2 = vld [vmem:[%s5554_s13 + $0x78] sm:$0xf] }
  0x4a   : > { %4768 = vmatprep.subr.bf16.mxu0 %v5288_v45  ;;  %v5840_v17 = vcombine.low %v512_v21, %v522_v59  ;;  %v541_v38 = vrot.slane %v540_v8, 4  ;;  %v5854_v39 = vcombine.low %v1339_v24, %v1342_v25  ;;  %v561_v21 = vshrl.u32 %v5824_v53, 16  ;;  %v5861_v54 = vld [vmem:[%s5554_s13 + $0x7c] sm:$0xf] }
  0x4b   : > { %4577 = vmatpush3.bf16.msra.mxu1 %v5294_v34  ;;  %v551_v34 = vshll.u32 %v5817_v40, 16  ;;  %v536_v57 = vsel %vm5599_vm2, %v531_v16, %v535_v31  ;;  %v550_v44 = vrot.slane %v548_v46, 4  ;;  %v567_v31 = vshll.u32 %v5832_v62, 16  ;;  %v5868_v16 = vld [vmem:[%s5554_s13 + $0x80] sm:$0x1] }
  0x4c   : > { %4578 = vmatprep.subr.bf16.mxu1 %v5296_v29  ;;  %6708 = vst [vmem:[#allocation9_spill] sm:$0xff] %v5840_v17  ;;  %4738 = vmatprep.mubr.bf16.mxu0 %v5840_v17  ;;  %v546_v55 = vsel %vm5599_vm2, %v541_v38, %v545_v52  ;;  %v3930_v59 = vrot.slane %v5605_v41, 9  ;;  %v1345_v24 = vrot.slane %v5608_v42, 5  ;;  %v572_v8 = vshrl.u32 %v5847_v2, 16  ;;  %v5876_v52 = vld [vmem:[%s6677_s1 + $0x80] sm:$0xff]  }
  0x4d   : > { %4769 = vmatpush3.bf16.msra.mxu0 %v5288_v45  ;;  %v5291_v45 = vld [vmem:[%s6677_s1 + $0x178] sm:$0xff]   ;;  %v553_v49 = vrot.slane %v551_v34, 5  ;;  %v5871_v46 = vcombine.low %v536_v57, %v546_v55  ;;  %v563_v34 = vrot.slane %v561_v21, 4  ;;  %v569_v19 = vrot.slane %v567_v31, 5  ;;  %v5885_v38 = vld [vmem:[%s5554_s13 + $0x84] sm:$0xf] }
  0x4e   : > { %4770 = vmatprep.subr.bf16.mxu0 %v5290_v63  ;;  %4547 = vmatmul.mubr.bf16.gmra.mrb[12].mxu1 %v5840_v17  ;;  %v1346_v41 = vsel %vm5806_vm5, %v3930_v59, %v1345_v24  ;;  %v1347_v42 = vrot.slane %v1345_v24, 4  ;;  %v574_v57 = vrot.slane %v572_v8, 4  ;;  %v581_v21 = vshll.u32 %v5861_v54, 16 }
  0x4f   : > { %4579 = vmatpush3.bf16.msra.mxu1 %v5296_v29  ;;  %6709 = vst [vmem:[#allocation10_spill] sm:$0xff] %v5871_v46  ;;  %v554_v25 = vor.u32 %v553_v49, %v550_v44  ;;  %v5293_v29 = vld [vmem:[%s6677_s1 + $0x180] sm:$0xff]   ;;  %4550 = vmatprep.mubr.bf16.mxu1 %v5871_v46  ;;  %v564_v49 = vor.u32 %v563_v34, %v559_v36  ;;  %v585_v31 = vshrl.u32 %v5861_v54, 16  ;;  %v591_v24 = vshll.u32 %v5868_v16, 16 }
  0x50   : > { %4580 = vmatprep.subr.bf16.mxu1 %v5298_v4  ;;  %4739 = vmatmul.mubr.bf16.gmra.mrb[12].mxu0 %v5871_v46  ;;  %v1349_v55 = vsel %vm5806_vm5, %v1347_v42, %v1348_v7  ;;  %v3931_v8 = vrot.slane %v5632_v3, 9  ;;  %v583_v46 = vrot.slane %v581_v21, 5  ;;  %v5905_v3 = vld [vmem:[%s5554_s13 + $0x88] sm:$0xf] }
  0x51   : > { %4771 = vmatpush3.bf16.msra.mxu0 %v5290_v63  ;;  %v575_v63 = vshll.u32 %v5847_v2, 16  ;;  %v555_v44 = vrot.slane %v554_v25, 4  ;;  %4774 = vmatprep.mubr.bf16.mxu0 %v5854_v39  ;;  %v565_v34 = vrot.slane %v564_v49, 4  ;;  %v5900_v26 = vcombine.low %v1346_v41, %v1349_v55 }
  0x52   : > { %4772 = vmatprep.subr.bf16.mxu0 %v5291_v45  ;;  %v587_v7 = vrot.slane %v585_v31, 4  ;;  %v593_v42 = vrot.slane %v591_v24, 5  ;;  %v596_v41 = vshrl.u32 %v5885_v38, 16  ;;  %v5295_v31 = vld [vmem:[%s6677_s1 + $0x188] sm:$0xff]   ;;  %v5924_v24 = vld [vmem:[%s5554_s13 + $0x90] sm:$0xf] }
  0x53   : > { %v577_v59 = vrot.slane %v575_v63, 5  ;;  %4581 = vmatpush3.bf16.msra.mxu1 %v5298_v4  ;;  %v560_v25 = vsel %vm5599_vm2, %v555_v44, %v559_v36  ;;  %v1352_v63 = vrot.slane %v5640_v9, 5  ;;  %v570_v4 = vsel %vm5599_vm2, %v565_v34, %v569_v19  ;;  %v5911_v36 = vld [vmem:[%s5554_s13 + $0x8c] sm:$0x1]  ;;  %v5927_v34 = vld [vmem:[%s5554_s13 + $0x94] sm:$0xf] }
  0x54   : > { %4614 = vmatprep.subr.bf16.mxu1 %v5876_v52  ;;  %v599_v44 = vshll.u32 %v5885_v38, 16  ;;  %v588_v21 = vor.u32 %v587_v7, %v583_v46  ;;  %v598_v55 = vrot.slane %v596_v41, 4  ;;  %v615_v7 = vshll.u32 %v5911_v36, 16 }
  0x55   : > { %4773 = vmatpush3.bf16.msra.mxu0 %v5291_v45  ;;  %v578_v48 = vor.u32 %v577_v59, %v574_v57  ;;  %v1355_v45 = vrot.slane %v5647_v14, 5  ;;  %v5915_v57 = vcombine.low %v560_v25, %v570_v4  ;;  %v1353_v9 = vsel %vm5806_vm5, %v3931_v8, %v1352_v63 }
  0x56   : > { %4806 = vmatprep.subr.bf16.mxu0 %v5293_v29  ;;  %v1354_v19 = vrot.slane %v1352_v63, 4  ;;  %v601_v14 = vrot.slane %v599_v44, 5  ;;  %v605_v59 = vshll.u32 %v5905_v3, 16  ;;  %v609_v8 = vshrl.u32 %v5905_v3, 16 }
  0x57   : > { %6710 = vst [vmem:[#allocation11_spill] sm:$0xff] %v5915_v57  ;;  %v579_v49 = vrot.slane %v578_v48, 4  ;;  %4551 = vmatmul.mubr.bf16.gmra.mrb[16].mxu1 %v5915_v57  ;;  %v589_v48 = vrot.slane %v588_v21, 4  ;;  %v3932_v44 = vrot.slane %v5652_v22, 9  ;;  %v617_v21 = vrot.slane %v615_v7, 5  ;;  %v5297_v22 = vld [vmem:[%s6677_s1 + $0x190] sm:$0xff]  }
  0x58   : > { %4775 = vmatmul.mubr.bf16.vlgmr.msra.gmra.mrb[0].mxu0 %v5900_v26  ;;  %v1356_v63 = vsel %vm5806_vm5, %v1354_v19, %v1355_v45  ;;  %v602_v4 = vor.u32 %v601_v14, %v598_v55  ;;  %v607_v41 = vrot.slane %v605_v59, 5  ;;  %v1362_v45 = vrot.slane %v5666_v35, 5  ;;  %v5963_v59 = vld [vmem:[%s5554_s13 + $0x9c] sm:$0xf] }
  0x59   : > { %v584_v25 = vsel %vm5599_vm2, %v579_v49, %v583_v46  ;;  %4807 = vmatpush3.bf16.msra.mxu0 %v5293_v29  ;;  %v594_v57 = vsel %vm5599_vm2, %v589_v48, %v593_v42  ;;  %v5940_v46 = vcombine.low %v1353_v9, %v1356_v63  ;;  %v611_v49 = vrot.slane %v609_v8, 4  ;;  %v5951_v42 = vld [vmem:[%s5554_s13 + $0x98] sm:$0x1]  ;;  %v5966_v63 = vld [vmem:[%s5554_s13 + $0xa0] sm:$0xf] }
  0x5a   : > { %v5942_v17 = vcombine.low %v584_v25, %v594_v57  ;;  %v603_v61 = vrot.slane %v602_v4, 4  ;;  %4808 = vmatprep.subr.bf16.mxu0 %v5295_v31  ;;  %v620_v57 = vshrl.u32 %v5924_v24, 16  ;;  %v623_v9 = vshll.u32 %v5924_v24, 16 }
  0x5b   : > { %4778 = vmatprep.mubr.bf16.mxu0 %v5940_v46  ;;  %v612_v29 = vor.u32 %v611_v49, %v607_v41  ;;  %v629_v19 = vshll.u32 %v5927_v34, 16  ;;  %v1360_v35 = vsel %vm5806_vm5, %v3932_v44, %v1359_v20  ;;  %v1361_v55 = vrot.slane %v1359_v20, 4  ;;  %v5973_v20 = vld [vmem:[%s5554_s13 + $0xa4] sm:$0x1] }
  0x5c   : > { %6711 = vst [vmem:[#allocation12_spill] sm:$0xff] %v5942_v17  ;;  %4554 = vmatprep.mubr.bf16.mxu1 %v5942_v17  ;;  %v608_v30 = vsel %vm5599_vm2, %v603_v61, %v607_v41  ;;  %v633_v14 = vshrl.u32 %v5927_v34, 16  ;;  %v622_v48 = vrot.slane %v620_v57, 4  ;;  %v625_v8 = vrot.slane %v623_v9, 5 }
  0x5d   : > { %v613_v25 = vrot.slane %v612_v29, 4  ;;  %4809 = vmatpush3.bf16.msra.mxu0 %v5295_v31  ;;  %v631_v7 = vrot.slane %v629_v19, 5  ;;  %v1363_v4 = vsel %vm5806_vm5, %v1361_v55, %v1362_v45  ;;  %v639_v61 = vshll.u32 %v5951_v42, 16  ;;  %v5299_v45 = vld [vmem:[%s6677_s1 + $0x198] sm:$0xff]  }
  0x5e   : > { %v635_v49 = vrot.slane %v633_v14, 4  ;;  %v3933_v41 = vrot.slane %v5681_v58, 9  ;;  %4810 = vmatprep.subr.bf16.mxu0 %v5297_v22  ;;  %v5977_v44 = vcombine.low %v1360_v35, %v1363_v4  ;;  %v626_v29 = vor.u32 %v625_v8, %v622_v48 }
  0x5f   : > { %v618_v31 = vsel %vm5599_vm2, %v613_v25, %v617_v21  ;;  %v1366_v57 = vrot.slane %v5695_v0, 5  ;;  %v641_v58 = vrot.slane %v639_v61, 5  ;;  %v1369_v55 = vrot.slane %v5698_v1, 5  ;;  %v5991_v25 = vld [vmem:[%s5554_s13 + $0xa8] sm:$0xf] }
  0x60   : > { %v5983_v9 = vcombine.low %v608_v30, %v618_v31  ;;  %v636_v19 = vor.u32 %v635_v49, %v631_v7  ;;  %4779 = vmatmul.mubr.bf16.gmra.mrb[4].mxu0 %v5977_v44  ;;  %v627_v14 = vrot.slane %v626_v29, 4  ;;  %v644_v0 = vshrl.u32 %v5963_v59, 16  ;;  %v5303_v30 = vld [vmem:[%s6677_s1 + $0x1a0] sm:$0xff]   ;;  %v6001_v49 = vld [vmem:[%s5554_s13 + $0xac] sm:$0xf] }
  0x61   : > { %v1367_v21 = vsel %vm5806_vm5, %v3933_v41, %v1366_v57  ;;  %v1368_v35 = vrot.slane %v1366_v57, 4  ;;  %v647_v1 = vshll.u32 %v5963_v59, 16  ;;  %v653_v8 = vshll.u32 %v5966_v63, 16  ;;  %4811 = vmatpush3.bf16.msra.mxu0 %v5297_v22 }
  0x62   : > { %6712 = vst [vmem:[#allocation13_spill] sm:$0xff] %v5983_v9  ;;  %4555 = vmatmul.mubr.bf16.gmra.mrb[20].mxu1 %v5983_v9  ;;  %v637_v48 = vrot.slane %v636_v19, 4  ;;  %v657_v4 = vshrl.u32 %v5966_v63, 16  ;;  %v632_v61 = vsel %vm5599_vm2, %v627_v14, %v631_v7  ;;  %v646_v31 = vrot.slane %v644_v0, 4  ;;  %4812 = vmatprep.subr.bf16.mxu0 %v5299_v45  ;;  %v6016_v14 = vld [vmem:[%s5554_s13 + $0xb0] sm:$0x1] }
  0x63   : > { %v1370_v41 = vsel %vm5806_vm5, %v1368_v35, %v1369_v55  ;;  %v663_v29 = vshll.u32 %v5973_v20, 16  ;;  %v649_v9 = vrot.slane %v647_v1, 5  ;;  %v655_v17 = vrot.slane %v653_v8, 5 }
  0x64   : > { %v642_v57 = vsel %vm5599_vm2, %v637_v48, %v641_v58  ;;  %v6010_v19 = vcombine.low %v1367_v21, %v1370_v41  ;;  %v659_v56 = vrot.slane %v657_v4, 4  ;;  %v3934_v7 = vrot.slane %v5712_v27, 9 }
  0x65   : > { %v6012_v22 = vcombine.low %v632_v61, %v642_v57  ;;  %v665_v18 = vrot.slane %v663_v29, 5  ;;  %v650_v55 = vor.u32 %v649_v9, %v646_v31  ;;  %v1373_v35 = vrot.slane %v5715_v28, 5  ;;  %4813 = vmatpush3.bf16.msra.mxu0 %v5299_v45  ;;  %v5307_v28 = vld [vmem:[%s6677_s1 + $0x1a8] sm:$0xff]  }
  0x66   : > { %4782 = vmatprep.mubr.bf16.mxu0 %v6010_v19  ;;  %v1376_v0 = vrot.slane %v5721_v33, 5  ;;  %v668_v58 = vshrl.u32 %v5991_v25, 16  ;;  %v660_v21 = vor.u32 %v659_v56, %v655_v17  ;;  %v671_v48 = vshll.u32 %v5991_v25, 16  ;;  %4814 = vmatprep.subr.bf16.mxu0 %v5303_v30 }
  0x67   : > { %6713 = vst [vmem:[#allocation14_spill] sm:$0xff] %v6012_v22  ;;  %4558 = vmatprep.mubr.bf16.mxu1 %v6012_v22  ;;  %v677_v1 = vshll.u32 %v6001_v49, 16  ;;  %v681_v27 = vshrl.u32 %v6001_v49, 16  ;;  %v651_v9 = vrot.slane %v650_v55, 4  ;;  %v1374_v33 = vsel %vm5806_vm5, %v3934_v7, %v1373_v35  ;;  %v6038_v22 = vld [vmem:[%s5554_s13 + $0xb4] sm:$0xf] }
  0x68   : > { %v1375_v45 = vrot.slane %v1373_v35, 4  ;;  %v670_v8 = vrot.slane %v668_v58, 4  ;;  %v661_v56 = vrot.slane %v660_v21, 4  ;;  %v673_v4 = vrot.slane %v671_v48, 5  ;;  %v6045_v48 = vld [vmem:[%s5554_s13 + $0xb8] sm:$0xf] }
  0x69   : > { %v679_v61 = vrot.slane %v677_v1, 5  ;;  %v683_v41 = vrot.slane %v681_v27, 4  ;;  %v656_v31 = vsel %vm5599_vm2, %v651_v9, %v655_v17  ;;  %v687_v57 = vshll.u32 %v6016_v14, 16  ;;  %4815 = vmatpush3.bf16.msra.mxu0 %v5303_v30  ;;  %v5311_v17 = vld [vmem:[%s6677_s1 + $0x1b0] sm:$0xff]   ;;  %v6055_v27 = vld [vmem:[%s5554_s13 + $0xbc] sm:$0x1] }
  0x6a   : > { %v1377_v29 = vsel %vm5806_vm5, %v1375_v45, %v1376_v0  ;;  %v3935_v55 = vrot.slane %v5749_v5, 9  ;;  %v666_v7 = vsel %vm5599_vm2, %v661_v56, %v665_v18  ;;  %v674_v58 = vor.u32 %v673_v4, %v670_v8  ;;  %4816 = vmatprep.subr.bf16.mxu0 %v5307_v28  ;;  %v5315_v4 = vld [vmem:[%s6677_s1 + $0x1b8] sm:$0xff]  }
  0x6b   : > { %v6042_v35 = vcombine.low %v1374_v33, %v1377_v29  ;;  %v684_v21 = vor.u32 %v683_v41, %v679_v61  ;;  %v6050_v0 = vcombine.low %v656_v31, %v666_v7  ;;  %v689_v5 = vrot.slane %v687_v57, 5 }
  0x6c   : > { %v1380_v1 = vrot.slane %v5752_v6, 5  ;;  %v1383_v30 = vrot.slane %v5755_v10, 5  ;;  %v675_v18 = vrot.slane %v674_v58, 4  ;;  %v692_v33 = vshrl.u32 %v6038_v22, 16 }
  0x6d   : > { %6714 = vst [vmem:[#allocation15_spill] sm:$0xff] %v6050_v0  ;;  %4783 = vmatmul.mubr.bf16.gmra.mrb[8].mxu0 %v6042_v35  ;;  %v685_v9 = vrot.slane %v684_v21, 4  ;;  %v695_v45 = vshll.u32 %v6038_v22, 16  ;;  %4559 = vmatmul.mubr.bf16.gmra.mrb[24].mxu1 %v6050_v0  ;;  %v701_v6 = vshll.u32 %v6045_v48, 16  ;;  %v705_v10 = vshrl.u32 %v6045_v48, 16 }
  0x6e   : > { %v1381_v8 = vsel %vm5806_vm5, %v3935_v55, %v1380_v1  ;;  %v1382_v56 = vrot.slane %v1380_v1, 4  ;;  %4817 = vmatpush3.bf16.msra.mxu0 %v5307_v28  ;;  %v680_v41 = vsel %vm5599_vm2, %v675_v18, %v679_v61  ;;  %v694_v29 = vrot.slane %v692_v33, 4 }
  0x6f   : > { %v690_v31 = vsel %vm5599_vm2, %v685_v9, %v689_v5  ;;  %v697_v57 = vrot.slane %v695_v45, 5  ;;  %4818 = vmatprep.subr.bf16.mxu0 %v5311_v17  ;;  %v703_v58 = vrot.slane %v701_v6, 5  ;;  %v707_v28 = vrot.slane %v705_v10, 4 }
  0x70   : > { %v6072_v55 = vcombine.low %v680_v41, %v690_v31  ;;  %v1384_v7 = vsel %vm5806_vm5, %v1382_v56, %v1383_v30  ;;  %v711_v0 = vshll.u32 %v6055_v27, 16  ;;  %v3936_v61 = vrot.slane %v5775_v32, 9  ;;  %v6087_v30 = vld [vmem:[%s6677_s1 + $0x1c0] sm:$0xff]  }
  0x71   : > { %v6076_v21 = vcombine.low %v1381_v8, %v1384_v7  ;;  %v698_v1 = vor.u32 %v697_v57, %v694_v29  ;;  %v708_v5 = vor.u32 %v707_v28, %v703_v58  ;;  %v1387_v18 = vrot.slane %v5783_v47, 5 }
  0x72   : > { %4562 = vmatprep.mubr.bf16.mxu1 %v6072_v55  ;;  %v1390_v9 = vrot.slane %v5789_v50, 5  ;;  %v3937_v33 = vrot.slane %v5817_v40, 9  ;;  %4819 = vmatpush3.bf16.msra.mxu0 %v5311_v17  ;;  %v713_v8 = vrot.slane %v711_v0, 5  ;;  %v1394_v56 = vrot.slane %v5824_v53, 5 }
  0x73   : > { %4786 = vmatprep.mubr.bf16.mxu0 %v6076_v21  ;;  %v699_v45 = vrot.slane %v698_v1, 4  ;;  %v1397_v6 = vrot.slane %v5832_v62, 5  ;;  %4820 = vmatprep.subr.bf16.mxu0 %v5315_v4  ;;  %v709_v10 = vrot.slane %v708_v5, 4  ;;  %v1388_v50 = vsel %vm5806_vm5, %v3936_v61, %v1387_v18 }
  0x74   : > { %v1389_v41 = vrot.slane %v1387_v18, 4  ;;  %v3938_v17 = vrot.slane %v5847_v2, 9  ;;  %v1395_v29 = vsel %vm5806_vm5, %v3937_v33, %v1394_v56  ;;  %v1396_v57 = vrot.slane %v1394_v56, 4 }
  0x75   : > { %v704_v31 = vsel %vm5599_vm2, %v699_v45, %v703_v58  ;;  %v1401_v0 = vrot.slane %v5861_v54, 5  ;;  %v714_v62 = vsel %vm5599_vm2, %v709_v10, %v713_v8  ;;  %v1404_v28 = vrot.slane %v5868_v16, 5 }
  0x76   : > { %v1391_v7 = vsel %vm5806_vm5, %v1389_v41, %v1390_v9  ;;  %v3939_v1 = vrot.slane %v5885_v38, 9  ;;  %4821 = vmatpush3.bf16.msra.mxu0 %v5315_v4  ;;  %v6106_v61 = vcombine.low %v704_v31, %v714_v62  ;;  %v1398_v5 = vsel %vm5806_vm5, %v1396_v57, %v1397_v6  ;;  %v5306_v57 = vld [vmem:[%s6677_s1 + $0x88] sm:$0xff]  }
  0x77   : > { %v6108_v58 = vcombine.low %v1388_v50, %v1391_v7  ;;  %4854 = vmatprep.subr.bf16.mxu0 %v6087_v30  ;;  %v6113_v18 = vcombine.low %v1395_v29, %v1398_v5  ;;  %v1403_v33 = vrot.slane %v1401_v0, 4  ;;  %v1408_v45 = vrot.slane %v5905_v3, 5 }
  0x78   : > { %v1411_v9 = vrot.slane %v5911_v36, 5  ;;  %4563 = vmatmul.mubr.bf16.gmra.mrb[28].mxu1 %v6106_v61  ;;  %v6715_v16 = vcombine.low %v5563_v12, %v5566_v13  ;;  %v1402_v4 = vsel %vm5806_vm5, %v3938_v17, %v1401_v0  ;;  %v1415_v6 = vrot.slane %v5927_v34, 5 }
  0x79   : > { %4787 = vmatmul.mubr.bf16.gmra.mrb[12].mxu0 %v6108_v58  ;;  %v1405_v8 = vsel %vm5806_vm5, %v1403_v33, %v1404_v28  ;;  %v1410_v56 = vrot.slane %v1408_v45, 4  ;;  %v1422_v36 = vrot.slane %v5966_v63, 5  ;;  %v1409_v10 = vsel %vm5806_vm5, %v3939_v1, %v1408_v45 }
  0x7a   : > { %4582 = vmatprep.mubr.bf16.mxu1 %v6715_v16  ;;  %4790 = vmatprep.mubr.bf16.mxu0 %v6113_v18  ;;  %v6133_v13 = vcombine.low %v1402_v4, %v1405_v8  ;;  %v3940_v50 = vrot.slane %v5924_v24, 9  ;;  %v1418_v41 = vrot.slane %v5951_v42, 5  ;;  %v1417_v17 = vrot.slane %v1415_v6, 4 }
  0x7b   : > { %v1412_v12 = vsel %vm5806_vm5, %v1410_v56, %v1411_v9  ;;  %v3941_v31 = vrot.slane %v5963_v59, 9  ;;  %v1424_v0 = vrot.slane %v1422_v36, 4  ;;  %v1425_v62 = vrot.slane %v5973_v20, 5 }
  0x7c   : > { %v6138_v29 = vcombine.low %v1409_v10, %v1412_v12  ;;  %v1416_v7 = vsel %vm5806_vm5, %v3940_v50, %v1415_v6  ;;  %v1429_v42 = vrot.slane %v6001_v49, 5  ;;  %v6151_v28 = vcombine.low %v5775_v32, %v5783_v47  ;;  %v5310_v47 = vld [vmem:[%s6677_s1 + $0x90] sm:$0xff]   ;;  %v308_v6 = vld [vmem:[%s5554_s13 + $0xc8] sm:$0x1]  ;;  %v5355_v10 = vld [vmem:[%s5554_s13 + $0x40] sm:$0xf] }
  0x7d   : > { %v1419_v20 = vsel %vm5806_vm5, %v1417_v17, %v1418_v41  ;;  %v1423_v1 = vsel %vm5806_vm5, %v3941_v31, %v1422_v36  ;;  %v3942_v5 = vrot.slane %v5991_v25, 9  ;;  %v6162_v33 = vcombine.low %v5817_v40, %v5824_v53  ;;  %v5354_v36 = vld [vmem:[%s5554_s13 + $0x3c] sm:$0xf]  ;;  %v5356_v41 = vld [vmem:[%s5554_s13 + $0x48] sm:$0xf] }
  0x7e   : > { %v1426_v32 = vsel %vm5806_vm5, %v1424_v0, %v1425_v62  ;;  %v6173_v45 = vcombine.low %v5847_v2, %v5861_v54  ;;  %v6177_v40 = vcombine.low %v5885_v38, %v5905_v3  ;;  %v6181_v53 = vcombine.low %v5924_v24, %v5927_v34  ;;  %v6201_v24 = vld [vmem:[%s5554_s13 + $0xc4] sm:$0xf]  ;;  %v5357_v17 = vld [vmem:[%s5554_s13 + $0x4c] sm:$0xf] }
  0x7f   : > { %v6185_v9 = vcombine.low %v5963_v59, %v5966_v63  ;;  %v6189_v16 = vcombine.low %v5991_v25, %v6001_v49  ;;  %v6191_v4 = vcombine.low %v1416_v7, %v1419_v20  ;;  %v1431_v2 = vrot.slane %v1429_v42, 4  ;;  %v5314_v25 = vld [vmem:[%s6677_s1 + $0x98] sm:$0xff]  }
  0x80   : > { %4583 = vmatmul.mubr.bf16.vlgmr.msra.gmra.mrb[0].mxu1 %v5612_v43  ;;  %v1432_v54 = vrot.slane %v6016_v14, 5  ;;  %v6196_v38 = vcombine.low %v6038_v22, %v6045_v48  ;;  %v6198_v3 = vcombine.low %v1423_v1, %v1426_v32  ;;  %v3943_v34 = vrot.slane %v6038_v22, 9  ;;  %v6215_v14 = vld [vmem:[%s5554_s13 + $0xc0] sm:$0xf] }
  0x81   : > { %4791 = vmatmul.mubr.bf16.gmra.mrb[16].mxu0 %v6133_v13  ;;  %4615 = vmatpush3.bf16.msra.mxu1 %v5876_v52  ;;  %v1436_v52 = vrot.slane %v6045_v48, 5  ;;  %v1439_v63 = vrot.slane %v6055_v27, 5  ;;  %v1430_v49 = vsel %vm5806_vm5, %v3942_v5, %v1429_v42  ;;  %v2316_v48 = vrot.slane %v6201_v24, 5  ;;  %v5318_v27 = vld [vmem:[%s6677_s1 + $0xa0] sm:$0xff]  }
  0x82   : > { %4586 = vmatprep.mubr.bf16.mxu1 %v5688_v60  ;;  %4794 = vmatprep.mubr.bf16.mxu0 %v6138_v29  ;;  %v1433_v22 = vsel %vm5806_vm5, %v1431_v2, %v1432_v54  ;;  %v6230_v12 = vcombine.low %v5354_v36, %v5355_v10  ;;  %v6236_v31 = vcombine.low %v5356_v41, %v5357_v17  ;;  %v2031_v0 = vshll.u32 %v6215_v14, 16  ;;  %v5322_v54 = vld [vmem:[%s6677_s1 + $0xa8] sm:$0xff]   ;;  %v5326_v36 = vld [vmem:[%s6677_s1 + $0xb0] sm:$0xff]   ;;  %v5359_v10 = vld [vmem:[%s5554_s13 + $0x58] sm:$0xf] }
  0x83   : > { %4616 = vmatprep.subr.bf16.mxu1 %v5306_v57  ;;  %v1438_v59 = vrot.slane %v1436_v52, 4  ;;  %v1437_v8 = vsel %vm5806_vm5, %v3943_v34, %v1436_v52  ;;  %v6232_v50 = vcombine.low %v1430_v49, %v1433_v22  ;;  %v2037_v62 = vshll.u32 %v6201_v24, 16 }
  0x84   : > { %v2041_v7 = vshrl.u32 %v6201_v24, 16  ;;  %v4034_v20 = vrot.slane %v6215_v14, 9  ;;  %v2318_v1 = vrot.slane %v2316_v48, 4  ;;  %v2319_v5 = vrot.slane %v308_v6, 5 }
  0x85   : > { %4617 = vmatpush3.bf16.msra.mxu1 %v5306_v57  ;;  %v1440_v56 = vsel %vm5806_vm5, %v1438_v59, %v1439_v63  ;;  %v2028_v57 = vshrl.u32 %v6215_v14, 16  ;;  %v2039_v52 = vrot.slane %v2037_v62, 5  ;;  %v2047_v63 = vshll.u32 %v308_v6, 16  ;;  %v5358_v6 = vld [vmem:[%s5554_s13 + $0x54] sm:$0xf]  ;;  %v5332_v62 = vld [vmem:[%s6677_s1 + $0xc0] sm:$0xff]  }
  0x86   : > { %4618 = vmatprep.subr.bf16.mxu1 %v5310_v47  ;;  %v6242_v42 = vcombine.low %v1437_v8, %v1440_v56  ;;  %v2043_v2 = vrot.slane %v2041_v7, 4  ;;  %v2320_v49 = vsel %vm5806_vm5, %v2318_v1, %v2319_v5  ;;  %v6261_v41 = vcombine.low %v5358_v6, %v5359_v10  ;;  %v5323_v7 = vld [vmem:[%s6677_s1 + $0x1c8] sm:$0xff]   ;;  %v5331_v1 = vld [vmem:[%s6677_s1 + $0x1d8] sm:$0xff]   ;;  %v5336_v6 = vld [vmem:[%s6677_s1 + $0xd0] sm:$0xff]  }
  0x87   : > { %v2030_v32 = vrot.slane %v2028_v57, 4  ;;  %v2049_v56 = vrot.slane %v2047_v63, 5  ;;  %v5339_v10 = vld [vmem:[%s6677_s1 + $0xd8] sm:$0xff]  }
  0x88   : > { %4587 = vmatmul.mubr.bf16.gmra.mrb[4].mxu1 %v5759_v11  ;;  %v2044_v59 = vor.u32 %v2043_v2, %v2039_v52  ;;  %v5362_v2 = vld [vmem:[%s5554_s13] sm:$0xf] }
  0x89   : > { %4795 = vmatmul.mubr.bf16.gmra.mrb[20].mxu0 %v6191_v4  ;;  %4590 = vmatprep.mubr.bf16.mxu1 %v5763_v15 }
  0x8a   : > { %4798 = vmatprep.mubr.bf16.mxu0 %v6198_v3  ;;  %4619 = vmatpush3.bf16.msra.mxu1 %v5310_v47  ;;  %v2033_v47 = vrot.slane %v2031_v0, 5  ;;  %v2045_v8 = vrot.slane %v2044_v59, 4  ;;  %v5330_v0 = vld [vmem:[%s6677_s1 + $0xb8] sm:$0xff]   ;;  %v5335_v59 = vld [vmem:[%s6677_s1 + $0x1e8] sm:$0xff]  }
  0x8b   : > { %4620 = vmatprep.subr.bf16.mxu1 %v5314_v25 }
  0x8c   : > { %v2034_v34 = vor.u32 %v2033_v47, %v2030_v32  ;;  %v5333_v32 = vld [vmem:[%s6677_s1 + $0x1e0] sm:$0xff]   ;;  %v5361_v47 = vld [vmem:[%s5554_s13 + $0x8] sm:$0x1] }
  0x8e   : > { %4621 = vmatpush3.bf16.msra.mxu1 %v5314_v25  ;;  %v2317_v25 = vsel %vm5806_vm5, %v4034_v20, %v2316_v48  ;;  %v2035_v22 = vrot.slane %v2034_v34, 4  ;;  %v5327_v20 = vld [vmem:[%s6677_s1 + $0x1d0] sm:$0xff]  }
  0x8f   : > { %4622 = vmatprep.subr.bf16.mxu1 %v5318_v27  ;;  %v6263_v17 = vcombine.low %v2317_v25, %v2320_v49  ;;  %v5337_v49 = vld [vmem:[%s6677_s1 + $0x1f0] sm:$0xff]  }
  0x90   : > { %4591 = vmatmul.mubr.bf16.gmra.mrb[8].mxu1 %v6230_v12  ;;  %v2040_v48 = vsel %vm5599_vm2, %v2035_v22, %v2039_v52  ;;  %v1334_v52 = vrot.slane %v5361_v47, 5  ;;  %v6718_v47 = vld [vmem:[#allocation7_spill] sm:$0xff] }
  0x91   : > { %4799 = vmatmul.mubr.bf16.gmra.mrb[24].mxu0 %v6232_v50  ;;  %4594 = vmatprep.mubr.bf16.mxu1 %v6236_v31 }
  0x92   : > { %4802 = vmatprep.mubr.bf16.mxu0 %v6242_v42  ;;  %4623 = vmatpush3.bf16.msra.mxu1 %v5318_v27  ;;  %v2050_v27 = vsel %vm5599_vm2, %v2045_v8, %v2049_v56  ;;  %v5341_v8 = vld [vmem:[%s6677_s1 + $0x1f8] sm:$0xff]   ;;  %v5343_v56 = vld [vmem:[%s6677_s1 + $0x200] sm:$0xff]  }
  0x93   : > { %4624 = vmatprep.subr.bf16.mxu1 %v5322_v54  ;;  %v6269_v57 = vcombine.low %v2040_v48, %v2050_v27  ;;  %v6350_v48 = vcombine.low %v6215_v14, %v6201_v24  ;;  %v5344_v27 = vld [vmem:[%s6677_s1 + $0xe8] sm:$0xff]   ;;  %v5346_v24 = vld [vmem:[%s6677_s1 + $0xf0] sm:$0xff]  }
  0x96   : > { %4625 = vmatpush3.bf16.msra.mxu1 %v5322_v54  ;;  %v3928_v54 = vrot.slane %v5362_v2, 9  ;;  %v5350_v2 = vld [vmem:[%s6677_s1 + $0x220] sm:$0xff]  }
  0x97   : > { %4626 = vmatprep.subr.bf16.mxu1 %v5326_v36 }
  0x98   : > { %4595 = vmatmul.mubr.bf16.gmra.mrb[12].mxu1 %v6261_v41 }
  0x99   : > { %4803 = vmatmul.mubr.bf16.gmra.mrb[28].mxu0 %v6263_v17  ;;  %4598 = vmatprep.mubr.bf16.mxu1 %v6151_v28 }
  0x9a   : > { %4822 = vmatprep.mubr.bf16.mxu0 %v5688_v60  ;;  %4627 = vmatpush3.bf16.msra.mxu1 %v5326_v36  ;;  %v5334_v36 = vld [vmem:[%s6677_s1 + $0xc8] sm:$0xff]  }
  0x9b   : > { %4628 = vmatprep.subr.bf16.mxu1 %v5330_v0 }
  0x9e   : > { %4629 = vmatpush3.bf16.msra.mxu1 %v5330_v0  ;;  %v6360_v0 = vld [vmem:[%s5554_s13 + $0xcc] sm:$0xf] }
  0x9f   : > { %4662 = vmatprep.subr.bf16.mxu1 %v5332_v62 }
  0xa0   : > { %4599 = vmatmul.mubr.bf16.gmra.mrb[16].mxu1 %v6162_v33 }
  0xa1   : > { %4823 = vmatmul.mubr.bf16.vlgmr.msra.gmra.mrb[0].mxu0 %v5759_v11  ;;  %4602 = vmatprep.mubr.bf16.mxu1 %v6173_v45 }
  0xa2   : > { %4855 = vmatpush3.bf16.msra.mxu0 %v6087_v30  ;;  %4826 = vmatprep.mubr.bf16.mxu0 %v5763_v15  ;;  %v5360_v30 = vld [vmem:[%s5554_s13 + $0x4] sm:$0xf] }
  0xa3   : > { %4856 = vmatprep.subr.bf16.mxu0 %v5323_v7  ;;  %v1331_v5 = vrot.slane %v5360_v30, 5  ;;  %v6716_v30 = vld [vmem:[#allocation5_spill] sm:$0xff] }
  0xa5   : > { %v1333_v34 = vrot.slane %v1331_v5, 4  ;;  %v1332_v63 = vsel %vm5806_vm5, %v3928_v54, %v1331_v5  ;;  %v5347_v5 = vld [vmem:[%s6677_s1 + $0x210] sm:$0xff]   ;;  %v5351_v54 = vld [vmem:[%s6677_s1 + $0x228] sm:$0xff]  }
  0xa6   : > { %4857 = vmatpush3.bf16.msra.mxu0 %v5323_v7  ;;  %v5348_v7 = vld [vmem:[%s6677_s1 + $0xf8] sm:$0xff]  }
  0xa7   : > { %4858 = vmatprep.subr.bf16.mxu0 %v5327_v20  ;;  %v1335_v25 = vsel %vm5806_vm5, %v1333_v34, %v1334_v52  ;;  %v6719_v52 = vld [vmem:[#allocation8_spill] sm:$0xff]  ;;  %v6720_v34 = vld [vmem:[#allocation9_spill] sm:$0xff] }
  0xa8   : > { %4603 = vmatmul.mubr.bf16.gmra.mrb[20].mxu1 %v6177_v40  ;;  %v3960_v22 = vcombine.low %v1332_v63, %v1335_v25  ;;  %v5352_v63 = vld [vmem:[%s6677_s1 + $0x230] sm:$0xff]   ;;  %v5353_v25 = vld [vmem:[%s6677_s1 + $0x238] sm:$0xff]  }
  0xa9   : > { %4827 = vmatmul.mubr.bf16.gmra.mrb[4].mxu0 %v6230_v12  ;;  %4606 = vmatprep.mubr.bf16.mxu1 %v6181_v53 }
  0xaa   : > { %4830 = vmatprep.mubr.bf16.mxu0 %v6236_v31  ;;  %4859 = vmatpush3.bf16.msra.mxu0 %v5327_v20  ;;  %v5345_v20 = vld [vmem:[%s6677_s1 + $0x208] sm:$0xff]  }
  0xab   : > { %4860 = vmatprep.subr.bf16.mxu0 %v5331_v1 }
  0xae   : > { %4861 = vmatpush3.bf16.msra.mxu0 %v5331_v1  ;;  %v5363_v1 = vld [vmem:[%s6677_s1 + $0x100] sm:$0xff]  }
  0xaf   : > { %4862 = vmatprep.subr.bf16.mxu0 %v5333_v32 }
  0xb0   : > { %4607 = vmatmul.mubr.bf16.gmra.mrb[24].mxu1 %v6185_v9 }
  0xb1   : > { %4831 = vmatmul.mubr.bf16.gmra.mrb[8].mxu0 %v6261_v41  ;;  %4610 = vmatprep.mubr.bf16.mxu1 %v6189_v16 }
  0xb2   : > { %4834 = vmatprep.mubr.bf16.mxu0 %v6151_v28  ;;  %4863 = vmatpush3.bf16.msra.mxu0 %v5333_v32  ;;  %v5349_v32 = vld [vmem:[%s6677_s1 + $0x218] sm:$0xff]  }
  0xb3   : > { %4864 = vmatprep.subr.bf16.mxu0 %v5335_v59 }
  0xb6   : > { %4865 = vmatpush3.bf16.msra.mxu0 %v5335_v59  ;;  %v6721_v59 = vld [vmem:[#allocation10_spill] sm:$0xff] }
  0xb7   : > { %4866 = vmatprep.subr.bf16.mxu0 %v5337_v49 }
  0xb8   : > { %4611 = vmatmul.mubr.bf16.gmra.mrb[28].mxu1 %v6196_v38 }
  0xb9   : > { %4835 = vmatmul.mubr.bf16.gmra.mrb[12].mxu0 %v6162_v33  ;;  %4630 = vmatprep.mubr.bf16.mxu1 %v3960_v22  ;;  %v6723_v22 = vld [vmem:[#allocation12_spill] sm:$0xff] }
  0xba   : > { %4838 = vmatprep.mubr.bf16.mxu0 %v6173_v45  ;;  %4867 = vmatpush3.bf16.msra.mxu0 %v5337_v49  ;;  %v6722_v49 = vld [vmem:[#allocation11_spill] sm:$0xff] }
  0xbb   : > { %4868 = vmatprep.subr.bf16.mxu0 %v5341_v8 }
  0xbe   : > { %4869 = vmatpush3.bf16.msra.mxu0 %v5341_v8  ;;  %v6724_v8 = vld [vmem:[#allocation13_spill] sm:$0xff] }
  0xbf   : > { %4902 = vmatprep.subr.bf16.mxu0 %v5343_v56 }
  0xc0   : > { %4631 = vmatmul.mubr.bf16.vlgmr.msra.gmra.mrb[0].mxu1 %v5854_v39  ;;  %v5342_v39 = vld [vmem:[%s6677_s1 + $0xe0] sm:$0xff]  }
  0xc1   : > { %4839 = vmatmul.mubr.bf16.gmra.mrb[16].mxu0 %v6177_v40  ;;  %4663 = vmatpush3.bf16.msra.mxu1 %v5332_v62  ;;  %v6363_v62 = vld [vmem:[%s5554_s13 + $0xd0] sm:$0xf] }
  0xc2   : > { %4634 = vmatprep.mubr.bf16.mxu1 %v5900_v26  ;;  %4842 = vmatprep.mubr.bf16.mxu0 %v6181_v53  ;;  %v4076_v14 = vcombine.low %v6360_v0, %v6363_v62 }
  0xc3   : > { %4664 = vmatprep.subr.bf16.mxu1 %v5334_v36 }
  0xc5   : > { %4665 = vmatpush3.bf16.msra.mxu1 %v5334_v36  ;;  %v2851_v36 = vshll.u32 %v6360_v0, 16 }
  0xc6   : > { %4666 = vmatprep.subr.bf16.mxu1 %v5336_v6 }
  0xc8   : > { %4635 = vmatmul.mubr.bf16.gmra.mrb[4].mxu1 %v5940_v46 }
  0xc9   : > { %4843 = vmatmul.mubr.bf16.gmra.mrb[20].mxu0 %v6185_v9  ;;  %4638 = vmatprep.mubr.bf16.mxu1 %v5977_v44 }
  0xca   : > { %4846 = vmatprep.mubr.bf16.mxu0 %v6189_v16  ;;  %4667 = vmatpush3.bf16.msra.mxu1 %v5336_v6  ;;  %v2861_v6 = vshrl.u32 %v6363_v62, 16 }
  0xcb   : > { %4668 = vmatprep.subr.bf16.mxu1 %v5339_v10 }
  0xce   : > { %4669 = vmatpush3.bf16.msra.mxu1 %v5339_v10  ;;  %v6725_v10 = vld [vmem:[#allocation14_spill] sm:$0xff] }
  0xcf   : > { %4670 = vmatprep.subr.bf16.mxu1 %v5342_v39 }
  0xd0   : > { %4639 = vmatmul.mubr.bf16.gmra.mrb[8].mxu1 %v6010_v19 }
  0xd1   : > { %4847 = vmatmul.mubr.bf16.gmra.mrb[24].mxu0 %v6196_v38  ;;  %4642 = vmatprep.mubr.bf16.mxu1 %v6042_v35 }
  0xd2   : > { %4850 = vmatprep.mubr.bf16.mxu0 %v6350_v48  ;;  %4671 = vmatpush3.bf16.msra.mxu1 %v5342_v39 }
  0xd3   : > { %4672 = vmatprep.subr.bf16.mxu1 %v5344_v27 }
  0xd6   : > { %4673 = vmatpush3.bf16.msra.mxu1 %v5344_v27  ;;  %v2853_v27 = vrot.slane %v2851_v36, 5 }
  0xd7   : > { %4674 = vmatprep.subr.bf16.mxu1 %v5346_v24 }
  0xd8   : > { %4643 = vmatmul.mubr.bf16.gmra.mrb[12].mxu1 %v6076_v21 }
  0xd9   : > { %4851 = vmatmul.mubr.bf16.gmra.mrb[28].mxu0 %v4076_v14  ;;  %4646 = vmatprep.mubr.bf16.mxu1 %v6108_v58  ;;  %v2863_v14 = vrot.slane %v2861_v6, 4 }
  0xda   : > { %4870 = vmatprep.mubr.bf16.mxu0 %v5676_v51  ;;  %4675 = vmatpush3.bf16.msra.mxu1 %v5346_v24  ;;  %v6717_v51 = vld [vmem:[#allocation6_spill] sm:$0xff] }
  0xdb   : > { %4676 = vmatprep.subr.bf16.mxu1 %v5348_v7 }
  0xde   : > { %4677 = vmatpush3.bf16.msra.mxu1 %v5348_v7  ;;  %v5365_v7 = vld [vmem:[%s6677_s1 + $0x110] sm:$0xff]  }
  0xdf   : > { %4950 = vmatprep.subr.bf16.mxu1 %v5363_v1 }
  0xe0   : > { %4647 = vmatmul.mubr.bf16.gmra.mrb[16].mxu1 %v6113_v18 }
  0xe1   : > { %4871 = vmatmul.mubr.bf16.vlgmr.msra.gmra.mrb[0].mxu0 %v6716_v30  ;;  %4650 = vmatprep.mubr.bf16.mxu1 %v6133_v13 }
  0xe2   : > { %4903 = vmatpush3.bf16.msra.mxu0 %v5343_v56  ;;  %4874 = vmatprep.mubr.bf16.mxu0 %v6717_v51  ;;  %v2848_v56 = vshrl.u32 %v6360_v0, 16 }
  0xe3   : > { %4904 = vmatprep.subr.bf16.mxu0 %v5345_v20 }
  0xe4   : > { %v2850_v39 = vrot.slane %v2848_v56, 4  ;;  %v3603_v56 = vld [vmem:[%s6520_s23 + $0x8] sm:$0xff] }
  0xe6   : > { %4905 = vmatpush3.bf16.msra.mxu0 %v5345_v20  ;;  %v6726_v20 = vld [vmem:[#allocation15_spill] sm:$0xff] }
  0xe7   : > { %4906 = vmatprep.subr.bf16.mxu0 %v5347_v5 }
  0xe8   : > { %4651 = vmatmul.mubr.bf16.gmra.mrb[20].mxu1 %v6138_v29 }
  0xe9   : > { %4875 = vmatmul.mubr.bf16.gmra.mrb[4].mxu0 %v6718_v47  ;;  %4654 = vmatprep.mubr.bf16.mxu1 %v6191_v4 }
  0xea   : > { %4878 = vmatprep.mubr.bf16.mxu0 %v6719_v52  ;;  %4907 = vmatpush3.bf16.msra.mxu0 %v5347_v5  ;;  %v5366_v5 = vld [vmem:[%s6677_s1 + $0x118] sm:$0xff]  }
  0xeb   : > { %4908 = vmatprep.subr.bf16.mxu0 %v5349_v32 }
  0xee   : > { %4909 = vmatpush3.bf16.msra.mxu0 %v5349_v32 }
  0xef   : > { %4910 = vmatprep.subr.bf16.mxu0 %v5350_v2 }
  0xf0   : > { %4655 = vmatmul.mubr.bf16.gmra.mrb[24].mxu1 %v6198_v3 }
  0xf1   : > { %4879 = vmatmul.mubr.bf16.gmra.mrb[8].mxu0 %v6720_v34  ;;  %4658 = vmatprep.mubr.bf16.mxu1 %v6232_v50 }
  0xf2   : > { %4882 = vmatprep.mubr.bf16.mxu0 %v6721_v59  ;;  %4911 = vmatpush3.bf16.msra.mxu0 %v5350_v2 }
  0xf3   : > { %4912 = vmatprep.subr.bf16.mxu0 %v5351_v54 }
  0xf6   : > { %4913 = vmatpush3.bf16.msra.mxu0 %v5351_v54  ;;  %v5368_v54 = vld [vmem:[%s6677_s1 + $0x128] sm:$0xff]  }
  0xf7   : > { %4914 = vmatprep.subr.bf16.mxu0 %v5352_v63 }
  0xf8   : > { %4659 = vmatmul.mubr.bf16.gmra.mrb[28].mxu1 %v6242_v42 }
  0xf9   : > { %4883 = vmatmul.mubr.bf16.gmra.mrb[12].mxu0 %v6722_v49  ;;  %4678 = vmatprep.mubr.bf16.mxu1 %v5612_v43  ;;  %v2857_v43 = vshll.u32 %v6363_v62, 16 }
  0xfa   : > { %4886 = vmatprep.mubr.bf16.mxu0 %v6723_v22  ;;  %4915 = vmatpush3.bf16.msra.mxu0 %v5352_v63 }
  0xfb   : > { %4916 = vmatprep.subr.bf16.mxu0 %v5353_v25  ;;  %v2859_v24 = vrot.slane %v2857_v43, 5 }
  0xfd   : > { %v2864_v30 = vor.u32 %v2863_v14, %v2859_v24 }
  0xfe   : > { %4917 = vmatpush3.bf16.msra.mxu0 %v5353_v25 }
  0xff   : > { %v2865_v47 = vrot.slane %v2864_v30, 4 }
 0x100   : > { %4679 = vmatmul.mubr.bf16.vlgmr.msra.gmra.mrb[0].mxu1 %v5688_v60  ;;  %v5364_v60 = vld [vmem:[%s6677_s1 + $0x108] sm:$0xff]  }
 0x101   : > { %4887 = vmatmul.mubr.bf16.gmra.mrb[16].mxu0 %v6724_v8  ;;  %4958 = vmatpush3.bf16.msra.mxu1 %v5363_v1  ;;  %v2854_v1 = vor.u32 %v2853_v27, %v2850_v39 }
 0x102   : > { %4682 = vmatprep.mubr.bf16.mxu1 %v5759_v11  ;;  %4890 = vmatprep.mubr.bf16.mxu0 %v6725_v10  ;;  %v6431_v11 = vld [vmem:[%s5554_s13 + $0xd4] sm:$0x1] }
 0x103   : > { %4951 = vmatprep.subr.bf16.mxu1 %v5364_v60  ;;  %v2867_v51 = vshll.u32 %v6431_v11, 16  ;;  %v2855_v32 = vrot.slane %v2854_v1, 4 }
 0x105   : > { %4959 = vmatpush3.bf16.msra.mxu1 %v5364_v60  ;;  %v2869_v52 = vrot.slane %v2867_v51, 5 }
 0x106   : > { %4952 = vmatprep.subr.bf16.mxu1 %v5365_v7 }
 0x107   : > { %v2870_v2 = vsel %vm5599_vm2, %v2865_v47, %v2869_v52 }
 0x108   : > { %4683 = vmatmul.mubr.bf16.gmra.mrb[4].mxu1 %v5763_v15  ;;  %v5367_v15 = vld [vmem:[%s6677_s1 + $0x120] sm:$0xff]  }
 0x109   : > { %4891 = vmatmul.mubr.bf16.gmra.mrb[20].mxu0 %v6726_v20  ;;  %4686 = vmatprep.mubr.bf16.mxu1 %v6230_v12  ;;  %v2860_v12 = vsel %vm5599_vm2, %v2855_v32, %v2859_v24  ;;  %v3606_v32 = vld [vmem:[%s6520_s23 + $0x20] sm:$0xff] }
 0x10a   : > { %4894 = vmatprep.mubr.bf16.mxu0 %v6072_v55  ;;  %4960 = vmatpush3.bf16.msra.mxu1 %v5365_v7  ;;  %v4101_v34 = vcombine.low %v2860_v12, %v2870_v2  ;;  %v3608_v2 = vld [vmem:[%s6520_s23 + $0x30] sm:$0xff] }
 0x10b   : > { %4953 = vmatprep.subr.bf16.mxu1 %v5366_v5 }
 0x10e   : > { %4961 = vmatpush3.bf16.msra.mxu1 %v5366_v5 }
 0x10f   : > { %4954 = vmatprep.subr.bf16.mxu1 %v5367_v15 }
 0x110   : > { %4687 = vmatmul.mubr.bf16.gmra.mrb[8].mxu1 %v6236_v31  ;;  %v5369_v31 = vld [vmem:[%s6677_s1 + $0x130] sm:$0xff]  }
 0x111   : > { %4895 = vmatmul.mubr.bf16.gmra.mrb[24].mxu0 %v6106_v61  ;;  %4690 = vmatprep.mubr.bf16.mxu1 %v6261_v41  ;;  %v6526_v41 = vld [vmem:[%s6678_s2] ss:$0 sm:$0xff] }
 0x112   : > { %4898 = vmatprep.mubr.bf16.mxu0 %v6269_v57  ;;  %4962 = vmatpush3.bf16.msra.mxu1 %v5367_v15 }
 0x113   : > { %4955 = vmatprep.subr.bf16.mxu1 %v5368_v54 }
 0x116   : > { %4963 = vmatpush3.bf16.msra.mxu1 %v5368_v54 }
 0x117   : > { %4956 = vmatprep.subr.bf16.mxu1 %v5369_v31 }
 0x118   : > { %4691 = vmatmul.mubr.bf16.gmra.mrb[12].mxu1 %v6151_v28 }
 0x119   : > { %4899 = vmatmul.mubr.bf16.gmra.mrb[28].mxu0 %v4101_v34  ;;  %4694 = vmatprep.mubr.bf16.mxu1 %v6162_v33 }
 0x11a   : > { %4918 = vmatprep.mubr.bf16.mxu0 %v5900_v26  ;;  %4964 = vmatpush3.bf16.msra.mxu1 %v5369_v31  ;;  %v3136_v26 = vrot.slane %v6363_v62, 5 }
 0x11b   : > { %4957 = vmatprep.subr.bf16.mxu1 %v5370_v37 }
 0x11e   : > { %4965 = vmatpush3.bf16.msra.mxu1 %v5370_v37  ;;  %v3607_v37 = vld [vmem:[%s6520_s23 + $0x28] sm:$0xff] }
 0x120   : > { %4695 = vmatmul.mubr.bf16.gmra.mrb[16].mxu1 %v6173_v45 }
 0x121   : > { %4919 = vmatmul.mubr.bf16.vlgmr.msra.gmra.mrb[0].mxu0 %v5940_v46  ;;  %4698 = vmatprep.mubr.bf16.mxu1 %v6177_v40  ;;  %v4110_v46 = vrot.slane %v6360_v0, 9  ;;  %v3602_v0 = vld [vmem:[%s6520_s23] sm:$0xff] }
 0x122   : > { %4922 = vmatprep.mubr.bf16.mxu0 %v5977_v44  ;;  %v3138_v44 = vrot.slane %v3136_v26, 4 }
 0x128   : > { %4699 = vmatmul.mubr.bf16.gmra.mrb[20].mxu1 %v6181_v53 }
 0x129   : > { %4923 = vmatmul.mubr.bf16.gmra.mrb[4].mxu0 %v6010_v19  ;;  %4702 = vmatprep.mubr.bf16.mxu1 %v6185_v9  ;;  %v3139_v19 = vrot.slane %v6431_v11, 5 }
 0x12a   : > { %4926 = vmatprep.mubr.bf16.mxu0 %v6042_v35  ;;  %v3137_v35 = vsel %vm5806_vm5, %v4110_v46, %v3136_v26 }
 0x130   : > { %4703 = vmatmul.mubr.bf16.gmra.mrb[24].mxu1 %v6189_v16 }
 0x131   : > { %4927 = vmatmul.mubr.bf16.gmra.mrb[8].mxu0 %v6076_v21  ;;  %4706 = vmatprep.mubr.bf16.mxu1 %v6196_v38  ;;  %v3140_v21 = vsel %vm5806_vm5, %v3138_v44, %v3139_v19 }
 0x132   : > { %4930 = vmatprep.mubr.bf16.mxu0 %v6108_v58  ;;  %v4127_v58 = vcombine.low %v3137_v35, %v3140_v21 }
 0x138   : > { %4707 = vmatmul.mubr.bf16.gmra.mrb[28].mxu1 %v6350_v48 }
 0x139   : > { %4931 = vmatmul.mubr.bf16.gmra.mrb[12].mxu0 %v6113_v18  ;;  %4742 = vmatprep.mubr.bf16.mxu1 %v6722_v49 }
 0x13a   : > { %4934 = vmatprep.mubr.bf16.mxu0 %v6133_v13 }
 0x140   : > { %4743 = vmatmul.mubr.bf16.vlgmr.msra.gmra.mrb[16].mxu1 %v6723_v22  ;;  %v3604_v22 = vld [vmem:[%s6520_s23 + $0x10] sm:$0xff] }
 0x141   : > { %4935 = vmatmul.mubr.bf16.gmra.mrb[16].mxu0 %v6138_v29  ;;  %4746 = vmatprep.mubr.bf16.mxu1 %v6724_v8 }
 0x142   : > { %4938 = vmatprep.mubr.bf16.mxu0 %v6191_v4 }
 0x148   : > { %4747 = vmatmul.mubr.bf16.gmra.mrb[20].mxu1 %v6725_v10  ;;  %v3605_v10 = vld [vmem:[%s6520_s23 + $0x18] sm:$0xff] }
 0x149   : > { %4939 = vmatmul.mubr.bf16.gmra.mrb[20].mxu0 %v6198_v3  ;;  %4750 = vmatprep.mubr.bf16.mxu1 %v6726_v20 }
 0x14a   : > { %4942 = vmatprep.mubr.bf16.mxu0 %v6232_v50 }
 0x150   : > { %4751 = vmatmul.mubr.bf16.gmra.mrb[24].mxu1 %v6072_v55 }
 0x151   : > { %4943 = vmatmul.mubr.bf16.gmra.mrb[24].mxu0 %v6242_v42  ;;  %4754 = vmatprep.mubr.bf16.mxu1 %v6106_v61 }
 0x152   : > { %4946 = vmatprep.mubr.bf16.mxu0 %v6263_v17 }
 0x158   : > { %4755 = vmatmul.mubr.bf16.gmra.mrb[28].mxu1 %v6269_v57 }
 0x159   : > { %4947 = vmatmul.mubr.bf16.gmra.mrb[28].mxu0 %v4127_v58  ;;  %v3609_v58 = vld [vmem:[%s6520_s23 + $0x38] sm:$0xff] }
 0x1d3   : > { %v4680_v18 = vpop.f32.mrb[0].mxu1 }
 0x1d4   : > { %v1868_v13 = vpop.f32.mrb[1].mxu1 }
 0x1d5   : > { %v4681_v55 = vpop.f32.mrb[2].mxu1 }
 0x1d6   : > { %v1871_v29 = vpop.f32.mrb[3].mxu1 }
 0x1db   : > { %v4684_v28 = vpop.f32.mrb[4].mxu1 }
 0x1dc   : > { %v1884_v33 = vpop.f32.mrb[5].mxu1 }
 0x1dd   : > { %v4685_v61 = vpop.f32.mrb[6].mxu1 }
 0x1de   : > { %v1887_v45 = vpop.f32.mrb[7].mxu1 }
 0x1e3   : > { %v6500_v40 = vpop.f32.mrb[8].mxu1 }
 0x1e4   : > { %v6502_v53 = vpop.f32.mrb[9].mxu1 }
 0x1e5   : > { %v6504_v23 = vpop.f32.mrb[10].mxu1 }
 0x1e6   : > { %v6507_v9 = vpop.f32.mrb[11].mxu1 }
 0x1eb   : > { %v6509_v16 = vpop.f32.mrb[12].mxu1 }
 0x1ec   : > { %v6511_v4 = vpop.f32.mrb[13].mxu1 }
 0x1ed   : > { %v6513_v38 = vpop.f32.mrb[14].mxu1 }
 0x1ee   : > { %v6515_v3 = vpop.f32.mrb[15].mxu1 }
 0x1f4   : > { %v4920_v50 = vpop.f32.mrb[0].mxu0 }
 0x1f5   : > { %v4966_v42 = vadd.f32 %v4920_v50, %v4680_v18  ;;  %v3244_v17 = vpop.f32.mrb[1].mxu0 }
 0x1f6   : > { %v4967_v57 = vadd.f32 %v3244_v17, %v1868_v13  ;;  %v4921_v48 = vpop.f32.mrb[2].mxu0 }
 0x1f7   : > { %v4968_v62 = vadd.f32 %v4921_v48, %v4681_v55  ;;  %v3247_v59 = vpop.f32.mrb[3].mxu0  ;;  %v3412_v63 = vadd.f32 %v4966_v42, %v6526_v41 }
 0x1f8   : > { %v3410_v25 = vadd.f32 %v4967_v57, %v6526_v41  ;;  %v4969_v49 = vadd.f32 %v3247_v59, %v1871_v29 }
 0x1f9   : > { %v3413_v8 = vadd.f32 %v4968_v62, %v6526_v41  ;;  %v3636_v60 = vsub.f32 %v3412_v63, %v3604_v22 }
 0x1fa   : > { %v3634_v36 = vsub.f32 %v3410_v25, %v3602_v0  ;;  %v3411_v6 = vadd.f32 %v4969_v49, %v6526_v41  ;;  %v3610_v0 = vld [vmem:[%s6520_s23 + $0x40] sm:$0xff]  ;;  %v3612_v49 = vld [vmem:[%s6520_s23 + $0x50] sm:$0xff] }
 0x1fb   : > { %v4215_v43 = vpack.c.bf16 %v3413_v8, %v3412_v63  ;;  %v3637_v20 = vsub.f32 %v3413_v8, %v3605_v10  ;;  %v3668_v15 = vmul.f32 %v3636_v60, %v3636_v60  ;;  %v3613_v60 = vld [vmem:[%s6520_s23 + $0x58] sm:$0xff] }
 0x1fc   : > { %v4210_v39 = vpack.c.bf16 %v3411_v6, %v3410_v25  ;;  %v3635_v27 = vsub.f32 %v3411_v6, %v3603_v56  ;;  %v4924_v24 = vpop.f32.mrb[4].mxu0  ;;  %v3666_v11 = vmul.f32 %v3634_v36, %v3634_v36  ;;  %v3611_v56 = vld [vmem:[%s6520_s23 + $0x48] sm:$0xff] }
 0x1fd   : > { %4287 = vst [vmem:[%s6538_s6 + $0x8] sm:$0xff] %v4215_v43   ;;  %v4970_v14 = vadd.f32 %v4924_v24, %v4684_v28  ;;  %v3260_v7 = vpop.f32.mrb[5].mxu0  ;;  %v3669_v26 = vmul.f32 %v3637_v20, %v3637_v20 }
 0x1fe   : > { %4211 = vst [vmem:[%s6538_s6] sm:$0xff] %v4210_v39   ;;  %v3667_v1 = vmul.f32 %v3635_v27, %v3635_v27  ;;  %v4971_v30 = vadd.f32 %v3260_v7, %v1884_v33  ;;  %v4925_v51 = vpop.f32.mrb[6].mxu0 }
 0x1ff   : > { %v3416_v5 = vadd.f32 %v4970_v14, %v6526_v41  ;;  %v4972_v47 = vadd.f32 %v4925_v51, %v4685_v61  ;;  %v3263_v52 = vpop.f32.mrb[7].mxu0 }
 0x200   : > { %v3698_v12 = vadd.f32 %v3667_v1, %v3666_v11  ;;  %v3414_v54 = vadd.f32 %v4971_v30, %v6526_v41  ;;  %v4973_v34 = vadd.f32 %v3263_v52, %v1887_v45 }
 0x201   : > { %v3417_v31 = vadd.f32 %v4972_v47, %v6526_v41  ;;  %v3640_v35 = vsub.f32 %v3416_v5, %v3608_v2  ;;  %v3614_v47 = vld [vmem:[%s6520_s23 + $0x60] sm:$0xff] }
 0x202   : > { %v3699_v46 = vadd.f32 %v3698_v12, %v3668_v15  ;;  %v3638_v44 = vsub.f32 %v3414_v54, %v3606_v32  ;;  %v3415_v19 = vadd.f32 %v4973_v34, %v6526_v41 }
 0x203   : > { %v4225_v21 = vpack.c.bf16 %v3417_v31, %v3416_v5  ;;  %v3641_v50 = vsub.f32 %v3417_v31, %v3609_v58  ;;  %v3672_v63 = vmul.f32 %v3640_v35, %v3640_v35  ;;  %v3617_v35 = vld [vmem:[%s6520_s23 + $0x78] sm:$0xff] }
 0x204   : > { %v3670_v18 = vmul.f32 %v3638_v44, %v3638_v44  ;;  %v3700_v13 = vadd.f32 %v3699_v46, %v3669_v26  ;;  %v4220_v55 = vpack.c.bf16 %v3415_v19, %v3414_v54  ;;  %v3639_v29 = vsub.f32 %v3415_v19, %v3607_v37  ;;  %v4928_v28 = vpop.f32.mrb[8].mxu0  ;;  %v3616_v54 = vld [vmem:[%s6520_s23 + $0x70] sm:$0xff]  ;;  %v3615_v37 = vld [vmem:[%s6520_s23 + $0x68] sm:$0xff] }
 0x205   : > { %4289 = vst [vmem:[%s6538_s6 + $0x18] sm:$0xff] %v4225_v21   ;;  %v4974_v33 = vadd.f32 %v4928_v28, %v6500_v40  ;;  %v3276_v61 = vpop.f32.mrb[9].mxu0 }
 0x206   : > { %v3701_v45 = vadd.f32 %v3700_v13, %v3670_v18  ;;  %4288 = vst [vmem:[%s6538_s6 + $0x10] sm:$0xff] %v4220_v55   ;;  %v3671_v42 = vmul.f32 %v3639_v29, %v3639_v29  ;;  %v4975_v17 = vadd.f32 %v3276_v61, %v6502_v53  ;;  %v4929_v57 = vpop.f32.mrb[10].mxu0  ;;  %v3673_v53 = vmul.f32 %v3641_v50, %v3641_v50 }
 0x207   : > { %v3420_v48 = vadd.f32 %v4974_v33, %v6526_v41  ;;  %v4976_v62 = vadd.f32 %v4929_v57, %v6504_v23  ;;  %v3279_v59 = vpop.f32.mrb[11].mxu0 }
 0x208   : > { %v3702_v25 = vadd.f32 %v3701_v45, %v3671_v42  ;;  %v3418_v40 = vadd.f32 %v4975_v17, %v6526_v41  ;;  %v4977_v22 = vadd.f32 %v3279_v59, %v6507_v9 }
 0x209   : > { %v3421_v8 = vadd.f32 %v4976_v62, %v6526_v41  ;;  %v3644_v10 = vsub.f32 %v3420_v48, %v3612_v49 }
 0x20a   : > { %v3703_v36 = vadd.f32 %v3702_v25, %v3672_v63  ;;  %v3642_v6 = vsub.f32 %v3418_v40, %v3610_v0  ;;  %v3419_v43 = vadd.f32 %v4977_v22, %v6526_v41  ;;  %v3618_v0 = vld [vmem:[%s6520_s23 + $0x80] sm:$0xff] }
 0x20b   : > { %v4235_v23 = vpack.c.bf16 %v3421_v8, %v3420_v48  ;;  %v3645_v1 = vsub.f32 %v3421_v8, %v3613_v60  ;;  %v3676_v12 = vmul.f32 %v3644_v10, %v3644_v10 }
 0x20c   : > { %v3674_v39 = vmul.f32 %v3642_v6, %v3642_v6  ;;  %v3704_v27 = vadd.f32 %v3703_v36, %v3673_v53  ;;  %v4230_v24 = vpack.c.bf16 %v3419_v43, %v3418_v40  ;;  %v3643_v14 = vsub.f32 %v3419_v43, %v3611_v56  ;;  %v4932_v7 = vpop.f32.mrb[12].mxu0  ;;  %v3620_v40 = vld [vmem:[%s6520_s23 + $0x90] sm:$0xff]  ;;  %v3619_v53 = vld [vmem:[%s6520_s23 + $0x88] sm:$0xff] }
 0x20d   : > { %4291 = vst [vmem:[%s6538_s6 + $0x28] sm:$0xff] %v4235_v23   ;;  %v4978_v9 = vadd.f32 %v4932_v7, %v6509_v16  ;;  %v3292_v11 = vpop.f32.mrb[13].mxu0 }
 0x20e   : > { %v3705_v20 = vadd.f32 %v3704_v27, %v3674_v39  ;;  %4290 = vst [vmem:[%s6538_s6 + $0x20] sm:$0xff] %v4230_v24   ;;  %v3675_v30 = vmul.f32 %v3643_v14, %v3643_v14  ;;  %v4979_v51 = vadd.f32 %v3292_v11, %v6511_v4  ;;  %v4933_v5 = vpop.f32.mrb[14].mxu0  ;;  %v3677_v4 = vmul.f32 %v3645_v1, %v3645_v1  ;;  %v3621_v39 = vld [vmem:[%s6520_s23 + $0x98] sm:$0xff] }
 0x20f   : > { %v3424_v32 = vadd.f32 %v4978_v9, %v6526_v41  ;;  %v4980_v52 = vadd.f32 %v4933_v5, %v6513_v38  ;;  %v3295_v15 = vpop.f32.mrb[15].mxu0 }
 0x210   : > { %v3706_v2 = vadd.f32 %v3705_v20, %v3675_v30  ;;  %v3422_v16 = vadd.f32 %v4979_v51, %v6526_v41  ;;  %v4981_v34 = vadd.f32 %v3295_v15, %v6515_v3 }
 0x211   : > { %v3425_v31 = vadd.f32 %v4980_v52, %v6526_v41  ;;  %v3648_v19 = vsub.f32 %v3424_v32, %v3616_v54 }
 0x212   : > { %v3707_v26 = vadd.f32 %v3706_v2, %v3676_v12  ;;  %v3646_v46 = vsub.f32 %v3422_v16, %v3614_v47  ;;  %v3423_v44 = vadd.f32 %v4981_v34, %v6526_v41  ;;  %v3622_v2 = vld [vmem:[%s6520_s23 + $0xa0] sm:$0xff] }
 0x213   : > { %v4245_v38 = vpack.c.bf16 %v3425_v31, %v3424_v32  ;;  %v4744_v55 = vpop.f32.mrb[16].mxu1  ;;  %v3649_v45 = vsub.f32 %v3425_v31, %v3617_v35  ;;  %v3680_v25 = vmul.f32 %v3648_v19, %v3648_v19  ;;  %v3623_v19 = vld [vmem:[%s6520_s23 + $0xa8] sm:$0xff] }
 0x214   : > { %v3678_v21 = vmul.f32 %v3646_v46, %v3646_v46  ;;  %v3708_v58 = vadd.f32 %v3707_v26, %v3677_v4  ;;  %v4240_v18 = vpack.c.bf16 %v3423_v44, %v3422_v16  ;;  %v3647_v13 = vsub.f32 %v3423_v44, %v3615_v37  ;;  %v4936_v3 = vpop.f32.mrb[16].mxu0  ;;  %v2218_v28 = vpop.f32.mrb[17].mxu1  ;;  %v3624_v4 = vld [vmem:[%s6520_s23 + $0xb0] sm:$0xff] }
 0x215   : > { %4293 = vst [vmem:[%s6538_s6 + $0x38] sm:$0xff] %v4245_v38   ;;  %v4982_v29 = vadd.f32 %v4936_v3, %v4744_v55  ;;  %v3308_v33 = vpop.f32.mrb[17].mxu0  ;;  %v4745_v17 = vpop.f32.mrb[18].mxu1  ;;  %v3681_v36 = vmul.f32 %v3649_v45, %v3649_v45  ;;  %v3625_v55 = vld [vmem:[%s6520_s23 + $0xb8] sm:$0xff] }
 0x216   : > { %v3709_v61 = vadd.f32 %v3708_v58, %v3678_v21  ;;  %4292 = vst [vmem:[%s6538_s6 + $0x30] sm:$0xff] %v4240_v18   ;;  %v3679_v50 = vmul.f32 %v3647_v13, %v3647_v13  ;;  %v4983_v42 = vadd.f32 %v3308_v33, %v2218_v28  ;;  %v4937_v57 = vpop.f32.mrb[18].mxu0  ;;  %v2221_v59 = vpop.f32.mrb[19].mxu1 }
 0x217   : > { %v3428_v48 = vadd.f32 %v4982_v29, %v6526_v41  ;;  %v4984_v62 = vadd.f32 %v4937_v57, %v4745_v17  ;;  %v3311_v63 = vpop.f32.mrb[19].mxu0 }
 0x218   : > { %v3710_v49 = vadd.f32 %v3709_v61, %v3679_v50  ;;  %v3426_v22 = vadd.f32 %v4983_v42, %v6526_v41  ;;  %v4985_v8 = vadd.f32 %v3311_v63, %v2221_v59 }
 0x219   : > { %v3429_v56 = vadd.f32 %v4984_v62, %v6526_v41  ;;  %v3652_v23 = vsub.f32 %v3428_v48, %v3620_v40 }
 0x21a   : > { %v3711_v6 = vadd.f32 %v3710_v49, %v3680_v25  ;;  %v3650_v43 = vsub.f32 %v3426_v22, %v3618_v0  ;;  %v3427_v10 = vadd.f32 %v4985_v8, %v6526_v41  ;;  %v3626_v49 = vld [vmem:[%s6520_s23 + $0xc0] sm:$0xff] }
 0x21b   : > { %v4255_v60 = vpack.c.bf16 %v3429_v56, %v3428_v48  ;;  %v4748_v9 = vpop.f32.mrb[20].mxu1  ;;  %v3653_v5 = vsub.f32 %v3429_v56, %v3621_v39  ;;  %v3684_v31 = vmul.f32 %v3652_v23, %v3652_v23  ;;  %v3627_v23 = vld [vmem:[%s6520_s23 + $0xc8] sm:$0xff] }
 0x21c   : > { %v3682_v27 = vmul.f32 %v3650_v43, %v3650_v43  ;;  %v3712_v24 = vadd.f32 %v3711_v6, %v3681_v36  ;;  %v4250_v14 = vpack.c.bf16 %v3427_v10, %v3426_v22  ;;  %v3651_v7 = vsub.f32 %v3427_v10, %v3619_v53  ;;  %v4940_v11 = vpop.f32.mrb[20].mxu0  ;;  %v2234_v1 = vpop.f32.mrb[21].mxu1  ;;  %v3628_v36 = vld [vmem:[%s6520_s23 + $0xd0] sm:$0xff] }
 0x21d   : > { %4295 = vst [vmem:[%s6538_s6 + $0x48] sm:$0xff] %v4255_v60   ;;  %v4986_v20 = vadd.f32 %v4940_v11, %v4748_v9  ;;  %v3324_v30 = vpop.f32.mrb[21].mxu0  ;;  %v4749_v52 = vpop.f32.mrb[22].mxu1  ;;  %v3685_v38 = vmul.f32 %v3653_v5, %v3653_v5  ;;  %v3629_v9 = vld [vmem:[%s6520_s23 + $0xd8] sm:$0xff] }
 0x21e   : > { %v3713_v51 = vadd.f32 %v3712_v24, %v3682_v27  ;;  %4294 = vst [vmem:[%s6538_s6 + $0x40] sm:$0xff] %v4250_v14   ;;  %v3683_v32 = vmul.f32 %v3651_v7, %v3651_v7  ;;  %v4987_v47 = vadd.f32 %v3324_v30, %v2234_v1  ;;  %v4941_v15 = vpop.f32.mrb[22].mxu0  ;;  %v2237_v16 = vpop.f32.mrb[23].mxu1 }
 0x21f   : > { %v3432_v12 = vadd.f32 %v4986_v20, %v6526_v41  ;;  %v4988_v54 = vadd.f32 %v4941_v15, %v4749_v52  ;;  %v3327_v34 = vpop.f32.mrb[23].mxu0 }
 0x220   : > { %v3714_v37 = vadd.f32 %v3713_v51, %v3683_v32  ;;  %v3430_v26 = vadd.f32 %v4987_v47, %v6526_v41  ;;  %v4989_v46 = vadd.f32 %v3327_v34, %v2237_v16 }
 0x221   : > { %v3433_v44 = vadd.f32 %v4988_v54, %v6526_v41  ;;  %v3656_v18 = vsub.f32 %v3432_v12, %v3624_v4 }
 0x222   : > { %v3715_v35 = vadd.f32 %v3714_v37, %v3684_v31  ;;  %v3654_v21 = vsub.f32 %v3430_v26, %v3622_v2  ;;  %v3431_v58 = vadd.f32 %v4989_v46, %v6526_v41  ;;  %v3630_v37 = vld [vmem:[%s6520_s23 + $0xe0] sm:$0xff] }
 0x223   : > { %v4265_v13 = vpack.c.bf16 %v3433_v44, %v3432_v12  ;;  %v4752_v61 = vpop.f32.mrb[24].mxu1  ;;  %v3657_v48 = vsub.f32 %v3433_v44, %v3625_v55  ;;  %v3688_v56 = vmul.f32 %v3656_v18, %v3656_v18  ;;  %v3631_v18 = vld [vmem:[%s6520_s23 + $0xe8] sm:$0xff] }
 0x224   : > { %v3686_v3 = vmul.f32 %v3654_v21, %v3654_v21  ;;  %v3716_v29 = vadd.f32 %v3715_v35, %v3685_v38  ;;  %v4260_v28 = vpack.c.bf16 %v3431_v58, %v3430_v26  ;;  %v3655_v33 = vsub.f32 %v3431_v58, %v3623_v19  ;;  %v4944_v45 = vpop.f32.mrb[24].mxu0  ;;  %v2250_v42 = vpop.f32.mrb[25].mxu1  ;;  %v3632_v38 = vld [vmem:[%s6520_s23 + $0xf0] sm:$0xff] }
 0x225   : > { %4297 = vst [vmem:[%s6538_s6 + $0x58] sm:$0xff] %v4265_v13   ;;  %v4990_v50 = vadd.f32 %v4944_v45, %v4752_v61  ;;  %v3340_v17 = vpop.f32.mrb[25].mxu0  ;;  %v4753_v59 = vpop.f32.mrb[26].mxu1  ;;  %v3689_v60 = vmul.f32 %v3657_v48, %v3657_v48  ;;  %v3633_v61 = vld [vmem:[%s6520_s23 + $0xf8] sm:$0xff] }
 0x226   : > { %v3717_v57 = vadd.f32 %v3716_v29, %v3686_v3  ;;  %4296 = vst [vmem:[%s6538_s6 + $0x50] sm:$0xff] %v4260_v28   ;;  %v3687_v0 = vmul.f32 %v3655_v33, %v3655_v33  ;;  %v4991_v62 = vadd.f32 %v3340_v17, %v2250_v42  ;;  %v4945_v63 = vpop.f32.mrb[26].mxu0  ;;  %v2253_v22 = vpop.f32.mrb[27].mxu1 }
 0x227   : > { %v3436_v25 = vadd.f32 %v4990_v50, %v6526_v41  ;;  %v4992_v40 = vadd.f32 %v4945_v63, %v4753_v59  ;;  %v3343_v8 = vpop.f32.mrb[27].mxu0 }
 0x228   : > { %v3718_v53 = vadd.f32 %v3717_v57, %v3687_v0  ;;  %v3434_v6 = vadd.f32 %v4991_v62, %v6526_v41  ;;  %v4993_v43 = vadd.f32 %v3343_v8, %v2253_v22 }
 0x229   : > { %v3437_v10 = vadd.f32 %v4992_v40, %v6526_v41  ;;  %v3660_v14 = vsub.f32 %v3436_v25, %v3628_v36 }
 0x22a   : > { %v3719_v39 = vadd.f32 %v3718_v53, %v3688_v56  ;;  %v3658_v27 = vsub.f32 %v3434_v6, %v3626_v49  ;;  %v3435_v24 = vadd.f32 %v4993_v43, %v6526_v41 }
 0x22b   : > { %v4275_v7 = vpack.c.bf16 %v3437_v10, %v3436_v25  ;;  %v4756_v51 = vpop.f32.mrb[28].mxu1  ;;  %v3661_v12 = vsub.f32 %v3437_v10, %v3629_v9  ;;  %v3692_v44 = vmul.f32 %v3660_v14, %v3660_v14 }
 0x22c   : > { %v3690_v11 = vmul.f32 %v3658_v27, %v3658_v27  ;;  %v3720_v20 = vadd.f32 %v3719_v39, %v3689_v60  ;;  %v4270_v1 = vpack.c.bf16 %v3435_v24, %v3434_v6  ;;  %v3659_v30 = vsub.f32 %v3435_v24, %v3627_v23  ;;  %v4948_v5 = vpop.f32.mrb[28].mxu0  ;;  %v2266_v47 = vpop.f32.mrb[29].mxu1 }
 0x22d   : > { %4299 = vst [vmem:[%s6538_s6 + $0x68] sm:$0xff] %v4275_v7   ;;  %v4994_v32 = vadd.f32 %v4948_v5, %v4756_v51  ;;  %v3356_v52 = vpop.f32.mrb[29].mxu0  ;;  %v4757_v16 = vpop.f32.mrb[30].mxu1  ;;  %v3693_v13 = vmul.f32 %v3661_v12, %v3661_v12 }
 0x22e   : > { %v3721_v15 = vadd.f32 %v3720_v20, %v3690_v11  ;;  %4298 = vst [vmem:[%s6538_s6 + $0x60] sm:$0xff] %v4270_v1   ;;  %v3691_v2 = vmul.f32 %v3659_v30, %v3659_v30  ;;  %v4995_v54 = vadd.f32 %v3356_v52, %v2266_v47  ;;  %v4949_v34 = vpop.f32.mrb[30].mxu0  ;;  %v2269_v26 = vpop.f32.mrb[31].mxu1 }
 0x22f   : > { %v3440_v31 = vadd.f32 %v4994_v32, %v6526_v41  ;;  %v4996_v4 = vadd.f32 %v4949_v34, %v4757_v16  ;;  %v3359_v46 = vpop.f32.mrb[31].mxu0 }
 0x230   : > { %v3722_v19 = vadd.f32 %v3721_v15, %v3691_v2  ;;  %v3438_v35 = vadd.f32 %v4995_v54, %v6526_v41  ;;  %v4997_v21 = vadd.f32 %v3359_v46, %v2269_v26 }
 0x231   : > { %v3441_v58 = vadd.f32 %v4996_v4, %v6526_v41  ;;  %v3664_v28 = vsub.f32 %v3440_v31, %v3632_v38 }
 0x232   : > { %v3723_v55 = vadd.f32 %v3722_v19, %v3692_v44  ;;  %v3662_v3 = vsub.f32 %v3438_v35, %v3630_v37  ;;  %v3439_v29 = vadd.f32 %v4997_v21, %v6526_v41 }
 0x233   : > { %v4285_v33 = vpack.c.bf16 %v3441_v58, %v3440_v31  ;;  %v3665_v57 = vsub.f32 %v3441_v58, %v3633_v61 }
 0x234   : > { %v3694_v45 = vmul.f32 %v3662_v3, %v3662_v3  ;;  %v3724_v50 = vadd.f32 %v3723_v55, %v3693_v13  ;;  %v4280_v42 = vpack.c.bf16 %v3439_v29, %v3438_v35  ;;  %v3663_v17 = vsub.f32 %v3439_v29, %v3631_v18 }
 0x235   : > { %4301 = vst [vmem:[%s6538_s6 + $0x78] sm:$0xff] %v4285_v33  }
 0x236   : > { %v3725_v41 = vadd.f32 %v3724_v50, %v3694_v45  ;;  %4300 = vst [vmem:[%s6538_s6 + $0x70] sm:$0xff] %v4280_v42   ;;  %v3695_v48 = vmul.f32 %v3663_v17, %v3663_v17 }
 0x237   : > { %5384 = shalt.err (!%p5381_p4)
}
 0x238   : > { %s5385_s23 = scalar_lea.hbm %s6623_s22, 2048  ;;  %s5389_s13 = scalar_lea.hbm %s6680_s4, 4096 }
 0x239   : > { %p5386_p7 = scmp.ne.s32.totalorder %s6623_s22, %s5385_s23  ;;  %p5390_p10 = scmp.lt.u32.totalorder %s6623_s22, %s6680_s4 }
 0x23a   : > { %p5391_p11 = scmp.lt.u32.totalorder %s5389_s13, %s5385_s23  ;;  %p5393_p13 = scmp.lt.u32.totalorder %s5385_s23, %s6623_s22 }
 0x23b   : > { %p5387_p8 = pnand %p5386_p7, %p5506_p5 }
 0x23c   : > { %p5392_p12 = por %p5391_p11, %p5390_p10 }
 0x23d   : > { %p5388_p9 = pneg %p5387_p8 }
 0x23e   : > { %p5394_p0 = por %p5393_p13, %p5392_p12 }
 0x240   : > { %p5395_p1 = pnand %p5394_p0, %p5388_p9 }
 0x242   : > { %5398 = shalt.err (!%p5395_p1)
}
 0x243   : > { %s5436_s7 = smov 64   ;;  %s5437_s9 = smov 4   ;;  %v3696_v0 = vmul.f32 %v3664_v28, %v3664_v28  ;;  %v3726_v62 = vadd.f32 %v3725_v41, %v3695_v48  ;;  %v3697_v59 = vmul.f32 %v3665_v57, %v3665_v57 }
 0x244   : > { %5223 = dma.vmem_to_hbm [thread:$0]  (%p5506_p5), %s6625_s8, 2048, %s6623_s22, %s6631_s11, %s5436_s7, %s5436_s7, %s5437_s9  }
 0x245   : > { %v3727_v63 = vadd.f32 %v3726_v62, %v3696_v0  ;;  %s3863_s10 = sshll.u32 %s5536_s17, 3 }
 0x246   : > { %s256_s15 = scalar_lea.vmem %s6681_s5, %s3863_s10 }
 0x247   : > { %v3728_v25 = vadd.f32 %v3727_v63, %v3697_v59 }
 0x249   : > { %v3729_v49 = vrot.slane %v3728_v25, 4 }
 0x24b   : > { %v3730_v40 = vadd.f32 %v3729_v49, %v3728_v25 }
 0x24d   : > { %v3731_v22 = vrot.slane %v3730_v40, 2 }
 0x24f   : > { %v3732_v8 = vadd.f32 %v3731_v22, %v3730_v40 }
 0x251   : > { %v3733_v56 = vrot.slane %v3732_v8, 1 }
 0x253   : > { %v3734_v53 = vadd.f32 %v3733_v56, %v3732_v8 }
 0x255   : > { %3735 = vst [vmem:[%s256_s15] sm:$0xff] %v3734_v53 }
 0x256 PF: > { %p5229_p5 = scmp.ge.s32.totalorder %s5433_s21, 2  ;;  %s3772_s28 = sand.u32 1, %s5421_s18  }
 0x257   : > { %s3773_s8 = scalar_lea.sflag [#allocation3], %s3772_s28 }
 0x258   : > { %p5226_p2 = pnand %p5229_p5, %p5510_p6 }
 0x25a   : > { %5416 = dma.done.wait (!%p5226_p2), %s3773_s8, 2048  }
 0x25b   : > { %5418 = vsyncadd (!%p5226_p2), %s3773_s8, 4294965248  ;;  %p16_p3 = scmp.ge.s32.totalorder %s5493_s24, 4   ;;  %s6727_s18 = smov %s5425_s19 }
 0x25c   : > { %s6728_s19 = smov %s5429_s20  ;;  %s6729_s20 = smov %s5504_s27 }
 0x25d   : > { %s6730_s21 = smov %s5493_s24  ;;  %18 = sbr.rel (!%p16_p3) target bundleno = 3 (0x3), region = 94 }
 0x264   :  { %3785 = vsyncpa [#allocation3], 1 }
 0x265   :  { %3787 = vsyncpa [#allocation3 + $0x1], 1 }

// kernel: vqvae_forward.16
= control target key start
LH: loop header
LB: loop body
LE: loop exit
PB: predicated region body
PF: predicated region fallthrough
CT: control target
= control target key end

     0   :  { %s8537_s1 = inlined_call_operand.vmem [shape: bf16[4,4,128,128], index: 1, kind: input, shape index: {}]   ;;  %s8538_s0 = inlined_call_operand.vmem [shape: bf16[9,128,128], index: 0, kind: input, shape index: {}]   ;;  %s8539_s2 = inlined_call_operand.vmem [shape: f32[1,128], index: 2, kind: input, shape index: {}]   ;;  %s8540_s3 = inlined_call_operand.vmem [shape: bf16[4,128,128], index: 3, kind: output, shape index: {}]  }
   0x1   :  { %v6764_v0 = vld [vmem:[%s8537_s1 + $0x40] sm:$0xff]   ;;  %v6766_v2 = vld [vmem:[%s8537_s1 + $0x48] sm:$0xff]   ;;  %v6768_v4 = vld [vmem:[%s8537_s1 + $0x50] sm:$0xff]  }
   0x2   :  { %v6765_v1 = vld [vmem:[%s8537_s1 + $0x140] sm:$0xff]   ;;  %6060 = vmatprep.subr.bf16.mxu0 %v6764_v0  ;;  %v6767_v3 = vld [vmem:[%s8537_s1 + $0x148] sm:$0xff]   ;;  %v6769_v5 = vld [vmem:[%s8537_s1 + $0x150] sm:$0xff]  }
   0x3   :  { %6188 = vmatprep.subr.bf16.mxu1 %v6765_v1  ;;  %6061 = vmatpush3.bf16.msra.mxu0 %v6764_v0  ;;  %v6770_v6 = vld [vmem:[%s8537_s1 + $0x58] sm:$0xff]   ;;  %v6772_v8 = vld [vmem:[%s8537_s1 + $0x60] sm:$0xff]   ;;  %v6774_v10 = vld [vmem:[%s8537_s1 + $0x68] sm:$0xff]  }
   0x4   :  { %6189 = vmatpush3.bf16.msra.mxu1 %v6765_v1  ;;  %6062 = vmatprep.subr.bf16.mxu0 %v6766_v2  ;;  %v6771_v7 = vld [vmem:[%s8537_s1 + $0x158] sm:$0xff]   ;;  %v6773_v9 = vld [vmem:[%s8537_s1 + $0x160] sm:$0xff]   ;;  %v6775_v11 = vld [vmem:[%s8537_s1 + $0x168] sm:$0xff]  }
   0x5   :  { %6190 = vmatprep.subr.bf16.mxu1 %v6767_v3  ;;  %v6780_v12 = vld [vmem:[%s8538_s0 + $0x40] sm:$0xff]   ;;  %v6776_v14 = vld [vmem:[%s8537_s1 + $0x70] sm:$0xff]   ;;  %v6778_v16 = vld [vmem:[%s8537_s1 + $0x78] sm:$0xff]  }
   0x6   :  { %v6781_v13 = vld [vmem:[%s8538_s0 + $0x80] sm:$0xff]   ;;  %6076 = vmatprep.mubr.bf16.mxu0 %v6780_v12  ;;  %v6777_v15 = vld [vmem:[%s8537_s1 + $0x170] sm:$0xff]   ;;  %v6779_v17 = vld [vmem:[%s8537_s1 + $0x178] sm:$0xff]  }
   0x7   :  { %6063 = vmatpush3.bf16.msra.mxu0 %v6766_v2  ;;  %6204 = vmatprep.mubr.bf16.mxu1 %v6781_v13  ;;  %v6782_v18 = vld [vmem:[%s8538_s0 + $0x48] sm:$0xff]   ;;  %v6783_v19 = vld [vmem:[%s8537_s1] sm:$0xff]   ;;  %v6788_v24 = vld [vmem:[%s8538_s0 + $0x50] sm:$0xff]  }
   0x8   :  { %6191 = vmatpush3.bf16.msra.mxu1 %v6767_v3  ;;  %6064 = vmatprep.subr.bf16.mxu0 %v6768_v4  ;;  %v6785_v20 = vld [vmem:[%s8537_s1 + $0x100] sm:$0xff]   ;;  %v6784_v21 = vld [vmem:[%s8538_s0 + $0x88] sm:$0xff]   ;;  %v6789_v25 = vld [vmem:[%s8538_s0 + $0x90] sm:$0xff]  }
   0x9   :  { %6192 = vmatprep.subr.bf16.mxu1 %v6769_v5  ;;  %v6786_v22 = vld [vmem:[%s8537_s1 + $0x8] sm:$0xff]   ;;  %v6790_v26 = vld [vmem:[%s8538_s0 + $0x58] sm:$0xff]   ;;  %v6791_v27 = vld [vmem:[%s8537_s1 + $0x10] sm:$0xff]  }
   0xa   :  { %v6787_v23 = vld [vmem:[%s8537_s1 + $0x108] sm:$0xff]   ;;  %v6793_v28 = vld [vmem:[%s8537_s1 + $0x110] sm:$0xff]   ;;  %v6792_v29 = vld [vmem:[%s8538_s0 + $0x98] sm:$0xff]  }
   0xb   :  { %6065 = vmatpush3.bf16.msra.mxu0 %v6768_v4  ;;  %v6794_v30 = vld [vmem:[%s8537_s1 + $0x18] sm:$0xff]   ;;  %v6796_v32 = vld [vmem:[%s8538_s0 + $0x60] sm:$0xff]   ;;  %v6798_v34 = vld [vmem:[%s8538_s0 + $0x68] sm:$0xff]  }
   0xc   :  { %6193 = vmatpush3.bf16.msra.mxu1 %v6769_v5  ;;  %6066 = vmatprep.subr.bf16.mxu0 %v6770_v6  ;;  %v6795_v31 = vld [vmem:[%s8537_s1 + $0x118] sm:$0xff]   ;;  %v6797_v33 = vld [vmem:[%s8538_s0 + $0xa0] sm:$0xff]   ;;  %v6800_v37 = vld [vmem:[%s8538_s0 + $0xa8] sm:$0xff]  }
   0xd   :  { %6194 = vmatprep.subr.bf16.mxu1 %v6771_v7  ;;  %v6799_v35 = vld [vmem:[%s8537_s1 + $0x20] sm:$0xff]   ;;  %v6802_v38 = vld [vmem:[%s8537_s1 + $0x28] sm:$0xff]   ;;  %v6804_v40 = vld [vmem:[%s8538_s0 + $0x70] sm:$0xff]  }
   0xe   :  { %v6801_v36 = vld [vmem:[%s8537_s1 + $0x120] sm:$0xff]   ;;  %v6803_v39 = vld [vmem:[%s8537_s1 + $0x128] sm:$0xff]   ;;  %v6805_v41 = vld [vmem:[%s8538_s0 + $0xb0] sm:$0xff]  }
   0xf   :  { %6067 = vmatpush3.bf16.msra.mxu0 %v6770_v6  ;;  %v6806_v42 = vld [vmem:[%s8538_s0 + $0x78] sm:$0xff]   ;;  %v6807_v43 = vld [vmem:[%s8537_s1 + $0x30] sm:$0xff]   ;;  %v6812_v48 = vld [vmem:[%s8538_s0] sm:$0xff]  }
  0x10   :  { %6195 = vmatpush3.bf16.msra.mxu1 %v6771_v7  ;;  %6068 = vmatprep.subr.bf16.mxu0 %v6772_v8  ;;  %v6809_v44 = vld [vmem:[%s8537_s1 + $0x130] sm:$0xff]   ;;  %v6808_v45 = vld [vmem:[%s8538_s0 + $0xb8] sm:$0xff]   ;;  %v6813_v49 = vld [vmem:[%s8538_s0 + $0x40] sm:$0xff]  }
  0x11   :  { %6196 = vmatprep.subr.bf16.mxu1 %v6773_v9  ;;  %v6810_v46 = vld [vmem:[%s8537_s1 + $0x38] sm:$0xff]   ;;  %v6814_v50 = vld [vmem:[%s8538_s0 + $0x8] sm:$0xff]   ;;  %v6815_v51 = vld [vmem:[%s8537_s1 + $0x80] sm:$0xff]  }
  0x12   :  { %v6811_v47 = vld [vmem:[%s8537_s1 + $0x138] sm:$0xff]   ;;  %v6817_v52 = vld [vmem:[%s8537_s1 + $0x180] sm:$0xff]   ;;  %v6816_v53 = vld [vmem:[%s8538_s0 + $0x48] sm:$0xff]  }
  0x13   :  { %6069 = vmatpush3.bf16.msra.mxu0 %v6772_v8  ;;  %v6818_v54 = vld [vmem:[%s8537_s1 + $0x88] sm:$0xff]   ;;  %v6820_v56 = vld [vmem:[%s8538_s0 + $0x10] sm:$0xff]   ;;  %v6822_v58 = vld [vmem:[%s8538_s0 + $0x18] sm:$0xff]  }
  0x14   :  { %6197 = vmatpush3.bf16.msra.mxu1 %v6773_v9  ;;  %6070 = vmatprep.subr.bf16.mxu0 %v6774_v10  ;;  %v6819_v55 = vld [vmem:[%s8537_s1 + $0x188] sm:$0xff]   ;;  %v6821_v57 = vld [vmem:[%s8538_s0 + $0x50] sm:$0xff]   ;;  %v6824_v61 = vld [vmem:[%s8538_s0 + $0x58] sm:$0xff]  }
  0x15   :  { %6198 = vmatprep.subr.bf16.mxu1 %v6775_v11  ;;  %v6823_v59 = vld [vmem:[%s8537_s1 + $0x90] sm:$0xff]   ;;  %v6826_v62 = vld [vmem:[%s8537_s1 + $0x98] sm:$0xff]   ;;  %v6828_v0 = vld [vmem:[%s8538_s0 + $0x20] sm:$0xff]  }
  0x16   :  { %v6825_v60 = vld [vmem:[%s8537_s1 + $0x190] sm:$0xff]   ;;  %v6827_v63 = vld [vmem:[%s8537_s1 + $0x198] sm:$0xff]   ;;  %v6829_v1 = vld [vmem:[%s8538_s0 + $0x60] sm:$0xff]  }
  0x17   :  { %6071 = vmatpush3.bf16.msra.mxu0 %v6774_v10  ;;  %v6830_v2 = vld [vmem:[%s8538_s0 + $0x28] sm:$0xff]   ;;  %v6831_v3 = vld [vmem:[%s8537_s1 + $0xa0] sm:$0xff]   ;;  %v6836_v8 = vld [vmem:[%s8538_s0 + $0x30] sm:$0xff]  }
  0x18   :  { %6199 = vmatpush3.bf16.msra.mxu1 %v6775_v11  ;;  %6072 = vmatprep.subr.bf16.mxu0 %v6776_v14  ;;  %v6833_v4 = vld [vmem:[%s8537_s1 + $0x1a0] sm:$0xff]   ;;  %v6832_v5 = vld [vmem:[%s8538_s0 + $0x68] sm:$0xff]   ;;  %v6837_v9 = vld [vmem:[%s8538_s0 + $0x70] sm:$0xff]  }
  0x19   :  { %6200 = vmatprep.subr.bf16.mxu1 %v6777_v15  ;;  %v6834_v6 = vld [vmem:[%s8537_s1 + $0xa8] sm:$0xff]   ;;  %v6838_v10 = vld [vmem:[%s8538_s0 + $0x38] sm:$0xff]   ;;  %v6839_v11 = vld [vmem:[%s8537_s1 + $0xb0] sm:$0xff]  }
  0x1a   :  { %v6835_v7 = vld [vmem:[%s8537_s1 + $0x1a8] sm:$0xff]   ;;  %v6841_v12 = vld [vmem:[%s8537_s1 + $0x1b0] sm:$0xff]   ;;  %v6840_v13 = vld [vmem:[%s8538_s0 + $0x78] sm:$0xff]  }
  0x1b   :  { %6073 = vmatpush3.bf16.msra.mxu0 %v6776_v14  ;;  %v6842_v14 = vld [vmem:[%s8537_s1 + $0xb8] sm:$0xff]  }
  0x1c   :  { %6201 = vmatpush3.bf16.msra.mxu1 %v6777_v15  ;;  %6074 = vmatprep.subr.bf16.mxu0 %v6778_v16  ;;  %v6843_v15 = vld [vmem:[%s8537_s1 + $0x1b8] sm:$0xff]  }
  0x1d   :  { %6202 = vmatprep.subr.bf16.mxu1 %v6779_v17 }
  0x1f   :  { %6075 = vmatpush3.bf16.msra.mxu0 %v6778_v16  ;;  %v6844_v16 = vld [vmem:[%s8538_s0 + $0xc0] sm:$0xff]  }
  0x20   :  { %6203 = vmatpush3.bf16.msra.mxu1 %v6779_v17  ;;  %6092 = vmatprep.subr.bf16.mxu0 %v6783_v19  ;;  %v6845_v17 = vld [vmem:[%s8538_s0 + $0x100] sm:$0xff]  }
  0x21   :  { %6220 = vmatprep.subr.bf16.mxu1 %v6785_v20 }
  0x22   :  { %6077 = vmatmul.mubr.bf16.vlgmr.msra.gmra.mrb[0].mxu0 %v6782_v18  ;;  %v6846_v18 = vld [vmem:[%s8538_s0 + $0xc8] sm:$0xff]  }
  0x23   :  { %6205 = vmatmul.mubr.bf16.vlgmr.msra.gmra.mrb[0].mxu1 %v6784_v21  ;;  %6093 = vmatpush3.bf16.msra.mxu0 %v6783_v19  ;;  %v6847_v19 = vld [vmem:[%s8537_s1 + $0xc0] sm:$0xff]   ;;  %v6848_v21 = vld [vmem:[%s8538_s0 + $0x108] sm:$0xff]  }
  0x24   :  { %6221 = vmatpush3.bf16.msra.mxu1 %v6785_v20  ;;  %6094 = vmatprep.subr.bf16.mxu0 %v6786_v22  ;;  %v6849_v20 = vld [vmem:[%s8537_s1 + $0x1c0] sm:$0xff]  }
  0x25   :  { %6222 = vmatprep.subr.bf16.mxu1 %v6787_v23  ;;  %6080 = vmatprep.mubr.bf16.mxu0 %v6788_v24  ;;  %v6852_v24 = vld [vmem:[%s8538_s0 + $0xd0] sm:$0xff]  }
  0x26   :  { %6208 = vmatprep.mubr.bf16.mxu1 %v6789_v25  ;;  %v6853_v25 = vld [vmem:[%s8538_s0 + $0x110] sm:$0xff]  }
  0x27   :  { %6095 = vmatpush3.bf16.msra.mxu0 %v6786_v22  ;;  %v6850_v22 = vld [vmem:[%s8537_s1 + $0xc8] sm:$0xff]  }
  0x28   :  { %6223 = vmatpush3.bf16.msra.mxu1 %v6787_v23  ;;  %6096 = vmatprep.subr.bf16.mxu0 %v6791_v27  ;;  %v6851_v23 = vld [vmem:[%s8537_s1 + $0x1c8] sm:$0xff]  }
  0x29   :  { %6224 = vmatprep.subr.bf16.mxu1 %v6793_v28 }
  0x2a   :  { %6081 = vmatmul.mubr.bf16.gmra.mrb[4].mxu0 %v6790_v26  ;;  %v6854_v26 = vld [vmem:[%s8538_s0 + $0xd8] sm:$0xff]  }
  0x2b   :  { %6209 = vmatmul.mubr.bf16.gmra.mrb[4].mxu1 %v6792_v29  ;;  %6097 = vmatpush3.bf16.msra.mxu0 %v6791_v27  ;;  %v6855_v27 = vld [vmem:[%s8537_s1 + $0xd0] sm:$0xff]   ;;  %v6856_v29 = vld [vmem:[%s8538_s0 + $0x118] sm:$0xff]  }
  0x2c   :  { %6225 = vmatpush3.bf16.msra.mxu1 %v6793_v28  ;;  %6098 = vmatprep.subr.bf16.mxu0 %v6794_v30  ;;  %v6857_v28 = vld [vmem:[%s8537_s1 + $0x1d0] sm:$0xff]  }
  0x2d   :  { %6226 = vmatprep.subr.bf16.mxu1 %v6795_v31  ;;  %6084 = vmatprep.mubr.bf16.mxu0 %v6796_v32  ;;  %v6860_v32 = vld [vmem:[%s8538_s0 + $0xe0] sm:$0xff]  }
  0x2e   :  { %6212 = vmatprep.mubr.bf16.mxu1 %v6797_v33  ;;  %v6861_v33 = vld [vmem:[%s8538_s0 + $0x120] sm:$0xff]  }
  0x2f   :  { %6099 = vmatpush3.bf16.msra.mxu0 %v6794_v30  ;;  %v6858_v30 = vld [vmem:[%s8537_s1 + $0xd8] sm:$0xff]  }
  0x30   :  { %6227 = vmatpush3.bf16.msra.mxu1 %v6795_v31  ;;  %6100 = vmatprep.subr.bf16.mxu0 %v6799_v35  ;;  %v6859_v31 = vld [vmem:[%s8537_s1 + $0x1d8] sm:$0xff]  }
  0x31   :  { %6228 = vmatprep.subr.bf16.mxu1 %v6801_v36 }
  0x32   :  { %6085 = vmatmul.mubr.bf16.gmra.mrb[8].mxu0 %v6798_v34  ;;  %v6862_v34 = vld [vmem:[%s8538_s0 + $0xe8] sm:$0xff]  }
  0x33   :  { %6213 = vmatmul.mubr.bf16.gmra.mrb[8].mxu1 %v6800_v37  ;;  %6101 = vmatpush3.bf16.msra.mxu0 %v6799_v35  ;;  %v6863_v35 = vld [vmem:[%s8537_s1 + $0xe0] sm:$0xff]   ;;  %v6864_v37 = vld [vmem:[%s8538_s0 + $0x128] sm:$0xff]  }
  0x34   :  { %6229 = vmatpush3.bf16.msra.mxu1 %v6801_v36  ;;  %6102 = vmatprep.subr.bf16.mxu0 %v6802_v38  ;;  %v6865_v36 = vld [vmem:[%s8537_s1 + $0x1e0] sm:$0xff]  }
  0x35   :  { %6230 = vmatprep.subr.bf16.mxu1 %v6803_v39  ;;  %6088 = vmatprep.mubr.bf16.mxu0 %v6804_v40  ;;  %v6868_v40 = vld [vmem:[%s8538_s0 + $0xf0] sm:$0xff]  }
  0x36   :  { %6216 = vmatprep.mubr.bf16.mxu1 %v6805_v41  ;;  %v6869_v41 = vld [vmem:[%s8538_s0 + $0x130] sm:$0xff]  }
  0x37   :  { %6103 = vmatpush3.bf16.msra.mxu0 %v6802_v38  ;;  %v6866_v38 = vld [vmem:[%s8537_s1 + $0xe8] sm:$0xff]  }
  0x38   :  { %6231 = vmatpush3.bf16.msra.mxu1 %v6803_v39  ;;  %6104 = vmatprep.subr.bf16.mxu0 %v6807_v43  ;;  %v6867_v39 = vld [vmem:[%s8537_s1 + $0x1e8] sm:$0xff]  }
  0x39   :  { %6232 = vmatprep.subr.bf16.mxu1 %v6809_v44 }
  0x3a   :  { %6089 = vmatmul.mubr.bf16.gmra.mrb[12].mxu0 %v6806_v42  ;;  %v6870_v42 = vld [vmem:[%s8538_s0 + $0xf8] sm:$0xff]  }
  0x3b   :  { %6217 = vmatmul.mubr.bf16.gmra.mrb[12].mxu1 %v6808_v45  ;;  %6105 = vmatpush3.bf16.msra.mxu0 %v6807_v43  ;;  %v6871_v43 = vld [vmem:[%s8537_s1 + $0xf0] sm:$0xff]   ;;  %v6872_v45 = vld [vmem:[%s8538_s0 + $0x138] sm:$0xff]  }
  0x3c   :  { %6233 = vmatpush3.bf16.msra.mxu1 %v6809_v44  ;;  %6106 = vmatprep.subr.bf16.mxu0 %v6810_v46  ;;  %v6873_v44 = vld [vmem:[%s8537_s1 + $0x1f0] sm:$0xff]  }
  0x3d   :  { %6234 = vmatprep.subr.bf16.mxu1 %v6811_v47  ;;  %6108 = vmatprep.mubr.bf16.mxu0 %v6812_v48  ;;  %v6876_v48 = vld [vmem:[%s8538_s0 + $0x100] sm:$0xff]  }
  0x3e   :  { %6236 = vmatprep.mubr.bf16.mxu1 %v6813_v49  ;;  %v6877_v49 = vld [vmem:[%s8538_s0 + $0x140] sm:$0xff]  }
  0x3f   :  { %6107 = vmatpush3.bf16.msra.mxu0 %v6810_v46  ;;  %v6874_v46 = vld [vmem:[%s8537_s1 + $0xf8] sm:$0xff]  }
  0x40   :  { %6235 = vmatpush3.bf16.msra.mxu1 %v6811_v47  ;;  %6124 = vmatprep.subr.bf16.mxu0 %v6815_v51  ;;  %v6875_v47 = vld [vmem:[%s8537_s1 + $0x1f8] sm:$0xff]  }
  0x41   :  { %6252 = vmatprep.subr.bf16.mxu1 %v6817_v52 }
  0x42   :  { %6109 = vmatmul.mubr.bf16.vlgmr.msra.gmra.mrb[0].mxu0 %v6814_v50  ;;  %v6878_v50 = vld [vmem:[%s8538_s0 + $0x108] sm:$0xff]  }
  0x43   :  { %6237 = vmatmul.mubr.bf16.vlgmr.msra.gmra.mrb[0].mxu1 %v6816_v53  ;;  %6125 = vmatpush3.bf16.msra.mxu0 %v6815_v51  ;;  %v6880_v51 = vld [vmem:[%s8537_s1 + $0x240] sm:$0xff]   ;;  %v6879_v53 = vld [vmem:[%s8538_s0 + $0x148] sm:$0xff]  }
  0x44   :  { %6253 = vmatpush3.bf16.msra.mxu1 %v6817_v52  ;;  %6126 = vmatprep.subr.bf16.mxu0 %v6818_v54  ;;  %v6881_v52 = vld [vmem:[%s8537_s1 + $0x340] sm:$0xff]  }
  0x45   :  { %6254 = vmatprep.subr.bf16.mxu1 %v6819_v55  ;;  %6112 = vmatprep.mubr.bf16.mxu0 %v6820_v56  ;;  %v6884_v56 = vld [vmem:[%s8538_s0 + $0x110] sm:$0xff]  }
  0x46   :  { %6240 = vmatprep.mubr.bf16.mxu1 %v6821_v57  ;;  %v6885_v57 = vld [vmem:[%s8538_s0 + $0x150] sm:$0xff]  }
  0x47   :  { %6127 = vmatpush3.bf16.msra.mxu0 %v6818_v54  ;;  %v6882_v54 = vld [vmem:[%s8537_s1 + $0x248] sm:$0xff]  }
  0x48   :  { %6255 = vmatpush3.bf16.msra.mxu1 %v6819_v55  ;;  %6128 = vmatprep.subr.bf16.mxu0 %v6823_v59  ;;  %v6883_v55 = vld [vmem:[%s8537_s1 + $0x348] sm:$0xff]  }
  0x49   :  { %6256 = vmatprep.subr.bf16.mxu1 %v6825_v60 }
  0x4a   :  { %6113 = vmatmul.mubr.bf16.gmra.mrb[4].mxu0 %v6822_v58  ;;  %v6886_v58 = vld [vmem:[%s8538_s0 + $0x118] sm:$0xff]  }
  0x4b   :  { %6241 = vmatmul.mubr.bf16.gmra.mrb[4].mxu1 %v6824_v61  ;;  %6129 = vmatpush3.bf16.msra.mxu0 %v6823_v59  ;;  %v6888_v59 = vld [vmem:[%s8537_s1 + $0x250] sm:$0xff]   ;;  %v6887_v61 = vld [vmem:[%s8538_s0 + $0x158] sm:$0xff]  }
  0x4c   :  { %6257 = vmatpush3.bf16.msra.mxu1 %v6825_v60  ;;  %6130 = vmatprep.subr.bf16.mxu0 %v6826_v62  ;;  %v6889_v60 = vld [vmem:[%s8537_s1 + $0x350] sm:$0xff]  }
  0x4d   :  { %6258 = vmatprep.subr.bf16.mxu1 %v6827_v63  ;;  %6116 = vmatprep.mubr.bf16.mxu0 %v6828_v0  ;;  %v6892_v0 = vld [vmem:[%s8538_s0 + $0x120] sm:$0xff]  }
  0x4e   :  { %6244 = vmatprep.mubr.bf16.mxu1 %v6829_v1  ;;  %v6893_v1 = vld [vmem:[%s8538_s0 + $0x160] sm:$0xff]  }
  0x4f   :  { %6131 = vmatpush3.bf16.msra.mxu0 %v6826_v62  ;;  %v6890_v62 = vld [vmem:[%s8537_s1 + $0x258] sm:$0xff]  }
  0x50   :  { %6259 = vmatpush3.bf16.msra.mxu1 %v6827_v63  ;;  %6132 = vmatprep.subr.bf16.mxu0 %v6831_v3  ;;  %v6891_v63 = vld [vmem:[%s8537_s1 + $0x358] sm:$0xff]  }
  0x51   :  { %6260 = vmatprep.subr.bf16.mxu1 %v6833_v4 }
  0x52   :  { %6117 = vmatmul.mubr.bf16.gmra.mrb[8].mxu0 %v6830_v2  ;;  %v6894_v2 = vld [vmem:[%s8538_s0 + $0x128] sm:$0xff]  }
  0x53   :  { %6245 = vmatmul.mubr.bf16.gmra.mrb[8].mxu1 %v6832_v5  ;;  %6133 = vmatpush3.bf16.msra.mxu0 %v6831_v3  ;;  %v6896_v3 = vld [vmem:[%s8537_s1 + $0x260] sm:$0xff]   ;;  %v6895_v5 = vld [vmem:[%s8538_s0 + $0x168] sm:$0xff]  }
  0x54   :  { %6261 = vmatpush3.bf16.msra.mxu1 %v6833_v4  ;;  %6134 = vmatprep.subr.bf16.mxu0 %v6834_v6  ;;  %v6897_v4 = vld [vmem:[%s8537_s1 + $0x360] sm:$0xff]  }
  0x55   :  { %6262 = vmatprep.subr.bf16.mxu1 %v6835_v7  ;;  %6120 = vmatprep.mubr.bf16.mxu0 %v6836_v8  ;;  %v6900_v8 = vld [vmem:[%s8538_s0 + $0x130] sm:$0xff]  }
  0x56   :  { %6248 = vmatprep.mubr.bf16.mxu1 %v6837_v9  ;;  %v6901_v9 = vld [vmem:[%s8538_s0 + $0x170] sm:$0xff]  }
  0x57   :  { %6135 = vmatpush3.bf16.msra.mxu0 %v6834_v6  ;;  %v6898_v6 = vld [vmem:[%s8537_s1 + $0x268] sm:$0xff]  }
  0x58   :  { %6263 = vmatpush3.bf16.msra.mxu1 %v6835_v7  ;;  %6136 = vmatprep.subr.bf16.mxu0 %v6839_v11  ;;  %v6899_v7 = vld [vmem:[%s8537_s1 + $0x368] sm:$0xff]  }
  0x59   :  { %6264 = vmatprep.subr.bf16.mxu1 %v6841_v12 }
  0x5a   :  { %6121 = vmatmul.mubr.bf16.gmra.mrb[12].mxu0 %v6838_v10  ;;  %v6902_v10 = vld [vmem:[%s8538_s0 + $0x138] sm:$0xff]  }
  0x5b   :  { %6249 = vmatmul.mubr.bf16.gmra.mrb[12].mxu1 %v6840_v13  ;;  %6137 = vmatpush3.bf16.msra.mxu0 %v6839_v11  ;;  %v6904_v11 = vld [vmem:[%s8537_s1 + $0x270] sm:$0xff]   ;;  %v6903_v13 = vld [vmem:[%s8538_s0 + $0x178] sm:$0xff]  }
  0x5c   :  { %6265 = vmatpush3.bf16.msra.mxu1 %v6841_v12  ;;  %6138 = vmatprep.subr.bf16.mxu0 %v6842_v14  ;;  %v6905_v12 = vld [vmem:[%s8537_s1 + $0x370] sm:$0xff]  }
  0x5d   :  { %6266 = vmatprep.subr.bf16.mxu1 %v6843_v15  ;;  %6140 = vmatprep.mubr.bf16.mxu0 %v6844_v16  ;;  %v6908_v16 = vld [vmem:[%s8538_s0 + $0x100] sm:$0xff]  }
  0x5e   :  { %6268 = vmatprep.mubr.bf16.mxu1 %v6845_v17  ;;  %v6909_v17 = vld [vmem:[%s8538_s0 + $0x140] sm:$0xff]  }
  0x5f   :  { %6139 = vmatpush3.bf16.msra.mxu0 %v6842_v14  ;;  %v6906_v14 = vld [vmem:[%s8537_s1 + $0x278] sm:$0xff]  }
  0x60   :  { %6267 = vmatpush3.bf16.msra.mxu1 %v6843_v15  ;;  %6156 = vmatprep.subr.bf16.mxu0 %v6847_v19  ;;  %v6907_v15 = vld [vmem:[%s8537_s1 + $0x378] sm:$0xff]  }
  0x61   :  { %6284 = vmatprep.subr.bf16.mxu1 %v6849_v20 }
  0x62   :  { %6141 = vmatmul.mubr.bf16.vlgmr.msra.gmra.mrb[0].mxu0 %v6846_v18  ;;  %v6910_v18 = vld [vmem:[%s8538_s0 + $0x108] sm:$0xff]  }
  0x63   :  { %6269 = vmatmul.mubr.bf16.vlgmr.msra.gmra.mrb[0].mxu1 %v6848_v21  ;;  %6157 = vmatpush3.bf16.msra.mxu0 %v6847_v19  ;;  %v6911_v19 = vld [vmem:[%s8537_s1 + $0x200] sm:$0xff]   ;;  %v6912_v21 = vld [vmem:[%s8538_s0 + $0x148] sm:$0xff]  }
  0x64   :  { %6285 = vmatpush3.bf16.msra.mxu1 %v6849_v20  ;;  %6158 = vmatprep.subr.bf16.mxu0 %v6850_v22  ;;  %v6913_v20 = vld [vmem:[%s8537_s1 + $0x300] sm:$0xff]  }
  0x65   :  { %6286 = vmatprep.subr.bf16.mxu1 %v6851_v23  ;;  %6144 = vmatprep.mubr.bf16.mxu0 %v6852_v24  ;;  %v6916_v24 = vld [vmem:[%s8538_s0 + $0x110] sm:$0xff]  }
  0x66   :  { %6272 = vmatprep.mubr.bf16.mxu1 %v6853_v25  ;;  %v6917_v25 = vld [vmem:[%s8538_s0 + $0x150] sm:$0xff]  }
  0x67   :  { %6159 = vmatpush3.bf16.msra.mxu0 %v6850_v22  ;;  %v6914_v22 = vld [vmem:[%s8537_s1 + $0x208] sm:$0xff]  }
  0x68   :  { %6287 = vmatpush3.bf16.msra.mxu1 %v6851_v23  ;;  %6160 = vmatprep.subr.bf16.mxu0 %v6855_v27  ;;  %v6915_v23 = vld [vmem:[%s8537_s1 + $0x308] sm:$0xff]  }
  0x69   :  { %6288 = vmatprep.subr.bf16.mxu1 %v6857_v28 }
  0x6a   :  { %6145 = vmatmul.mubr.bf16.gmra.mrb[4].mxu0 %v6854_v26  ;;  %v6918_v26 = vld [vmem:[%s8538_s0 + $0x118] sm:$0xff]  }
  0x6b   :  { %6273 = vmatmul.mubr.bf16.gmra.mrb[4].mxu1 %v6856_v29  ;;  %6161 = vmatpush3.bf16.msra.mxu0 %v6855_v27  ;;  %v6919_v27 = vld [vmem:[%s8537_s1 + $0x210] sm:$0xff]   ;;  %v6920_v29 = vld [vmem:[%s8538_s0 + $0x158] sm:$0xff]  }
  0x6c   :  { %6289 = vmatpush3.bf16.msra.mxu1 %v6857_v28  ;;  %6162 = vmatprep.subr.bf16.mxu0 %v6858_v30  ;;  %v6921_v28 = vld [vmem:[%s8537_s1 + $0x310] sm:$0xff]  }
  0x6d   :  { %6290 = vmatprep.subr.bf16.mxu1 %v6859_v31  ;;  %6148 = vmatprep.mubr.bf16.mxu0 %v6860_v32  ;;  %v6924_v32 = vld [vmem:[%s8538_s0 + $0x120] sm:$0xff]  }
  0x6e   :  { %6276 = vmatprep.mubr.bf16.mxu1 %v6861_v33  ;;  %v6925_v33 = vld [vmem:[%s8538_s0 + $0x160] sm:$0xff]  }
  0x6f   :  { %6163 = vmatpush3.bf16.msra.mxu0 %v6858_v30  ;;  %v6922_v30 = vld [vmem:[%s8537_s1 + $0x218] sm:$0xff]  }
  0x70   :  { %6291 = vmatpush3.bf16.msra.mxu1 %v6859_v31  ;;  %6164 = vmatprep.subr.bf16.mxu0 %v6863_v35  ;;  %v6923_v31 = vld [vmem:[%s8537_s1 + $0x318] sm:$0xff]  }
  0x71   :  { %6292 = vmatprep.subr.bf16.mxu1 %v6865_v36 }
  0x72   :  { %6149 = vmatmul.mubr.bf16.gmra.mrb[8].mxu0 %v6862_v34  ;;  %v6926_v34 = vld [vmem:[%s8538_s0 + $0x128] sm:$0xff]  }
  0x73   :  { %6277 = vmatmul.mubr.bf16.gmra.mrb[8].mxu1 %v6864_v37  ;;  %6165 = vmatpush3.bf16.msra.mxu0 %v6863_v35  ;;  %v6927_v35 = vld [vmem:[%s8537_s1 + $0x220] sm:$0xff]   ;;  %v6928_v37 = vld [vmem:[%s8538_s0 + $0x168] sm:$0xff]  }
  0x74   :  { %6293 = vmatpush3.bf16.msra.mxu1 %v6865_v36  ;;  %6166 = vmatprep.subr.bf16.mxu0 %v6866_v38  ;;  %v6929_v36 = vld [vmem:[%s8537_s1 + $0x320] sm:$0xff]  }
  0x75   :  { %6294 = vmatprep.subr.bf16.mxu1 %v6867_v39  ;;  %6152 = vmatprep.mubr.bf16.mxu0 %v6868_v40  ;;  %v6932_v40 = vld [vmem:[%s8538_s0 + $0x130] sm:$0xff]  }
  0x76   :  { %6280 = vmatprep.mubr.bf16.mxu1 %v6869_v41  ;;  %v6933_v41 = vld [vmem:[%s8538_s0 + $0x170] sm:$0xff]  }
  0x77   :  { %6167 = vmatpush3.bf16.msra.mxu0 %v6866_v38  ;;  %v6930_v38 = vld [vmem:[%s8537_s1 + $0x228] sm:$0xff]  }
  0x78   :  { %6295 = vmatpush3.bf16.msra.mxu1 %v6867_v39  ;;  %6168 = vmatprep.subr.bf16.mxu0 %v6871_v43  ;;  %v6931_v39 = vld [vmem:[%s8537_s1 + $0x328] sm:$0xff]  }
  0x79   :  { %6296 = vmatprep.subr.bf16.mxu1 %v6873_v44 }
  0x7a   :  { %6153 = vmatmul.mubr.bf16.gmra.mrb[12].mxu0 %v6870_v42  ;;  %v6934_v42 = vld [vmem:[%s8538_s0 + $0x138] sm:$0xff]  }
  0x7b   :  { %6281 = vmatmul.mubr.bf16.gmra.mrb[12].mxu1 %v6872_v45  ;;  %6169 = vmatpush3.bf16.msra.mxu0 %v6871_v43  ;;  %v6935_v43 = vld [vmem:[%s8537_s1 + $0x230] sm:$0xff]   ;;  %v6936_v45 = vld [vmem:[%s8538_s0 + $0x178] sm:$0xff]  }
  0x7c   :  { %6297 = vmatpush3.bf16.msra.mxu1 %v6873_v44  ;;  %6170 = vmatprep.subr.bf16.mxu0 %v6874_v46  ;;  %v6937_v44 = vld [vmem:[%s8537_s1 + $0x330] sm:$0xff]  }
  0x7d   :  { %6298 = vmatprep.subr.bf16.mxu1 %v6875_v47  ;;  %6172 = vmatprep.mubr.bf16.mxu0 %v6876_v48  ;;  %v6940_v48 = vld [vmem:[%s8538_s0 + $0xc0] sm:$0xff]  }
  0x7e   :  { %6300 = vmatprep.mubr.bf16.mxu1 %v6877_v49  ;;  %v6941_v49 = vld [vmem:[%s8538_s0 + $0x100] sm:$0xff]  }
  0x7f   :  { %6171 = vmatpush3.bf16.msra.mxu0 %v6874_v46  ;;  %v6938_v46 = vld [vmem:[%s8537_s1 + $0x238] sm:$0xff]  }
  0x80   :  { %6299 = vmatpush3.bf16.msra.mxu1 %v6875_v47  ;;  %6316 = vmatprep.subr.bf16.mxu0 %v6880_v51  ;;  %v6939_v47 = vld [vmem:[%s8537_s1 + $0x338] sm:$0xff]  }
  0x81   :  { %6444 = vmatprep.subr.bf16.mxu1 %v6881_v52 }
  0x82   :  { %6173 = vmatmul.mubr.bf16.vlgmr.msra.gmra.mrb[0].mxu0 %v6878_v50  ;;  %v6942_v50 = vld [vmem:[%s8538_s0 + $0xc8] sm:$0xff]  }
  0x83   :  { %6301 = vmatmul.mubr.bf16.vlgmr.msra.gmra.mrb[0].mxu1 %v6879_v53  ;;  %6317 = vmatpush3.bf16.msra.mxu0 %v6880_v51  ;;  %v6943_v51 = vld [vmem:[%s8537_s1 + $0x280] sm:$0xff]   ;;  %v6944_v53 = vld [vmem:[%s8538_s0 + $0x108] sm:$0xff]  }
  0x84   :  { %6445 = vmatpush3.bf16.msra.mxu1 %v6881_v52  ;;  %6318 = vmatprep.subr.bf16.mxu0 %v6882_v54  ;;  %v6945_v52 = vld [vmem:[%s8537_s1 + $0x380] sm:$0xff]  }
  0x85   :  { %6446 = vmatprep.subr.bf16.mxu1 %v6883_v55  ;;  %6176 = vmatprep.mubr.bf16.mxu0 %v6884_v56  ;;  %v6948_v56 = vld [vmem:[%s8538_s0 + $0xd0] sm:$0xff]  }
  0x86   :  { %6304 = vmatprep.mubr.bf16.mxu1 %v6885_v57  ;;  %v6949_v57 = vld [vmem:[%s8538_s0 + $0x110] sm:$0xff]  }
  0x87   :  { %6319 = vmatpush3.bf16.msra.mxu0 %v6882_v54  ;;  %v6946_v54 = vld [vmem:[%s8537_s1 + $0x288] sm:$0xff]  }
  0x88   :  { %6447 = vmatpush3.bf16.msra.mxu1 %v6883_v55  ;;  %6320 = vmatprep.subr.bf16.mxu0 %v6888_v59  ;;  %v6947_v55 = vld [vmem:[%s8537_s1 + $0x388] sm:$0xff]  }
  0x89   :  { %6448 = vmatprep.subr.bf16.mxu1 %v6889_v60 }
  0x8a   :  { %6177 = vmatmul.mubr.bf16.gmra.mrb[4].mxu0 %v6886_v58  ;;  %v6950_v58 = vld [vmem:[%s8538_s0 + $0xd8] sm:$0xff]  }
  0x8b   :  { %6305 = vmatmul.mubr.bf16.gmra.mrb[4].mxu1 %v6887_v61  ;;  %6321 = vmatpush3.bf16.msra.mxu0 %v6888_v59  ;;  %v6951_v59 = vld [vmem:[%s8537_s1 + $0x290] sm:$0xff]   ;;  %v6952_v61 = vld [vmem:[%s8538_s0 + $0x118] sm:$0xff]  }
  0x8c   :  { %6449 = vmatpush3.bf16.msra.mxu1 %v6889_v60  ;;  %6322 = vmatprep.subr.bf16.mxu0 %v6890_v62  ;;  %v6953_v60 = vld [vmem:[%s8537_s1 + $0x390] sm:$0xff]  }
  0x8d   :  { %6450 = vmatprep.subr.bf16.mxu1 %v6891_v63  ;;  %6180 = vmatprep.mubr.bf16.mxu0 %v6892_v0  ;;  %v6956_v0 = vld [vmem:[%s8538_s0 + $0xe0] sm:$0xff]  }
  0x8e   :  { %6308 = vmatprep.mubr.bf16.mxu1 %v6893_v1  ;;  %v6957_v1 = vld [vmem:[%s8538_s0 + $0x120] sm:$0xff]  }
  0x8f   :  { %6323 = vmatpush3.bf16.msra.mxu0 %v6890_v62  ;;  %v6954_v62 = vld [vmem:[%s8537_s1 + $0x298] sm:$0xff]  }
  0x90   :  { %6451 = vmatpush3.bf16.msra.mxu1 %v6891_v63  ;;  %6324 = vmatprep.subr.bf16.mxu0 %v6896_v3  ;;  %v6955_v63 = vld [vmem:[%s8537_s1 + $0x398] sm:$0xff]  }
  0x91   :  { %6452 = vmatprep.subr.bf16.mxu1 %v6897_v4 }
  0x92   :  { %6181 = vmatmul.mubr.bf16.gmra.mrb[8].mxu0 %v6894_v2  ;;  %v6958_v2 = vld [vmem:[%s8538_s0 + $0xe8] sm:$0xff]  }
  0x93   :  { %6309 = vmatmul.mubr.bf16.gmra.mrb[8].mxu1 %v6895_v5  ;;  %6325 = vmatpush3.bf16.msra.mxu0 %v6896_v3  ;;  %v6959_v3 = vld [vmem:[%s8537_s1 + $0x2a0] sm:$0xff]   ;;  %v6960_v5 = vld [vmem:[%s8538_s0 + $0x128] sm:$0xff]  }
  0x94   :  { %6453 = vmatpush3.bf16.msra.mxu1 %v6897_v4  ;;  %6326 = vmatprep.subr.bf16.mxu0 %v6898_v6  ;;  %v6961_v4 = vld [vmem:[%s8537_s1 + $0x3a0] sm:$0xff]  }
  0x95   :  { %6454 = vmatprep.subr.bf16.mxu1 %v6899_v7  ;;  %6184 = vmatprep.mubr.bf16.mxu0 %v6900_v8  ;;  %v6964_v8 = vld [vmem:[%s8538_s0 + $0xf0] sm:$0xff]  }
  0x96   :  { %6312 = vmatprep.mubr.bf16.mxu1 %v6901_v9  ;;  %v6965_v9 = vld [vmem:[%s8538_s0 + $0x130] sm:$0xff]  }
  0x97   :  { %6327 = vmatpush3.bf16.msra.mxu0 %v6898_v6  ;;  %v6962_v6 = vld [vmem:[%s8537_s1 + $0x2a8] sm:$0xff]  }
  0x98   :  { %6455 = vmatpush3.bf16.msra.mxu1 %v6899_v7  ;;  %6328 = vmatprep.subr.bf16.mxu0 %v6904_v11  ;;  %v6963_v7 = vld [vmem:[%s8537_s1 + $0x3a8] sm:$0xff]  }
  0x99   :  { %6456 = vmatprep.subr.bf16.mxu1 %v6905_v12 }
  0x9a   :  { %6185 = vmatmul.mubr.bf16.gmra.mrb[12].mxu0 %v6902_v10  ;;  %v6966_v10 = vld [vmem:[%s8538_s0 + $0xf8] sm:$0xff]  }
  0x9b   :  { %6313 = vmatmul.mubr.bf16.gmra.mrb[12].mxu1 %v6903_v13  ;;  %6329 = vmatpush3.bf16.msra.mxu0 %v6904_v11  ;;  %v6967_v11 = vld [vmem:[%s8537_s1 + $0x2b0] sm:$0xff]   ;;  %v6968_v13 = vld [vmem:[%s8538_s0 + $0x138] sm:$0xff]  }
  0x9c   :  { %6457 = vmatpush3.bf16.msra.mxu1 %v6905_v12  ;;  %6330 = vmatprep.subr.bf16.mxu0 %v6906_v14  ;;  %v6969_v12 = vld [vmem:[%s8537_s1 + $0x3b0] sm:$0xff]  }
  0x9d   :  { %6458 = vmatprep.subr.bf16.mxu1 %v6907_v15  ;;  %6332 = vmatprep.mubr.bf16.mxu0 %v6908_v16  ;;  %v6972_v16 = vld [vmem:[%s8538_s0 + $0x180] sm:$0xff]  }
  0x9e   :  { %6460 = vmatprep.mubr.bf16.mxu1 %v6909_v17  ;;  %v6973_v17 = vld [vmem:[%s8538_s0 + $0x1c0] sm:$0xff]  }
  0x9f   :  { %6331 = vmatpush3.bf16.msra.mxu0 %v6906_v14  ;;  %v6970_v14 = vld [vmem:[%s8537_s1 + $0x2b8] sm:$0xff]  }
  0xa0   :  { %6459 = vmatpush3.bf16.msra.mxu1 %v6907_v15  ;;  %6348 = vmatprep.subr.bf16.mxu0 %v6911_v19  ;;  %v6971_v15 = vld [vmem:[%s8537_s1 + $0x3b8] sm:$0xff]  }
  0xa1   :  { %6476 = vmatprep.subr.bf16.mxu1 %v6913_v20 }
  0xa2   :  { %6333 = vmatmul.mubr.bf16.vlgmr.msra.gmra.mrb[16].mxu0 %v6910_v18  ;;  %v6974_v18 = vld [vmem:[%s8538_s0 + $0x188] sm:$0xff]  }
  0xa3   :  { %6461 = vmatmul.mubr.bf16.vlgmr.msra.gmra.mrb[16].mxu1 %v6912_v21  ;;  %6349 = vmatpush3.bf16.msra.mxu0 %v6911_v19  ;;  %v6975_v19 = vld [vmem:[%s8537_s1 + $0x2c0] sm:$0xff]   ;;  %v6976_v21 = vld [vmem:[%s8538_s0 + $0x1c8] sm:$0xff]  }
  0xa4   :  { %6477 = vmatpush3.bf16.msra.mxu1 %v6913_v20  ;;  %6350 = vmatprep.subr.bf16.mxu0 %v6914_v22  ;;  %v6977_v20 = vld [vmem:[%s8537_s1 + $0x3c0] sm:$0xff]  }
  0xa5   :  { %6478 = vmatprep.subr.bf16.mxu1 %v6915_v23  ;;  %6336 = vmatprep.mubr.bf16.mxu0 %v6916_v24  ;;  %v6980_v24 = vld [vmem:[%s8538_s0 + $0x190] sm:$0xff]  }
  0xa6   :  { %6464 = vmatprep.mubr.bf16.mxu1 %v6917_v25  ;;  %v6981_v25 = vld [vmem:[%s8538_s0 + $0x1d0] sm:$0xff]  }
  0xa7   :  { %6351 = vmatpush3.bf16.msra.mxu0 %v6914_v22  ;;  %v6978_v22 = vld [vmem:[%s8537_s1 + $0x2c8] sm:$0xff]  }
  0xa8   :  { %6479 = vmatpush3.bf16.msra.mxu1 %v6915_v23  ;;  %6352 = vmatprep.subr.bf16.mxu0 %v6919_v27  ;;  %v6979_v23 = vld [vmem:[%s8537_s1 + $0x3c8] sm:$0xff]  }
  0xa9   :  { %6480 = vmatprep.subr.bf16.mxu1 %v6921_v28 }
  0xaa   :  { %6337 = vmatmul.mubr.bf16.gmra.mrb[20].mxu0 %v6918_v26  ;;  %v6982_v26 = vld [vmem:[%s8538_s0 + $0x198] sm:$0xff]  }
  0xab   :  { %6465 = vmatmul.mubr.bf16.gmra.mrb[20].mxu1 %v6920_v29  ;;  %6353 = vmatpush3.bf16.msra.mxu0 %v6919_v27  ;;  %v6983_v27 = vld [vmem:[%s8537_s1 + $0x2d0] sm:$0xff]   ;;  %v6984_v29 = vld [vmem:[%s8538_s0 + $0x1d8] sm:$0xff]  }
  0xac   :  { %6481 = vmatpush3.bf16.msra.mxu1 %v6921_v28  ;;  %6354 = vmatprep.subr.bf16.mxu0 %v6922_v30  ;;  %v6985_v28 = vld [vmem:[%s8537_s1 + $0x3d0] sm:$0xff]  }
  0xad   :  { %6482 = vmatprep.subr.bf16.mxu1 %v6923_v31  ;;  %6340 = vmatprep.mubr.bf16.mxu0 %v6924_v32  ;;  %v6988_v32 = vld [vmem:[%s8538_s0 + $0x1a0] sm:$0xff]  }
  0xae   :  { %6468 = vmatprep.mubr.bf16.mxu1 %v6925_v33  ;;  %v6989_v33 = vld [vmem:[%s8538_s0 + $0x1e0] sm:$0xff]  }
  0xaf   :  { %6355 = vmatpush3.bf16.msra.mxu0 %v6922_v30  ;;  %v6986_v30 = vld [vmem:[%s8537_s1 + $0x2d8] sm:$0xff]  }
  0xb0   :  { %6483 = vmatpush3.bf16.msra.mxu1 %v6923_v31  ;;  %6356 = vmatprep.subr.bf16.mxu0 %v6927_v35  ;;  %v6987_v31 = vld [vmem:[%s8537_s1 + $0x3d8] sm:$0xff]  }
  0xb1   :  { %6484 = vmatprep.subr.bf16.mxu1 %v6929_v36 }
  0xb2   :  { %6341 = vmatmul.mubr.bf16.gmra.mrb[24].mxu0 %v6926_v34  ;;  %v6990_v34 = vld [vmem:[%s8538_s0 + $0x1a8] sm:$0xff]  }
  0xb3   :  { %6469 = vmatmul.mubr.bf16.gmra.mrb[24].mxu1 %v6928_v37  ;;  %6357 = vmatpush3.bf16.msra.mxu0 %v6927_v35  ;;  %v6991_v35 = vld [vmem:[%s8537_s1 + $0x2e0] sm:$0xff]   ;;  %v6992_v37 = vld [vmem:[%s8538_s0 + $0x1e8] sm:$0xff]  }
  0xb4   :  { %6485 = vmatpush3.bf16.msra.mxu1 %v6929_v36  ;;  %6358 = vmatprep.subr.bf16.mxu0 %v6930_v38  ;;  %v6993_v36 = vld [vmem:[%s8537_s1 + $0x3e0] sm:$0xff]  }
  0xb5   :  { %6486 = vmatprep.subr.bf16.mxu1 %v6931_v39  ;;  %6344 = vmatprep.mubr.bf16.mxu0 %v6932_v40  ;;  %v6996_v40 = vld [vmem:[%s8538_s0 + $0x1b0] sm:$0xff]  }
  0xb6   :  { %6472 = vmatprep.mubr.bf16.mxu1 %v6933_v41  ;;  %v6997_v41 = vld [vmem:[%s8538_s0 + $0x1f0] sm:$0xff]  }
  0xb7   :  { %6359 = vmatpush3.bf16.msra.mxu0 %v6930_v38  ;;  %v6994_v38 = vld [vmem:[%s8537_s1 + $0x2e8] sm:$0xff]  }
  0xb8   :  { %6487 = vmatpush3.bf16.msra.mxu1 %v6931_v39  ;;  %6360 = vmatprep.subr.bf16.mxu0 %v6935_v43  ;;  %v6995_v39 = vld [vmem:[%s8537_s1 + $0x3e8] sm:$0xff]  }
  0xb9   :  { %6488 = vmatprep.subr.bf16.mxu1 %v6937_v44 }
  0xba   :  { %6345 = vmatmul.mubr.bf16.gmra.mrb[28].mxu0 %v6934_v42  ;;  %v6998_v42 = vld [vmem:[%s8538_s0 + $0x1b8] sm:$0xff]  }
  0xbb   :  { %6473 = vmatmul.mubr.bf16.gmra.mrb[28].mxu1 %v6936_v45  ;;  %6361 = vmatpush3.bf16.msra.mxu0 %v6935_v43  ;;  %v6999_v43 = vld [vmem:[%s8537_s1 + $0x2f0] sm:$0xff]   ;;  %v7000_v45 = vld [vmem:[%s8538_s0 + $0x1f8] sm:$0xff]  }
  0xbc   :  { %6489 = vmatpush3.bf16.msra.mxu1 %v6937_v44  ;;  %6362 = vmatprep.subr.bf16.mxu0 %v6938_v46  ;;  %v7001_v44 = vld [vmem:[%s8537_s1 + $0x3f0] sm:$0xff]  }
  0xbd   :  { %6490 = vmatprep.subr.bf16.mxu1 %v6939_v47  ;;  %6364 = vmatprep.mubr.bf16.mxu0 %v6940_v48  ;;  %v7004_v48 = vld [vmem:[%s8538_s0 + $0x1c0] sm:$0xff]  }
  0xbe   :  { %6492 = vmatprep.mubr.bf16.mxu1 %v6941_v49  ;;  %v7005_v49 = vld [vmem:[%s8538_s0 + $0x200] sm:$0xff]  }
  0xbf   :  { %6363 = vmatpush3.bf16.msra.mxu0 %v6938_v46  ;;  %v7002_v46 = vld [vmem:[%s8537_s1 + $0x2f8] sm:$0xff]  }
  0xc0   :  { %6491 = vmatpush3.bf16.msra.mxu1 %v6939_v47  ;;  %6380 = vmatprep.subr.bf16.mxu0 %v6943_v51  ;;  %v7003_v47 = vld [vmem:[%s8537_s1 + $0x3f8] sm:$0xff]  }
  0xc1   :  { %6508 = vmatprep.subr.bf16.mxu1 %v6945_v52 }
  0xc2   :  { %6365 = vmatmul.mubr.bf16.vlgmr.msra.gmra.mrb[16].mxu0 %v6942_v50  ;;  %v7006_v50 = vld [vmem:[%s8538_s0 + $0x1c8] sm:$0xff]  }
  0xc3   :  { %6493 = vmatmul.mubr.bf16.vlgmr.msra.gmra.mrb[16].mxu1 %v6944_v53  ;;  %6381 = vmatpush3.bf16.msra.mxu0 %v6943_v51  ;;  %v7007_v51 = vld [vmem:[%s8538_s0 + $0x208] sm:$0xff]   ;;  %v7009_v53 = vld [vmem:[%s8538_s0 + $0x210] sm:$0xff]  }
  0xc4   :  { %6509 = vmatpush3.bf16.msra.mxu1 %v6945_v52  ;;  %6382 = vmatprep.subr.bf16.mxu0 %v6946_v54  ;;  %v7008_v52 = vld [vmem:[%s8538_s0 + $0x1d0] sm:$0xff]  }
  0xc5   :  { %6510 = vmatprep.subr.bf16.mxu1 %v6947_v55  ;;  %6368 = vmatprep.mubr.bf16.mxu0 %v6948_v56  ;;  %v7012_v56 = vld [vmem:[%s8538_s0 + $0x1e0] sm:$0xff]  }
  0xc6   :  { %6496 = vmatprep.mubr.bf16.mxu1 %v6949_v57  ;;  %v7013_v57 = vld [vmem:[%s8538_s0 + $0x220] sm:$0xff]  }
  0xc7   :  { %6383 = vmatpush3.bf16.msra.mxu0 %v6946_v54  ;;  %v7010_v54 = vld [vmem:[%s8538_s0 + $0x1d8] sm:$0xff]  }
  0xc8   :  { %6511 = vmatpush3.bf16.msra.mxu1 %v6947_v55  ;;  %6384 = vmatprep.subr.bf16.mxu0 %v6951_v59  ;;  %v7011_v55 = vld [vmem:[%s8538_s0 + $0x218] sm:$0xff]  }
  0xc9   :  { %6512 = vmatprep.subr.bf16.mxu1 %v6953_v60 }
  0xca   :  { %6369 = vmatmul.mubr.bf16.gmra.mrb[20].mxu0 %v6950_v58  ;;  %v7014_v58 = vld [vmem:[%s8538_s0 + $0x1e8] sm:$0xff]  }
  0xcb   :  { %6497 = vmatmul.mubr.bf16.gmra.mrb[20].mxu1 %v6952_v61  ;;  %6385 = vmatpush3.bf16.msra.mxu0 %v6951_v59  ;;  %v7015_v59 = vld [vmem:[%s8538_s0 + $0x228] sm:$0xff]   ;;  %v7017_v61 = vld [vmem:[%s8538_s0 + $0x230] sm:$0xff]  }
  0xcc   :  { %6513 = vmatpush3.bf16.msra.mxu1 %v6953_v60  ;;  %6386 = vmatprep.subr.bf16.mxu0 %v6954_v62  ;;  %v7016_v60 = vld [vmem:[%s8538_s0 + $0x1f0] sm:$0xff]  }
  0xcd   :  { %6514 = vmatprep.subr.bf16.mxu1 %v6955_v63  ;;  %6372 = vmatprep.mubr.bf16.mxu0 %v6956_v0  ;;  %v8068_v0 = vld [vmem:[%s8539_s2] ss:$0 sm:$0xff] }
  0xce   :  { %6500 = vmatprep.mubr.bf16.mxu1 %v6957_v1 }
  0xcf   :  { %6387 = vmatpush3.bf16.msra.mxu0 %v6954_v62  ;;  %v7018_v62 = vld [vmem:[%s8538_s0 + $0x1f8] sm:$0xff]  }
  0xd0   :  { %6515 = vmatpush3.bf16.msra.mxu1 %v6955_v63  ;;  %6388 = vmatprep.subr.bf16.mxu0 %v6959_v3  ;;  %v7019_v63 = vld [vmem:[%s8538_s0 + $0x238] sm:$0xff]  }
  0xd1   :  { %6516 = vmatprep.subr.bf16.mxu1 %v6961_v4 }
  0xd2   :  { %6373 = vmatmul.mubr.bf16.gmra.mrb[24].mxu0 %v6958_v2 }
  0xd3   :  { %6501 = vmatmul.mubr.bf16.gmra.mrb[24].mxu1 %v6960_v5  ;;  %6389 = vmatpush3.bf16.msra.mxu0 %v6959_v3 }
  0xd4   :  { %6517 = vmatpush3.bf16.msra.mxu1 %v6961_v4  ;;  %6390 = vmatprep.subr.bf16.mxu0 %v6962_v6 }
  0xd5   :  { %6518 = vmatprep.subr.bf16.mxu1 %v6963_v7  ;;  %6376 = vmatprep.mubr.bf16.mxu0 %v6964_v8 }
  0xd6   :  { %6504 = vmatprep.mubr.bf16.mxu1 %v6965_v9 }
  0xd7   :  { %6391 = vmatpush3.bf16.msra.mxu0 %v6962_v6 }
  0xd8   :  { %6519 = vmatpush3.bf16.msra.mxu1 %v6963_v7  ;;  %6392 = vmatprep.subr.bf16.mxu0 %v6967_v11 }
  0xd9   :  { %6520 = vmatprep.subr.bf16.mxu1 %v6969_v12 }
  0xda   :  { %6377 = vmatmul.mubr.bf16.gmra.mrb[28].mxu0 %v6966_v10 }
  0xdb   :  { %6505 = vmatmul.mubr.bf16.gmra.mrb[28].mxu1 %v6968_v13  ;;  %6393 = vmatpush3.bf16.msra.mxu0 %v6967_v11 }
  0xdc   :  { %6521 = vmatpush3.bf16.msra.mxu1 %v6969_v12  ;;  %6394 = vmatprep.subr.bf16.mxu0 %v6970_v14 }
  0xdd   :  { %6522 = vmatprep.subr.bf16.mxu1 %v6971_v15  ;;  %6396 = vmatprep.mubr.bf16.mxu0 %v6972_v16 }
  0xde   :  { %6524 = vmatprep.mubr.bf16.mxu1 %v6973_v17 }
  0xdf   :  { %6395 = vmatpush3.bf16.msra.mxu0 %v6970_v14 }
  0xe0   :  { %6523 = vmatpush3.bf16.msra.mxu1 %v6971_v15  ;;  %6412 = vmatprep.subr.bf16.mxu0 %v6975_v19 }
  0xe1   :  { %6540 = vmatprep.subr.bf16.mxu1 %v6977_v20 }
  0xe2   :  { %6397 = vmatmul.mubr.bf16.vlgmr.msra.gmra.mrb[16].mxu0 %v6974_v18 }
  0xe3   :  { %6525 = vmatmul.mubr.bf16.vlgmr.msra.gmra.mrb[16].mxu1 %v6976_v21  ;;  %6413 = vmatpush3.bf16.msra.mxu0 %v6975_v19 }
  0xe4   :  { %6541 = vmatpush3.bf16.msra.mxu1 %v6977_v20  ;;  %6414 = vmatprep.subr.bf16.mxu0 %v6978_v22 }
  0xe5   :  { %6542 = vmatprep.subr.bf16.mxu1 %v6979_v23  ;;  %6400 = vmatprep.mubr.bf16.mxu0 %v6980_v24 }
  0xe6   :  { %6528 = vmatprep.mubr.bf16.mxu1 %v6981_v25 }
  0xe7   :  { %6415 = vmatpush3.bf16.msra.mxu0 %v6978_v22 }
  0xe8   :  { %6543 = vmatpush3.bf16.msra.mxu1 %v6979_v23  ;;  %6416 = vmatprep.subr.bf16.mxu0 %v6983_v27 }
  0xe9   :  { %6544 = vmatprep.subr.bf16.mxu1 %v6985_v28 }
  0xea   :  { %6401 = vmatmul.mubr.bf16.gmra.mrb[20].mxu0 %v6982_v26 }
  0xeb   :  { %6529 = vmatmul.mubr.bf16.gmra.mrb[20].mxu1 %v6984_v29  ;;  %6417 = vmatpush3.bf16.msra.mxu0 %v6983_v27 }
  0xec   :  { %6545 = vmatpush3.bf16.msra.mxu1 %v6985_v28  ;;  %6418 = vmatprep.subr.bf16.mxu0 %v6986_v30 }
  0xed   :  { %6546 = vmatprep.subr.bf16.mxu1 %v6987_v31  ;;  %6404 = vmatprep.mubr.bf16.mxu0 %v6988_v32 }
  0xee   :  { %6532 = vmatprep.mubr.bf16.mxu1 %v6989_v33 }
  0xef   :  { %6419 = vmatpush3.bf16.msra.mxu0 %v6986_v30 }
  0xf0   :  { %6547 = vmatpush3.bf16.msra.mxu1 %v6987_v31  ;;  %6420 = vmatprep.subr.bf16.mxu0 %v6991_v35 }
  0xf1   :  { %6548 = vmatprep.subr.bf16.mxu1 %v6993_v36 }
  0xf2   :  { %6405 = vmatmul.mubr.bf16.gmra.mrb[24].mxu0 %v6990_v34 }
  0xf3   :  { %6533 = vmatmul.mubr.bf16.gmra.mrb[24].mxu1 %v6992_v37  ;;  %6421 = vmatpush3.bf16.msra.mxu0 %v6991_v35 }
  0xf4   :  { %6549 = vmatpush3.bf16.msra.mxu1 %v6993_v36  ;;  %6422 = vmatprep.subr.bf16.mxu0 %v6994_v38 }
  0xf5   :  { %6550 = vmatprep.subr.bf16.mxu1 %v6995_v39  ;;  %6408 = vmatprep.mubr.bf16.mxu0 %v6996_v40 }
  0xf6   :  { %6536 = vmatprep.mubr.bf16.mxu1 %v6997_v41 }
  0xf7   :  { %6423 = vmatpush3.bf16.msra.mxu0 %v6994_v38 }
  0xf8   :  { %6551 = vmatpush3.bf16.msra.mxu1 %v6995_v39  ;;  %6424 = vmatprep.subr.bf16.mxu0 %v6999_v43 }
  0xf9   :  { %6552 = vmatprep.subr.bf16.mxu1 %v7001_v44 }
  0xfa   :  { %6409 = vmatmul.mubr.bf16.gmra.mrb[28].mxu0 %v6998_v42 }
  0xfb   :  { %6537 = vmatmul.mubr.bf16.gmra.mrb[28].mxu1 %v7000_v45  ;;  %6425 = vmatpush3.bf16.msra.mxu0 %v6999_v43 }
  0xfc   :  { %6553 = vmatpush3.bf16.msra.mxu1 %v7001_v44  ;;  %6426 = vmatprep.subr.bf16.mxu0 %v7002_v46 }
  0xfd   :  { %6554 = vmatprep.subr.bf16.mxu1 %v7003_v47  ;;  %6428 = vmatprep.mubr.bf16.mxu0 %v7004_v48 }
  0xfe   :  { %6556 = vmatprep.mubr.bf16.mxu1 %v7005_v49 }
  0xff   :  { %6427 = vmatpush3.bf16.msra.mxu0 %v7002_v46 }
 0x100   :  { %6555 = vmatpush3.bf16.msra.mxu1 %v7003_v47 }
 0x102   :  { %6429 = vmatmul.mubr.bf16.vlgmr.msra.gmra.mrb[16].mxu0 %v7006_v50 }
 0x103   :  { %6557 = vmatmul.mubr.bf16.vlgmr.msra.gmra.mrb[16].mxu1 %v7007_v51  ;;  %6432 = vmatprep.mubr.bf16.mxu0 %v7008_v52 }
 0x104   :  { %6560 = vmatprep.mubr.bf16.mxu1 %v7009_v53 }
 0x10a   :  { %6433 = vmatmul.mubr.bf16.gmra.mrb[20].mxu0 %v7010_v54 }
 0x10b   :  { %6561 = vmatmul.mubr.bf16.gmra.mrb[20].mxu1 %v7011_v55  ;;  %6436 = vmatprep.mubr.bf16.mxu0 %v7012_v56 }
 0x10c   :  { %6564 = vmatprep.mubr.bf16.mxu1 %v7013_v57 }
 0x112   :  { %6437 = vmatmul.mubr.bf16.gmra.mrb[24].mxu0 %v7014_v58 }
 0x113   :  { %6565 = vmatmul.mubr.bf16.gmra.mrb[24].mxu1 %v7015_v59  ;;  %6440 = vmatprep.mubr.bf16.mxu0 %v7016_v60 }
 0x114   :  { %6568 = vmatprep.mubr.bf16.mxu1 %v7017_v61 }
 0x11a   :  { %6441 = vmatmul.mubr.bf16.gmra.mrb[28].mxu0 %v7018_v62 }
 0x11b   :  { %6569 = vmatmul.mubr.bf16.gmra.mrb[28].mxu1 %v7019_v63 }
 0x155   :  { %v6174_v1 = vpop.f32.mrb[0].mxu0 }
 0x156   :  { %v8071_v2 = vadd.f32 %v6174_v1, %v8068_v0  ;;  %v6302_v3 = vpop.f32.mrb[0].mxu1  ;;  %v874_v4 = vpop.f32.mrb[1].mxu0 }
 0x157   :  { %v8074_v5 = vadd.f32 %v6302_v3, %v8068_v0  ;;  %v8077_v6 = vadd.f32 %v8068_v0, %v874_v4  ;;  %v2027_v7 = vpop.f32.mrb[1].mxu1  ;;  %v6175_v8 = vpop.f32.mrb[2].mxu0 }
 0x158   :  { %v4796_v9 = vmul.f32 -1.442695, %v8071_v2  ;;  %v8081_v10 = vadd.f32 %v8068_v0, %v2027_v7  ;;  %v8084_v11 = vadd.f32 %v6175_v8, %v8068_v0  ;;  %v6303_v12 = vpop.f32.mrb[2].mxu1  ;;  %v877_v13 = vpop.f32.mrb[3].mxu0 }
 0x159   :  { %v5021_v14 = vmul.f32 -1.442695, %v8074_v5  ;;  %v4794_v15 = vmul.f32 -1.442695, %v8077_v6  ;;  %v8089_v16 = vadd.f32 %v6303_v12, %v8068_v0  ;;  %v8092_v17 = vadd.f32 %v8068_v0, %v877_v13  ;;  %v2030_v18 = vpop.f32.mrb[3].mxu1 }
 0x15a   :  { %7020 = vpow2.f32 %v4796_v9  ;;  %v5019_v19 = vmul.f32 -1.442695, %v8081_v10  ;;  %v4797_v20 = vmul.f32 -1.442695, %v8084_v11  ;;  %v8097_v21 = vadd.f32 %v8068_v0, %v2030_v18 }
 0x15b   :  { %7022 = vpow2.f32 %v5021_v14  ;;  %v5022_v22 = vmul.f32 -1.442695, %v8089_v16  ;;  %v4795_v23 = vmul.f32 -1.442695, %v8092_v17 }
 0x15c   :  { %7024 = vpow2.f32 %v4794_v15  ;;  %v5020_v24 = vmul.f32 -1.442695, %v8097_v21 }
 0x15d   :  { %7026 = vpow2.f32 %v5019_v19  ;;  %v6178_v25 = vpop.f32.mrb[4].mxu0 }
 0x15e   :  { %7028 = vpow2.f32 %v4797_v20  ;;  %v8103_v26 = vadd.f32 %v6178_v25, %v8068_v0  ;;  %v6306_v27 = vpop.f32.mrb[4].mxu1  ;;  %v890_v28 = vpop.f32.mrb[5].mxu0 }
 0x15f   :  { %7030 = vpow2.f32 %v5022_v22  ;;  %v8106_v29 = vadd.f32 %v6306_v27, %v8068_v0  ;;  %v8109_v30 = vadd.f32 %v8068_v0, %v890_v28  ;;  %v2043_v31 = vpop.f32.mrb[5].mxu1  ;;  %v6179_v32 = vpop.f32.mrb[6].mxu0 }
 0x160   :  { %7032 = vpow2.f32 %v4795_v23  ;;  %v4800_v33 = vmul.f32 -1.442695, %v8103_v26  ;;  %v8113_v34 = vadd.f32 %v8068_v0, %v2043_v31  ;;  %v8116_v35 = vadd.f32 %v6179_v32, %v8068_v0  ;;  %v6307_v36 = vpop.f32.mrb[6].mxu1  ;;  %v893_v37 = vpop.f32.mrb[7].mxu0 }
 0x161   :  { %7034 = vpow2.f32 %v5020_v24  ;;  %v5025_v38 = vmul.f32 -1.442695, %v8106_v29  ;;  %v4798_v39 = vmul.f32 -1.442695, %v8109_v30  ;;  %v2046_v40 = vpop.f32.mrb[7].mxu1  ;;  %v8123_v61 = vadd.f32 %v6307_v36, %v8068_v0 }
 0x162   :  { %7036 = vpow2.f32 %v4800_v33  ;;  %v5023_v41 = vmul.f32 -1.442695, %v8113_v34  ;;  %v4801_v42 = vmul.f32 -1.442695, %v8116_v35  ;;  %v8126_v3 = vadd.f32 %v8068_v0, %v893_v37 }
 0x163   :  { %7038 = vpow2.f32 %v5025_v38  ;;  %v5026_v14 = vmul.f32 -1.442695, %v8123_v61  ;;  %v8130_v15 = vadd.f32 %v8068_v0, %v2046_v40 }
 0x164   :  { %v7021_v43 = vpop.eup %7020  ;;  %7040 = vpow2.f32 %v4798_v39  ;;  %v4799_v22 = vmul.f32 -1.442695, %v8126_v3 }
 0x165   :  { %v7023_v44 = vpop.eup %7022  ;;  %v1026_v45 = vadd.f32 1.0, %v7021_v43  ;;  %7042 = vpow2.f32 %v5023_v41  ;;  %v6182_v46 = vpop.f32.mrb[8].mxu0 }
 0x166   :  { %v7025_v47 = vpop.eup %7024  ;;  %v2179_v48 = vadd.f32 1.0, %v7023_v44  ;;  %7044 = vpow2.f32 %v4801_v42  ;;  %v6310_v49 = vpop.f32.mrb[8].mxu1  ;;  %v8134_v23 = vadd.f32 %v6182_v46, %v8068_v0 }
 0x167   :  { %v906_v50 = vpop.f32.mrb[9].mxu0  ;;  %v7027_v51 = vpop.eup %7026  ;;  %7046 = vrcp.f32 %v1026_v45  ;;  %v1024_v52 = vadd.f32 1.0, %v7025_v47  ;;  %v8139_v31 = vadd.f32 %v6310_v49, %v8068_v0  ;;  %v5024_v49 = vmul.f32 -1.442695, %v8130_v15 }
 0x168   :  { %v2059_v53 = vpop.f32.mrb[9].mxu1  ;;  %v6183_v54 = vpop.f32.mrb[10].mxu0  ;;  %7048 = vrcp.f32 %v2179_v48  ;;  %v2177_v56 = vadd.f32 1.0, %v7027_v51  ;;  %v8142_v32 = vadd.f32 %v8068_v0, %v906_v50  ;;  %v4804_v51 = vmul.f32 -1.442695, %v8134_v23 }
 0x169   :  { %v7029_v55 = vpop.eup %7028  ;;  %v6311_v57 = vpop.f32.mrb[10].mxu1  ;;  %7050 = vrcp.f32 %v1024_v52  ;;  %v8149_v39 = vadd.f32 %v8068_v0, %v2059_v53  ;;  %v8152_v40 = vadd.f32 %v6183_v54, %v8068_v0  ;;  %v5029_v52 = vmul.f32 -1.442695, %v8139_v31 }
 0x16a   :  { %v909_v58 = vpop.f32.mrb[11].mxu0  ;;  %v7031_v59 = vpop.eup %7030  ;;  %v1027_v60 = vadd.f32 1.0, %v7029_v55  ;;  %7052 = vrcp.f32 %v2177_v56  ;;  %v8159_v45 = vadd.f32 %v6311_v57, %v8068_v0  ;;  %v4802_v54 = vmul.f32 -1.442695, %v8142_v32 }
 0x16b   :  { %v2062_v62 = vpop.f32.mrb[11].mxu1  ;;  %v7033_v63 = vpop.eup %7032  ;;  %v2180_v1 = vadd.f32 1.0, %v7031_v59  ;;  %v8162_v46 = vadd.f32 %v8068_v0, %v909_v58  ;;  %v5027_v55 = vmul.f32 -1.442695, %v8149_v39  ;;  %v4805_v56 = vmul.f32 -1.442695, %v8152_v40 }
 0x16c   :  { %v7035_v4 = vpop.eup %7034  ;;  %7054 = vrcp.f32 %v1027_v60  ;;  %v1025_v7 = vadd.f32 1.0, %v7033_v63  ;;  %v5030_v58 = vmul.f32 -1.442695, %v8159_v45  ;;  %v8175_v60 = vadd.f32 %v8068_v0, %v2062_v62 }
 0x16d   :  { %v7037_v8 = vpop.eup %7036  ;;  %7056 = vrcp.f32 %v2180_v1  ;;  %v2178_v9 = vadd.f32 1.0, %v7035_v4  ;;  %v6186_v18 = vpop.f32.mrb[12].mxu0  ;;  %v4803_v59 = vmul.f32 -1.442695, %v8162_v46 }
 0x16e   :  { %v7039_v12 = vpop.eup %7038  ;;  %7058 = vrcp.f32 %v1025_v7  ;;  %v1030_v13 = vadd.f32 1.0, %v7037_v8  ;;  %v6314_v24 = vpop.f32.mrb[12].mxu1  ;;  %v8180_v7 = vadd.f32 %v6186_v18, %v8068_v0 }
 0x16f   :  { %v7041_v19 = vpop.eup %7040  ;;  %7060 = vrcp.f32 %v2178_v9  ;;  %v2183_v20 = vadd.f32 1.0, %v7039_v12  ;;  %v8136_v25 = vpop.f32.mrb[13].mxu0 }
 0x170   :  { %v7043_v27 = vpop.eup %7042  ;;  %7062 = vrcp.f32 %v1030_v13  ;;  %v1028_v28 = vadd.f32 1.0, %v7041_v19  ;;  %v8144_v33 = vpop.f32.mrb[13].mxu1  ;;  %v8185_v13 = vadd.f32 %v6314_v24, %v8068_v0 }
 0x171   :  { %v8146_v36 = vpop.f32.mrb[14].mxu0  ;;  %v7045_v37 = vpop.eup %7044  ;;  %7064 = vrcp.f32 %v2183_v20  ;;  %v2181_v38 = vadd.f32 1.0, %v7043_v27 }
 0x172   :  { %v8154_v41 = vpop.f32.mrb[14].mxu1  ;;  %v8156_v42 = vpop.f32.mrb[15].mxu0  ;;  %7066 = vrcp.f32 %v1028_v28  ;;  %v1031_v44 = vadd.f32 1.0, %v7045_v37  ;;  %v5033_v27 = vmul.f32 -1.442695, %v8185_v13 }
 0x173   :  { %v7047_v43 = vpop.eup %7046  ;;  %v8164_v47 = vpop.f32.mrb[15].mxu1  ;;  %7068 = vrcp.f32 %v2181_v38 }
 0x174   :  { %v7049_v48 = vpop.eup %7048  ;;  %7070 = vrcp.f32 %v1031_v44  ;;  %v1074_v1 = vmul.f32 %v7047_v43, %v8071_v2 }
 0x175   :  { %v7051_v50 = vpop.eup %7050  ;;  %7072 = vpow2.f32 %v5026_v14  ;;  %v2227_v9 = vmul.f32 %v7049_v48, %v8074_v5 }
 0x176   :  { %v7053_v53 = vpop.eup %7052  ;;  %7074 = vpow2.f32 %v4799_v22  ;;  %v1072_v14 = vmul.f32 %v7051_v50, %v8077_v6  ;;  %v5028_v6 = vmul.f32 -1.442695, %v8175_v60 }
 0x177   :  { %v7055_v57 = vpop.eup %7054  ;;  %7076 = vpow2.f32 %v5024_v49  ;;  %v2225_v18 = vmul.f32 %v7053_v53, %v8081_v10 }
 0x178   :  { %v7057_v63 = vpop.eup %7056  ;;  %v1075_v4 = vmul.f32 %v7055_v57, %v8084_v11  ;;  %7078 = vpow2.f32 %v4804_v51 }
 0x179   :  { %v7059_v8 = vpop.eup %7058  ;;  %v2228_v12 = vmul.f32 %v7057_v63, %v8089_v16  ;;  %7080 = vpow2.f32 %v5029_v52 }
 0x17a   :  { %v7061_v62 = vpop.eup %7060  ;;  %v5621_v19 = vpack.c.bf16 %v1075_v4, %v1074_v1  ;;  %v1073_v2 = vmul.f32 %v7059_v8, %v8092_v17  ;;  %7082 = vpow2.f32 %v4802_v54  ;;  %v4808_v17 = vmul.f32 -1.442695, %v8180_v7 }
 0x17b   :  { %v7063_v11 = vpop.eup %7062  ;;  %v5661_v20 = vpack.c.bf16 %v2228_v12, %v2227_v9  ;;  %v2226_v22 = vmul.f32 %v7061_v62, %v8097_v21  ;;  %7084 = vpow2.f32 %v5027_v55  ;;  %v8219_v4 = vadd.f32 %v8068_v0, %v8136_v25 }
 0x17c   :  { %v8191_v5 = vpop.eup %7064  ;;  %5773 = vst [vmem:[%s8540_s3 + $0x8] sm:$0xff] %v5621_v19   ;;  %v5616_v16 = vpack.c.bf16 %v1073_v2, %v1072_v14  ;;  %7086 = vpow2.f32 %v4805_v56  ;;  %v1078_v38 = vmul.f32 %v7063_v11, %v8103_v26  ;;  %v8223_v12 = vadd.f32 %v8068_v0, %v8144_v33 }
 0x17d   :  { %v8197_v24 = vpop.eup %7066  ;;  %5781 = vst [vmem:[%s8540_s3 + $0x48] sm:$0xff] %v5661_v20   ;;  %v5656_v10 = vpack.c.bf16 %v2226_v22, %v2225_v18  ;;  %7088 = vpow2.f32 %v5030_v58  ;;  %v8227_v19 = vadd.f32 %v8146_v36, %v8068_v0  ;;  %v8231_v25 = vadd.f32 %v8154_v41, %v8068_v0 }
 0x17e   :  { %v8203_v21 = vpop.eup %7068  ;;  %5617 = vst [vmem:[%s8540_s3] sm:$0xff] %v5616_v16   ;;  %7090 = vpow2.f32 %v4803_v59  ;;  %v8235_v18 = vadd.f32 %v8068_v0, %v8156_v42  ;;  %v4806_v20 = vmul.f32 -1.442695, %v8219_v4  ;;  %v5031_v36 = vmul.f32 -1.442695, %v8223_v12 }
 0x17f   :  { %v7071_v28 = vpop.eup %7070  ;;  %5780 = vst [vmem:[%s8540_s3 + $0x40] sm:$0xff] %v5656_v10   ;;  %7092 = vpow2.f32 %v5028_v6  ;;  %v8241_v16 = vadd.f32 %v8068_v0, %v8164_v47  ;;  %v2231_v41 = vmul.f32 %v8191_v5, %v8106_v29  ;;  %v4809_v42 = vmul.f32 -1.442695, %v8227_v19 }
 0x180   :  { %v7073_v37 = vpop.eup %7072  ;;  %v1079_v43 = vmul.f32 %v7071_v28, %v8116_v35  ;;  %7094 = vpow2.f32 %v4808_v17 }
 0x181   :  { %v7075_v44 = vpop.eup %7074  ;;  %v2184_v48 = vadd.f32 1.0, %v7073_v37  ;;  %7096 = vpow2.f32 %v5033_v27  ;;  %v1076_v27 = vmul.f32 %v8197_v24, %v8109_v30  ;;  %v5034_v37 = vmul.f32 -1.442695, %v8231_v25 }
 0x182   :  { %v7077_v49 = vpop.eup %7076  ;;  %v5631_v50 = vpack.c.bf16 %v1079_v43, %v1078_v38  ;;  %v1029_v51 = vadd.f32 1.0, %v7075_v44  ;;  %v4807_v38 = vmul.f32 -1.442695, %v8235_v18  ;;  %v2229_v43 = vmul.f32 %v8203_v21, %v8113_v34 }
 0x183   :  { %v7079_v52 = vpop.eup %7078  ;;  %7098 = vrcp.f32 %v2184_v48  ;;  %v2182_v53 = vadd.f32 1.0, %v7077_v49  ;;  %v5032_v48 = vmul.f32 -1.442695, %v8241_v16 }
 0x184   :  { %v7081_v54 = vpop.eup %7080  ;;  %5775 = vst [vmem:[%s8540_s3 + $0x18] sm:$0xff] %v5631_v50   ;;  %7100 = vrcp.f32 %v1029_v51  ;;  %v1034_v26 = vadd.f32 1.0, %v7079_v52 }
 0x185   :  { %v7083_v55 = vpop.eup %7082  ;;  %7102 = vrcp.f32 %v2182_v53  ;;  %v2187_v35 = vadd.f32 1.0, %v7081_v54 }
 0x186   :  { %v7085_v56 = vpop.eup %7084  ;;  %7104 = vrcp.f32 %v1034_v26  ;;  %v1032_v57 = vadd.f32 1.0, %v7083_v55 }
 0x187   :  { %v7087_v58 = vpop.eup %7086  ;;  %7106 = vrcp.f32 %v2187_v35  ;;  %v2185_v59 = vadd.f32 1.0, %v7085_v56 }
 0x188   :  { %v7089_v63 = vpop.eup %7088  ;;  %7108 = vrcp.f32 %v1032_v57  ;;  %v1035_v1 = vadd.f32 1.0, %v7087_v58 }
 0x189   :  { %v7091_v8 = vpop.eup %7090  ;;  %7110 = vrcp.f32 %v2185_v59  ;;  %v2188_v9 = vadd.f32 1.0, %v7089_v63 }
 0x18a   :  { %v7093_v62 = vpop.eup %7092  ;;  %7112 = vrcp.f32 %v1035_v1  ;;  %v1033_v14 = vadd.f32 1.0, %v7091_v8 }
 0x18b   :  { %v7095_v2 = vpop.eup %7094  ;;  %7114 = vrcp.f32 %v2188_v9  ;;  %v2186_v11 = vadd.f32 1.0, %v7093_v62 }
 0x18c   :  { %v7097_v33 = vpop.eup %7096  ;;  %7116 = vrcp.f32 %v1033_v14  ;;  %v1038_v35 = vadd.f32 1.0, %v7095_v2 }
 0x18d   :  { %v7099_v22 = vpop.eup %7098  ;;  %7118 = vrcp.f32 %v2186_v11  ;;  %v2191_v58 = vadd.f32 1.0, %v7097_v33 }
 0x18e   :  { %v7101_v6 = vpop.eup %7100  ;;  %v2232_v10 = vmul.f32 %v7099_v22, %v8123_v61  ;;  %7120 = vpow2.f32 %v4806_v20 }
 0x18f   :  { %v7103_v17 = vpop.eup %7102  ;;  %v1077_v28 = vmul.f32 %v7101_v6, %v8126_v3  ;;  %7122 = vpow2.f32 %v5031_v36 }
 0x190   :  { %v7105_v47 = vpop.eup %7104  ;;  %v5671_v44 = vpack.c.bf16 %v2232_v10, %v2231_v41  ;;  %v2230_v29 = vmul.f32 %v7103_v17, %v8130_v15  ;;  %7124 = vpow2.f32 %v4809_v42 }
 0x191   :  { %v7107_v61 = vpop.eup %7106  ;;  %v5626_v5 = vpack.c.bf16 %v1077_v28, %v1076_v27  ;;  %7126 = vpow2.f32 %v5034_v37  ;;  %v1082_v21 = vmul.f32 %v7105_v47, %v8134_v23 }
 0x192   :  { %v7109_v30 = vpop.eup %7108  ;;  %5783 = vst [vmem:[%s8540_s3 + $0x58] sm:$0xff] %v5671_v44   ;;  %v5666_v3 = vpack.c.bf16 %v2230_v29, %v2229_v43  ;;  %7128 = vpow2.f32 %v4807_v38  ;;  %v2235_v51 = vmul.f32 %v7107_v61, %v8139_v31 }
 0x193   :  { %v7111_v24 = vpop.eup %7110  ;;  %5774 = vst [vmem:[%s8540_s3 + $0x10] sm:$0xff] %v5626_v5   ;;  %7130 = vpow2.f32 %v5032_v48  ;;  %v1080_v54 = vmul.f32 %v7109_v30, %v8142_v32 }
 0x194   :  { %v7113_v34 = vpop.eup %7112  ;;  %5782 = vst [vmem:[%s8540_s3 + $0x50] sm:$0xff] %v5666_v3   ;;  %v2233_v56 = vmul.f32 %v7111_v24, %v8149_v39  ;;  %7132 = vrcp.f32 %v1038_v35 }
 0x195   :  { %v7115_v15 = vpop.eup %7114  ;;  %v1083_v49 = vmul.f32 %v7113_v34, %v8152_v40  ;;  %7134 = vrcp.f32 %v2191_v58 }
 0x196   :  { %v7117_v50 = vpop.eup %7116  ;;  %v2236_v52 = vmul.f32 %v7115_v15, %v8159_v45 }
 0x197   :  { %v7119_v53 = vpop.eup %7118  ;;  %v5641_v26 = vpack.c.bf16 %v1083_v49, %v1082_v21  ;;  %v1081_v55 = vmul.f32 %v7117_v50, %v8162_v46 }
 0x198   :  { %v5681_v57 = vpack.c.bf16 %v2236_v52, %v2235_v51  ;;  %v2234_v23 = vmul.f32 %v7119_v53, %v8175_v60  ;;  %v7121_v40 = vpop.eup %7120 }
 0x199   :  { %5777 = vst [vmem:[%s8540_s3 + $0x28] sm:$0xff] %v5641_v26   ;;  %v5636_v31 = vpack.c.bf16 %v1081_v55, %v1080_v54  ;;  %v7123_v45 = vpop.eup %7122  ;;  %v1036_v39 = vadd.f32 1.0, %v7121_v40 }
 0x19a   :  { %5785 = vst [vmem:[%s8540_s3 + $0x68] sm:$0xff] %v5681_v57   ;;  %v5676_v32 = vpack.c.bf16 %v2234_v23, %v2233_v56  ;;  %v7125_v46 = vpop.eup %7124  ;;  %v2189_v60 = vadd.f32 1.0, %v7123_v45 }
 0x19b   :  { %5776 = vst [vmem:[%s8540_s3 + $0x20] sm:$0xff] %v5636_v31   ;;  %v7127_v59 = vpop.eup %7126  ;;  %7136 = vrcp.f32 %v1036_v39  ;;  %v1039_v63 = vadd.f32 1.0, %v7125_v46 }
 0x19c   :  { %5784 = vst [vmem:[%s8540_s3 + $0x60] sm:$0xff] %v5676_v32   ;;  %v7129_v1 = vpop.eup %7128  ;;  %7138 = vrcp.f32 %v2189_v60  ;;  %v2192_v8 = vadd.f32 1.0, %v7127_v59 }
 0x19d   :  { %v7131_v9 = vpop.eup %7130  ;;  %7140 = vrcp.f32 %v1039_v63  ;;  %v1037_v62 = vadd.f32 1.0, %v7129_v1 }
 0x19e   :  { %7142 = vrcp.f32 %v2192_v8  ;;  %v2190_v14 = vadd.f32 1.0, %v7131_v9  ;;  %v7133_v2 = vpop.eup %7132 }
 0x19f   :  { %7144 = vrcp.f32 %v1037_v62  ;;  %v7135_v11 = vpop.eup %7134  ;;  %v1086_v6 = vmul.f32 %v7133_v2, %v8180_v7 }
 0x1a0   :  { %7146 = vrcp.f32 %v2190_v14  ;;  %v2239_v42 = vmul.f32 %v7135_v11, %v8185_v13 }
 0x1a5   :  { %v7137_v33 = vpop.eup %7136 }
 0x1a6   :  { %v7139_v20 = vpop.eup %7138  ;;  %v1084_v28 = vmul.f32 %v7137_v33, %v8219_v4 }
 0x1a7   :  { %v7141_v22 = vpop.eup %7140  ;;  %v2237_v47 = vmul.f32 %v7139_v20, %v8223_v12 }
 0x1a8   :  { %v7143_v36 = vpop.eup %7142  ;;  %v1087_v41 = vmul.f32 %v7141_v22, %v8227_v19 }
 0x1a9   :  { %v7145_v10 = vpop.eup %7144  ;;  %v2240_v17 = vmul.f32 %v7143_v36, %v8231_v25 }
 0x1aa   :  { %v7147_v27 = vpop.eup %7146  ;;  %v5651_v37 = vpack.c.bf16 %v1087_v41, %v1086_v6  ;;  %v1085_v38 = vmul.f32 %v7145_v10, %v8235_v18 }
 0x1ab   :  { %v5691_v43 = vpack.c.bf16 %v2240_v17, %v2239_v42  ;;  %v2238_v44 = vmul.f32 %v7147_v27, %v8241_v16 }
 0x1ac   :  { %5779 = vst [vmem:[%s8540_s3 + $0x38] sm:$0xff] %v5651_v37   ;;  %v5646_v7 = vpack.c.bf16 %v1085_v38, %v1084_v28 }
 0x1ad   :  { %5787 = vst [vmem:[%s8540_s3 + $0x78] sm:$0xff] %v5691_v43   ;;  %v5686_v13 = vpack.c.bf16 %v2238_v44, %v2237_v47 }
 0x1ae   :  { %5778 = vst [vmem:[%s8540_s3 + $0x30] sm:$0xff] %v5646_v7  }
 0x1af   :  { %5786 = vst [vmem:[%s8540_s3 + $0x70] sm:$0xff] %v5686_v13  }
 0x1d5   :  { %v6430_v4 = vpop.f32.mrb[16].mxu0 }
 0x1d6   :  { %v8306_v12 = vadd.f32 %v6430_v4, %v8068_v0  ;;  %v6558_v19 = vpop.f32.mrb[16].mxu1  ;;  %v3181_v25 = vpop.f32.mrb[17].mxu0 }
 0x1d7   :  { %v8309_v18 = vadd.f32 %v6558_v19, %v8068_v0  ;;  %v8312_v16 = vadd.f32 %v8068_v0, %v3181_v25  ;;  %v4334_v29 = vpop.f32.mrb[17].mxu1  ;;  %v6431_v61 = vpop.f32.mrb[18].mxu0 }
 0x1d8   :  { %v5262_v5 = vmul.f32 -1.442695, %v8306_v12  ;;  %v8316_v48 = vadd.f32 %v8068_v0, %v4334_v29  ;;  %v8319_v30 = vadd.f32 %v6431_v61, %v8068_v0  ;;  %v6559_v3 = vpop.f32.mrb[18].mxu1  ;;  %v3184_v24 = vpop.f32.mrb[19].mxu0 }
 0x1d9   :  { %v5503_v34 = vmul.f32 -1.442695, %v8309_v18  ;;  %v5260_v15 = vmul.f32 -1.442695, %v8312_v16  ;;  %v8324_v21 = vadd.f32 %v6559_v3, %v8068_v0  ;;  %v8327_v49 = vadd.f32 %v8068_v0, %v3184_v24  ;;  %v4337_v50 = vpop.f32.mrb[19].mxu1 }
 0x1da   :  { %7148 = vpow2.f32 %v5262_v5  ;;  %v5501_v51 = vmul.f32 -1.442695, %v8316_v48  ;;  %v5263_v52 = vmul.f32 -1.442695, %v8319_v30  ;;  %v8332_v53 = vadd.f32 %v8068_v0, %v4337_v50 }
 0x1db   :  { %7150 = vpow2.f32 %v5503_v34  ;;  %v5504_v54 = vmul.f32 -1.442695, %v8324_v21  ;;  %v5261_v26 = vmul.f32 -1.442695, %v8327_v49 }
 0x1dc   :  { %7152 = vpow2.f32 %v5260_v15  ;;  %v5502_v55 = vmul.f32 -1.442695, %v8332_v53 }
 0x1dd   :  { %7154 = vpow2.f32 %v5501_v51  ;;  %v6434_v35 = vpop.f32.mrb[20].mxu0 }
 0x1de   :  { %7156 = vpow2.f32 %v5263_v52  ;;  %v8338_v56 = vadd.f32 %v6434_v35, %v8068_v0  ;;  %v6562_v57 = vpop.f32.mrb[20].mxu1  ;;  %v3197_v23 = vpop.f32.mrb[21].mxu0 }
 0x1df   :  { %7158 = vpow2.f32 %v5504_v54  ;;  %v8341_v58 = vadd.f32 %v6562_v57, %v8068_v0  ;;  %v8344_v31 = vadd.f32 %v8068_v0, %v3197_v23  ;;  %v4350_v40 = vpop.f32.mrb[21].mxu1  ;;  %v6435_v32 = vpop.f32.mrb[22].mxu0 }
 0x1e0   :  { %7160 = vpow2.f32 %v5261_v26  ;;  %v5266_v45 = vmul.f32 -1.442695, %v8338_v56  ;;  %v8348_v39 = vadd.f32 %v8068_v0, %v4350_v40  ;;  %v8351_v46 = vadd.f32 %v6435_v32, %v8068_v0  ;;  %v6563_v60 = vpop.f32.mrb[22].mxu1  ;;  %v3200_v59 = vpop.f32.mrb[23].mxu0 }
 0x1e1   :  { %7162 = vpow2.f32 %v5502_v55  ;;  %v5507_v63 = vmul.f32 -1.442695, %v8341_v58  ;;  %v5264_v1 = vmul.f32 -1.442695, %v8344_v31  ;;  %v4353_v8 = vpop.f32.mrb[23].mxu1  ;;  %v8358_v44 = vadd.f32 %v6563_v60, %v8068_v0 }
 0x1e2   :  { %7164 = vpow2.f32 %v5266_v45  ;;  %v5505_v9 = vmul.f32 -1.442695, %v8348_v39  ;;  %v5267_v62 = vmul.f32 -1.442695, %v8351_v46  ;;  %v8361_v19 = vadd.f32 %v8068_v0, %v3200_v59 }
 0x1e3   :  { %7166 = vpow2.f32 %v5507_v63  ;;  %v5508_v34 = vmul.f32 -1.442695, %v8358_v44  ;;  %v8365_v15 = vadd.f32 %v8068_v0, %v4353_v8 }
 0x1e4   :  { %v7149_v14 = vpop.eup %7148  ;;  %7168 = vpow2.f32 %v5264_v1  ;;  %v5265_v54 = vmul.f32 -1.442695, %v8361_v19 }
 0x1e5   :  { %v7151_v2 = vpop.eup %7150  ;;  %v3333_v11 = vadd.f32 1.0, %v7149_v14  ;;  %7170 = vpow2.f32 %v5505_v9  ;;  %v6438_v33 = vpop.f32.mrb[24].mxu0 }
 0x1e6   :  { %v7153_v20 = vpop.eup %7152  ;;  %v4486_v22 = vadd.f32 1.0, %v7151_v2  ;;  %7172 = vpow2.f32 %v5267_v62  ;;  %v6566_v36 = vpop.f32.mrb[24].mxu1  ;;  %v8369_v26 = vadd.f32 %v6438_v33, %v8068_v0 }
 0x1e7   :  { %v3213_v6 = vpop.f32.mrb[25].mxu0  ;;  %v7155_v41 = vpop.eup %7154  ;;  %7174 = vrcp.f32 %v3333_v11  ;;  %v3331_v10 = vadd.f32 1.0, %v7153_v20  ;;  %v8374_v40 = vadd.f32 %v6566_v36, %v8068_v0  ;;  %v5506_v36 = vmul.f32 -1.442695, %v8365_v15 }
 0x1e8   :  { %v4366_v42 = vpop.f32.mrb[25].mxu1  ;;  %v6439_v17 = vpop.f32.mrb[26].mxu0  ;;  %7176 = vrcp.f32 %v4486_v22  ;;  %v4484_v28 = vadd.f32 1.0, %v7155_v41  ;;  %v8377_v32 = vadd.f32 %v8068_v0, %v3213_v6  ;;  %v5270_v41 = vmul.f32 -1.442695, %v8369_v26 }
 0x1e9   :  { %v7157_v27 = vpop.eup %7156  ;;  %v6567_v37 = vpop.f32.mrb[26].mxu1  ;;  %7178 = vrcp.f32 %v3331_v10  ;;  %v8384_v1 = vadd.f32 %v8068_v0, %v4366_v42  ;;  %v8387_v8 = vadd.f32 %v6439_v17, %v8068_v0  ;;  %v5511_v10 = vmul.f32 -1.442695, %v8374_v40 }
 0x1ea   :  { %v3216_v38 = vpop.f32.mrb[27].mxu0  ;;  %v7159_v47 = vpop.eup %7158  ;;  %v3334_v43 = vadd.f32 1.0, %v7157_v27  ;;  %7180 = vrcp.f32 %v4484_v28  ;;  %v8394_v11 = vadd.f32 %v6567_v37, %v8068_v0  ;;  %v5268_v17 = vmul.f32 -1.442695, %v8377_v32 }
 0x1eb   :  { %v4369_v7 = vpop.f32.mrb[27].mxu1  ;;  %v7161_v13 = vpop.eup %7160  ;;  %v4487_v4 = vadd.f32 1.0, %v7159_v47  ;;  %v8397_v33 = vadd.f32 %v8068_v0, %v3216_v38  ;;  %v5509_v27 = vmul.f32 -1.442695, %v8384_v1  ;;  %v5271_v28 = vmul.f32 -1.442695, %v8387_v8 }
 0x1ec   :  { %v7163_v25 = vpop.eup %7162  ;;  %7182 = vrcp.f32 %v3334_v43  ;;  %v3332_v29 = vadd.f32 1.0, %v7161_v13  ;;  %v5512_v38 = vmul.f32 -1.442695, %v8394_v11  ;;  %v8410_v43 = vadd.f32 %v8068_v0, %v4369_v7 }
 0x1ed   :  { %v7165_v61 = vpop.eup %7164  ;;  %7184 = vrcp.f32 %v4487_v4  ;;  %v4485_v5 = vadd.f32 1.0, %v7163_v25  ;;  %v6442_v50 = vpop.f32.mrb[28].mxu0  ;;  %v5269_v47 = vmul.f32 -1.442695, %v8397_v33 }
 0x1ee   :  { %v7167_v3 = vpop.eup %7166  ;;  %7186 = vrcp.f32 %v3332_v29  ;;  %v3337_v24 = vadd.f32 1.0, %v7165_v61  ;;  %v6570_v55 = vpop.f32.mrb[28].mxu1  ;;  %v8415_v29 = vadd.f32 %v6442_v50, %v8068_v0 }
 0x1ef   :  { %v7169_v51 = vpop.eup %7168  ;;  %7188 = vrcp.f32 %v4485_v5  ;;  %v4490_v52 = vadd.f32 1.0, %v7167_v3  ;;  %v8371_v35 = vpop.f32.mrb[29].mxu0 }
 0x1f0   :  { %v7171_v57 = vpop.eup %7170  ;;  %7190 = vrcp.f32 %v3337_v24  ;;  %v3335_v23 = vadd.f32 1.0, %v7169_v51  ;;  %v8379_v45 = vpop.f32.mrb[29].mxu1  ;;  %v8420_v24 = vadd.f32 %v6570_v55, %v8068_v0 }
 0x1f1   :  { %v8381_v60 = vpop.f32.mrb[30].mxu0  ;;  %v7173_v59 = vpop.eup %7172  ;;  %7192 = vrcp.f32 %v4490_v52  ;;  %v4488_v63 = vadd.f32 1.0, %v7171_v57 }
 0x1f2   :  { %v8389_v9 = vpop.f32.mrb[30].mxu1  ;;  %v8391_v62 = vpop.f32.mrb[31].mxu0  ;;  %7194 = vrcp.f32 %v3335_v23  ;;  %v3338_v2 = vadd.f32 1.0, %v7173_v59  ;;  %v5515_v55 = vmul.f32 -1.442695, %v8420_v24 }
 0x1f3   :  { %v7175_v14 = vpop.eup %7174  ;;  %v8399_v20 = vpop.f32.mrb[31].mxu1  ;;  %7196 = vrcp.f32 %v4488_v63 }
 0x1f4   :  { %v7177_v22 = vpop.eup %7176  ;;  %7198 = vrcp.f32 %v3338_v2  ;;  %v3381_v4 = vmul.f32 %v7175_v14, %v8306_v12 }
 0x1f5   :  { %v7179_v6 = vpop.eup %7178  ;;  %7200 = vpow2.f32 %v5508_v34  ;;  %v4534_v5 = vmul.f32 %v7177_v22, %v8309_v18 }
 0x1f6   :  { %v7181_v42 = vpop.eup %7180  ;;  %7202 = vpow2.f32 %v5265_v54  ;;  %v3379_v34 = vmul.f32 %v7179_v6, %v8312_v16  ;;  %v5510_v16 = vmul.f32 -1.442695, %v8410_v43 }
 0x1f7   :  { %v7183_v37 = vpop.eup %7182  ;;  %7204 = vpow2.f32 %v5506_v36  ;;  %v4532_v50 = vmul.f32 %v7181_v42, %v8316_v48 }
 0x1f8   :  { %v7185_v13 = vpop.eup %7184  ;;  %v3382_v25 = vmul.f32 %v7183_v37, %v8319_v30  ;;  %7206 = vpow2.f32 %v5270_v41 }
 0x1f9   :  { %v7187_v61 = vpop.eup %7186  ;;  %v4535_v3 = vmul.f32 %v7185_v13, %v8324_v21  ;;  %7208 = vpow2.f32 %v5511_v10 }
 0x1fa   :  { %v7189_v7 = vpop.eup %7188  ;;  %v5701_v51 = vpack.c.bf16 %v3382_v25, %v3381_v4  ;;  %v3380_v12 = vmul.f32 %v7187_v61, %v8327_v49  ;;  %7210 = vpow2.f32 %v5268_v17  ;;  %v5274_v49 = vmul.f32 -1.442695, %v8415_v29  ;;  %v7276_v4 = vld [vmem:[%s8539_s2] ss:$0 sm:$0xff] }
 0x1fb   :  { %v7191_v30 = vpop.eup %7190  ;;  %v5741_v52 = vpack.c.bf16 %v4535_v3, %v4534_v5  ;;  %v4533_v54 = vmul.f32 %v7189_v7, %v8332_v53  ;;  %7212 = vpow2.f32 %v5509_v27  ;;  %v8456_v25 = vadd.f32 %v7276_v4, %v8371_v35 }
 0x1fc   :  { %v8426_v18 = vpop.eup %7192  ;;  %5789 = vst [vmem:[%s8540_s3 + $0x88] sm:$0xff] %v5701_v51   ;;  %v5696_v0 = vpack.c.bf16 %v3380_v12, %v3379_v34  ;;  %7214 = vpow2.f32 %v5271_v28  ;;  %v3385_v59 = vmul.f32 %v7191_v30, %v8338_v56  ;;  %v8459_v3 = vadd.f32 %v7276_v4, %v8379_v45 }
 0x1fd   :  { %v8432_v21 = vpop.eup %7194  ;;  %5797 = vst [vmem:[%s8540_s3 + $0xc8] sm:$0xff] %v5741_v52   ;;  %v5736_v48 = vpack.c.bf16 %v4533_v54, %v4532_v50  ;;  %7216 = vpow2.f32 %v5512_v38  ;;  %v8462_v51 = vadd.f32 %v7276_v4, %v8381_v60  ;;  %v8465_v50 = vadd.f32 %v7276_v4, %v8389_v9 }
 0x1fe   :  { %v8438_v53 = vpop.eup %7196  ;;  %5788 = vst [vmem:[%s8540_s3 + $0x80] sm:$0xff] %v5696_v0   ;;  %7218 = vpow2.f32 %v5269_v47  ;;  %v8468_v35 = vadd.f32 %v7276_v4, %v8391_v62  ;;  %v5272_v45 = vmul.f32 -1.442695, %v8456_v25  ;;  %v5513_v0 = vmul.f32 -1.442695, %v8459_v3 }
 0x1ff   :  { %v7199_v57 = vpop.eup %7198  ;;  %5796 = vst [vmem:[%s8540_s3 + $0xc0] sm:$0xff] %v5736_v48   ;;  %7220 = vpow2.f32 %v5510_v16  ;;  %v8473_v60 = vadd.f32 %v7276_v4, %v8399_v20  ;;  %v4538_v48 = vmul.f32 %v8426_v18, %v8341_v58  ;;  %v5275_v62 = vmul.f32 -1.442695, %v8462_v51 }
 0x200   :  { %v7201_v23 = vpop.eup %7200  ;;  %v3386_v63 = vmul.f32 %v7199_v57, %v8351_v46  ;;  %7222 = vpow2.f32 %v5274_v49 }
 0x201   :  { %v7203_v14 = vpop.eup %7202  ;;  %v4491_v2 = vadd.f32 1.0, %v7201_v23  ;;  %7224 = vpow2.f32 %v5515_v55  ;;  %v3383_v55 = vmul.f32 %v8432_v21, %v8344_v31  ;;  %v5516_v23 = vmul.f32 -1.442695, %v8465_v50 }
 0x202   :  { %v7205_v22 = vpop.eup %7204  ;;  %v5711_v36 = vpack.c.bf16 %v3386_v63, %v3385_v59  ;;  %v3336_v6 = vadd.f32 1.0, %v7203_v14  ;;  %v5273_v59 = vmul.f32 -1.442695, %v8468_v35  ;;  %v4536_v63 = vmul.f32 %v8438_v53, %v8348_v39 }
 0x203   :  { %v7207_v41 = vpop.eup %7206  ;;  %7226 = vrcp.f32 %v4491_v2  ;;  %v4489_v10 = vadd.f32 1.0, %v7205_v22  ;;  %v5514_v2 = vmul.f32 -1.442695, %v8473_v60 }
 0x204   :  { %v7209_v42 = vpop.eup %7208  ;;  %5791 = vst [vmem:[%s8540_s3 + $0x98] sm:$0xff] %v5711_v36   ;;  %7228 = vrcp.f32 %v3336_v6  ;;  %v3341_v56 = vadd.f32 1.0, %v7207_v41 }
 0x205   :  { %v7211_v17 = vpop.eup %7210  ;;  %7230 = vrcp.f32 %v4489_v10  ;;  %v4494_v46 = vadd.f32 1.0, %v7209_v42 }
 0x206   :  { %v7213_v27 = vpop.eup %7212  ;;  %7232 = vrcp.f32 %v3341_v56  ;;  %v3339_v28 = vadd.f32 1.0, %v7211_v17 }
 0x207   :  { %v7215_v37 = vpop.eup %7214  ;;  %7234 = vrcp.f32 %v4494_v46  ;;  %v4492_v38 = vadd.f32 1.0, %v7213_v27 }
 0x208   :  { %v7217_v47 = vpop.eup %7216  ;;  %7236 = vrcp.f32 %v3339_v28  ;;  %v3342_v13 = vadd.f32 1.0, %v7215_v37 }
 0x209   :  { %v7219_v61 = vpop.eup %7218  ;;  %7238 = vrcp.f32 %v4492_v38  ;;  %v4495_v5 = vadd.f32 1.0, %v7217_v47 }
 0x20a   :  { %v7221_v7 = vpop.eup %7220  ;;  %7240 = vrcp.f32 %v3342_v13  ;;  %v3340_v34 = vadd.f32 1.0, %v7219_v61 }
 0x20b   :  { %v7223_v12 = vpop.eup %7222  ;;  %7242 = vrcp.f32 %v4495_v5  ;;  %v4493_v30 = vadd.f32 1.0, %v7221_v7 }
 0x20c   :  { %v7225_v52 = vpop.eup %7224  ;;  %7244 = vrcp.f32 %v3340_v34  ;;  %v3345_v46 = vadd.f32 1.0, %v7223_v12 }
 0x20d   :  { %v7227_v54 = vpop.eup %7226  ;;  %7246 = vrcp.f32 %v4493_v30  ;;  %v4498_v37 = vadd.f32 1.0, %v7225_v52 }
 0x20e   :  { %v7229_v16 = vpop.eup %7228  ;;  %v4539_v9 = vmul.f32 %v7227_v54, %v8358_v44  ;;  %7248 = vpow2.f32 %v5272_v45 }
 0x20f   :  { %v7231_v49 = vpop.eup %7230  ;;  %v3384_v57 = vmul.f32 %v7229_v16, %v8361_v19  ;;  %7250 = vpow2.f32 %v5513_v0 }
 0x210   :  { %v7233_v20 = vpop.eup %7232  ;;  %v5751_v14 = vpack.c.bf16 %v4539_v9, %v4538_v48  ;;  %v4537_v58 = vmul.f32 %v7231_v49, %v8365_v15  ;;  %7252 = vpow2.f32 %v5275_v62 }
 0x211   :  { %v7235_v44 = vpop.eup %7234  ;;  %v5706_v18 = vpack.c.bf16 %v3384_v57, %v3383_v55  ;;  %7254 = vpow2.f32 %v5516_v23  ;;  %v3389_v53 = vmul.f32 %v7233_v20, %v8369_v26 }
 0x212   :  { %v7237_v31 = vpop.eup %7236  ;;  %5799 = vst [vmem:[%s8540_s3 + $0xd8] sm:$0xff] %v5751_v14   ;;  %v5746_v19 = vpack.c.bf16 %v4537_v58, %v4536_v63  ;;  %7256 = vpow2.f32 %v5273_v59  ;;  %v4542_v6 = vmul.f32 %v7235_v44, %v8374_v40 }
 0x213   :  { %v7239_v21 = vpop.eup %7238  ;;  %5790 = vst [vmem:[%s8540_s3 + $0x90] sm:$0xff] %v5706_v18   ;;  %7258 = vpow2.f32 %v5514_v2  ;;  %v3387_v42 = vmul.f32 %v7237_v31, %v8377_v32 }
 0x214   :  { %v7241_v39 = vpop.eup %7240  ;;  %5798 = vst [vmem:[%s8540_s3 + $0xd0] sm:$0xff] %v5746_v19   ;;  %v4540_v27 = vmul.f32 %v7239_v21, %v8384_v1  ;;  %7260 = vrcp.f32 %v3345_v46 }
 0x215   :  { %v7243_v15 = vpop.eup %7242  ;;  %v3390_v22 = vmul.f32 %v7241_v39, %v8387_v8  ;;  %7262 = vrcp.f32 %v4498_v37 }
 0x216   :  { %v7245_v36 = vpop.eup %7244  ;;  %v4543_v41 = vmul.f32 %v7243_v15, %v8394_v11 }
 0x217   :  { %v7247_v10 = vpop.eup %7246  ;;  %v5721_v56 = vpack.c.bf16 %v3390_v22, %v3389_v53  ;;  %v3388_v17 = vmul.f32 %v7245_v36, %v8397_v33 }
 0x218   :  { %v5761_v28 = vpack.c.bf16 %v4543_v41, %v4542_v6  ;;  %v4541_v26 = vmul.f32 %v7247_v10, %v8410_v43  ;;  %v7249_v8 = vpop.eup %7248 }
 0x219   :  { %5793 = vst [vmem:[%s8540_s3 + $0xa8] sm:$0xff] %v5721_v56   ;;  %v5716_v40 = vpack.c.bf16 %v3388_v17, %v3387_v42  ;;  %v7251_v11 = vpop.eup %7250  ;;  %v3343_v1 = vadd.f32 1.0, %v7249_v8 }
 0x21a   :  { %5801 = vst [vmem:[%s8540_s3 + $0xe8] sm:$0xff] %v5761_v28   ;;  %v5756_v32 = vpack.c.bf16 %v4541_v26, %v4540_v27  ;;  %v7253_v33 = vpop.eup %7252  ;;  %v4496_v43 = vadd.f32 1.0, %v7251_v11 }
 0x21b   :  { %5792 = vst [vmem:[%s8540_s3 + $0xa0] sm:$0xff] %v5716_v40   ;;  %v7255_v38 = vpop.eup %7254  ;;  %7264 = vrcp.f32 %v3343_v1  ;;  %v3346_v47 = vadd.f32 1.0, %v7253_v33 }
 0x21c   :  { %5800 = vst [vmem:[%s8540_s3 + $0xe0] sm:$0xff] %v5756_v32   ;;  %v7257_v13 = vpop.eup %7256  ;;  %7266 = vrcp.f32 %v4496_v43  ;;  %v4499_v4 = vadd.f32 1.0, %v7255_v38 }
 0x21d   :  { %v7259_v61 = vpop.eup %7258  ;;  %7268 = vrcp.f32 %v3346_v47  ;;  %v3344_v5 = vadd.f32 1.0, %v7257_v13 }
 0x21e   :  { %7270 = vrcp.f32 %v4499_v4  ;;  %v4497_v7 = vadd.f32 1.0, %v7259_v61  ;;  %v7261_v34 = vpop.eup %7260 }
 0x21f   :  { %7272 = vrcp.f32 %v3344_v5  ;;  %v7263_v12 = vpop.eup %7262  ;;  %v3393_v0 = vmul.f32 %v7261_v34, %v8415_v29 }
 0x220   :  { %7274 = vrcp.f32 %v4497_v7  ;;  %v4546_v9 = vmul.f32 %v7263_v12, %v8420_v24 }
 0x225   :  { %v7265_v30 = vpop.eup %7264 }
 0x226   :  { %v7267_v52 = vpop.eup %7266  ;;  %v3391_v55 = vmul.f32 %v7265_v30, %v8456_v25 }
 0x227   :  { %v7269_v45 = vpop.eup %7268  ;;  %v4544_v59 = vmul.f32 %v7267_v52, %v8459_v3 }
 0x228   :  { %v7271_v54 = vpop.eup %7270  ;;  %v3394_v16 = vmul.f32 %v7269_v45, %v8462_v51 }
 0x229   :  { %v7273_v48 = vpop.eup %7272  ;;  %v4547_v62 = vmul.f32 %v7271_v54, %v8465_v50 }
 0x22a   :  { %v7275_v49 = vpop.eup %7274  ;;  %v5731_v57 = vpack.c.bf16 %v3394_v16, %v3393_v0  ;;  %v3392_v23 = vmul.f32 %v7273_v48, %v8468_v35 }
 0x22b   :  { %v5771_v20 = vpack.c.bf16 %v4547_v62, %v4546_v9  ;;  %v4545_v63 = vmul.f32 %v7275_v49, %v8473_v60 }
 0x22c   :  { %5795 = vst [vmem:[%s8540_s3 + $0xb8] sm:$0xff] %v5731_v57   ;;  %v5726_v29 = vpack.c.bf16 %v3392_v23, %v3391_v55 }
 0x22d   :  { %5803 = vst [vmem:[%s8540_s3 + $0xf8] sm:$0xff] %v5771_v20   ;;  %v5766_v24 = vpack.c.bf16 %v4545_v63, %v4544_v59 }
 0x22e   :  { %5794 = vst [vmem:[%s8540_s3 + $0xb0] sm:$0xff] %v5726_v29  }
 0x22f   :  { %5802 = vst [vmem:[%s8540_s3 + $0xf0] sm:$0xff] %v5766_v24  }

</bundles_post_ra>
